<compile_context>
chip_gen: v5e
topology: v5e:2x2
jax: 0.10.0
libtpu: 0.0.40
codegen_flags: <defaults>
</compile_context>

<pallas_src>
import jax
import jax.numpy as jnp
from jax.experimental import pallas as pl
from jax.experimental.pallas import tpu as pltpu


# ------------------------------------------------------------------- kernel --

def _vae_encoder_kernel(x_ref,
                        wd1_ref, cb1_ref, s1_ref, p1_ref,
                        wd2_ref, cb2_ref, s2_ref, p2_ref,
                        wd3_ref, cb3_ref, s3_ref, g3_ref,
                        wfa_ref, wfb_ref, fb_ref, eps_ref,
                        z_ref, mean_ref, var_ref):
    f32 = jnp.float32

    def conv_relu_hpool(xT, wd_ref, b_ref, s_ref):
        # xT: [B*W, Cin*H] -> [B*Wo, Cout*Hp]   (conv + bias + ReLU + H-half of 2x2 pool)
        oe = None
        oo = None
        for kw in range(s_ref.shape[0]):
            xs = jnp.dot(s_ref[kw], xT, preferred_element_type=f32)       # width shift
            te = jnp.dot(xs, wd_ref[kw, 0], preferred_element_type=f32)   # even out rows
            to = jnp.dot(xs, wd_ref[kw, 1], preferred_element_type=f32)   # odd out rows
            oe = te if oe is None else oe + te
            oo = to if oo is None else oo + to
        b = b_ref[...]
        return jnp.maximum(jnp.maximum(oe + b, 0.0), jnp.maximum(oo + b, 0.0))

    def wpool(rhT, p_ref):
        # W-half of the 2x2 max-pool via 0/1 selection matmuls.
        return jnp.maximum(jnp.dot(p_ref[0], rhT, preferred_element_type=f32),
                           jnp.dot(p_ref[1], rhT, preferred_element_type=f32))

    x1 = x_ref[...]
    rh1 = conv_relu_hpool(x1, wd1_ref, cb1_ref, s1_ref)
    x2 = wpool(rh1, p1_ref)
    rh2 = conv_relu_hpool(x2, wd2_ref, cb2_ref, s2_ref)
    x3 = wpool(rh2, p2_ref)
    rh3 = conv_relu_hpool(x3, wd3_ref, cb3_ref, s3_ref)

    # Final W-pool, split into the two pooled-width positions (w = 0 / 1 of the flatten).
    x4a = jnp.maximum(jnp.dot(g3_ref[0, 0], rh3, preferred_element_type=f32),
                      jnp.dot(g3_ref[0, 1], rh3, preferred_element_type=f32))  # [B, 64]
    x4b = jnp.maximum(jnp.dot(g3_ref[1, 0], rh3, preferred_element_type=f32),
                      jnp.dot(g3_ref[1, 1], rh3, preferred_element_type=f32))  # [B, 64]

    # fc1 / fc2 + reparameterize (note: 'var' is log-variance, as in the PyTorch module).
    mean = (jnp.dot(x4a, wfa_ref[0], preferred_element_type=f32)
            + jnp.dot(x4b, wfb_ref[0], preferred_element_type=f32) + fb_ref[0])
    logvar = (jnp.dot(x4a, wfa_ref[1], preferred_element_type=f32)
              + jnp.dot(x4b, wfb_ref[1], preferred_element_type=f32) + fb_ref[1])
    z = mean + jnp.exp(0.5 * logvar) * eps_ref[...]

    z_ref[...] = z.astype(z_ref.dtype)
    mean_ref[...] = mean.astype(mean_ref.dtype)
    var_ref[...] = logvar.astype(var_ref.dtype)


# ------------------------------------------- derived operands (tiny, XLA side) --

def _conv_pool_weights(w, Ho):
    """w: [Cout, Cin, KH, KW] -> Wd: [KW, 2, Cin*H, Cout*Hp] with
       Wd[kw, d, ci*H + h, co*Hp + ip] = w[co, ci, h - (2*ip + d), kw]  (0 if out of range),
       H = Ho + KH - 1, Hp = Ho // 2.  The even/odd (d) split folds the H-half of the
       2x2 max-pool into the conv matmul."""
    Cout, Cin, KH, KW = w.shape
    H = Ho + KH - 1
    Hp = Ho // 2
    i = jnp.arange(Ho)
    h = jnp.arange(H)
    kh = h[None, :] - i[:, None]                     # [Ho, H]
    valid = (kh >= 0) & (kh < KH)
    khc = jnp.clip(kh, 0, KH - 1)
    wt = jnp.transpose(w, (3, 0, 1, 2))              # [KW, Cout, Cin, KH]
    T = wt[:, :, :, khc]                             # [KW, Cout, Cin, Ho, H]
    T = T * valid[None, None, None].astype(w.dtype)
    T = T.reshape(KW, Cout, Cin, Hp, 2, H)
    T = jnp.transpose(T, (0, 4, 2, 5, 1, 3))         # [KW, 2, Cin, H, Cout, Hp]
    return T.reshape(KW, 2, Cin * H, Cout * Hp)


def _shift_mats(B, W, Wo, KW, dtype):
    """S[kw, n*Wo + j, m*W + c] = 1 iff n == m and c == j + kw  (batch-block-diagonal)."""
    rn = jnp.arange(B * Wo) // Wo
    rj = jnp.arange(B * Wo) % Wo
    cn = jnp.arange(B * W) // W
    cc = jnp.arange(B * W) % W
    mats = [((rn[:, None] == cn[None, :]) & (cc[None, :] == rj[:, None] + kw)).astype(dtype)
            for kw in range(KW)]
    return jnp.stack(mats)


def _wpool_mats(B, Wo, dtype):
    """P[d, n*Wp + jp, m*Wo + c] = 1 iff n == m and c == 2*jp + d."""
    Wp = Wo // 2
    rn = jnp.arange(B * Wp) // Wp
    rj = jnp.arange(B * Wp) % Wp
    cn = jnp.arange(B * Wo) // Wo
    cc = jnp.arange(B * Wo) % Wo
    mats = [((rn[:, None] == cn[None, :]) & (cc[None, :] == 2 * rj[:, None] + d)).astype(dtype)
            for d in range(2)]
    return jnp.stack(mats)


def _final_wpool_mats(B, Wo, dtype):
    """G[jp, d, n, m*Wo + c] = 1 iff n == m and c == 2*jp + d  (final pool, Wp == 2)."""
    rn = jnp.arange(B)
    cn = jnp.arange(B * Wo) // Wo
    cc = jnp.arange(B * Wo) % Wo
    out = []
    for jp in range(2):
        out.append(jnp.stack([
            ((rn[:, None] == cn[None, :]) & (cc[None, :] == 2 * jp + d)).astype(dtype)
            for d in range(2)]))
    return jnp.stack(out)                            # [2, 2, B, B*Wo]


# ------------------------------------------------------------------- model --

def init_params(key, input_channels):
    def uinit(k, shape, fan_in):
        bound = 1.0 / jnp.sqrt(fan_in)
        return jax.random.uniform(k, shape, jnp.float32, -bound, bound)

    ks = jax.random.split(key, 10)
    p = {}
    p["w1"] = uinit(ks[0], (8, input_channels, 162, 3), input_channels * 162 * 3)
    p["c1b"] = uinit(ks[1], (8,), input_channels * 162 * 3)
    p["w2"] = uinit(ks[2], (16, 8, 15, 3), 8 * 15 * 3)
    p["c2b"] = uinit(ks[3], (16,), 8 * 15 * 3)
    p["w3"] = uinit(ks[4], (32, 16, 9, 3), 16 * 9 * 3)
    p["c3b"] = uinit(ks[5], (32,), 16 * 9 * 3)
    # Linear(128, 32) x2 (stored transposed to [in, out])
    p["fc1_w"] = uinit(ks[6], (128, 32), 128)
    p["fc1_b"] = uinit(ks[7], (32,), 128)
    p["fc2_w"] = uinit(ks[8], (128, 32), 128)
    p["fc2_b"] = uinit(ks[9], (32,), 128)
    return p


def vae_forward(params, x, eps):
    dt = jnp.float32
    B, Cin, H, W = x.shape
    conv_ws = [params["w1"], params["w2"], params["w3"]]
    conv_bs = [params["c1b"], params["c2b"], params["c3b"]]

    # Input to [B*W, Cin*H] layout (width/batch on rows, channels*height on lanes).
    xT = jnp.transpose(x, (0, 3, 1, 2)).reshape(B * W, Cin * H).astype(dt)

    layer_args = []
    for li, (w, b) in enumerate(zip(conv_ws, conv_bs)):
        Cout, Cin_l, KH, KW = w.shape
        assert Cin_l == Cin
        Ho, Wo = H - KH + 1, W - KW + 1
        assert Ho % 2 == 0 and Wo % 2 == 0
        Hp, Wp = Ho // 2, Wo // 2
        wd = _conv_pool_weights(w.astype(dt), Ho)            # [KW, 2, Cin*H, Cout*Hp]
        cb = jnp.repeat(b.astype(dt), Hp)[None, :]           # [1, Cout*Hp]
        s = _shift_mats(B, W, Wo, KW, dt)                    # [KW, B*Wo, B*W]
        if li < 2:
            pool = _wpool_mats(B, Wo, dt)                    # [2, B*Wp, B*Wo]
        else:
            assert Wp == 2                                   # needed by the flatten split
            pool = _final_wpool_mats(B, Wo, dt)              # [2, 2, B, B*Wo]
        layer_args += [wd, cb, s, pool]
        Cin, H, W = Cout, Hp, Wp

    assert Cin * H * W == params["fc1_w"].shape[0]           # flatten size == fc in_features

    # fc weights split by the final pooled-width position (w = 0 / 1 of the flatten order).
    wfa = jnp.stack([params["fc1_w"][0::2, :], params["fc2_w"][0::2, :]]).astype(dt)  # [2,64,32]
    wfb = jnp.stack([params["fc1_w"][1::2, :], params["fc2_w"][1::2, :]]).astype(dt)
    fb = jnp.stack([params["fc1_b"][None, :], params["fc2_b"][None, :]]).astype(dt)   # [2,1,32]

    nz = params["fc1_w"].shape[1]
    o = jax.ShapeDtypeStruct((B, nz), dt)
    z, mean, var = pl.pallas_call(
        _vae_encoder_kernel,
        out_shape=(o, o, o),
        compiler_params=pltpu.CompilerParams(vmem_limit_bytes=32 * 1024 * 1024),
    )(xT, *layer_args, wfa, wfb, fb, eps.astype(dt))
    return z, mean, var
    # TODO(synk): decode() is `pass` in the reference module — intentionally not implemented.


if __name__ == "__main__":
    key = jax.random.PRNGKey(0)
    k_param, k_x, k_eps = jax.random.split(key, 3)

    input_channels = 1
    # Spatial size chosen so the flattened encoder output is exactly 128 (= fc in_features):
    # H: 237 -conv(162)-> 76 -pool-> 38 -conv(15)-> 24 -pool-> 12 -conv(9)-> 4 -pool-> 2
    # W:  30 -conv(3) -> 28 -pool-> 14 -conv(3) -> 12 -pool->  6 -conv(3)-> 4 -pool-> 2
    # 32 * 2 * 2 = 128.
    B, H, W = 2, 237, 30
    x = jax.random.normal(k_x, (B, input_channels, H, W), jnp.float32)
    # torch.randn(*mean.size()) replaced by a deterministic JAX normal draw.
    eps = jax.random.normal(k_eps, (B, 32), jnp.float32)

    params = init_params(k_param, input_channels)

    z, mean, var = jax.jit(vae_forward)(params, x, eps)
    jax.block_until_ready((z, mean, var))

    assert z.shape == (B, 32) and mean.shape == (B, 32) and var.shape == (B, 32)
    assert bool(jnp.all(jnp.isfinite(z))) and bool(jnp.all(jnp.isfinite(mean)))
    print("KERNEL_OK")
</pallas_src>

<mosaic_0001>
module attributes {stable_mosaic.version = 11 : i64} {
  func.func @_vae_encoder_kernel(%arg0: memref<60x237xf32, #tpu.memory_space<vmem>>, %arg1: memref<3x2x237x304xf32, #tpu.memory_space<vmem>>, %arg2: memref<1x304xf32, #tpu.memory_space<vmem>>, %arg3: memref<3x56x60xf32, #tpu.memory_space<vmem>>, %arg4: memref<2x28x56xf32, #tpu.memory_space<vmem>>, %arg5: memref<3x2x304x192xf32, #tpu.memory_space<vmem>>, %arg6: memref<1x192xf32, #tpu.memory_space<vmem>>, %arg7: memref<3x24x28xf32, #tpu.memory_space<vmem>>, %arg8: memref<2x12x24xf32, #tpu.memory_space<vmem>>, %arg9: memref<3x2x192x64xf32, #tpu.memory_space<vmem>>, %arg10: memref<1x64xf32, #tpu.memory_space<vmem>>, %arg11: memref<3x8x12xf32, #tpu.memory_space<vmem>>, %arg12: memref<2x2x2x8xf32, #tpu.memory_space<vmem>>, %arg13: memref<2x64x32xf32, #tpu.memory_space<vmem>>, %arg14: memref<2x64x32xf32, #tpu.memory_space<vmem>>, %arg15: memref<2x1x32xf32, #tpu.memory_space<vmem>>, %arg16: memref<2x32xf32, #tpu.memory_space<vmem>>, %arg17: memref<2x32xf32, #tpu.memory_space<vmem>>, %arg18: memref<2x32xf32, #tpu.memory_space<vmem>>, %arg19: memref<2x32xf32, #tpu.memory_space<vmem>>) attributes {dimension_semantics = [], scalar_prefetch = 0 : i64, scratch_operands = 0 : i64, tpu.core_type = #tpu.core_type<tc>} {
    %c0 = arith.constant 0 : index
    %c0_0 = arith.constant 0 : index
    %0 = vector.load %arg0[%c0, %c0_0] : memref<60x237xf32, #tpu.memory_space<vmem>>, vector<60x237xf32>
    %c0_1 = arith.constant 0 : index
    %c0_2 = arith.constant 0 : index
    %c0_3 = arith.constant 0 : index
    %1 = vector.load %arg3[%c0_1, %c0_2, %c0_3] : memref<3x56x60xf32, #tpu.memory_space<vmem>>, vector<1x56x60xf32>
    %2 = vector.shape_cast %1 : vector<1x56x60xf32> to vector<56x60xf32>
    %cst = arith.constant dense<0.000000e+00> : vector<56x237xf32>
    %3 = tpu.matmul %2, %0, %cst {dimension_numbers = #tpu.dot_dimension_numbers<[1], [0], [0], [1], [0, 0, 1, 1], [], []>} : vector<56x60xf32>, vector<60x237xf32>, vector<56x237xf32> -> vector<56x237xf32>
    %c0_4 = arith.constant 0 : index
    %c0_5 = arith.constant 0 : index
    %c0_6 = arith.constant 0 : index
    %c0_7 = arith.constant 0 : index
    %4 = vector.load %arg1[%c0_4, %c0_5, %c0_6, %c0_7] : memref<3x2x237x304xf32, #tpu.memory_space<vmem>>, vector<1x1x237x304xf32>
    %5 = vector.shape_cast %4 : vector<1x1x237x304xf32> to vector<237x304xf32>
    %cst_8 = arith.constant dense<0.000000e+00> : vector<56x304xf32>
    %6 = tpu.matmul %3, %5, %cst_8 {dimension_numbers = #tpu.dot_dimension_numbers<[1], [0], [0], [1], [0, 0, 1, 1], [], []>} : vector<56x237xf32>, vector<237x304xf32>, vector<56x304xf32> -> vector<56x304xf32>
    %c0_9 = arith.constant 0 : index
    %c1 = arith.constant 1 : index
    %c0_10 = arith.constant 0 : index
    %c0_11 = arith.constant 0 : index
    %7 = vector.load %arg1[%c0_9, %c1, %c0_10, %c0_11] : memref<3x2x237x304xf32, #tpu.memory_space<vmem>>, vector<1x1x237x304xf32>
    %8 = vector.shape_cast %7 : vector<1x1x237x304xf32> to vector<237x304xf32>
    %cst_12 = arith.constant dense<0.000000e+00> : vector<56x304xf32>
    %9 = tpu.matmul %3, %8, %cst_12 {dimension_numbers = #tpu.dot_dimension_numbers<[1], [0], [0], [1], [0, 0, 1, 1], [], []>} : vector<56x237xf32>, vector<237x304xf32>, vector<56x304xf32> -> vector<56x304xf32>
    %c1_13 = arith.constant 1 : index
    %c0_14 = arith.constant 0 : index
    %c0_15 = arith.constant 0 : index
    %10 = vector.load %arg3[%c1_13, %c0_14, %c0_15] : memref<3x56x60xf32, #tpu.memory_space<vmem>>, vector<1x56x60xf32>
    %11 = vector.shape_cast %10 : vector<1x56x60xf32> to vector<56x60xf32>
    %cst_16 = arith.constant dense<0.000000e+00> : vector<56x237xf32>
    %12 = tpu.matmul %11, %0, %cst_16 {dimension_numbers = #tpu.dot_dimension_numbers<[1], [0], [0], [1], [0, 0, 1, 1], [], []>} : vector<56x60xf32>, vector<60x237xf32>, vector<56x237xf32> -> vector<56x237xf32>
    %c1_17 = arith.constant 1 : index
    %c0_18 = arith.constant 0 : index
    %c0_19 = arith.constant 0 : index
    %c0_20 = arith.constant 0 : index
    %13 = vector.load %arg1[%c1_17, %c0_18, %c0_19, %c0_20] : memref<3x2x237x304xf32, #tpu.memory_space<vmem>>, vector<1x1x237x304xf32>
    %14 = vector.shape_cast %13 : vector<1x1x237x304xf32> to vector<237x304xf32>
    %cst_21 = arith.constant dense<0.000000e+00> : vector<56x304xf32>
    %15 = tpu.matmul %12, %14, %cst_21 {dimension_numbers = #tpu.dot_dimension_numbers<[1], [0], [0], [1], [0, 0, 1, 1], [], []>} : vector<56x237xf32>, vector<237x304xf32>, vector<56x304xf32> -> vector<56x304xf32>
    %c1_22 = arith.constant 1 : index
    %c1_23 = arith.constant 1 : index
    %c0_24 = arith.constant 0 : index
    %c0_25 = arith.constant 0 : index
    %16 = vector.load %arg1[%c1_22, %c1_23, %c0_24, %c0_25] : memref<3x2x237x304xf32, #tpu.memory_space<vmem>>, vector<1x1x237x304xf32>
    %17 = vector.shape_cast %16 : vector<1x1x237x304xf32> to vector<237x304xf32>
    %cst_26 = arith.constant dense<0.000000e+00> : vector<56x304xf32>
    %18 = tpu.matmul %12, %17, %cst_26 {dimension_numbers = #tpu.dot_dimension_numbers<[1], [0], [0], [1], [0, 0, 1, 1], [], []>} : vector<56x237xf32>, vector<237x304xf32>, vector<56x304xf32> -> vector<56x304xf32>
    %19 = arith.addf %6, %15 : vector<56x304xf32>
    %20 = arith.addf %9, %18 : vector<56x304xf32>
    %c2 = arith.constant 2 : index
    %c0_27 = arith.constant 0 : index
    %c0_28 = arith.constant 0 : index
    %21 = vector.load %arg3[%c2, %c0_27, %c0_28] : memref<3x56x60xf32, #tpu.memory_space<vmem>>, vector<1x56x60xf32>
    %22 = vector.shape_cast %21 : vector<1x56x60xf32> to vector<56x60xf32>
    %cst_29 = arith.constant dense<0.000000e+00> : vector<56x237xf32>
    %23 = tpu.matmul %22, %0, %cst_29 {dimension_numbers = #tpu.dot_dimension_numbers<[1], [0], [0], [1], [0, 0, 1, 1], [], []>} : vector<56x60xf32>, vector<60x237xf32>, vector<56x237xf32> -> vector<56x237xf32>
    %c2_30 = arith.constant 2 : index
    %c0_31 = arith.constant 0 : index
    %c0_32 = arith.constant 0 : index
    %c0_33 = arith.constant 0 : index
    %24 = vector.load %arg1[%c2_30, %c0_31, %c0_32, %c0_33] : memref<3x2x237x304xf32, #tpu.memory_space<vmem>>, vector<1x1x237x304xf32>
    %25 = vector.shape_cast %24 : vector<1x1x237x304xf32> to vector<237x304xf32>
    %cst_34 = arith.constant dense<0.000000e+00> : vector<56x304xf32>
    %26 = tpu.matmul %23, %25, %cst_34 {dimension_numbers = #tpu.dot_dimension_numbers<[1], [0], [0], [1], [0, 0, 1, 1], [], []>} : vector<56x237xf32>, vector<237x304xf32>, vector<56x304xf32> -> vector<56x304xf32>
    %c2_35 = arith.constant 2 : index
    %c1_36 = arith.constant 1 : index
    %c0_37 = arith.constant 0 : index
    %c0_38 = arith.constant 0 : index
    %27 = vector.load %arg1[%c2_35, %c1_36, %c0_37, %c0_38] : memref<3x2x237x304xf32, #tpu.memory_space<vmem>>, vector<1x1x237x304xf32>
    %28 = vector.shape_cast %27 : vector<1x1x237x304xf32> to vector<237x304xf32>
    %cst_39 = arith.constant dense<0.000000e+00> : vector<56x304xf32>
    %29 = tpu.matmul %23, %28, %cst_39 {dimension_numbers = #tpu.dot_dimension_numbers<[1], [0], [0], [1], [0, 0, 1, 1], [], []>} : vector<56x237xf32>, vector<237x304xf32>, vector<56x304xf32> -> vector<56x304xf32>
    %30 = arith.addf %19, %26 : vector<56x304xf32>
    %31 = arith.addf %20, %29 : vector<56x304xf32>
    %c0_40 = arith.constant 0 : index
    %c0_41 = arith.constant 0 : index
    %32 = vector.load %arg2[%c0_40, %c0_41] : memref<1x304xf32, #tpu.memory_space<vmem>>, vector<1x304xf32>
    %33 = vector.broadcast %32 : vector<1x304xf32> to vector<56x304xf32>
    %34 = arith.addf %30, %33 : vector<56x304xf32>
    %cst_42 = arith.constant 0.000000e+00 : f32
    %35 = vector.broadcast %cst_42 : f32 to vector<56x304xf32>
    %36 = arith.maximumf %34, %35 : vector<56x304xf32>
    %37 = vector.broadcast %32 : vector<1x304xf32> to vector<56x304xf32>
    %38 = arith.addf %31, %37 : vector<56x304xf32>
    %cst_43 = arith.constant 0.000000e+00 : f32
    %39 = vector.broadcast %cst_43 : f32 to vector<56x304xf32>
    %40 = arith.maximumf %38, %39 : vector<56x304xf32>
    %41 = arith.maximumf %36, %40 : vector<56x304xf32>
    %c0_44 = arith.constant 0 : index
    %c0_45 = arith.constant 0 : index
    %c0_46 = arith.constant 0 : index
    %42 = vector.load %arg4[%c0_44, %c0_45, %c0_46] : memref<2x28x56xf32, #tpu.memory_space<vmem>>, vector<1x28x56xf32>
    %43 = vector.shape_cast %42 : vector<1x28x56xf32> to vector<28x56xf32>
    %cst_47 = arith.constant dense<0.000000e+00> : vector<28x304xf32>
    %44 = tpu.matmul %43, %41, %cst_47 {dimension_numbers = #tpu.dot_dimension_numbers<[1], [0], [0], [1], [0, 0, 1, 1], [], []>} : vector<28x56xf32>, vector<56x304xf32>, vector<28x304xf32> -> vector<28x304xf32>
    %c1_48 = arith.constant 1 : index
    %c0_49 = arith.constant 0 : index
    %c0_50 = arith.constant 0 : index
    %45 = vector.load %arg4[%c1_48, %c0_49, %c0_50] : memref<2x28x56xf32, #tpu.memory_space<vmem>>, vector<1x28x56xf32>
    %46 = vector.shape_cast %45 : vector<1x28x56xf32> to vector<28x56xf32>
    %cst_51 = arith.constant dense<0.000000e+00> : vector<28x304xf32>
    %47 = tpu.matmul %46, %41, %cst_51 {dimension_numbers = #tpu.dot_dimension_numbers<[1], [0], [0], [1], [0, 0, 1, 1], [], []>} : vector<28x56xf32>, vector<56x304xf32>, vector<28x304xf32> -> vector<28x304xf32>
    %48 = arith.maximumf %44, %47 : vector<28x304xf32>
    %c0_52 = arith.constant 0 : index
    %c0_53 = arith.constant 0 : index
    %c0_54 = arith.constant 0 : index
    %49 = vector.load %arg7[%c0_52, %c0_53, %c0_54] : memref<3x24x28xf32, #tpu.memory_space<vmem>>, vector<1x24x28xf32>
    %50 = vector.shape_cast %49 : vector<1x24x28xf32> to vector<24x28xf32>
    %cst_55 = arith.constant dense<0.000000e+00> : vector<24x304xf32>
    %51 = tpu.matmul %50, %48, %cst_55 {dimension_numbers = #tpu.dot_dimension_numbers<[1], [0], [0], [1], [0, 0, 1, 1], [], []>} : vector<24x28xf32>, vector<28x304xf32>, vector<24x304xf32> -> vector<24x304xf32>
    %c0_56 = arith.constant 0 : index
    %c0_57 = arith.constant 0 : index
    %c0_58 = arith.constant 0 : index
    %c0_59 = arith.constant 0 : index
    %52 = vector.load %arg5[%c0_56, %c0_57, %c0_58, %c0_59] : memref<3x2x304x192xf32, #tpu.memory_space<vmem>>, vector<1x1x304x192xf32>
    %53 = vector.shape_cast %52 : vector<1x1x304x192xf32> to vector<304x192xf32>
    %cst_60 = arith.constant dense<0.000000e+00> : vector<24x192xf32>
    %54 = tpu.matmul %51, %53, %cst_60 {dimension_numbers = #tpu.dot_dimension_numbers<[1], [0], [0], [1], [0, 0, 1, 1], [], []>} : vector<24x304xf32>, vector<304x192xf32>, vector<24x192xf32> -> vector<24x192xf32>
    %c0_61 = arith.constant 0 : index
    %c1_62 = arith.constant 1 : index
    %c0_63 = arith.constant 0 : index
    %c0_64 = arith.constant 0 : index
    %55 = vector.load %arg5[%c0_61, %c1_62, %c0_63, %c0_64] : memref<3x2x304x192xf32, #tpu.memory_space<vmem>>, vector<1x1x304x192xf32>
    %56 = vector.shape_cast %55 : vector<1x1x304x192xf32> to vector<304x192xf32>
    %cst_65 = arith.constant dense<0.000000e+00> : vector<24x192xf32>
    %57 = tpu.matmul %51, %56, %cst_65 {dimension_numbers = #tpu.dot_dimension_numbers<[1], [0], [0], [1], [0, 0, 1, 1], [], []>} : vector<24x304xf32>, vector<304x192xf32>, vector<24x192xf32> -> vector<24x192xf32>
    %c1_66 = arith.constant 1 : index
    %c0_67 = arith.constant 0 : index
    %c0_68 = arith.constant 0 : index
    %58 = vector.load %arg7[%c1_66, %c0_67, %c0_68] : memref<3x24x28xf32, #tpu.memory_space<vmem>>, vector<1x24x28xf32>
    %59 = vector.shape_cast %58 : vector<1x24x28xf32> to vector<24x28xf32>
    %cst_69 = arith.constant dense<0.000000e+00> : vector<24x304xf32>
    %60 = tpu.matmul %59, %48, %cst_69 {dimension_numbers = #tpu.dot_dimension_numbers<[1], [0], [0], [1], [0, 0, 1, 1], [], []>} : vector<24x28xf32>, vector<28x304xf32>, vector<24x304xf32> -> vector<24x304xf32>
    %c1_70 = arith.constant 1 : index
    %c0_71 = arith.constant 0 : index
    %c0_72 = arith.constant 0 : index
    %c0_73 = arith.constant 0 : index
    %61 = vector.load %arg5[%c1_70, %c0_71, %c0_72, %c0_73] : memref<3x2x304x192xf32, #tpu.memory_space<vmem>>, vector<1x1x304x192xf32>
    %62 = vector.shape_cast %61 : vector<1x1x304x192xf32> to vector<304x192xf32>
    %cst_74 = arith.constant dense<0.000000e+00> : vector<24x192xf32>
    %63 = tpu.matmul %60, %62, %cst_74 {dimension_numbers = #tpu.dot_dimension_numbers<[1], [0], [0], [1], [0, 0, 1, 1], [], []>} : vector<24x304xf32>, vector<304x192xf32>, vector<24x192xf32> -> vector<24x192xf32>
    %c1_75 = arith.constant 1 : index
    %c1_76 = arith.constant 1 : index
    %c0_77 = arith.constant 0 : index
    %c0_78 = arith.constant 0 : index
    %64 = vector.load %arg5[%c1_75, %c1_76, %c0_77, %c0_78] : memref<3x2x304x192xf32, #tpu.memory_space<vmem>>, vector<1x1x304x192xf32>
    %65 = vector.shape_cast %64 : vector<1x1x304x192xf32> to vector<304x192xf32>
    %cst_79 = arith.constant dense<0.000000e+00> : vector<24x192xf32>
    %66 = tpu.matmul %60, %65, %cst_79 {dimension_numbers = #tpu.dot_dimension_numbers<[1], [0], [0], [1], [0, 0, 1, 1], [], []>} : vector<24x304xf32>, vector<304x192xf32>, vector<24x192xf32> -> vector<24x192xf32>
    %67 = arith.addf %54, %63 : vector<24x192xf32>
    %68 = arith.addf %57, %66 : vector<24x192xf32>
    %c2_80 = arith.constant 2 : index
    %c0_81 = arith.constant 0 : index
    %c0_82 = arith.constant 0 : index
    %69 = vector.load %arg7[%c2_80, %c0_81, %c0_82] : memref<3x24x28xf32, #tpu.memory_space<vmem>>, vector<1x24x28xf32>
    %70 = vector.shape_cast %69 : vector<1x24x28xf32> to vector<24x28xf32>
    %cst_83 = arith.constant dense<0.000000e+00> : vector<24x304xf32>
    %71 = tpu.matmul %70, %48, %cst_83 {dimension_numbers = #tpu.dot_dimension_numbers<[1], [0], [0], [1], [0, 0, 1, 1], [], []>} : vector<24x28xf32>, vector<28x304xf32>, vector<24x304xf32> -> vector<24x304xf32>
    %c2_84 = arith.constant 2 : index
    %c0_85 = arith.constant 0 : index
    %c0_86 = arith.constant 0 : index
    %c0_87 = arith.constant 0 : index
    %72 = vector.load %arg5[%c2_84, %c0_85, %c0_86, %c0_87] : memref<3x2x304x192xf32, #tpu.memory_space<vmem>>, vector<1x1x304x192xf32>
    %73 = vector.shape_cast %72 : vector<1x1x304x192xf32> to vector<304x192xf32>
    %cst_88 = arith.constant dense<0.000000e+00> : vector<24x192xf32>
    %74 = tpu.matmul %71, %73, %cst_88 {dimension_numbers = #tpu.dot_dimension_numbers<[1], [0], [0], [1], [0, 0, 1, 1], [], []>} : vector<24x304xf32>, vector<304x192xf32>, vector<24x192xf32> -> vector<24x192xf32>
    %c2_89 = arith.constant 2 : index
    %c1_90 = arith.constant 1 : index
    %c0_91 = arith.constant 0 : index
    %c0_92 = arith.constant 0 : index
    %75 = vector.load %arg5[%c2_89, %c1_90, %c0_91, %c0_92] : memref<3x2x304x192xf32, #tpu.memory_space<vmem>>, vector<1x1x304x192xf32>
    %76 = vector.shape_cast %75 : vector<1x1x304x192xf32> to vector<304x192xf32>
    %cst_93 = arith.constant dense<0.000000e+00> : vector<24x192xf32>
    %77 = tpu.matmul %71, %76, %cst_93 {dimension_numbers = #tpu.dot_dimension_numbers<[1], [0], [0], [1], [0, 0, 1, 1], [], []>} : vector<24x304xf32>, vector<304x192xf32>, vector<24x192xf32> -> vector<24x192xf32>
    %78 = arith.addf %67, %74 : vector<24x192xf32>
    %79 = arith.addf %68, %77 : vector<24x192xf32>
    %c0_94 = arith.constant 0 : index
    %c0_95 = arith.constant 0 : index
    %80 = vector.load %arg6[%c0_94, %c0_95] : memref<1x192xf32, #tpu.memory_space<vmem>>, vector<1x192xf32>
    %81 = vector.broadcast %80 : vector<1x192xf32> to vector<24x192xf32>
    %82 = arith.addf %78, %81 : vector<24x192xf32>
    %cst_96 = arith.constant 0.000000e+00 : f32
    %83 = vector.broadcast %cst_96 : f32 to vector<24x192xf32>
    %84 = arith.maximumf %82, %83 : vector<24x192xf32>
    %85 = vector.broadcast %80 : vector<1x192xf32> to vector<24x192xf32>
    %86 = arith.addf %79, %85 : vector<24x192xf32>
    %cst_97 = arith.constant 0.000000e+00 : f32
    %87 = vector.broadcast %cst_97 : f32 to vector<24x192xf32>
    %88 = arith.maximumf %86, %87 : vector<24x192xf32>
    %89 = arith.maximumf %84, %88 : vector<24x192xf32>
    %c0_98 = arith.constant 0 : index
    %c0_99 = arith.constant 0 : index
    %c0_100 = arith.constant 0 : index
    %90 = vector.load %arg8[%c0_98, %c0_99, %c0_100] : memref<2x12x24xf32, #tpu.memory_space<vmem>>, vector<1x12x24xf32>
    %91 = vector.shape_cast %90 : vector<1x12x24xf32> to vector<12x24xf32>
    %cst_101 = arith.constant dense<0.000000e+00> : vector<12x192xf32>
    %92 = tpu.matmul %91, %89, %cst_101 {dimension_numbers = #tpu.dot_dimension_numbers<[1], [0], [0], [1], [0, 0, 1, 1], [], []>} : vector<12x24xf32>, vector<24x192xf32>, vector<12x192xf32> -> vector<12x192xf32>
    %c1_102 = arith.constant 1 : index
    %c0_103 = arith.constant 0 : index
    %c0_104 = arith.constant 0 : index
    %93 = vector.load %arg8[%c1_102, %c0_103, %c0_104] : memref<2x12x24xf32, #tpu.memory_space<vmem>>, vector<1x12x24xf32>
    %94 = vector.shape_cast %93 : vector<1x12x24xf32> to vector<12x24xf32>
    %cst_105 = arith.constant dense<0.000000e+00> : vector<12x192xf32>
    %95 = tpu.matmul %94, %89, %cst_105 {dimension_numbers = #tpu.dot_dimension_numbers<[1], [0], [0], [1], [0, 0, 1, 1], [], []>} : vector<12x24xf32>, vector<24x192xf32>, vector<12x192xf32> -> vector<12x192xf32>
    %96 = arith.maximumf %92, %95 : vector<12x192xf32>
    %c0_106 = arith.constant 0 : index
    %c0_107 = arith.constant 0 : index
    %c0_108 = arith.constant 0 : index
    %97 = vector.load %arg11[%c0_106, %c0_107, %c0_108] : memref<3x8x12xf32, #tpu.memory_space<vmem>>, vector<1x8x12xf32>
    %98 = vector.shape_cast %97 : vector<1x8x12xf32> to vector<8x12xf32>
    %cst_109 = arith.constant dense<0.000000e+00> : vector<8x192xf32>
    %99 = tpu.matmul %98, %96, %cst_109 {dimension_numbers = #tpu.dot_dimension_numbers<[1], [0], [0], [1], [0, 0, 1, 1], [], []>} : vector<8x12xf32>, vector<12x192xf32>, vector<8x192xf32> -> vector<8x192xf32>
    %c0_110 = arith.constant 0 : index
    %c0_111 = arith.constant 0 : index
    %c0_112 = arith.constant 0 : index
    %c0_113 = arith.constant 0 : index
    %100 = vector.load %arg9[%c0_110, %c0_111, %c0_112, %c0_113] : memref<3x2x192x64xf32, #tpu.memory_space<vmem>>, vector<1x1x192x64xf32>
    %101 = vector.shape_cast %100 : vector<1x1x192x64xf32> to vector<192x64xf32>
    %cst_114 = arith.constant dense<0.000000e+00> : vector<8x64xf32>
    %102 = tpu.matmul %99, %101, %cst_114 {dimension_numbers = #tpu.dot_dimension_numbers<[1], [0], [0], [1], [0, 0, 1, 1], [], []>} : vector<8x192xf32>, vector<192x64xf32>, vector<8x64xf32> -> vector<8x64xf32>
    %c0_115 = arith.constant 0 : index
    %c1_116 = arith.constant 1 : index
    %c0_117 = arith.constant 0 : index
    %c0_118 = arith.constant 0 : index
    %103 = vector.load %arg9[%c0_115, %c1_116, %c0_117, %c0_118] : memref<3x2x192x64xf32, #tpu.memory_space<vmem>>, vector<1x1x192x64xf32>
    %104 = vector.shape_cast %103 : vector<1x1x192x64xf32> to vector<192x64xf32>
    %cst_119 = arith.constant dense<0.000000e+00> : vector<8x64xf32>
    %105 = tpu.matmul %99, %104, %cst_119 {dimension_numbers = #tpu.dot_dimension_numbers<[1], [0], [0], [1], [0, 0, 1, 1], [], []>} : vector<8x192xf32>, vector<192x64xf32>, vector<8x64xf32> -> vector<8x64xf32>
    %c1_120 = arith.constant 1 : index
    %c0_121 = arith.constant 0 : index
    %c0_122 = arith.constant 0 : index
    %106 = vector.load %arg11[%c1_120, %c0_121, %c0_122] : memref<3x8x12xf32, #tpu.memory_space<vmem>>, vector<1x8x12xf32>
    %107 = vector.shape_cast %106 : vector<1x8x12xf32> to vector<8x12xf32>
    %cst_123 = arith.constant dense<0.000000e+00> : vector<8x192xf32>
    %108 = tpu.matmul %107, %96, %cst_123 {dimension_numbers = #tpu.dot_dimension_numbers<[1], [0], [0], [1], [0, 0, 1, 1], [], []>} : vector<8x12xf32>, vector<12x192xf32>, vector<8x192xf32> -> vector<8x192xf32>
    %c1_124 = arith.constant 1 : index
    %c0_125 = arith.constant 0 : index
    %c0_126 = arith.constant 0 : index
    %c0_127 = arith.constant 0 : index
    %109 = vector.load %arg9[%c1_124, %c0_125, %c0_126, %c0_127] : memref<3x2x192x64xf32, #tpu.memory_space<vmem>>, vector<1x1x192x64xf32>
    %110 = vector.shape_cast %109 : vector<1x1x192x64xf32> to vector<192x64xf32>
    %cst_128 = arith.constant dense<0.000000e+00> : vector<8x64xf32>
    %111 = tpu.matmul %108, %110, %cst_128 {dimension_numbers = #tpu.dot_dimension_numbers<[1], [0], [0], [1], [0, 0, 1, 1], [], []>} : vector<8x192xf32>, vector<192x64xf32>, vector<8x64xf32> -> vector<8x64xf32>
    %c1_129 = arith.constant 1 : index
    %c1_130 = arith.constant 1 : index
    %c0_131 = arith.constant 0 : index
    %c0_132 = arith.constant 0 : index
    %112 = vector.load %arg9[%c1_129, %c1_130, %c0_131, %c0_132] : memref<3x2x192x64xf32, #tpu.memory_space<vmem>>, vector<1x1x192x64xf32>
    %113 = vector.shape_cast %112 : vector<1x1x192x64xf32> to vector<192x64xf32>
    %cst_133 = arith.constant dense<0.000000e+00> : vector<8x64xf32>
    %114 = tpu.matmul %108, %113, %cst_133 {dimension_numbers = #tpu.dot_dimension_numbers<[1], [0], [0], [1], [0, 0, 1, 1], [], []>} : vector<8x192xf32>, vector<192x64xf32>, vector<8x64xf32> -> vector<8x64xf32>
    %115 = arith.addf %102, %111 : vector<8x64xf32>
    %116 = arith.addf %105, %114 : vector<8x64xf32>
    %c2_134 = arith.constant 2 : index
    %c0_135 = arith.constant 0 : index
    %c0_136 = arith.constant 0 : index
    %117 = vector.load %arg11[%c2_134, %c0_135, %c0_136] : memref<3x8x12xf32, #tpu.memory_space<vmem>>, vector<1x8x12xf32>
    %118 = vector.shape_cast %117 : vector<1x8x12xf32> to vector<8x12xf32>
    %cst_137 = arith.constant dense<0.000000e+00> : vector<8x192xf32>
    %119 = tpu.matmul %118, %96, %cst_137 {dimension_numbers = #tpu.dot_dimension_numbers<[1], [0], [0], [1], [0, 0, 1, 1], [], []>} : vector<8x12xf32>, vector<12x192xf32>, vector<8x192xf32> -> vector<8x192xf32>
    %c2_138 = arith.constant 2 : index
    %c0_139 = arith.constant 0 : index
    %c0_140 = arith.constant 0 : index
    %c0_141 = arith.constant 0 : index
    %120 = vector.load %arg9[%c2_138, %c0_139, %c0_140, %c0_141] : memref<3x2x192x64xf32, #tpu.memory_space<vmem>>, vector<1x1x192x64xf32>
    %121 = vector.shape_cast %120 : vector<1x1x192x64xf32> to vector<192x64xf32>
    %cst_142 = arith.constant dense<0.000000e+00> : vector<8x64xf32>
    %122 = tpu.matmul %119, %121, %cst_142 {dimension_numbers = #tpu.dot_dimension_numbers<[1], [0], [0], [1], [0, 0, 1, 1], [], []>} : vector<8x192xf32>, vector<192x64xf32>, vector<8x64xf32> -> vector<8x64xf32>
    %c2_143 = arith.constant 2 : index
    %c1_144 = arith.constant 1 : index
    %c0_145 = arith.constant 0 : index
    %c0_146 = arith.constant 0 : index
    %123 = vector.load %arg9[%c2_143, %c1_144, %c0_145, %c0_146] : memref<3x2x192x64xf32, #tpu.memory_space<vmem>>, vector<1x1x192x64xf32>
    %124 = vector.shape_cast %123 : vector<1x1x192x64xf32> to vector<192x64xf32>
    %cst_147 = arith.constant dense<0.000000e+00> : vector<8x64xf32>
    %125 = tpu.matmul %119, %124, %cst_147 {dimension_numbers = #tpu.dot_dimension_numbers<[1], [0], [0], [1], [0, 0, 1, 1], [], []>} : vector<8x192xf32>, vector<192x64xf32>, vector<8x64xf32> -> vector<8x64xf32>
    %126 = arith.addf %115, %122 : vector<8x64xf32>
    %127 = arith.addf %116, %125 : vector<8x64xf32>
    %c0_148 = arith.constant 0 : index
    %c0_149 = arith.constant 0 : index
    %128 = vector.load %arg10[%c0_148, %c0_149] : memref<1x64xf32, #tpu.memory_space<vmem>>, vector<1x64xf32>
    %129 = vector.broadcast %128 : vector<1x64xf32> to vector<8x64xf32>
    %130 = arith.addf %126, %129 : vector<8x64xf32>
    %cst_150 = arith.constant 0.000000e+00 : f32
    %131 = vector.broadcast %cst_150 : f32 to vector<8x64xf32>
    %132 = arith.maximumf %130, %131 : vector<8x64xf32>
    %133 = vector.broadcast %128 : vector<1x64xf32> to vector<8x64xf32>
    %134 = arith.addf %127, %133 : vector<8x64xf32>
    %cst_151 = arith.constant 0.000000e+00 : f32
    %135 = vector.broadcast %cst_151 : f32 to vector<8x64xf32>
    %136 = arith.maximumf %134, %135 : vector<8x64xf32>
    %137 = arith.maximumf %132, %136 : vector<8x64xf32>
    %c0_152 = arith.constant 0 : index
    %c0_153 = arith.constant 0 : index
    %c0_154 = arith.constant 0 : index
    %c0_155 = arith.constant 0 : index
    %138 = vector.load %arg12[%c0_152, %c0_153, %c0_154, %c0_155] : memref<2x2x2x8xf32, #tpu.memory_space<vmem>>, vector<1x1x2x8xf32>
    %139 = vector.shape_cast %138 : vector<1x1x2x8xf32> to vector<2x8xf32>
    %cst_156 = arith.constant dense<0.000000e+00> : vector<2x64xf32>
    %140 = tpu.matmul %139, %137, %cst_156 {dimension_numbers = #tpu.dot_dimension_numbers<[1], [0], [0], [1], [0, 0, 1, 1], [], []>} : vector<2x8xf32>, vector<8x64xf32>, vector<2x64xf32> -> vector<2x64xf32>
    %c0_157 = arith.constant 0 : index
    %c1_158 = arith.constant 1 : index
    %c0_159 = arith.constant 0 : index
    %c0_160 = arith.constant 0 : index
    %141 = vector.load %arg12[%c0_157, %c1_158, %c0_159, %c0_160] : memref<2x2x2x8xf32, #tpu.memory_space<vmem>>, vector<1x1x2x8xf32>
    %142 = vector.shape_cast %141 : vector<1x1x2x8xf32> to vector<2x8xf32>
    %cst_161 = arith.constant dense<0.000000e+00> : vector<2x64xf32>
    %143 = tpu.matmul %142, %137, %cst_161 {dimension_numbers = #tpu.dot_dimension_numbers<[1], [0], [0], [1], [0, 0, 1, 1], [], []>} : vector<2x8xf32>, vector<8x64xf32>, vector<2x64xf32> -> vector<2x64xf32>
    %144 = arith.maximumf %140, %143 : vector<2x64xf32>
    %c1_162 = arith.constant 1 : index
    %c0_163 = arith.constant 0 : index
    %c0_164 = arith.constant 0 : index
    %c0_165 = arith.constant 0 : index
    %145 = vector.load %arg12[%c1_162, %c0_163, %c0_164, %c0_165] : memref<2x2x2x8xf32, #tpu.memory_space<vmem>>, vector<1x1x2x8xf32>
    %146 = vector.shape_cast %145 : vector<1x1x2x8xf32> to vector<2x8xf32>
    %cst_166 = arith.constant dense<0.000000e+00> : vector<2x64xf32>
    %147 = tpu.matmul %146, %137, %cst_166 {dimension_numbers = #tpu.dot_dimension_numbers<[1], [0], [0], [1], [0, 0, 1, 1], [], []>} : vector<2x8xf32>, vector<8x64xf32>, vector<2x64xf32> -> vector<2x64xf32>
    %c1_167 = arith.constant 1 : index
    %c1_168 = arith.constant 1 : index
    %c0_169 = arith.constant 0 : index
    %c0_170 = arith.constant 0 : index
    %148 = vector.load %arg12[%c1_167, %c1_168, %c0_169, %c0_170] : memref<2x2x2x8xf32, #tpu.memory_space<vmem>>, vector<1x1x2x8xf32>
    %149 = vector.shape_cast %148 : vector<1x1x2x8xf32> to vector<2x8xf32>
    %cst_171 = arith.constant dense<0.000000e+00> : vector<2x64xf32>
    %150 = tpu.matmul %149, %137, %cst_171 {dimension_numbers = #tpu.dot_dimension_numbers<[1], [0], [0], [1], [0, 0, 1, 1], [], []>} : vector<2x8xf32>, vector<8x64xf32>, vector<2x64xf32> -> vector<2x64xf32>
    %151 = arith.maximumf %147, %150 : vector<2x64xf32>
    %c0_172 = arith.constant 0 : index
    %c0_173 = arith.constant 0 : index
    %c0_174 = arith.constant 0 : index
    %152 = vector.load %arg13[%c0_172, %c0_173, %c0_174] : memref<2x64x32xf32, #tpu.memory_space<vmem>>, vector<1x64x32xf32>
    %153 = vector.shape_cast %152 : vector<1x64x32xf32> to vector<64x32xf32>
    %cst_175 = arith.constant dense<0.000000e+00> : vector<2x32xf32>
    %154 = tpu.matmul %144, %153, %cst_175 {dimension_numbers = #tpu.dot_dimension_numbers<[1], [0], [0], [1], [0, 0, 1, 1], [], []>} : vector<2x64xf32>, vector<64x32xf32>, vector<2x32xf32> -> vector<2x32xf32>
    %c0_176 = arith.constant 0 : index
    %c0_177 = arith.constant 0 : index
    %c0_178 = arith.constant 0 : index
    %155 = vector.load %arg14[%c0_176, %c0_177, %c0_178] : memref<2x64x32xf32, #tpu.memory_space<vmem>>, vector<1x64x32xf32>
    %156 = vector.shape_cast %155 : vector<1x64x32xf32> to vector<64x32xf32>
    %cst_179 = arith.constant dense<0.000000e+00> : vector<2x32xf32>
    %157 = tpu.matmul %151, %156, %cst_179 {dimension_numbers = #tpu.dot_dimension_numbers<[1], [0], [0], [1], [0, 0, 1, 1], [], []>} : vector<2x64xf32>, vector<64x32xf32>, vector<2x32xf32> -> vector<2x32xf32>
    %158 = arith.addf %154, %157 : vector<2x32xf32>
    %c0_180 = arith.constant 0 : index
    %c0_181 = arith.constant 0 : index
    %c0_182 = arith.constant 0 : index
    %159 = vector.load %arg15[%c0_180, %c0_181, %c0_182] : memref<2x1x32xf32, #tpu.memory_space<vmem>>, vector<1x1x32xf32>
    %160 = vector.shape_cast %159 : vector<1x1x32xf32> to vector<1x32xf32>
    %161 = vector.broadcast %160 : vector<1x32xf32> to vector<2x32xf32>
    %162 = arith.addf %158, %161 : vector<2x32xf32>
    %c1_183 = arith.constant 1 : index
    %c0_184 = arith.constant 0 : index
    %c0_185 = arith.constant 0 : index
    %163 = vector.load %arg13[%c1_183, %c0_184, %c0_185] : memref<2x64x32xf32, #tpu.memory_space<vmem>>, vector<1x64x32xf32>
    %164 = vector.shape_cast %163 : vector<1x64x32xf32> to vector<64x32xf32>
    %cst_186 = arith.constant dense<0.000000e+00> : vector<2x32xf32>
    %165 = tpu.matmul %144, %164, %cst_186 {dimension_numbers = #tpu.dot_dimension_numbers<[1], [0], [0], [1], [0, 0, 1, 1], [], []>} : vector<2x64xf32>, vector<64x32xf32>, vector<2x32xf32> -> vector<2x32xf32>
    %c1_187 = arith.constant 1 : index
    %c0_188 = arith.constant 0 : index
    %c0_189 = arith.constant 0 : index
    %166 = vector.load %arg14[%c1_187, %c0_188, %c0_189] : memref<2x64x32xf32, #tpu.memory_space<vmem>>, vector<1x64x32xf32>
    %167 = vector.shape_cast %166 : vector<1x64x32xf32> to vector<64x32xf32>
    %cst_190 = arith.constant dense<0.000000e+00> : vector<2x32xf32>
    %168 = tpu.matmul %151, %167, %cst_190 {dimension_numbers = #tpu.dot_dimension_numbers<[1], [0], [0], [1], [0, 0, 1, 1], [], []>} : vector<2x64xf32>, vector<64x32xf32>, vector<2x32xf32> -> vector<2x32xf32>
    %169 = arith.addf %165, %168 : vector<2x32xf32>
    %c1_191 = arith.constant 1 : index
    %c0_192 = arith.constant 0 : index
    %c0_193 = arith.constant 0 : index
    %170 = vector.load %arg15[%c1_191, %c0_192, %c0_193] : memref<2x1x32xf32, #tpu.memory_space<vmem>>, vector<1x1x32xf32>
    %171 = vector.shape_cast %170 : vector<1x1x32xf32> to vector<1x32xf32>
    %172 = vector.broadcast %171 : vector<1x32xf32> to vector<2x32xf32>
    %173 = arith.addf %169, %172 : vector<2x32xf32>
    %cst_194 = arith.constant 5.000000e-01 : f32
    %174 = vector.broadcast %cst_194 : f32 to vector<2x32xf32>
    %175 = arith.mulf %174, %173 : vector<2x32xf32>
    %176 = math.exp %175 : vector<2x32xf32>
    %c0_195 = arith.constant 0 : index
    %c0_196 = arith.constant 0 : index
    %177 = vector.load %arg16[%c0_195, %c0_196] : memref<2x32xf32, #tpu.memory_space<vmem>>, vector<2x32xf32>
    %178 = arith.mulf %176, %177 : vector<2x32xf32>
    %179 = arith.addf %162, %178 : vector<2x32xf32>
    %c0_197 = arith.constant 0 : index
    %c0_198 = arith.constant 0 : index
    %180 = vector.load %arg17[%c0_197, %c0_198] : memref<2x32xf32, #tpu.memory_space<vmem>>, vector<2x32xf32>
    tpu.vector_store %arg17[%c0_197, %c0_198], %179 {strides = array<i32>} : memref<2x32xf32, #tpu.memory_space<vmem>>, vector<2x32xf32>,
    %c0_199 = arith.constant 0 : index
    %c0_200 = arith.constant 0 : index
    %181 = vector.load %arg18[%c0_199, %c0_200] : memref<2x32xf32, #tpu.memory_space<vmem>>, vector<2x32xf32>
    tpu.vector_store %arg18[%c0_199, %c0_200], %162 {strides = array<i32>} : memref<2x32xf32, #tpu.memory_space<vmem>>, vector<2x32xf32>,
    %c0_201 = arith.constant 0 : index
    %c0_202 = arith.constant 0 : index
    %182 = vector.load %arg19[%c0_201, %c0_202] : memref<2x32xf32, #tpu.memory_space<vmem>>, vector<2x32xf32>
    tpu.vector_store %arg19[%c0_201, %c0_202], %173 {strides = array<i32>} : memref<2x32xf32, #tpu.memory_space<vmem>>, vector<2x32xf32>,
    return
  }
}

</mosaic_0001>

<bundles_post_ra>
// kernel: vae_forward.1
= control target key start
LH: loop header
LB: loop body
LE: loop exit
PB: predicated region body
PF: predicated region fallthrough
CT: control target
= control target key end

     0   :  { %s12755_s0 = inlined_call_operand.vmem [shape: f32[60,237], index: 0, kind: input, shape index: {}]   ;;  %s12756_s1 = inlined_call_operand.vmem [shape: f32[3,2,237,304], index: 1, kind: input, shape index: {}]   ;;  %s12757_s2 = inlined_call_operand.vmem [shape: f32[1,304], index: 2, kind: input, shape index: {}]   ;;  %s12758_s3 = inlined_call_operand.vmem [shape: f32[3,56,60], index: 3, kind: input, shape index: {}]   ;;  %s12759_s4 = inlined_call_operand.vmem [shape: f32[2,28,56], index: 4, kind: input, shape index: {}]   ;;  %s12760_s5 = inlined_call_operand.vmem [shape: f32[3,2,304,192], index: 5, kind: input, shape index: {}]   ;;  %s12761_s6 = inlined_call_operand.vmem [shape: f32[1,192], index: 6, kind: input, shape index: {}]   ;;  %s12762_s7 = inlined_call_operand.vmem [shape: f32[3,24,28], index: 7, kind: input, shape index: {}]   ;;  %s12763_s8 = inlined_call_operand.vmem [shape: f32[2,12,24], index: 8, kind: input, shape index: {}]   ;;  %s12764_s9 = inlined_call_operand.vmem [shape: f32[3,2,192,64], index: 9, kind: input, shape index: {}]   ;;  %s12765_s10 = inlined_call_operand.vmem [shape: f32[1,64], index: 10, kind: input, shape index: {}]   ;;  %s12766_s11 = inlined_call_operand.vmem [shape: f32[3,8,12], index: 11, kind: input, shape index: {}]   ;;  %s12767_s12 = inlined_call_operand.vmem [shape: f32[2,2,2,8], index: 12, kind: input, shape index: {}]   ;;  %s12768_s13 = inlined_call_operand.vmem [shape: f32[2,64,32], index: 13, kind: input, shape index: {}]   ;;  %s12769_s14 = inlined_call_operand.vmem [shape: f32[2,64,32], index: 14, kind: input, shape index: {}]   ;;  %s12770_s15 = inlined_call_operand.vmem [shape: f32[2,1,32], index: 15, kind: input, shape index: {}]   ;;  %s12771_s16 = inlined_call_operand.vmem [shape: f32[2,32], index: 16, kind: input, shape index: {}]   ;;  %s12772_s17 = inlined_call_operand.hbm [shape: f32[2,32], index: 17, kind: output, shape index: {0}]   ;;  %s12773_s18 = inlined_call_operand.hbm [shape: f32[2,32], index: 18, kind: output, shape index: {1}]   ;;  %s12774_s19 = inlined_call_operand.hbm [shape: f32[2,32], index: 19, kind: output, shape index: {2}]  }
   0x1   :  { %12785 = sst [smem:[#allocation138_spill]] %s12755_s0 }
   0x2   :  { %12786 = sst [smem:[#allocation139_spill]] %s12756_s1 }
   0x3   :  { %12787 = sst [smem:[#allocation140_spill]] %s12757_s2 }
   0x4   :  { %12788 = sst [smem:[#allocation141_spill]] %s12758_s3 }
   0x5   :  { %25 = vsyncpa [#allocation3], 0  ;;  %s12789_s20 = sld [smem:[#allocation138_spill]]  ;;  %vm106_vm0 = vcmask 1043456  }
   0xb   :  { %v75_v0 = vld [vmem:[%s12789_s20 + $0x70] sm:$0xf]  ;;  %v76_v1 = vld [vmem:[%s12789_s20 + $0x78] sm:$0xf]  ;;  %v73_v2 = vld [vmem:[%s12789_s20 + $0x60] sm:$0xff] }
   0xc   :  { %5629 = vmatpush.msk.msra.mxu2 %vm106_vm0, %v75_v0  ;;  %5637 = vmatpush.msk.msra.mxu3 %vm106_vm0, %v76_v1  ;;  %v74_v3 = vld [vmem:[%s12789_s20 + $0x68] sm:$0xff]  ;;  %v71_v4 = vld [vmem:[%s12789_s20 + $0x50] sm:$0xff]  ;;  %v72_v5 = vld [vmem:[%s12789_s20 + $0x58] sm:$0xff] }
   0xd   :  { %5516 = vmatpush.msk.msra.mxu0 %vm106_vm0, %v75_v0  ;;  %5524 = vmatpush.msk.msra.mxu1 %vm106_vm0, %v76_v1  ;;  %v69_v6 = vld [vmem:[%s12789_s20 + $0x40] sm:$0xff]  ;;  %v70_v7 = vld [vmem:[%s12789_s20 + $0x48] sm:$0xff]  ;;  %v67_v8 = vld [vmem:[%s12789_s20 + $0x30] sm:$0xff] }
   0xe   :  { %408 = vmatpush.msra.mxu2 %v73_v2  ;;  %446 = vmatpush.msra.mxu3 %v74_v3  ;;  %v68_v9 = vld [vmem:[%s12789_s20 + $0x38] sm:$0xff] }
   0xf   :  { %122 = vmatpush.msra.mxu0 %v73_v2  ;;  %160 = vmatpush.msra.mxu1 %v74_v3 }
  0x10   :  { %409 = vmatpush.msra.mxu2 %v71_v4  ;;  %447 = vmatpush.msra.mxu3 %v72_v5 }
  0x11   :  { %123 = vmatpush.msra.mxu0 %v71_v4  ;;  %161 = vmatpush.msra.mxu1 %v72_v5 }
  0x12   :  { %410 = vmatpush.msra.mxu2 %v69_v6  ;;  %448 = vmatpush.msra.mxu3 %v70_v7 }
  0x13   :  { %26 = vsyncpa [#allocation5], 0  ;;  %v65_v10 = vld [vmem:[%s12789_s20 + $0x20] sm:$0xff]  ;;  %v66_v11 = vld [vmem:[%s12789_s20 + $0x28] sm:$0xff]  ;;  %124 = vmatpush.msra.mxu0 %v69_v6  ;;  %162 = vmatpush.msra.mxu1 %v70_v7  ;;  %vm84_vm1 = vcmask 490496   ;;  %s12790_s23 = sld [smem:[#allocation141_spill]] }
  0x14   :  { %411 = vmatpush.msra.mxu2 %v67_v8  ;;  %449 = vmatpush.msra.mxu3 %v68_v9  ;;  %v63_v12 = vld [vmem:[%s12789_s20 + $0x10] sm:$0xff]  ;;  %v64_v13 = vld [vmem:[%s12789_s20 + $0x18] sm:$0xff]  ;;  %v61_v14 = vld [vmem:[%s12789_s20] sm:$0xff]  ;;  %s12791_s30 = sld [smem:[#allocation139_spill]]  ;;  %vm588_vm2 = vcmask 1044480   ;;  %vm566_vm3 = vcmask 891904  }
  0x15   :  { %125 = vmatpush.msra.mxu0 %v67_v8  ;;  %163 = vmatpush.msra.mxu1 %v68_v9  ;;  %v62_v15 = vld [vmem:[%s12789_s20 + $0x8] sm:$0xff]  ;;  %s12914_s21 = sld [smem:[#allocation140_spill]]  ;;  %vm2590_vm4 = vcmask 457728   ;;  %vm2809_vm5 = vcmask 228352   ;;  %vm3227_vm6 = vcmask 392192   ;;  %vm4563_vm7 = vcmask 195584  }
  0x16   :  { %412 = vmatpush.msra.mxu2 %v65_v10  ;;  %450 = vmatpush.msra.mxu3 %v66_v11  ;;  %vm4676_vm8 = vcmask 97280   ;;  %vm4845_vm9 = vcmask 523264   ;;  %vm5227_vm10 = vcmask 64512   ;;  %vm5465_vm11 = vcmask 254976   ;;  %s5487_s22 = sshll.u32 %s12773_s18, 4  ;;  %s6937_s2 = smov [#allocation6]   ;;  %s5488_s22 = int_to_ptr.hbm [resolvable:$true] %s5487_s22 }
  0x17   :  { %126 = vmatpush.msra.mxu0 %v65_v10  ;;  %164 = vmatpush.msra.mxu1 %v66_v11  ;;  %s6938_s18 = smov [#allocation2]  }
  0x18   :  { %413 = vmatpush.msra.mxu2 %v63_v12  ;;  %451 = vmatpush.msra.mxu3 %v64_v13  ;;  %s5474_s26 = sshll.u32 %s6938_s18, 4  ;;  %s5475_s26 = int_to_ptr.vmem [resolvable:$true] %s5474_s26 }
  0x19   :  { %v5622_v16 = vld [vmem:[%s12790_s23 + $0x38] sm:$0xff]  ;;  %127 = vmatpush.msra.mxu0 %v63_v12  ;;  %165 = vmatpush.msra.mxu1 %v64_v13  ;;  %v5623_v17 = vld [vmem:[%s12790_s23 + $0x40] sm:$0xff]  ;;  %v5624_v18 = vld [vmem:[%s12790_s23 + $0x48] sm:$0xff] }
  0x1a   :  { %414 = vmatpush.msra.mxu2 %v61_v14  ;;  %452 = vmatpush.msra.mxu3 %v62_v15  ;;  %v77_v19 = vld [vmem:[%s12790_s23] sm:$0xff]  ;;  %v5690_v20 = vld [vmem:[%s12791_s30 + $0x708] sm:$0xff]  ;;  %v5691_v21 = vld [vmem:[%s12791_s30 + $0x710] sm:$0xff] }
  0x1b   :  { %5630 = vmatmul.msk.f32.vlgmr.msra.gmra.mxu2 %vm84_vm1, %v5622_v16  ;;  %5638 = vmatmul.msk.f32.vlgmr.msra.gmra.mxu3 %vm84_vm1, %v5622_v16  ;;  %v5687_v22 = vld [vmem:[%s12791_s30 + $0x6f0] sm:$0xff]  ;;  %v5688_v23 = vld [vmem:[%s12791_s30 + $0x6f8] sm:$0xff]  ;;  %v5685_v26 = vld [vmem:[%s12791_s30 + $0x6e0] sm:$0xff] }
  0x1c   :  { %128 = vmatpush.msra.mxu0 %v61_v14  ;;  %166 = vmatpush.msra.mxu1 %v62_v15  ;;  %v5684_v24 = vld [vmem:[%s12791_s30 + $0x6d8] sm:$0xff]  ;;  %v5733_v27 = vld [vmem:[%s12791_s30 + $0x860] sm:$0x1f]  ;;  %v5625_v29 = vld [vmem:[%s12790_s23 + $0x50] sm:$0xff] }
  0x1d   :  { %5517 = vmatmul.msk.f32.vlgmr.msra.gmra.mxu0 %vm84_vm1, %v77_v19  ;;  %5525 = vmatmul.msk.f32.vlgmr.msra.gmra.mxu1 %vm84_vm1, %v77_v19  ;;  %v5732_v25 = vld [vmem:[%s12791_s30 + $0x858] sm:$0x1f]  ;;  %v5729_v28 = vld [vmem:[%s12791_s30 + $0x840] sm:$0xff]  ;;  %v5730_v30 = vld [vmem:[%s12791_s30 + $0x848] sm:$0xff] }
  0x1e   :  { %598 = vmatpush.msrb.mxu0 %v5690_v20  ;;  %674 = vmatpush.msrb.mxu2 %v5691_v21  ;;  %v78_v31 = vld [vmem:[%s12790_s23 + $0x8] sm:$0xff]  ;;  %v5681_v32 = vld [vmem:[%s12791_s30 + $0x6c0] sm:$0xff]  ;;  %v5727_v35 = vld [vmem:[%s12791_s30 + $0x830] sm:$0xff] }
  0x1f   :  { %5735 = vmatpush.msk.msrb.mxu1 %vm588_vm2, %v5732_v25  ;;  %5743 = vmatpush.msk.msrb.mxu3 %vm588_vm2, %v5733_v27  ;;  %v5682_v33 = vld [vmem:[%s12791_s30 + $0x6c8] sm:$0xff]  ;;  %v5679_v37 = vld [vmem:[%s12791_s30 + $0x6b0] sm:$0xff]  ;;  %v5724_v39 = vld [vmem:[%s12791_s30 + $0x818] sm:$0xff] }
  0x20   :  { %599 = vmatpush.msrb.mxu0 %v5687_v22  ;;  %675 = vmatpush.msrb.mxu2 %v5688_v23  ;;  %v5726_v34 = vld [vmem:[%s12791_s30 + $0x828] sm:$0xff]  ;;  %v5723_v38 = vld [vmem:[%s12791_s30 + $0x810] sm:$0xff]  ;;  %v5676_v41 = vld [vmem:[%s12791_s30 + $0x698] sm:$0xff] }
  0x21   :  { %639 = vmatpush.msrb.mxu1 %v5729_v28  ;;  %715 = vmatpush.msrb.mxu3 %v5730_v30  ;;  %v5678_v36 = vld [vmem:[%s12791_s30 + $0x6a8] sm:$0xff]  ;;  %v5675_v40 = vld [vmem:[%s12791_s30 + $0x690] sm:$0xff]  ;;  %v5720_v42 = vld [vmem:[%s12791_s30 + $0x7f8] sm:$0xff] }
  0x22   :  { %600 = vmatpush.msrb.mxu0 %v5684_v24  ;;  %676 = vmatpush.msrb.mxu2 %v5685_v26  ;;  %v5721_v43 = vld [vmem:[%s12791_s30 + $0x800] sm:$0xff]  ;;  %v5626_v44 = vld [vmem:[%s12790_s23 + $0x58] sm:$0xff]  ;;  %v79_v45 = vld [vmem:[%s12790_s23 + $0x10] sm:$0xff] }
  0x23   :  { %5631 = vmatmul.msk.f32.gmra.mxu2 %vm84_vm1, %v5623_v17  ;;  %5639 = vmatmul.msk.f32.gmra.mxu3 %vm84_vm1, %v5623_v17  ;;  %v5672_v46 = vld [vmem:[%s12791_s30 + $0x678] sm:$0xff]  ;;  %v5673_v47 = vld [vmem:[%s12791_s30 + $0x680] sm:$0xff]  ;;  %v5718_v49 = vld [vmem:[%s12791_s30 + $0x7e8] sm:$0xff] }
  0x24   :  { %601 = vmatpush.msrb.mxu0 %v5681_v32  ;;  %677 = vmatpush.msrb.mxu2 %v5682_v33  ;;  %v5717_v48 = vld [vmem:[%s12791_s30 + $0x7e0] sm:$0xff]  ;;  %v5670_v51 = vld [vmem:[%s12791_s30 + $0x668] sm:$0xff]  ;;  %v5715_v53 = vld [vmem:[%s12791_s30 + $0x7d0] sm:$0xff] }
  0x25   :  { %5518 = vmatmul.msk.f32.gmra.mxu0 %vm84_vm1, %v78_v31  ;;  %5526 = vmatmul.msk.f32.gmra.mxu1 %vm84_vm1, %v78_v31  ;;  %v5669_v50 = vld [vmem:[%s12791_s30 + $0x660] sm:$0xff]  ;;  %v5714_v52 = vld [vmem:[%s12791_s30 + $0x7c8] sm:$0xff]  ;;  %v5667_v55 = vld [vmem:[%s12791_s30 + $0x650] sm:$0xff] }
  0x26   :  { %640 = vmatpush.msrb.mxu1 %v5726_v34  ;;  %716 = vmatpush.msrb.mxu3 %v5727_v35  ;;  %v5666_v54 = vld [vmem:[%s12791_s30 + $0x648] sm:$0xff]  ;;  %v5711_v56 = vld [vmem:[%s12791_s30 + $0x7b0] sm:$0xff]  ;;  %v5712_v57 = vld [vmem:[%s12791_s30 + $0x7b8] sm:$0xff] }
  0x27   :  { %602 = vmatpush.msrb.mxu0 %v5678_v36  ;;  %678 = vmatpush.msrb.mxu2 %v5679_v37  ;;  %v5627_v58 = vld [vmem:[%s12790_s23 + $0x60] sm:$0xff]  ;;  %v80_v59 = vld [vmem:[%s12790_s23 + $0x18] sm:$0xff]  ;;  %v5663_v60 = vld [vmem:[%s12791_s30 + $0x630] sm:$0xff] }
  0x28   :  { %641 = vmatpush.msrb.mxu1 %v5723_v38  ;;  %717 = vmatpush.msrb.mxu3 %v5724_v39  ;;  %v5664_v61 = vld [vmem:[%s12791_s30 + $0x638] sm:$0xff]  ;;  %v5709_v63 = vld [vmem:[%s12791_s30 + $0x7a0] sm:$0xff]  ;;  %v5706_v3 = vld [vmem:[%s12791_s30 + $0x788] sm:$0xff] }
  0x29   :  { %603 = vmatpush.msrb.mxu0 %v5675_v40  ;;  %679 = vmatpush.msrb.mxu2 %v5676_v41  ;;  %v5708_v62 = vld [vmem:[%s12791_s30 + $0x798] sm:$0xff]  ;;  %v5661_v1 = vld [vmem:[%s12791_s30 + $0x620] sm:$0xff]  ;;  %v5658_v5 = vld [vmem:[%s12791_s30 + $0x608] sm:$0xff] }
  0x2a   :  { %642 = vmatpush.msrb.mxu1 %v5720_v42  ;;  %718 = vmatpush.msrb.mxu3 %v5721_v43  ;;  %v5660_v0 = vld [vmem:[%s12791_s30 + $0x618] sm:$0xff]  ;;  %v5705_v2 = vld [vmem:[%s12791_s30 + $0x780] sm:$0xff]  ;;  %v5702_v6 = vld [vmem:[%s12791_s30 + $0x768] sm:$0xff] }
  0x2b   :  { %5632 = vmatmul.msk.f32.gmra.mxu2 %vm84_vm1, %v5624_v18  ;;  %5640 = vmatmul.msk.f32.gmra.mxu3 %vm84_vm1, %v5624_v18  ;;  %v5657_v4 = vld [vmem:[%s12791_s30 + $0x600] sm:$0xff]  ;;  %v5703_v7 = vld [vmem:[%s12791_s30 + $0x770] sm:$0xff]  ;;  %v5628_v8 = vld [vmem:[%s12790_s23 + $0x68] sm:$0xff] }
  0x2c   :  { %604 = vmatpush.msrb.mxu0 %v5672_v46  ;;  %680 = vmatpush.msrb.mxu2 %v5673_v47  ;;  %v81_v9 = vld [vmem:[%s12790_s23 + $0x20] sm:$0xff]  ;;  %v5654_v10 = vld [vmem:[%s12791_s30 + $0x5e8] sm:$0xff]  ;;  %v5655_v11 = vld [vmem:[%s12791_s30 + $0x5f0] sm:$0xff] }
  0x2d   :  { %5519 = vmatmul.msk.f32.gmra.mxu0 %vm84_vm1, %v79_v45  ;;  %5527 = vmatmul.msk.f32.gmra.mxu1 %vm84_vm1, %v79_v45  ;;  %v5699_v12 = vld [vmem:[%s12791_s30 + $0x750] sm:$0xff]  ;;  %v5700_v13 = vld [vmem:[%s12791_s30 + $0x758] sm:$0xff]  ;;  %v5697_v17 = vld [vmem:[%s12791_s30 + $0x740] sm:$0xff] }
  0x2e   :  { %643 = vmatpush.msrb.mxu1 %v5717_v48  ;;  %719 = vmatpush.msrb.mxu3 %v5718_v49  ;;  %v5651_v14 = vld [vmem:[%s12791_s30 + $0x5d0] sm:$0xff]  ;;  %v5652_v15 = vld [vmem:[%s12791_s30 + $0x5d8] sm:$0xff]  ;;  %v5649_v19 = vld [vmem:[%s12791_s30 + $0x5c0] sm:$0xff] }
  0x2f   :  { %605 = vmatpush.msrb.mxu0 %v5669_v50  ;;  %681 = vmatpush.msrb.mxu2 %v5670_v51  ;;  %v5696_v16 = vld [vmem:[%s12791_s30 + $0x738] sm:$0xff]  ;;  %v82_v20 = vld [vmem:[%s12790_s23 + $0x28] sm:$0xff]  ;;  %v83_v21 = vld [vmem:[%s12790_s23 + $0x30] sm:$0xff] }
  0x30   :  { %644 = vmatpush.msrb.mxu1 %v5714_v52  ;;  %720 = vmatpush.msrb.mxu3 %v5715_v53  ;;  %v5648_v18 = vld [vmem:[%s12791_s30 + $0x5b8] sm:$0xff]  ;;  %v5645_v22 = vld [vmem:[%s12791_s30 + $0x5a0] sm:$0xff]  ;;  %v5646_v24 = vld [vmem:[%s12791_s30 + $0x5a8] sm:$0xff] }
  0x31   :  { %606 = vmatpush.msrb.mxu0 %v5666_v54  ;;  %682 = vmatpush.msrb.mxu2 %v5667_v55  ;;  %v5693_v23 = vld [vmem:[%s12791_s30 + $0x720] sm:$0xff]  ;;  %v5694_v25 = vld [vmem:[%s12791_s30 + $0x728] sm:$0xff]  ;;  %v5692_v26 = vld [vmem:[%s12791_s30 + $0x718] sm:$0xff] }
  0x32   :  { %645 = vmatpush.msrb.mxu1 %v5711_v56  ;;  %721 = vmatpush.msrb.mxu3 %v5712_v57  ;;  %v5804_v27 = vld [vmem:[%s12791_s30 + $0x9d8] sm:$0xff]  ;;  %v5689_v28 = vld [vmem:[%s12791_s30 + $0x700] sm:$0xff]  ;;  %v5734_v30 = vld [vmem:[%s12791_s30 + $0x868] sm:$0x1f] }
  0x33   :  { %5633 = vmatmul.msk.f32.gmra.mxu2 %vm84_vm1, %v5625_v29  ;;  %5641 = vmatmul.msk.f32.gmra.mxu3 %vm84_vm1, %v5625_v29  ;;  %v5801_v29 = vld [vmem:[%s12791_s30 + $0x9c0] sm:$0xff]  ;;  %v5686_v31 = vld [vmem:[%s12791_s30 + $0x6e8] sm:$0xff]  ;;  %v5683_v36 = vld [vmem:[%s12791_s30 + $0x6d0] sm:$0xff] }
  0x34   :  { %607 = vmatpush.msrb.mxu0 %v5663_v60  ;;  %683 = vmatpush.msrb.mxu2 %v5664_v61  ;;  %v5798_v32 = vld [vmem:[%s12791_s30 + $0x9a8] sm:$0xff]  ;;  %v5731_v37 = vld [vmem:[%s12791_s30 + $0x850] sm:$0xff]  ;;  %v5680_v40 = vld [vmem:[%s12791_s30 + $0x6b8] sm:$0xff] }
  0x35   :  { %5520 = vmatmul.msk.f32.gmra.mxu0 %vm84_vm1, %v80_v59  ;;  %5528 = vmatmul.msk.f32.gmra.mxu1 %vm84_vm1, %v80_v59  ;;  %v5846_v33 = vld [vmem:[%s12791_s30 + $0xb28] sm:$0x1f]  ;;  %v5795_v38 = vld [vmem:[%s12791_s30 + $0x990] sm:$0xff]  ;;  %v5728_v41 = vld [vmem:[%s12791_s30 + $0x838] sm:$0xff] }
  0x36   :  { %646 = vmatpush.msrb.mxu1 %v5708_v62  ;;  %722 = vmatpush.msrb.mxu3 %v5709_v63  ;;  %v5843_v39 = vld [vmem:[%s12791_s30 + $0xb10] sm:$0xff]  ;;  %v5792_v42 = vld [vmem:[%s12791_s30 + $0x978] sm:$0xff]  ;;  %v5725_v45 = vld [vmem:[%s12791_s30 + $0x820] sm:$0xff] }
  0x37   :  { %608 = vmatpush.msrb.mxu0 %v5660_v0  ;;  %684 = vmatpush.msrb.mxu2 %v5661_v1  ;;  %v5840_v43 = vld [vmem:[%s12791_s30 + $0xaf8] sm:$0xff]  ;;  %v5789_v46 = vld [vmem:[%s12791_s30 + $0x960] sm:$0xff]  ;;  %v5674_v50 = vld [vmem:[%s12791_s30 + $0x688] sm:$0xff] }
  0x38   :  { %647 = vmatpush.msrb.mxu1 %v5705_v2  ;;  %723 = vmatpush.msrb.mxu3 %v5706_v3  ;;  %v5837_v47 = vld [vmem:[%s12791_s30 + $0xae0] sm:$0xff]  ;;  %v5722_v51 = vld [vmem:[%s12791_s30 + $0x808] sm:$0xff]  ;;  %v5671_v54 = vld [vmem:[%s12791_s30 + $0x670] sm:$0xff] }
  0x39   :  { %609 = vmatpush.msrb.mxu0 %v5657_v4  ;;  %685 = vmatpush.msrb.mxu2 %v5658_v5  ;;  %v5786_v52 = vld [vmem:[%s12791_s30 + $0x948] sm:$0xff]  ;;  %v5719_v55 = vld [vmem:[%s12791_s30 + $0x7f0] sm:$0xff]  ;;  %v5716_v59 = vld [vmem:[%s12791_s30 + $0x7d8] sm:$0xff] }
  0x3a   :  { %648 = vmatpush.msrb.mxu1 %v5702_v6  ;;  %724 = vmatpush.msrb.mxu3 %v5703_v7  ;;  %v5834_v53 = vld [vmem:[%s12791_s30 + $0xac8] sm:$0xff]  ;;  %v5783_v56 = vld [vmem:[%s12791_s30 + $0x930] sm:$0xff]  ;;  %v5780_v60 = vld [vmem:[%s12791_s30 + $0x918] sm:$0xff] }
  0x3b   :  { %5634 = vmatmul.msk.f32.gmra.mxu2 %vm84_vm1, %v5626_v44  ;;  %5642 = vmatmul.msk.f32.gmra.mxu3 %vm84_vm1, %v5626_v44  ;;  %v5677_v44 = vld [vmem:[%s12791_s30 + $0x6a0] sm:$0xff]  ;;  %v5831_v57 = vld [vmem:[%s12791_s30 + $0xab0] sm:$0xff]  ;;  %v5828_v61 = vld [vmem:[%s12791_s30 + $0xa98] sm:$0xff] }
  0x3c   :  { %610 = vmatpush.msrb.mxu0 %v5654_v10  ;;  %686 = vmatpush.msrb.mxu2 %v5655_v11  ;;  %v5665_v0 = vld [vmem:[%s12791_s30 + $0x640] sm:$0xff]  ;;  %v5662_v4 = vld [vmem:[%s12791_s30 + $0x628] sm:$0xff]  ;;  %v5771_v10 = vld [vmem:[%s12791_s30 + $0x8d0] sm:$0xff] }
  0x3d   :  { %5521 = vmatmul.msk.f32.gmra.mxu0 %vm84_vm1, %v81_v9  ;;  %5529 = vmatmul.msk.f32.gmra.mxu1 %vm84_vm1, %v81_v9  ;;  %v5713_v1 = vld [vmem:[%s12791_s30 + $0x7c0] sm:$0xff]  ;;  %v5710_v5 = vld [vmem:[%s12791_s30 + $0x7a8] sm:$0xff]  ;;  %v5707_v9 = vld [vmem:[%s12791_s30 + $0x790] sm:$0xff] }
  0x3e   :  { %649 = vmatpush.msrb.mxu1 %v5699_v12  ;;  %725 = vmatpush.msrb.mxu3 %v5700_v13  ;;  %v5777_v2 = vld [vmem:[%s12791_s30 + $0x900] sm:$0xff]  ;;  %v5774_v6 = vld [vmem:[%s12791_s30 + $0x8e8] sm:$0xff]  ;;  %v5819_v11 = vld [vmem:[%s12791_s30 + $0xa50] sm:$0xff] }
  0x3f   :  { %611 = vmatpush.msrb.mxu0 %v5651_v14  ;;  %687 = vmatpush.msrb.mxu2 %v5652_v15  ;;  %v5825_v3 = vld [vmem:[%s12791_s30 + $0xa80] sm:$0xff]  ;;  %v5822_v7 = vld [vmem:[%s12791_s30 + $0xa68] sm:$0xff]  ;;  %v5656_v14 = vld [vmem:[%s12791_s30 + $0x5f8] sm:$0xff] }
  0x40   :  { %650 = vmatpush.msrb.mxu1 %v5696_v16  ;;  %726 = vmatpush.msrb.mxu3 %v5697_v17  ;;  %v5704_v15 = vld [vmem:[%s12791_s30 + $0x778] sm:$0xff] }
  0x41   :  { %612 = vmatpush.msrb.mxu0 %v5648_v18  ;;  %688 = vmatpush.msrb.mxu2 %v5649_v19  ;;  %v5768_v16 = vld [vmem:[%s12791_s30 + $0x8b8] sm:$0xff]  ;;  %v5653_v18 = vld [vmem:[%s12791_s30 + $0x5e0] sm:$0xff] }
  0x42   :  { %651 = vmatpush.msrb.mxu1 %v5693_v23  ;;  %727 = vmatpush.msrb.mxu3 %v5694_v25  ;;  %v5816_v17 = vld [vmem:[%s12791_s30 + $0xa38] sm:$0xff]  ;;  %v5701_v19 = vld [vmem:[%s12791_s30 + $0x760] sm:$0xff]  ;;  %v5698_v23 = vld [vmem:[%s12791_s30 + $0x748] sm:$0xff] }
  0x43   :  { %5635 = vmatmul.msk.f32.gmra.mxu2 %vm84_vm1, %v5627_v58  ;;  %5643 = vmatmul.msk.f32.gmra.mxu3 %vm84_vm1, %v5627_v58  ;;  %v5668_v58 = vld [vmem:[%s12791_s30 + $0x658] sm:$0xff]  ;;  %v5810_v25 = vld [vmem:[%s12791_s30 + $0xa08] sm:$0xff] }
  0x44   :  { %613 = vmatpush.msrb.mxu0 %v5645_v22  ;;  %689 = vmatpush.msrb.mxu2 %v5646_v24  ;;  %v5650_v22 = vld [vmem:[%s12791_s30 + $0x5c8] sm:$0xff] }
  0x45   :  { %5522 = vmatmul.msk.f32.gmra.mxu0 %vm84_vm1, %v82_v20  ;;  %5530 = vmatmul.msk.f32.gmra.mxu1 %vm84_vm1, %v82_v20  ;;  %v5765_v20 = vld [vmem:[%s12791_s30 + $0x8a0] sm:$0xff]  ;;  %v5762_v24 = vld [vmem:[%s12791_s30 + $0x888] sm:$0xff] }
  0x46   :  { %750 = vmatpush.msra.mxu0 %v5692_v26  ;;  %926 = vmatpush.msra.mxu2 %v5804_v27 }
  0x47   :  { %5751 = vmatpush.msk.msra.mxu1 %vm588_vm2, %v5734_v30  ;;  %5849 = vmatpush.msk.msra.mxu3 %vm588_vm2, %v5846_v33  ;;  %v5759_v30 = vld [vmem:[%s12791_s30 + $0x870] sm:$0xff] }
  0x48   :  { %751 = vmatpush.msra.mxu0 %v5689_v28  ;;  %927 = vmatpush.msra.mxu2 %v5801_v29  ;;  %v5647_v28 = vld [vmem:[%s12791_s30 + $0x5b0] sm:$0xff] }
  0x49   :  { %791 = vmatpush.msra.mxu1 %v5731_v37  ;;  %967 = vmatpush.msra.mxu3 %v5843_v39  ;;  %v5695_v29 = vld [vmem:[%s12791_s30 + $0x730] sm:$0xff]  ;;  %v5806_v39 = vld [vmem:[%s12791_s30 + $0x9e8] sm:$0xff] }
  0x4a   :  { %752 = vmatpush.msra.mxu0 %v5686_v31  ;;  %928 = vmatpush.msra.mxu2 %v5798_v32  ;;  %v5807_v31 = vld [vmem:[%s12791_s30 + $0x9f0] sm:$0xff] }
  0x4b   :  { %5636 = vmatmul.msk.f32.gmra.mxu2 %vm84_vm1, %v5628_v8  ;;  %5644 = vmatmul.msk.f32.gmra.mxu3 %vm84_vm1, %v5628_v8  ;;  %v5659_v8 = vld [vmem:[%s12791_s30 + $0x610] sm:$0xff] }
  0x4c   :  { %753 = vmatpush.msra.mxu0 %v5683_v36  ;;  %929 = vmatpush.msra.mxu2 %v5795_v38  ;;  %v5805_v38 = vld [vmem:[%s12791_s30 + $0x9e0] sm:$0xff] }
  0x4d   :  { %5523 = vmatmul.msk.f32.gmra.mxu0 %vm84_vm1, %v83_v21  ;;  %5531 = vmatmul.msk.f32.gmra.mxu1 %vm84_vm1, %v83_v21  ;;  %v5813_v21 = vld [vmem:[%s12791_s30 + $0xa20] sm:$0xff] }
  0x4e   :  { %754 = vmatpush.msra.mxu0 %v5680_v40  ;;  %792 = vmatpush.msra.mxu1 %v5728_v41  ;;  %v5802_v40 = vld [vmem:[%s12791_s30 + $0x9c8] sm:$0xff]  ;;  %v5803_v41 = vld [vmem:[%s12791_s30 + $0x9d0] sm:$0xff] }
  0x4f   :  { %930 = vmatpush.msra.mxu2 %v5792_v42  ;;  %968 = vmatpush.msra.mxu3 %v5840_v43  ;;  %v5847_v42 = vld [vmem:[%s12791_s30 + $0xb30] sm:$0x1f] }
  0x50   :  { %755 = vmatpush.msra.mxu0 %v5677_v44  ;;  %793 = vmatpush.msra.mxu1 %v5725_v45  ;;  %v5799_v43 = vld [vmem:[%s12791_s30 + $0x9b0] sm:$0xff]  ;;  %v5800_v44 = vld [vmem:[%s12791_s30 + $0x9b8] sm:$0xff] }
  0x51   :  { %931 = vmatpush.msra.mxu2 %v5789_v46  ;;  %969 = vmatpush.msra.mxu3 %v5837_v47  ;;  %v5848_v45 = vld [vmem:[%s12791_s30 + $0xb38] sm:$0x1f]  ;;  %v5845_v47 = vld [vmem:[%s12791_s30 + $0xb20] sm:$0xff] }
  0x52   :  { %756 = vmatpush.msra.mxu0 %v5674_v50  ;;  %794 = vmatpush.msra.mxu1 %v5722_v51  ;;  %v5844_v46 = vld [vmem:[%s12791_s30 + $0xb18] sm:$0xff] }
  0x53   :  { %932 = vmatpush.msra.mxu2 %v5786_v52  ;;  %970 = vmatpush.msra.mxu3 %v5834_v53  ;;  %v5796_v52 = vld [vmem:[%s12791_s30 + $0x998] sm:$0xff]  ;;  %v5797_v53 = vld [vmem:[%s12791_s30 + $0x9a0] sm:$0xff] }
  0x54   :  { %757 = vmatpush.msra.mxu0 %v5671_v54  ;;  %795 = vmatpush.msra.mxu1 %v5719_v55  ;;  %v5793_v54 = vld [vmem:[%s12791_s30 + $0x980] sm:$0xff] }
  0x55   :  { %933 = vmatpush.msra.mxu2 %v5783_v56  ;;  %971 = vmatpush.msra.mxu3 %v5831_v57  ;;  %v5841_v55 = vld [vmem:[%s12791_s30 + $0xb00] sm:$0xff]  ;;  %v5794_v56 = vld [vmem:[%s12791_s30 + $0x988] sm:$0xff] }
  0x56   :  { %758 = vmatpush.msra.mxu0 %v5668_v58  ;;  %796 = vmatpush.msra.mxu1 %v5716_v59  ;;  %v5842_v57 = vld [vmem:[%s12791_s30 + $0xb08] sm:$0xff] }
  0x57   :  { %934 = vmatpush.msra.mxu2 %v5780_v60  ;;  %972 = vmatpush.msra.mxu3 %v5828_v61  ;;  %v5838_v58 = vld [vmem:[%s12791_s30 + $0xae8] sm:$0xff]  ;;  %v5791_v60 = vld [vmem:[%s12791_s30 + $0x970] sm:$0xff] }
  0x58   :  { %759 = vmatpush.msra.mxu0 %v5665_v0  ;;  %797 = vmatpush.msra.mxu1 %v5713_v1  ;;  %v5790_v59 = vld [vmem:[%s12791_s30 + $0x968] sm:$0xff]  ;;  %v5839_v61 = vld [vmem:[%s12791_s30 + $0xaf0] sm:$0xff]  ;;  %v5836_v1 = vld [vmem:[%s12791_s30 + $0xad8] sm:$0xff] }
  0x59   :  { %935 = vmatpush.msra.mxu2 %v5777_v2  ;;  %973 = vmatpush.msra.mxu3 %v5825_v3  ;;  %v5835_v0 = vld [vmem:[%s12791_s30 + $0xad0] sm:$0xff]  ;;  %v5788_v3 = vld [vmem:[%s12791_s30 + $0x958] sm:$0xff] }
  0x5a   :  { %760 = vmatpush.msra.mxu0 %v5662_v4  ;;  %798 = vmatpush.msra.mxu1 %v5710_v5  ;;  %v5787_v2 = vld [vmem:[%s12791_s30 + $0x950] sm:$0xff]  ;;  %v5832_v4 = vld [vmem:[%s12791_s30 + $0xab8] sm:$0xff]  ;;  %v5833_v5 = vld [vmem:[%s12791_s30 + $0xac0] sm:$0xff] }
  0x5b   :  { %936 = vmatpush.msra.mxu2 %v5774_v6  ;;  %974 = vmatpush.msra.mxu3 %v5822_v7 }
  0x5c   :  { %761 = vmatpush.msra.mxu0 %v5659_v8  ;;  %799 = vmatpush.msra.mxu1 %v5707_v9  ;;  %v5784_v8 = vld [vmem:[%s12791_s30 + $0x938] sm:$0xff]  ;;  %v5785_v9 = vld [vmem:[%s12791_s30 + $0x940] sm:$0xff] }
  0x5d   :  { %937 = vmatpush.msra.mxu2 %v5771_v10  ;;  %975 = vmatpush.msra.mxu3 %v5819_v11  ;;  %v5829_v10 = vld [vmem:[%s12791_s30 + $0xaa0] sm:$0xff]  ;;  %v5830_v11 = vld [vmem:[%s12791_s30 + $0xaa8] sm:$0xff] }
  0x5e   :  { %762 = vmatpush.msra.mxu0 %v5656_v14  ;;  %800 = vmatpush.msra.mxu1 %v5704_v15  ;;  %v5781_v14 = vld [vmem:[%s12791_s30 + $0x920] sm:$0xff]  ;;  %v5782_v15 = vld [vmem:[%s12791_s30 + $0x928] sm:$0xff] }
  0x5f   :  { %938 = vmatpush.msra.mxu2 %v5768_v16  ;;  %976 = vmatpush.msra.mxu3 %v5816_v17  ;;  %v5826_v16 = vld [vmem:[%s12791_s30 + $0xa88] sm:$0xff]  ;;  %v5827_v17 = vld [vmem:[%s12791_s30 + $0xa90] sm:$0xff] }
  0x60   :  { %763 = vmatpush.msra.mxu0 %v5653_v18  ;;  %801 = vmatpush.msra.mxu1 %v5701_v19  ;;  %v5778_v18 = vld [vmem:[%s12791_s30 + $0x908] sm:$0xff]  ;;  %v5779_v19 = vld [vmem:[%s12791_s30 + $0x910] sm:$0xff] }
  0x61   :  { %939 = vmatpush.msra.mxu2 %v5765_v20  ;;  %977 = vmatpush.msra.mxu3 %v5813_v21  ;;  %v5823_v20 = vld [vmem:[%s12791_s30 + $0xa70] sm:$0xff]  ;;  %v5824_v21 = vld [vmem:[%s12791_s30 + $0xa78] sm:$0xff] }
  0x62   :  { %764 = vmatpush.msra.mxu0 %v5650_v22  ;;  %802 = vmatpush.msra.mxu1 %v5698_v23  ;;  %v5775_v22 = vld [vmem:[%s12791_s30 + $0x8f0] sm:$0xff]  ;;  %v5776_v23 = vld [vmem:[%s12791_s30 + $0x8f8] sm:$0xff] }
  0x63   :  { %940 = vmatpush.msra.mxu2 %v5762_v24  ;;  %978 = vmatpush.msra.mxu3 %v5810_v25  ;;  %v5820_v24 = vld [vmem:[%s12791_s30 + $0xa58] sm:$0xff]  ;;  %v5821_v25 = vld [vmem:[%s12791_s30 + $0xa60] sm:$0xff] }
  0x64   :  { %765 = vmatpush.msra.mxu0 %v5647_v28  ;;  %803 = vmatpush.msra.mxu1 %v5695_v29 }
  0x65   :  { %941 = vmatpush.msra.mxu2 %v5759_v30  ;;  %979 = vmatpush.msra.mxu3 %v5807_v31  ;;  %v5772_v30 = vld [vmem:[%s12791_s30 + $0x8d8] sm:$0xff]  ;;  %v5773_v31 = vld [vmem:[%s12791_s30 + $0x8e0] sm:$0xff] }
  0x9a   :  { %v7627_v50 = vpop.f32.mrf.mxu0  ;;  %v7629_v51 = vpop.f32.mrf.mxu1 }
  0x9e   :  { %v7369_v34 = vpop.f32.mrf.mxu2  ;;  %v7371_v35 = vpop.f32.mrf.mxu3 }
  0x9f   :  { %614 = vmatmul.f32.vlgmr.msrb.gmra.mxu0 %v7369_v34  ;;  %5736 = vmatmul.msk.f32.vlgmr.msrb.gmra.mxu1 %vm566_vm3, %v7371_v35 }
  0xa0   :  { %690 = vmatmul.f32.vlgmr.msrb.gmra.mxu2 %v7369_v34  ;;  %5744 = vmatmul.msk.f32.vlgmr.msrb.gmra.mxu3 %vm566_vm3, %v7371_v35 }
  0xa1   :  { %1002 = vmatpush.msrb.mxu0 %v5805_v38  ;;  %1078 = vmatpush.msrb.mxu2 %v5806_v39  ;;  %v5817_v38 = vld [vmem:[%s12791_s30 + $0xa40] sm:$0xff]  ;;  %v5818_v39 = vld [vmem:[%s12791_s30 + $0xa48] sm:$0xff] }
  0xa2   :  { %5857 = vmatpush.msk.msrb.mxu1 %vm588_vm2, %v5847_v42  ;;  %5865 = vmatpush.msk.msrb.mxu3 %vm588_vm2, %v5848_v45  ;;  %v7691_v6 = vpop.f32.mrf.mxu0  ;;  %v7693_v7 = vpop.f32.mrf.mxu1  ;;  %v5814_v42 = vld [vmem:[%s12791_s30 + $0xa28] sm:$0xff]  ;;  %v5767_v45 = vld [vmem:[%s12791_s30 + $0x8b0] sm:$0xff] }
  0xa3   :  { %1003 = vmatpush.msrb.mxu0 %v5802_v40  ;;  %1079 = vmatpush.msrb.mxu2 %v5803_v41  ;;  %v5769_v40 = vld [vmem:[%s12791_s30 + $0x8c0] sm:$0xff]  ;;  %v5770_v41 = vld [vmem:[%s12791_s30 + $0x8c8] sm:$0xff] }
  0xa4   :  { %1043 = vmatpush.msrb.mxu1 %v5844_v46  ;;  %1119 = vmatpush.msrb.mxu3 %v5845_v47  ;;  %v5811_v46 = vld [vmem:[%s12791_s30 + $0xa10] sm:$0xff]  ;;  %v5812_v47 = vld [vmem:[%s12791_s30 + $0xa18] sm:$0xff] }
  0xa5   :  { %1004 = vmatpush.msrb.mxu0 %v5799_v43  ;;  %1080 = vmatpush.msrb.mxu2 %v5800_v44  ;;  %v5815_v43 = vld [vmem:[%s12791_s30 + $0xa30] sm:$0xff]  ;;  %v5766_v44 = vld [vmem:[%s12791_s30 + $0x8a8] sm:$0xff] }
  0xa6   :  { %v7415_v48 = vpop.f32.mrf.mxu2  ;;  %v7417_v49 = vpop.f32.mrf.mxu3  ;;  %1044 = vmatpush.msrb.mxu1 %v5841_v55  ;;  %1120 = vmatpush.msrb.mxu3 %v5842_v57  ;;  %v5809_v55 = vld [vmem:[%s12791_s30 + $0xa00] sm:$0xff] }
  0xa7   :  { %617 = vmatmul.f32.gmra.mxu0 %v7415_v48  ;;  %5737 = vmatmul.msk.f32.gmra.mxu1 %vm566_vm3, %v7417_v49 }
  0xa8   :  { %693 = vmatmul.f32.gmra.mxu2 %v7415_v48  ;;  %5745 = vmatmul.msk.f32.gmra.mxu3 %vm566_vm3, %v7417_v49 }
  0xa9   :  { %1005 = vmatpush.msrb.mxu0 %v5796_v52  ;;  %1081 = vmatpush.msrb.mxu2 %v5797_v53  ;;  %v5763_v52 = vld [vmem:[%s12791_s30 + $0x890] sm:$0xff]  ;;  %v5764_v53 = vld [vmem:[%s12791_s30 + $0x898] sm:$0xff] }
  0xaa   :  { %1045 = vmatpush.msrb.mxu1 %v5838_v58  ;;  %1121 = vmatpush.msrb.mxu3 %v5839_v61  ;;  %v7749_v28 = vpop.f32.mrf.mxu0  ;;  %v7751_v29 = vpop.f32.mrf.mxu1  ;;  %v5760_v58 = vld [vmem:[%s12791_s30 + $0x878] sm:$0xff] }
  0xab   :  { %1006 = vmatpush.msrb.mxu0 %v5793_v54  ;;  %1082 = vmatpush.msrb.mxu2 %v5794_v56  ;;  %v5808_v54 = vld [vmem:[%s12791_s30 + $0x9f8] sm:$0xff] }
  0xac   :  { %1046 = vmatpush.msrb.mxu1 %v5835_v0  ;;  %1122 = vmatpush.msrb.mxu3 %v5836_v1 }
  0xad   :  { %1007 = vmatpush.msrb.mxu0 %v5790_v59  ;;  %1083 = vmatpush.msrb.mxu2 %v5791_v60  ;;  %v5761_v59 = vld [vmem:[%s12791_s30 + $0x880] sm:$0xff] }
  0xae   :  { %v7461_v62 = vpop.f32.mrf.mxu2  ;;  %v7463_v63 = vpop.f32.mrf.mxu3  ;;  %1047 = vmatpush.msrb.mxu1 %v5832_v4  ;;  %1123 = vmatpush.msrb.mxu3 %v5833_v5  ;;  %v231_v4 = vld [vmem:[%s12791_s30 + $0x150] sm:$0xff]  ;;  %v232_v5 = vld [vmem:[%s12791_s30 + $0x158] sm:$0xff] }
  0xaf   :  { %620 = vmatmul.f32.gmra.mxu0 %v7461_v62  ;;  %5738 = vmatmul.msk.f32.gmra.mxu1 %vm566_vm3, %v7463_v63 }
  0xb0   :  { %696 = vmatmul.f32.gmra.mxu2 %v7461_v62  ;;  %5746 = vmatmul.msk.f32.gmra.mxu3 %vm566_vm3, %v7463_v63 }
  0xb1   :  { %1008 = vmatpush.msrb.mxu0 %v5787_v2  ;;  %1084 = vmatpush.msrb.mxu2 %v5788_v3  ;;  %v234_v2 = vld [vmem:[%s12791_s30 + $0x168] sm:$0xff]  ;;  %v235_v3 = vld [vmem:[%s12791_s30 + $0x170] sm:$0xff] }
  0xb2   :  { %1048 = vmatpush.msrb.mxu1 %v5829_v10  ;;  %1124 = vmatpush.msrb.mxu3 %v5830_v11  ;;  %v7807_v56 = vpop.f32.mrf.mxu0  ;;  %v7809_v57 = vpop.f32.mrf.mxu1  ;;  %v229_v10 = vld [vmem:[%s12791_s30 + $0x140] sm:$0xff] }
  0xb3   :  { %1009 = vmatpush.msrb.mxu0 %v5784_v8  ;;  %1085 = vmatpush.msrb.mxu2 %v5785_v9  ;;  %v228_v8 = vld [vmem:[%s12791_s30 + $0x138] sm:$0xff]  ;;  %v277_v11 = vld [vmem:[%s12791_s30 + $0x2c0] sm:$0x1f] }
  0xb4   :  { %1049 = vmatpush.msrb.mxu1 %v5826_v16  ;;  %1125 = vmatpush.msrb.mxu3 %v5827_v17  ;;  %v276_v9 = vld [vmem:[%s12791_s30 + $0x2b8] sm:$0x1f]  ;;  %v226_v16 = vld [vmem:[%s12791_s30 + $0x128] sm:$0xff] }
  0xb5   :  { %1010 = vmatpush.msrb.mxu0 %v5781_v14  ;;  %1086 = vmatpush.msrb.mxu2 %v5782_v15  ;;  %v225_v14 = vld [vmem:[%s12791_s30 + $0x120] sm:$0xff]  ;;  %v274_v17 = vld [vmem:[%s12791_s30 + $0x2a8] sm:$0xff] }
  0xb6   :  { %v7507_v12 = vpop.f32.mrf.mxu2  ;;  %v7509_v13 = vpop.f32.mrf.mxu3  ;;  %1050 = vmatpush.msrb.mxu1 %v5823_v20  ;;  %1126 = vmatpush.msrb.mxu3 %v5824_v21  ;;  %v273_v15 = vld [vmem:[%s12791_s30 + $0x2a0] sm:$0xff]  ;;  %v223_v20 = vld [vmem:[%s12791_s30 + $0x110] sm:$0xff] }
  0xb7   :  { %623 = vmatmul.f32.gmra.mxu0 %v7507_v12  ;;  %5739 = vmatmul.msk.f32.gmra.mxu1 %vm566_vm3, %v7509_v13 }
  0xb8   :  { %699 = vmatmul.f32.gmra.mxu2 %v7507_v12  ;;  %5747 = vmatmul.msk.f32.gmra.mxu3 %vm566_vm3, %v7509_v13 }
  0xb9   :  { %1011 = vmatpush.msrb.mxu0 %v5778_v18  ;;  %1087 = vmatpush.msrb.mxu2 %v5779_v19  ;;  %v222_v18 = vld [vmem:[%s12791_s30 + $0x108] sm:$0xff] }
  0xba   :  { %1051 = vmatpush.msrb.mxu1 %v5820_v24  ;;  %1127 = vmatpush.msrb.mxu3 %v5821_v25  ;;  %v7823_v60 = vpop.f32.mrf.mxu0  ;;  %v7825_v61 = vpop.f32.mrf.mxu1  ;;  %v270_v19 = vld [vmem:[%s12791_s30 + $0x288] sm:$0xff]  ;;  %v220_v24 = vld [vmem:[%s12791_s30 + $0xf8] sm:$0xff] }
  0xbb   :  { %1012 = vmatpush.msrb.mxu0 %v5775_v22  ;;  %1088 = vmatpush.msrb.mxu2 %v5776_v23  ;;  %v219_v22 = vld [vmem:[%s12791_s30 + $0xf0] sm:$0xff]  ;;  %v268_v25 = vld [vmem:[%s12791_s30 + $0x278] sm:$0xff] }
  0xbc   :  { %1052 = vmatpush.msrb.mxu1 %v5817_v38  ;;  %1128 = vmatpush.msrb.mxu3 %v5818_v39  ;;  %v267_v23 = vld [vmem:[%s12791_s30 + $0x270] sm:$0xff]  ;;  %v217_v38 = vld [vmem:[%s12791_s30 + $0xe0] sm:$0xff] }
  0xbd   :  { %1013 = vmatpush.msrb.mxu0 %v5772_v30  ;;  %1089 = vmatpush.msrb.mxu2 %v5773_v31  ;;  %v216_v30 = vld [vmem:[%s12791_s30 + $0xd8] sm:$0xff]  ;;  %v265_v39 = vld [vmem:[%s12791_s30 + $0x260] sm:$0xff] }
  0xbe   :  { %v7553_v26 = vpop.f32.mrf.mxu2  ;;  %v7555_v27 = vpop.f32.mrf.mxu3  ;;  %1053 = vmatpush.msrb.mxu1 %v5814_v42  ;;  %1129 = vmatpush.msrb.mxu3 %v5815_v43  ;;  %v264_v31 = vld [vmem:[%s12791_s30 + $0x258] sm:$0xff]  ;;  %v214_v42 = vld [vmem:[%s12791_s30 + $0xc8] sm:$0xff] }
  0xbf   :  { %626 = vmatmul.f32.gmra.mxu0 %v7553_v26  ;;  %5740 = vmatmul.msk.f32.gmra.mxu1 %vm566_vm3, %v7555_v27  ;;  %v258_v43 = vld [vmem:[%s12791_s30 + $0x228] sm:$0xff] }
  0xc0   :  { %702 = vmatmul.f32.gmra.mxu2 %v7553_v26  ;;  %5748 = vmatmul.msk.f32.gmra.mxu3 %vm566_vm3, %v7555_v27 }
  0xc1   :  { %1014 = vmatpush.msrb.mxu0 %v5769_v40  ;;  %1090 = vmatpush.msrb.mxu2 %v5770_v41  ;;  %v213_v40 = vld [vmem:[%s12791_s30 + $0xc0] sm:$0xff] }
  0xc2   :  { %1054 = vmatpush.msrb.mxu1 %v5811_v46  ;;  %1130 = vmatpush.msrb.mxu3 %v5812_v47  ;;  %v7839_v0 = vpop.f32.mrf.mxu0  ;;  %v7841_v1 = vpop.f32.mrf.mxu1  ;;  %v261_v41 = vld [vmem:[%s12791_s30 + $0x240] sm:$0xff] }
  0xc3   :  { %1015 = vmatpush.msrb.mxu0 %v5766_v44  ;;  %1091 = vmatpush.msrb.mxu2 %v5767_v45  ;;  %v211_v44 = vld [vmem:[%s12791_s30 + $0xb0] sm:$0xff] }
  0xc4   :  { %1055 = vmatpush.msrb.mxu1 %v5808_v54  ;;  %1131 = vmatpush.msrb.mxu3 %v5809_v55  ;;  %v259_v45 = vld [vmem:[%s12791_s30 + $0x230] sm:$0xff]  ;;  %v208_v54 = vld [vmem:[%s12791_s30 + $0x98] sm:$0xff] }
  0xc5   :  { %1016 = vmatpush.msrb.mxu0 %v5763_v52  ;;  %1092 = vmatpush.msrb.mxu2 %v5764_v53  ;;  %v207_v52 = vld [vmem:[%s12791_s30 + $0x90] sm:$0xff]  ;;  %v256_v55 = vld [vmem:[%s12791_s30 + $0x218] sm:$0xff] }
  0xc6   :  { %v7575_v32 = vpop.f32.mrf.mxu2  ;;  %v7577_v33 = vpop.f32.mrf.mxu3  ;;  %v255_v53 = vld [vmem:[%s12791_s30 + $0x210] sm:$0xff] }
  0xc7   :  { %629 = vmatmul.f32.gmra.mxu0 %v7575_v32  ;;  %5741 = vmatmul.msk.f32.gmra.mxu1 %vm566_vm3, %v7577_v33 }
  0xc8   :  { %705 = vmatmul.f32.gmra.mxu2 %v7575_v32  ;;  %5749 = vmatmul.msk.f32.gmra.mxu3 %vm566_vm3, %v7577_v33 }
  0xc9   :  { %1017 = vmatpush.msrb.mxu0 %v5760_v58  ;;  %1093 = vmatpush.msrb.mxu2 %v5761_v59  ;;  %v204_v58 = vld [vmem:[%s12791_s30 + $0x78] sm:$0xff] }
  0xca   :  { %v7899_v21 = vpop.f32.mrf.mxu0  ;;  %v252_v59 = vld [vmem:[%s12791_s30 + $0x1f8] sm:$0xff] }
  0xce   :  { %v7585_v36 = vpop.f32.mrf.mxu2  ;;  %v7587_v37 = vpop.f32.mrf.mxu3 }
  0xcf   :  { %632 = vmatmul.f32.gmra.mxu0 %v7585_v36  ;;  %5742 = vmatmul.msk.f32.gmra.mxu1 %vm566_vm3, %v7587_v37 }
  0xd0   :  { %708 = vmatmul.f32.gmra.mxu2 %v7585_v36  ;;  %5750 = vmatmul.msk.f32.gmra.mxu3 %vm566_vm3, %v7587_v37 }
  0xd7   :  { %766 = vmatmul.f32.vlgmr.msra.gmra.mxu0 %v7369_v34  ;;  %5752 = vmatmul.msk.f32.vlgmr.msra.gmra.mxu1 %vm566_vm3, %v7371_v35 }
  0xd8   :  { %942 = vmatmul.f32.vlgmr.msra.gmra.mxu2 %v7369_v34  ;;  %5850 = vmatmul.msk.f32.vlgmr.msra.gmra.mxu3 %vm566_vm3, %v7371_v35 }
  0xd9   :  { %1184 = vmatpush.msra.mxu0 %v234_v2  ;;  %1260 = vmatpush.msra.mxu2 %v235_v3  ;;  %v205_v2 = vld [vmem:[%s12791_s30 + $0x80] sm:$0xff] }
  0xda   :  { %5873 = vmatpush.msk.msra.mxu1 %vm588_vm2, %v276_v9  ;;  %5881 = vmatpush.msk.msra.mxu3 %vm588_vm2, %v277_v11  ;;  %v249_v3 = vld [vmem:[%s12791_s30 + $0x1e0] sm:$0xff]  ;;  %v250_v9 = vld [vmem:[%s12791_s30 + $0x1e8] sm:$0xff] }
  0xdb   :  { %1185 = vmatpush.msra.mxu0 %v231_v4  ;;  %1261 = vmatpush.msra.mxu2 %v232_v5 }
  0xdc   :  { %1225 = vmatpush.msra.mxu1 %v273_v15  ;;  %1301 = vmatpush.msra.mxu3 %v274_v17  ;;  %v198_v15 = vld [vmem:[%s12791_s30 + $0x48] sm:$0xff]  ;;  %v199_v17 = vld [vmem:[%s12791_s30 + $0x50] sm:$0xff] }
  0xdd   :  { %1186 = vmatpush.msra.mxu0 %v228_v8  ;;  %1262 = vmatpush.msra.mxu2 %v229_v10  ;;  %v202_v8 = vld [vmem:[%s12791_s30 + $0x68] sm:$0xff] }
  0xde   :  { %1226 = vmatpush.msra.mxu1 %v270_v19  ;;  %v195_v19 = vld [vmem:[%s12791_s30 + $0x30] sm:$0xff] }
  0xdf   :  { %769 = vmatmul.f32.gmra.mxu0 %v7415_v48  ;;  %5753 = vmatmul.msk.f32.gmra.mxu1 %vm566_vm3, %v7417_v49 }
  0xe0   :  { %945 = vmatmul.f32.gmra.mxu2 %v7415_v48  ;;  %5851 = vmatmul.msk.f32.gmra.mxu3 %vm566_vm3, %v7417_v49 }
  0xe1   :  { %1187 = vmatpush.msra.mxu0 %v225_v14  ;;  %1263 = vmatpush.msra.mxu2 %v226_v16  ;;  %v246_v16 = vld [vmem:[%s12791_s30 + $0x1c8] sm:$0xff] }
  0xe2   :  { %1227 = vmatpush.msra.mxu1 %v267_v23 }
  0xe3   :  { %1188 = vmatpush.msra.mxu0 %v222_v18  ;;  %1264 = vmatpush.msra.mxu2 %v223_v20  ;;  %v247_v18 = vld [vmem:[%s12791_s30 + $0x1d0] sm:$0xff] }
  0xe4   :  { %1228 = vmatpush.msra.mxu1 %v264_v31  ;;  %v243_v20 = vld [vmem:[%s12791_s30 + $0x1b0] sm:$0xff] }
  0xe5   :  { %1189 = vmatpush.msra.mxu0 %v219_v22  ;;  %1265 = vmatpush.msra.mxu2 %v220_v24  ;;  %v240_v22 = vld [vmem:[%s12791_s30 + $0x198] sm:$0xff] }
  0xe6   :  { %1229 = vmatpush.msra.mxu1 %v261_v41  ;;  %v237_v41 = vld [vmem:[%s12791_s30 + $0x180] sm:$0xff] }
  0xe7   :  { %772 = vmatmul.f32.gmra.mxu0 %v7461_v62  ;;  %5754 = vmatmul.msk.f32.gmra.mxu1 %vm566_vm3, %v7463_v63 }
  0xe8   :  { %948 = vmatmul.f32.gmra.mxu2 %v7461_v62  ;;  %5852 = vmatmul.msk.f32.gmra.mxu3 %vm566_vm3, %v7463_v63 }
  0xe9   :  { %1190 = vmatpush.msra.mxu0 %v216_v30  ;;  %1266 = vmatpush.msra.mxu2 %v217_v38  ;;  %v241_v30 = vld [vmem:[%s12791_s30 + $0x1a0] sm:$0xff] }
  0xea   :  { %1230 = vmatpush.msra.mxu1 %v258_v43 }
  0xeb   :  { %1191 = vmatpush.msra.mxu0 %v213_v40  ;;  %1267 = vmatpush.msra.mxu2 %v214_v42  ;;  %v189_v40 = vld [vmem:[%s12791_s30] sm:$0xff]  ;;  %v190_v42 = vld [vmem:[%s12791_s30 + $0x8] sm:$0xff] }
  0xec   :  { %1231 = vmatpush.msra.mxu1 %v255_v53 }
  0xed   :  { %1268 = vmatpush.msra.mxu2 %v211_v44 }
  0xee   :  { %1232 = vmatpush.msra.mxu1 %v252_v59 }
  0xef   :  { %775 = vmatmul.f32.gmra.mxu0 %v7507_v12  ;;  %5755 = vmatmul.msk.f32.gmra.mxu1 %vm566_vm3, %v7509_v13 }
  0xf0   :  { %951 = vmatmul.f32.gmra.mxu2 %v7507_v12  ;;  %5853 = vmatmul.msk.f32.gmra.mxu3 %vm566_vm3, %v7509_v13 }
  0xf1   :  { %1269 = vmatpush.msra.mxu2 %v208_v54  ;;  %1233 = vmatpush.msra.mxu1 %v249_v3  ;;  %v230_v3 = vld [vmem:[%s12791_s30 + $0x148] sm:$0xff] }
  0xf3   :  { %1270 = vmatpush.msra.mxu2 %v205_v2  ;;  %1234 = vmatpush.msra.mxu1 %v246_v16  ;;  %v5568_v16 = vld [vmem:[%s12791_s30 + $0x3f0] sm:$0xff] }
  0xf5   :  { %1271 = vmatpush.msra.mxu2 %v202_v8  ;;  %1235 = vmatpush.msra.mxu1 %v243_v20  ;;  %v5619_v8 = vld [vmem:[%s12791_s30 + $0x588] sm:$0x1f]  ;;  %v5565_v20 = vld [vmem:[%s12791_s30 + $0x3d8] sm:$0xff] }
  0xf7   :  { %778 = vmatmul.f32.gmra.mxu0 %v7553_v26  ;;  %5756 = vmatmul.msk.f32.gmra.mxu1 %vm566_vm3, %v7555_v27 }
  0xf8   :  { %954 = vmatmul.f32.gmra.mxu2 %v7553_v26  ;;  %5854 = vmatmul.msk.f32.gmra.mxu3 %vm566_vm3, %v7555_v27 }
  0xf9   :  { %1272 = vmatpush.msra.mxu2 %v199_v17  ;;  %1236 = vmatpush.msra.mxu1 %v240_v22  ;;  %v5616_v17 = vld [vmem:[%s12791_s30 + $0x570] sm:$0xff] }
  0xfb   :  { %1237 = vmatpush.msra.mxu1 %v237_v41 }
  0xff   :  { %781 = vmatmul.f32.gmra.mxu0 %v7575_v32  ;;  %5757 = vmatmul.msk.f32.gmra.mxu1 %vm566_vm3, %v7577_v33 }
 0x100   :  { %957 = vmatmul.f32.gmra.mxu2 %v7575_v32  ;;  %5855 = vmatmul.msk.f32.gmra.mxu3 %vm566_vm3, %v7577_v33 }
 0x107   :  { %784 = vmatmul.f32.gmra.mxu0 %v7585_v36  ;;  %5758 = vmatmul.msk.f32.gmra.mxu1 %vm566_vm3, %v7587_v37 }
 0x108   :  { %960 = vmatmul.f32.gmra.mxu2 %v7585_v36  ;;  %5856 = vmatmul.msk.f32.gmra.mxu3 %vm566_vm3, %v7587_v37 }
 0x10f   :  { %1018 = vmatmul.f32.vlgmr.msrb.gmra.mxu0 %v7369_v34  ;;  %5858 = vmatmul.msk.f32.vlgmr.msrb.gmra.mxu1 %vm566_vm3, %v7371_v35 }
 0x110   :  { %1094 = vmatmul.f32.vlgmr.msrb.gmra.mxu2 %v7369_v34  ;;  %5866 = vmatmul.msk.f32.vlgmr.msrb.gmra.mxu3 %vm566_vm3, %v7371_v35  ;;  %v271_v34 = vld [vmem:[%s12791_s30 + $0x290] sm:$0xff]  ;;  %v7901_v35 = vpop.f32.mrf.mxu1 }
 0x111   :  { %1302 = vmatpush.msra.mxu3 %v271_v34  ;;  %v196_v34 = vld [vmem:[%s12791_s30 + $0x38] sm:$0xff] }
 0x112   :  { %1273 = vmatpush.msra.mxu2 %v196_v34  ;;  %v5613_v34 = vld [vmem:[%s12791_s30 + $0x558] sm:$0xff] }
 0x113   :  { %1303 = vmatpush.msra.mxu3 %v268_v25  ;;  %v193_v25 = vld [vmem:[%s12791_s30 + $0x20] sm:$0xff] }
 0x114   :  { %1274 = vmatpush.msra.mxu2 %v193_v25  ;;  %v5610_v25 = vld [vmem:[%s12791_s30 + $0x540] sm:$0xff] }
 0x115   :  { %1304 = vmatpush.msra.mxu3 %v265_v39 }
 0x116   :  { %1275 = vmatpush.msra.mxu2 %v190_v42  ;;  %v218_v42 = vld [vmem:[%s12791_s30 + $0xe8] sm:$0xff] }
 0x117   :  { %1021 = vmatmul.f32.gmra.mxu0 %v7415_v48  ;;  %5859 = vmatmul.msk.f32.gmra.mxu1 %vm566_vm3, %v7417_v49 }
 0x118   :  { %1097 = vmatmul.f32.gmra.mxu2 %v7415_v48  ;;  %5867 = vmatmul.msk.f32.gmra.mxu3 %vm566_vm3, %v7417_v49  ;;  %v262_v48 = vld [vmem:[%s12791_s30 + $0x248] sm:$0xff] }
 0x119   :  { %v210_v49 = vld [vmem:[%s12791_s30 + $0xa8] sm:$0xff]  ;;  %1305 = vmatpush.msra.mxu3 %v262_v48 }
 0x11a   :  { %1192 = vmatpush.msra.mxu0 %v210_v49  ;;  %v238_v48 = vld [vmem:[%s12791_s30 + $0x188] sm:$0xff] }
 0x11b   :  { %1306 = vmatpush.msra.mxu3 %v259_v45 }
 0x11c   :  { %v7957_v46 = vpop.f32.mrf.mxu0  ;;  %v7959_v47 = vpop.f32.mrf.mxu1  ;;  %1193 = vmatpush.msra.mxu0 %v207_v52 }
 0x11d   :  { %1307 = vmatpush.msra.mxu3 %v256_v55 }
 0x11e   :  { %1194 = vmatpush.msra.mxu0 %v204_v58  ;;  %v233_v58 = vld [vmem:[%s12791_s30 + $0x160] sm:$0xff] }
 0x11f   :  { %1024 = vmatmul.f32.gmra.mxu0 %v7461_v62  ;;  %5860 = vmatmul.msk.f32.gmra.mxu1 %vm566_vm3, %v7463_v63 }
 0x120   :  { %1100 = vmatmul.f32.gmra.mxu2 %v7461_v62  ;;  %5868 = vmatmul.msk.f32.gmra.mxu3 %vm566_vm3, %v7463_v63  ;;  %v253_v62 = vld [vmem:[%s12791_s30 + $0x200] sm:$0xff] }
 0x121   :  { %v201_v63 = vld [vmem:[%s12791_s30 + $0x60] sm:$0xff]  ;;  %1308 = vmatpush.msra.mxu3 %v253_v62 }
 0x122   :  { %1195 = vmatpush.msra.mxu0 %v201_v63 }
 0x123   :  { %v691_v4 = vpop.f32.mrf.mxu2  ;;  %v729_v5 = vpop.f32.mrf.mxu3  ;;  %1309 = vmatpush.msra.mxu3 %v250_v9  ;;  %v227_v9 = vld [vmem:[%s12791_s30 + $0x130] sm:$0xff] }
 0x124   :  { %v8003_v10 = vadd.f32 %v729_v5, %v691_v4  ;;  %v8005_v11 = vpop.f32.mrf.mxu0  ;;  %v8007_v14 = vpop.f32.mrf.mxu1  ;;  %1196 = vmatpush.msra.mxu0 %v198_v15  ;;  %v278_v4 = vld [vmem:[%s12791_s30 + $0x2c8] sm:$0x1f]  ;;  %v275_v15 = vld [vmem:[%s12791_s30 + $0x2b0] sm:$0xff] }
 0x125   :  { %1310 = vmatpush.msra.mxu3 %v247_v18  ;;  %v5571_v5 = vld [vmem:[%s12791_s30 + $0x408] sm:$0xff]  ;;  %5889 = vmatpush.msk.msrb.mxu1 %vm588_vm2, %v278_v4  ;;  %v224_v18 = vld [vmem:[%s12791_s30 + $0x118] sm:$0xff] }
 0x126   :  { %12792 = vst [vmem:[#allocation9_spill] sm:$0xff] %v8003_v10  ;;  %1197 = vmatpush.msra.mxu0 %v195_v19  ;;  %v272_v19 = vld [vmem:[%s12791_s30 + $0x298] sm:$0xff] }
 0x127   :  { %1027 = vmatmul.f32.gmra.mxu0 %v7507_v12  ;;  %5861 = vmatmul.msk.f32.gmra.mxu1 %vm566_vm3, %v7509_v13  ;;  %v5601_v4 = vld [vmem:[%s12791_s30 + $0x4f8] sm:$0xff] }
 0x128   :  { %1103 = vmatmul.f32.gmra.mxu2 %v7507_v12  ;;  %5869 = vmatmul.msk.f32.gmra.mxu3 %vm566_vm3, %v7509_v13  ;;  %v244_v12 = vld [vmem:[%s12791_s30 + $0x1b8] sm:$0xff] }
 0x129   :  { %v192_v13 = vld [vmem:[%s12791_s30 + $0x18] sm:$0xff]  ;;  %1311 = vmatpush.msra.mxu3 %v244_v12  ;;  %1377 = vmatpush.msrb.mxu1 %v275_v15  ;;  %v221_v12 = vld [vmem:[%s12791_s30 + $0x100] sm:$0xff] }
 0x12a   :  { %1198 = vmatpush.msra.mxu0 %v192_v13  ;;  %v269_v13 = vld [vmem:[%s12791_s30 + $0x280] sm:$0xff] }
 0x12b   :  { %v694_v23 = vpop.f32.mrf.mxu2  ;;  %v732_v24 = vpop.f32.mrf.mxu3  ;;  %1312 = vmatpush.msra.mxu3 %v241_v30  ;;  %1378 = vmatpush.msrb.mxu1 %v272_v19  ;;  %v209_v15 = vld [vmem:[%s12791_s30 + $0xa0] sm:$0xff]  ;;  %v206_v19 = vld [vmem:[%s12791_s30 + $0x88] sm:$0xff] }
 0x12c   :  { %v8051_v31 = vadd.f32 %v732_v24, %v694_v23  ;;  %v8053_v38 = vpop.f32.mrf.mxu0  ;;  %v8055_v39 = vpop.f32.mrf.mxu1  ;;  %1199 = vmatpush.msra.mxu0 %v189_v40  ;;  %v5562_v24 = vld [vmem:[%s12791_s30 + $0x3c0] sm:$0xff] }
 0x12d   :  { %1313 = vmatpush.msra.mxu3 %v238_v48  ;;  %1379 = vmatpush.msrb.mxu1 %v269_v13  ;;  %v266_v48 = vld [vmem:[%s12791_s30 + $0x268] sm:$0xff]  ;;  %v203_v13 = vld [vmem:[%s12791_s30 + $0x70] sm:$0xff] }
 0x12e   :  { %12793 = vst [vmem:[#allocation10_spill] sm:$0xff] %v8051_v31 }
 0x12f   :  { %1030 = vmatmul.f32.gmra.mxu0 %v7553_v26  ;;  %5862 = vmatmul.msk.f32.gmra.mxu1 %vm566_vm3, %v7555_v27 }
 0x130   :  { %1106 = vmatmul.f32.gmra.mxu2 %v7553_v26  ;;  %5870 = vmatmul.msk.f32.gmra.mxu3 %vm566_vm3, %v7555_v27 }
 0x131   :  { %5897 = vmatpush.msk.msrb.mxu3 %vm588_vm2, %v5619_v8  ;;  %1380 = vmatpush.msrb.mxu1 %v266_v48 }
 0x133   :  { %v697_v49 = vpop.f32.mrf.mxu2  ;;  %v735_v43 = vpop.f32.mrf.mxu3  ;;  %1462 = vmatpush.msrb.mxu3 %v5616_v17  ;;  %v5550_v17 = vld [vmem:[%s12791_s30 + $0x360] sm:$0xff] }
 0x134   :  { %v8075_v44 = vadd.f32 %v735_v43, %v697_v49  ;;  %v8077_v45 = vpop.f32.mrf.mxu0  ;;  %v8079_v52 = vpop.f32.mrf.mxu1  ;;  %v5559_v49 = vld [vmem:[%s12791_s30 + $0x3a8] sm:$0xff] }
 0x135   :  { %1463 = vmatpush.msrb.mxu3 %v5613_v34  ;;  %v5607_v43 = vld [vmem:[%s12791_s30 + $0x528] sm:$0xff] }
 0x136   :  { %12794 = vst [vmem:[#allocation11_spill] sm:$0xff] %v8075_v44  ;;  %v5547_v34 = vld [vmem:[%s12791_s30 + $0x348] sm:$0xff]  ;;  %v5546_v44 = vld [vmem:[%s12791_s30 + $0x340] sm:$0xff] }
 0x137   :  { %1033 = vmatmul.f32.gmra.mxu0 %v7575_v32  ;;  %5863 = vmatmul.msk.f32.gmra.mxu1 %vm566_vm3, %v7577_v33 }
 0x138   :  { %1109 = vmatmul.f32.gmra.mxu2 %v7575_v32  ;;  %5871 = vmatmul.msk.f32.gmra.mxu3 %vm566_vm3, %v7577_v33  ;;  %v236_v32 = vld [vmem:[%s12791_s30 + $0x178] sm:$0xff] }
 0x139   :  { %v5577_v33 = vld [vmem:[%s12791_s30 + $0x438] sm:$0xff]  ;;  %1336 = vmatpush.msrb.mxu0 %v236_v32  ;;  %1464 = vmatpush.msrb.mxu3 %v5610_v25  ;;  %v5556_v32 = vld [vmem:[%s12791_s30 + $0x390] sm:$0xff] }
 0x13a   :  { %1421 = vmatpush.msrb.mxu2 %v5577_v33  ;;  %v5604_v33 = vld [vmem:[%s12791_s30 + $0x510] sm:$0xff] }
 0x13b   :  { %v700_v26 = vpop.f32.mrf.mxu2  ;;  %v738_v27 = vpop.f32.mrf.mxu3  ;;  %1337 = vmatpush.msrb.mxu0 %v233_v58  ;;  %1465 = vmatpush.msrb.mxu3 %v5607_v43  ;;  %v212_v58 = vld [vmem:[%s12791_s30 + $0xb8] sm:$0xff]  ;;  %v5544_v25 = vld [vmem:[%s12791_s30 + $0x330] sm:$0xff] }
 0x13c   :  { %v8087_v53 = vadd.f32 %v738_v27, %v700_v26  ;;  %v8089_v54 = vpop.f32.mrf.mxu0  ;;  %v8091_v55 = vpop.f32.mrf.mxu1  ;;  %v215_v26 = vld [vmem:[%s12791_s30 + $0xd0] sm:$0xff] }
 0x13d   :  { %1338 = vmatpush.msrb.mxu0 %v230_v3  ;;  %v263_v27 = vld [vmem:[%s12791_s30 + $0x250] sm:$0xff]  ;;  %v5553_v3 = vld [vmem:[%s12791_s30 + $0x378] sm:$0xff]  ;;  %1466 = vmatpush.msrb.mxu3 %v5604_v33 }
 0x13e   :  { %12795 = vst [vmem:[#allocation12_spill] sm:$0xff] %v8087_v53  ;;  %1381 = vmatpush.msrb.mxu1 %v263_v27  ;;  %v248_v27 = vld [vmem:[%s12791_s30 + $0x1d8] sm:$0xff] }
 0x13f   :  { %1036 = vmatmul.f32.gmra.mxu0 %v7585_v36  ;;  %5864 = vmatmul.msk.f32.gmra.mxu1 %vm566_vm3, %v7587_v37  ;;  %v5589_v33 = vld [vmem:[%s12791_s30 + $0x498] sm:$0xff] }
 0x140   :  { %1112 = vmatmul.f32.gmra.mxu2 %v7585_v36  ;;  %5872 = vmatmul.msk.f32.gmra.mxu3 %vm566_vm3, %v7587_v37  ;;  %v5574_v36 = vld [vmem:[%s12791_s30 + $0x420] sm:$0xff] }
 0x141   :  { %1422 = vmatpush.msrb.mxu2 %v5574_v36  ;;  %1339 = vmatpush.msrb.mxu0 %v227_v9  ;;  %v260_v36 = vld [vmem:[%s12791_s30 + $0x238] sm:$0xff] }
 0x142   :  { %1382 = vmatpush.msrb.mxu1 %v260_v36  ;;  %1467 = vmatpush.msrb.mxu3 %v5601_v4  ;;  %v245_v36 = vld [vmem:[%s12791_s30 + $0x1c0] sm:$0xff]  ;;  %v242_v4 = vld [vmem:[%s12791_s30 + $0x1a8] sm:$0xff] }
 0x143   :  { %v703_v59 = vpop.f32.mrf.mxu2  ;;  %v741_v37 = vpop.f32.mrf.mxu3  ;;  %1423 = vmatpush.msrb.mxu2 %v5571_v5  ;;  %1340 = vmatpush.msrb.mxu0 %v224_v18  ;;  %v5598_v18 = vld [vmem:[%s12791_s30 + $0x4e0] sm:$0xff] }
 0x144   :  { %v8111_v2 = vadd.f32 %v741_v37, %v703_v59  ;;  %v8113_v62 = vpop.f32.mrf.mxu0  ;;  %v8115_v63 = vpop.f32.mrf.mxu1  ;;  %1468 = vmatpush.msrb.mxu3 %v5598_v18  ;;  %v5583_v18 = vld [vmem:[%s12791_s30 + $0x468] sm:$0xff] }
 0x145   :  { %1424 = vmatpush.msrb.mxu2 %v5568_v16  ;;  %1341 = vmatpush.msrb.mxu0 %v221_v12  ;;  %v257_v16 = vld [vmem:[%s12791_s30 + $0x220] sm:$0xff]  ;;  %v5595_v12 = vld [vmem:[%s12791_s30 + $0x4c8] sm:$0xff] }
 0x146   :  { %12796 = vst [vmem:[#allocation13_spill] sm:$0xff] %v8111_v2  ;;  %1383 = vmatpush.msrb.mxu1 %v257_v16  ;;  %1469 = vmatpush.msrb.mxu3 %v5595_v12  ;;  %v191_v12 = vld [vmem:[%s12791_s30 + $0x10] sm:$0xff] }
 0x147   :  { %1200 = vmatmul.f32.vlgmr.msra.gmra.mxu0 %v7627_v50  ;;  %5874 = vmatmul.msk.f32.vlgmr.msra.gmra.mxu1 %vm566_vm3, %v7629_v51 }
 0x148   :  { %1276 = vmatmul.f32.vlgmr.msra.gmra.mxu2 %v7627_v50  ;;  %5882 = vmatmul.msk.f32.vlgmr.msra.gmra.mxu3 %vm566_vm3, %v7629_v51 }
 0x149   :  { %1425 = vmatpush.msrb.mxu2 %v5565_v20  ;;  %1342 = vmatpush.msrb.mxu0 %v218_v42  ;;  %v254_v20 = vld [vmem:[%s12791_s30 + $0x208] sm:$0xff]  ;;  %v5592_v42 = vld [vmem:[%s12791_s30 + $0x4b0] sm:$0xff] }
 0x14a   :  { %1384 = vmatpush.msrb.mxu1 %v254_v20  ;;  %1470 = vmatpush.msrb.mxu3 %v5592_v42 }
 0x14b   :  { %v706_v22 = vpop.f32.mrf.mxu2  ;;  %v744_v23 = vpop.f32.mrf.mxu3  ;;  %1426 = vmatpush.msrb.mxu2 %v5562_v24  ;;  %1343 = vmatpush.msrb.mxu0 %v215_v26  ;;  %v200_v26 = vld [vmem:[%s12791_s30 + $0x58] sm:$0xff] }
 0x14c   :  { %v8173_v30 = vadd.f32 %v744_v23, %v706_v22  ;;  %v8175_v40 = vpop.f32.mrf.mxu0  ;;  %v8177_v41 = vpop.f32.mrf.mxu1  ;;  %v251_v22 = vld [vmem:[%s12791_s30 + $0x1f0] sm:$0xff]  ;;  %1471 = vmatpush.msrb.mxu3 %v5589_v33 }
 0x14d   :  { %1427 = vmatpush.msrb.mxu2 %v5559_v49  ;;  %1344 = vmatpush.msrb.mxu0 %v212_v58  ;;  %v197_v58 = vld [vmem:[%s12791_s30 + $0x40] sm:$0xff] }
 0x14e   :  { %12797 = vst [vmem:[#allocation14_spill] sm:$0xff] %v8173_v30  ;;  %1385 = vmatpush.msrb.mxu1 %v251_v22  ;;  %v5532_v22 = vld [vmem:[%s12791_s30 + $0x2d0] sm:$0xff]  ;;  %v5555_v30 = vld [vmem:[%s12791_s30 + $0x388] sm:$0xff] }
 0x14f   :  { %1203 = vmatmul.f32.gmra.mxu0 %v7691_v6  ;;  %5875 = vmatmul.msk.f32.gmra.mxu1 %vm566_vm3, %v7693_v7 }
 0x150   :  { %1279 = vmatmul.f32.gmra.mxu2 %v7691_v6  ;;  %5883 = vmatmul.msk.f32.gmra.mxu3 %vm566_vm3, %v7693_v7 }
 0x151   :  { %1428 = vmatpush.msrb.mxu2 %v5556_v32  ;;  %1345 = vmatpush.msrb.mxu0 %v209_v15  ;;  %v5541_v32 = vld [vmem:[%s12791_s30 + $0x318] sm:$0xff] }
 0x152   :  { %1386 = vmatpush.msrb.mxu1 %v248_v27 }
 0x153   :  { %v709_v59 = vpop.f32.mrf.mxu2  ;;  %v747_v37 = vpop.f32.mrf.mxu3  ;;  %1429 = vmatpush.msrb.mxu2 %v5553_v3  ;;  %1346 = vmatpush.msrb.mxu0 %v206_v19  ;;  %v194_v3 = vld [vmem:[%s12791_s30 + $0x28] sm:$0xff] }
 0x154   :  { %v8221_v5 = vadd.f32 %v747_v37, %v709_v59  ;;  %v8223_v8 = vpop.f32.mrf.mxu0  ;;  %v8225_v9 = vpop.f32.mrf.mxu1  ;;  %v5538_v59 = vld [vmem:[%s12791_s30 + $0x300] sm:$0xff]  ;;  %1387 = vmatpush.msrb.mxu1 %v245_v36 }
 0x155   :  { %12799 = vst [vmem:[#allocation16_spill] sm:$0xff] %v8223_v8  ;;  %1430 = vmatpush.msrb.mxu2 %v5550_v17  ;;  %1347 = vmatpush.msrb.mxu0 %v203_v13  ;;  %v5586_v37 = vld [vmem:[%s12791_s30 + $0x480] sm:$0xff]  ;;  %v5535_v17 = vld [vmem:[%s12791_s30 + $0x2e8] sm:$0xff]  ;;  %v239_v13 = vld [vmem:[%s12791_s30 + $0x190] sm:$0xff] }
 0x156   :  { %12798 = vst [vmem:[#allocation15_spill] sm:$0xff] %v8221_v5  ;;  %1472 = vmatpush.msrb.mxu3 %v5586_v37  ;;  %1388 = vmatpush.msrb.mxu1 %v242_v4  ;;  %v5578_v37 = vld [vmem:[%s12791_s30 + $0x440] sm:$0xff]  ;;  %v5575_v4 = vld [vmem:[%s12791_s30 + $0x428] sm:$0xff] }
 0x157   :  { %12800 = vst [vmem:[#allocation17_spill] sm:$0xff] %v8225_v9  ;;  %1206 = vmatmul.f32.gmra.mxu0 %v7749_v28  ;;  %5876 = vmatmul.msk.f32.gmra.mxu1 %vm566_vm3, %v7751_v29  ;;  %v6105_v9 = vld [vmem:[%s12791_s30 + $0xf88] sm:$0xff] }
 0x158   :  { %1282 = vmatmul.f32.gmra.mxu2 %v7749_v28  ;;  %5884 = vmatmul.msk.f32.gmra.mxu3 %vm566_vm3, %v7751_v29  ;;  %v6101_v8 = vld [vmem:[%s12791_s30 + $0xf68] sm:$0xff] }
 0x159   :  { %1431 = vmatpush.msrb.mxu2 %v5547_v34  ;;  %1348 = vmatpush.msrb.mxu0 %v200_v26 }
 0x15a   :  { %1473 = vmatpush.msrb.mxu3 %v5583_v18  ;;  %1389 = vmatpush.msrb.mxu1 %v239_v13 }
 0x15b   :  { %v943_v23 = vpop.f32.mrf.mxu2  ;;  %v981_v24 = vpop.f32.mrf.mxu3  ;;  %1432 = vmatpush.msrb.mxu2 %v5544_v25  ;;  %1349 = vmatpush.msrb.mxu0 %v197_v58 }
 0x15c   :  { %v8269_v48 = vadd.f32 %v981_v24, %v943_v23  ;;  %v8271_v49 = vpop.f32.mrf.mxu0  ;;  %v8273_v43 = vpop.f32.mrf.mxu1  ;;  %v5580_v23 = vld [vmem:[%s12791_s30 + $0x450] sm:$0xff] }
 0x15d   :  { %12801 = vst [vmem:[#allocation18_spill] sm:$0xff] %v8271_v49  ;;  %1433 = vmatpush.msrb.mxu2 %v5541_v32  ;;  %1350 = vmatpush.msrb.mxu0 %v194_v3  ;;  %v5579_v3 = vld [vmem:[%s12791_s30 + $0x448] sm:$0xff] }
 0x15e   :  { %12802 = vst [vmem:[#allocation19_spill] sm:$0xff] %v8273_v43  ;;  %1474 = vmatpush.msrb.mxu3 %v5580_v23  ;;  %v5620_v23 = vld [vmem:[%s12791_s30 + $0x590] sm:$0x1f]  ;;  %v5997_v43 = vld [vmem:[%s12791_s30 + $0xce8] sm:$0xff] }
 0x15f   :  { %1209 = vmatmul.f32.gmra.mxu0 %v7807_v56  ;;  %5877 = vmatmul.msk.f32.gmra.mxu1 %vm566_vm3, %v7809_v57 }
 0x160   :  { %1285 = vmatmul.f32.gmra.mxu2 %v7807_v56  ;;  %5885 = vmatmul.msk.f32.gmra.mxu3 %vm566_vm3, %v7809_v57 }
 0x161   :  { %1434 = vmatpush.msrb.mxu2 %v5538_v59  ;;  %1351 = vmatpush.msrb.mxu0 %v191_v12 }
 0x162   :  { %5905 = vmatpush.msk.msra.mxu1 %vm588_vm2, %v5620_v23  ;;  %v5611_v23 = vld [vmem:[%s12791_s30 + $0x548] sm:$0xff] }
 0x163   :  { %v946_v15 = vpop.f32.mrf.mxu2  ;;  %v984_v16 = vpop.f32.mrf.mxu3  ;;  %1435 = vmatpush.msrb.mxu2 %v5535_v17  ;;  %1497 = vmatpush.msra.mxu0 %v5578_v37  ;;  %v5570_v37 = vld [vmem:[%s12791_s30 + $0x400] sm:$0xff] }
 0x164   :  { %v8317_v19 = vadd.f32 %v984_v16, %v946_v15  ;;  %v8319_v20 = vpop.f32.mrf.mxu0  ;;  %v8321_v34 = vpop.f32.mrf.mxu1  ;;  %v5576_v15 = vld [vmem:[%s12791_s30 + $0x430] sm:$0xff] }
 0x165   :  { %12803 = vst [vmem:[#allocation20_spill] sm:$0xff] %v8319_v20  ;;  %1436 = vmatpush.msrb.mxu2 %v5532_v22  ;;  %1498 = vmatpush.msra.mxu0 %v5575_v4  ;;  %v5572_v22 = vld [vmem:[%s12791_s30 + $0x410] sm:$0xff]  ;;  %v5566_v4 = vld [vmem:[%s12791_s30 + $0x3e0] sm:$0xff]  ;;  %v5949_v20 = vld [vmem:[%s12791_s30 + $0xb68] sm:$0xff] }
 0x166   :  { %12804 = vst [vmem:[#allocation21_spill] sm:$0xff] %v8321_v34  ;;  %v6112_v34 = vld [vmem:[%s12791_s30 + $0xfc0] sm:$0xff] }
 0x167   :  { %1212 = vmatmul.f32.gmra.mxu0 %v7823_v60  ;;  %5878 = vmatmul.msk.f32.gmra.mxu1 %vm566_vm3, %v7825_v61 }
 0x168   :  { %1288 = vmatmul.f32.gmra.mxu2 %v7823_v60  ;;  %5886 = vmatmul.msk.f32.gmra.mxu3 %vm566_vm3, %v7825_v61 }
 0x169   :  { %1573 = vmatpush.msra.mxu2 %v5579_v3  ;;  %1499 = vmatpush.msra.mxu0 %v5572_v22  ;;  %v5618_v3 = vld [vmem:[%s12791_s30 + $0x580] sm:$0xff]  ;;  %v5563_v22 = vld [vmem:[%s12791_s30 + $0x3c8] sm:$0xff] }
 0x16b   :  { %v949_v24 = vpop.f32.mrf.mxu2  ;;  %v987_v25 = vpop.f32.mrf.mxu3  ;;  %1574 = vmatpush.msra.mxu2 %v5576_v15  ;;  %v5614_v15 = vld [vmem:[%s12791_s30 + $0x560] sm:$0xff] }
 0x16c   :  { %v8341_v42 = vadd.f32 %v987_v25, %v949_v24  ;;  %v8343_v26 = vpop.f32.mrf.mxu0  ;;  %v8345_v27 = vpop.f32.mrf.mxu1  ;;  %v5573_v24 = vld [vmem:[%s12791_s30 + $0x418] sm:$0xff] }
 0x16d   :  { %12805 = vst [vmem:[#allocation22_spill] sm:$0xff] %v8343_v26  ;;  %v5621_v25 = vld [vmem:[%s12791_s30 + $0x598] sm:$0x1f]  ;;  %1575 = vmatpush.msra.mxu2 %v5573_v24 }
 0x16e   :  { %12806 = vst [vmem:[#allocation23_spill] sm:$0xff] %v8345_v27  ;;  %5913 = vmatpush.msk.msra.mxu3 %vm588_vm2, %v5621_v25  ;;  %v6006_v27 = vld [vmem:[%s12791_s30 + $0xd30] sm:$0xff] }
 0x16f   :  { %1215 = vmatmul.f32.gmra.mxu0 %v7839_v0  ;;  %5879 = vmatmul.msk.f32.gmra.mxu1 %vm566_vm3, %v7841_v1 }
 0x170   :  { %1291 = vmatmul.f32.gmra.mxu2 %v7839_v0  ;;  %5887 = vmatmul.msk.f32.gmra.mxu3 %vm566_vm3, %v7841_v1 }
 0x171   :  { %1576 = vmatpush.msra.mxu2 %v5570_v37  ;;  %1614 = vmatpush.msra.mxu3 %v5618_v3 }
 0x173   :  { %v952_v32 = vpop.f32.mrf.mxu2  ;;  %v990_v33 = vpop.f32.mrf.mxu3 }
 0x174   :  { %v8353_v58 = vadd.f32 %v990_v33, %v952_v32  ;;  %v8355_v36 = vpop.f32.mrf.mxu0  ;;  %v8357_v59 = vpop.f32.mrf.mxu1  ;;  %v5569_v32 = vld [vmem:[%s12791_s30 + $0x3f8] sm:$0xff] }
 0x175   :  { %12807 = vst [vmem:[#allocation24_spill] sm:$0xff] %v8355_v36  ;;  %v5617_v33 = vld [vmem:[%s12791_s30 + $0x578] sm:$0xff]  ;;  %1500 = vmatpush.msra.mxu0 %v5569_v32  ;;  %v5564_v32 = vld [vmem:[%s12791_s30 + $0x3d0] sm:$0xff] }
 0x176   :  { %12808 = vst [vmem:[#allocation25_spill] sm:$0xff] %v8357_v59  ;;  %1538 = vmatpush.msra.mxu1 %v5617_v33  ;;  %v5612_v33 = vld [vmem:[%s12791_s30 + $0x550] sm:$0xff] }
 0x177   :  { %1218 = vmatmul.f32.gmra.mxu0 %v7899_v21  ;;  %5880 = vmatmul.msk.f32.gmra.mxu1 %vm566_vm3, %v7901_v35  ;;  %v5958_v36 = vld [vmem:[%s12791_s30 + $0xbb0] sm:$0xff] }
 0x178   :  { %1294 = vmatmul.f32.gmra.mxu2 %v7899_v21  ;;  %5888 = vmatmul.msk.f32.gmra.mxu3 %vm566_vm3, %v7901_v35 }
 0x179   :  { %1501 = vmatpush.msra.mxu0 %v5566_v4  ;;  %1539 = vmatpush.msra.mxu1 %v5614_v15  ;;  %v5560_v4 = vld [vmem:[%s12791_s30 + $0x3b0] sm:$0xff] }
 0x17a   :  { %v5608_v15 = vld [vmem:[%s12791_s30 + $0x530] sm:$0xff] }
 0x17b   :  { %v955_v16 = vpop.f32.mrf.mxu2  ;;  %v993_v17 = vpop.f32.mrf.mxu3  ;;  %1502 = vmatpush.msra.mxu0 %v5563_v22  ;;  %1540 = vmatpush.msra.mxu1 %v5611_v23  ;;  %v5557_v22 = vld [vmem:[%s12791_s30 + $0x398] sm:$0xff] }
 0x17c   :  { %v8377_v18 = vadd.f32 %v993_v17, %v955_v16  ;;  %v8379_v12 = vpop.f32.mrf.mxu0  ;;  %v8381_v13 = vpop.f32.mrf.mxu1  ;;  %v5567_v16 = vld [vmem:[%s12791_s30 + $0x3e8] sm:$0xff]  ;;  %v5605_v23 = vld [vmem:[%s12791_s30 + $0x518] sm:$0xff] }
 0x17d   :  { %12809 = vst [vmem:[#allocation26_spill] sm:$0xff] %v8379_v12  ;;  %v5615_v17 = vld [vmem:[%s12791_s30 + $0x568] sm:$0xff]  ;;  %1577 = vmatpush.msra.mxu2 %v5567_v16  ;;  %v5561_v16 = vld [vmem:[%s12791_s30 + $0x3b8] sm:$0xff]  ;;  %1503 = vmatpush.msra.mxu0 %v5560_v4 }
 0x17e   :  { %12810 = vst [vmem:[#allocation27_spill] sm:$0xff] %v8381_v13  ;;  %1615 = vmatpush.msra.mxu3 %v5615_v17  ;;  %v5609_v17 = vld [vmem:[%s12791_s30 + $0x538] sm:$0xff]  ;;  %1541 = vmatpush.msra.mxu1 %v5608_v15 }
 0x17f   :  { %1352 = vmatmul.f32.vlgmr.msrb.gmra.mxu0 %v7627_v50  ;;  %5890 = vmatmul.msk.f32.vlgmr.msrb.gmra.mxu1 %vm566_vm3, %v7629_v51  ;;  %v6015_v13 = vld [vmem:[%s12791_s30 + $0xd78] sm:$0xff] }
 0x180   :  { %1437 = vmatmul.f32.vlgmr.msrb.gmra.mxu2 %v7627_v50  ;;  %5898 = vmatmul.msk.f32.vlgmr.msrb.gmra.mxu3 %vm566_vm3, %v7629_v51  ;;  %v6079_v12 = vld [vmem:[%s12791_s30 + $0xeb8] sm:$0xff] }
 0x181   :  { %1578 = vmatpush.msra.mxu2 %v5564_v32  ;;  %1616 = vmatpush.msra.mxu3 %v5612_v33  ;;  %v5554_v32 = vld [vmem:[%s12791_s30 + $0x380] sm:$0xff] }
 0x182   :  { %v5602_v33 = vld [vmem:[%s12791_s30 + $0x500] sm:$0xff]  ;;  %1504 = vmatpush.msra.mxu0 %v5557_v22  ;;  %1542 = vmatpush.msra.mxu1 %v5605_v23  ;;  %v5551_v22 = vld [vmem:[%s12791_s30 + $0x368] sm:$0xff] }
 0x183   :  { %v958_v24 = vpop.f32.mrf.mxu2  ;;  %v996_v25 = vpop.f32.mrf.mxu3  ;;  %1579 = vmatpush.msra.mxu2 %v5561_v16  ;;  %1617 = vmatpush.msra.mxu3 %v5609_v17  ;;  %v5603_v16 = vld [vmem:[%s12791_s30 + $0x508] sm:$0xff] }
 0x184   :  { %v8439_v37 = vadd.f32 %v996_v25, %v958_v24  ;;  %v8441_v3 = vpop.f32.mrf.mxu0  ;;  %v8443_v5 = vpop.f32.mrf.mxu1  ;;  %v5558_v24 = vld [vmem:[%s12791_s30 + $0x3a0] sm:$0xff]  ;;  %1505 = vmatpush.msra.mxu0 %v5554_v32  ;;  %1543 = vmatpush.msra.mxu1 %v5602_v33  ;;  %v5599_v23 = vld [vmem:[%s12791_s30 + $0x4e8] sm:$0xff]  ;;  %v5596_v32 = vld [vmem:[%s12791_s30 + $0x4d0] sm:$0xff] }
 0x185   :  { %12811 = vst [vmem:[#allocation28_spill] sm:$0xff] %v8441_v3  ;;  %v5606_v25 = vld [vmem:[%s12791_s30 + $0x520] sm:$0xff]  ;;  %1580 = vmatpush.msra.mxu2 %v5558_v24  ;;  %v5552_v24 = vld [vmem:[%s12791_s30 + $0x370] sm:$0xff]  ;;  %v5549_v33 = vld [vmem:[%s12791_s30 + $0x358] sm:$0xff] }
 0x186   :  { %12812 = vst [vmem:[#allocation29_spill] sm:$0xff] %v8443_v5  ;;  %1618 = vmatpush.msra.mxu3 %v5606_v25  ;;  %v5548_v25 = vld [vmem:[%s12791_s30 + $0x350] sm:$0xff]  ;;  %1506 = vmatpush.msra.mxu0 %v5551_v22  ;;  %v6024_v5 = vld [vmem:[%s12791_s30 + $0xdc0] sm:$0xff]  ;;  %v5967_v3 = vld [vmem:[%s12791_s30 + $0xbf8] sm:$0xff] }
 0x187   :  { %1355 = vmatmul.f32.gmra.mxu0 %v7691_v6  ;;  %5891 = vmatmul.msk.f32.gmra.mxu1 %vm566_vm3, %v7693_v7 }
 0x188   :  { %1440 = vmatmul.f32.gmra.mxu2 %v7691_v6  ;;  %5899 = vmatmul.msk.f32.gmra.mxu3 %vm566_vm3, %v7693_v7 }
 0x189   :  { %1581 = vmatpush.msra.mxu2 %v5555_v30  ;;  %1619 = vmatpush.msra.mxu3 %v5603_v16  ;;  %v5600_v30 = vld [vmem:[%s12791_s30 + $0x4f0] sm:$0xff]  ;;  %v5593_v16 = vld [vmem:[%s12791_s30 + $0x4b8] sm:$0xff] }
 0x18a   :  { %1544 = vmatpush.msra.mxu1 %v5599_v23  ;;  %1507 = vmatpush.msra.mxu0 %v5548_v25  ;;  %v5542_v25 = vld [vmem:[%s12791_s30 + $0x320] sm:$0xff] }
 0x18b   :  { %v961_v4 = vpop.f32.mrf.mxu2  ;;  %v999_v15 = vpop.f32.mrf.mxu3  ;;  %1582 = vmatpush.msra.mxu2 %v5552_v24  ;;  %1620 = vmatpush.msra.mxu3 %v5600_v30  ;;  %v5594_v24 = vld [vmem:[%s12791_s30 + $0x4c0] sm:$0xff] }
 0x18c   :  { %v8487_v17 = vadd.f32 %v999_v15, %v961_v4  ;;  %v8489_v2 = vpop.f32.mrf.mxu0  ;;  %v8491_v53 = vpop.f32.mrf.mxu1  ;;  %v5597_v4 = vld [vmem:[%s12791_s30 + $0x4d8] sm:$0xff]  ;;  %1545 = vmatpush.msra.mxu1 %v5596_v32  ;;  %v5590_v32 = vld [vmem:[%s12791_s30 + $0x4a0] sm:$0xff] }
 0x18d   :  { %12814 = vst [vmem:[#allocation31_spill] sm:$0xff] %v8489_v2  ;;  %v5545_v15 = vld [vmem:[%s12791_s30 + $0x338] sm:$0xff]  ;;  %1583 = vmatpush.msra.mxu2 %v5549_v33  ;;  %1621 = vmatpush.msra.mxu3 %v5597_v4  ;;  %v5543_v33 = vld [vmem:[%s12791_s30 + $0x328] sm:$0xff]  ;;  %v5976_v2 = vld [vmem:[%s12791_s30 + $0xc40] sm:$0xff] }
 0x18e   :  { %12813 = vst [vmem:[#allocation30_spill] sm:$0xff] %v8487_v17  ;;  %1508 = vmatpush.msra.mxu0 %v5545_v15  ;;  %1546 = vmatpush.msra.mxu1 %v5593_v16  ;;  %v5539_v4 = vld [vmem:[%s12791_s30 + $0x308] sm:$0xff]  ;;  %v5540_v16 = vld [vmem:[%s12791_s30 + $0x310] sm:$0xff]  ;;  %v6099_v17 = vld [vmem:[%s12791_s30 + $0xf58] sm:$0xff] }
 0x18f   :  { %12815 = vst [vmem:[#allocation32_spill] sm:$0xff] %v8491_v53  ;;  %1358 = vmatmul.f32.gmra.mxu0 %v7749_v28  ;;  %5892 = vmatmul.msk.f32.gmra.mxu1 %vm566_vm3, %v7751_v29  ;;  %v5587_v15 = vld [vmem:[%s12791_s30 + $0x488] sm:$0xff]  ;;  %v6139_v53 = vld [vmem:[%s12791_s30 + $0x1098] sm:$0xff] }
 0x190   :  { %1443 = vmatmul.f32.gmra.mxu2 %v7749_v28  ;;  %5900 = vmatmul.msk.f32.gmra.mxu3 %vm566_vm3, %v7751_v29 }
 0x191   :  { %1584 = vmatpush.msra.mxu2 %v5546_v44  ;;  %1622 = vmatpush.msra.mxu3 %v5594_v24  ;;  %v5591_v44 = vld [vmem:[%s12791_s30 + $0x4a8] sm:$0xff]  ;;  %v5584_v24 = vld [vmem:[%s12791_s30 + $0x470] sm:$0xff] }
 0x192   :  { %1509 = vmatpush.msra.mxu0 %v5542_v25  ;;  %1547 = vmatpush.msra.mxu1 %v5590_v32 }
 0x193   :  { %v1095_v22 = vpop.f32.mrf.mxu2  ;;  %v1133_v23 = vpop.f32.mrf.mxu3  ;;  %1585 = vmatpush.msra.mxu2 %v5543_v33  ;;  %1623 = vmatpush.msra.mxu3 %v5591_v44  ;;  %v5585_v33 = vld [vmem:[%s12791_s30 + $0x478] sm:$0xff] }
 0x194   :  { %v8535_v30 = vadd.f32 %v1133_v23, %v1095_v22  ;;  %v8537_v31 = vpop.f32.mrf.mxu0  ;;  %v8539_v10 = vpop.f32.mrf.mxu1  ;;  %v5588_v22 = vld [vmem:[%s12791_s30 + $0x490] sm:$0xff]  ;;  %1510 = vmatpush.msra.mxu0 %v5539_v4  ;;  %1548 = vmatpush.msra.mxu1 %v5587_v15  ;;  %v5533_v4 = vld [vmem:[%s12791_s30 + $0x2d8] sm:$0xff] }
 0x195   :  { %12817 = vst [vmem:[#allocation34_spill] sm:$0xff] %v8537_v31  ;;  %v5536_v23 = vld [vmem:[%s12791_s30 + $0x2f0] sm:$0xff]  ;;  %1586 = vmatpush.msra.mxu2 %v5540_v16  ;;  %1624 = vmatpush.msra.mxu3 %v5588_v22  ;;  %v5581_v15 = vld [vmem:[%s12791_s30 + $0x458] sm:$0xff]  ;;  %v5534_v16 = vld [vmem:[%s12791_s30 + $0x2e0] sm:$0xff] }
 0x196   :  { %12816 = vst [vmem:[#allocation33_spill] sm:$0xff] %v8535_v30  ;;  %v5537_v30 = vld [vmem:[%s12791_s30 + $0x2f8] sm:$0xff]  ;;  %1511 = vmatpush.msra.mxu0 %v5536_v23  ;;  %1549 = vmatpush.msra.mxu1 %v5584_v24  ;;  %v6844_v24 = vld [vmem:[%s12789_s20 + $0x70] sm:$0xf] }
 0x197   :  { %12818 = vst [vmem:[#allocation35_spill] sm:$0xff] %v8539_v10  ;;  %1361 = vmatmul.f32.gmra.mxu0 %v7807_v56  ;;  %5893 = vmatmul.msk.f32.gmra.mxu1 %vm566_vm3, %v7809_v57 }
 0x198   :  { %1446 = vmatmul.f32.gmra.mxu2 %v7807_v56  ;;  %5901 = vmatmul.msk.f32.gmra.mxu3 %vm566_vm3, %v7809_v57 }
 0x199   :  { %1587 = vmatpush.msra.mxu2 %v5537_v30  ;;  %1625 = vmatpush.msra.mxu3 %v5585_v33  ;;  %v5582_v30 = vld [vmem:[%s12791_s30 + $0x460] sm:$0xff] }
 0x19a   :  { %1512 = vmatpush.msra.mxu0 %v5533_v4  ;;  %1550 = vmatpush.msra.mxu1 %v5581_v15  ;;  %v6846_v15 = vld [vmem:[%s12789_s20 + $0x60] sm:$0xff] }
 0x19b   :  { %v1098_v25 = vpop.f32.mrf.mxu2  ;;  %v1136_v32 = vpop.f32.mrf.mxu3  ;;  %1588 = vmatpush.msra.mxu2 %v5534_v16  ;;  %1626 = vmatpush.msra.mxu3 %v5582_v30  ;;  %v6847_v16 = vld [vmem:[%s12789_s20 + $0x68] sm:$0xff]  ;;  %v6848_v30 = vld [vmem:[%s12789_s20 + $0x50] sm:$0xff] }
 0x19c   :  { %v8583_v44 = vadd.f32 %v1136_v32, %v1098_v25  ;;  %v8585_v10 = vpop.f32.mrf.mxu0  ;;  %v8587_v31 = vpop.f32.mrf.mxu1  ;;  %5928 = vmatpush.msk.msrb.mxu0 %vm106_vm0, %v6844_v24  ;;  %v6845_v25 = vld [vmem:[%s12789_s20 + $0x78] sm:$0xf] }
 0x19d   :  { %12820 = vst [vmem:[#allocation37_spill] sm:$0xff] %v8585_v10  ;;  %5936 = vmatpush.msk.msrb.mxu1 %vm106_vm0, %v6845_v25  ;;  %v6850_v25 = vld [vmem:[%s12789_s20 + $0x40] sm:$0xff] }
 0x19e   :  { %12819 = vst [vmem:[#allocation36_spill] sm:$0xff] %v8583_v44  ;;  %1687 = vmatpush.msrb.mxu0 %v6846_v15  ;;  %v6851_v15 = vld [vmem:[%s12789_s20 + $0x48] sm:$0xff] }
 0x19f   :  { %12821 = vst [vmem:[#allocation38_spill] sm:$0xff] %v8587_v31  ;;  %1364 = vmatmul.f32.gmra.mxu0 %v7823_v60  ;;  %5894 = vmatmul.msk.f32.gmra.mxu1 %vm566_vm3, %v7825_v61 }
 0x1a0   :  { %1449 = vmatmul.f32.gmra.mxu2 %v7823_v60  ;;  %5902 = vmatmul.msk.f32.gmra.mxu3 %vm566_vm3, %v7825_v61 }
 0x1a1   :  { %1725 = vmatpush.msrb.mxu1 %v6847_v16  ;;  %1688 = vmatpush.msrb.mxu0 %v6848_v30 }
 0x1a3   :  { %v1101_v22 = vpop.f32.mrf.mxu2  ;;  %v1139_v23 = vpop.f32.mrf.mxu3  ;;  %1689 = vmatpush.msrb.mxu0 %v6850_v25  ;;  %v6853_v25 = vld [vmem:[%s12789_s20 + $0x38] sm:$0xff] }
 0x1a4   :  { %v8615_v32 = vadd.f32 %v1139_v23, %v1101_v22  ;;  %v8617_v33 = vpop.f32.mrf.mxu0  ;;  %v8619_v4 = vpop.f32.mrf.mxu1  ;;  %v6849_v22 = vld [vmem:[%s12789_s20 + $0x58] sm:$0xff] }
 0x1a5   :  { %12823 = vst [vmem:[#allocation40_spill] sm:$0xff] %v8617_v33  ;;  %1726 = vmatpush.msrb.mxu1 %v6849_v22  ;;  %v6852_v22 = vld [vmem:[%s12789_s20 + $0x30] sm:$0xff] }
 0x1a6   :  { %12822 = vst [vmem:[#allocation39_spill] sm:$0xff] %v8615_v32  ;;  %1690 = vmatpush.msrb.mxu0 %v6852_v22  ;;  %v6857_v22 = vld [vmem:[%s12789_s20 + $0x18] sm:$0xff] }
 0x1a7   :  { %12824 = vst [vmem:[#allocation41_spill] sm:$0xff] %v8619_v4  ;;  %1367 = vmatmul.f32.gmra.mxu0 %v7839_v0  ;;  %5895 = vmatmul.msk.f32.gmra.mxu1 %vm566_vm3, %v7841_v1 }
 0x1a8   :  { %1452 = vmatmul.f32.gmra.mxu2 %v7839_v0  ;;  %5903 = vmatmul.msk.f32.gmra.mxu3 %vm566_vm3, %v7841_v1 }
 0x1a9   :  { %1727 = vmatpush.msrb.mxu1 %v6851_v15  ;;  %v6856_v15 = vld [vmem:[%s12789_s20 + $0x10] sm:$0xff] }
 0x1ab   :  { %v1104_v23 = vpop.f32.mrf.mxu2  ;;  %v1142_v24 = vpop.f32.mrf.mxu3  ;;  %1728 = vmatpush.msrb.mxu1 %v6853_v25 }
 0x1ac   :  { %v8645_v16 = vadd.f32 %v1142_v24, %v1104_v23  ;;  %v8647_v30 = vpop.f32.mrf.mxu0  ;;  %v8649_v32 = vpop.f32.mrf.mxu1  ;;  %v6854_v23 = vld [vmem:[%s12789_s20 + $0x20] sm:$0xff]  ;;  %v6855_v24 = vld [vmem:[%s12789_s20 + $0x28] sm:$0xff] }
 0x1ad   :  { %12826 = vst [vmem:[#allocation43_spill] sm:$0xff] %v8647_v30  ;;  %1691 = vmatpush.msrb.mxu0 %v6854_v23  ;;  %1729 = vmatpush.msrb.mxu1 %v6855_v24  ;;  %v6858_v23 = vld [vmem:[%s12789_s20] sm:$0xff]  ;;  %v6859_v24 = vld [vmem:[%s12789_s20 + $0x8] sm:$0xff] }
 0x1ae   :  { %12825 = vst [vmem:[#allocation42_spill] sm:$0xff] %v8645_v16 }
 0x1af   :  { %12827 = vst [vmem:[#allocation44_spill] sm:$0xff] %v8649_v32  ;;  %1370 = vmatmul.f32.gmra.mxu0 %v7899_v21  ;;  %5896 = vmatmul.msk.f32.gmra.mxu1 %vm566_vm3, %v7901_v35 }
 0x1b0   :  { %1455 = vmatmul.f32.gmra.mxu2 %v7899_v21  ;;  %5904 = vmatmul.msk.f32.gmra.mxu3 %vm566_vm3, %v7901_v35 }
 0x1b1   :  { %1692 = vmatpush.msrb.mxu0 %v6856_v15  ;;  %1730 = vmatpush.msrb.mxu1 %v6857_v22 }
 0x1b3   :  { %1693 = vmatpush.msrb.mxu0 %v6858_v23  ;;  %1731 = vmatpush.msrb.mxu1 %v6859_v24 }
 0x1b4   :  { %v8675_v25 = vpop.f32.mrf.mxu0  ;;  %v8677_v16 = vpop.f32.mrf.mxu1 }
 0x1b5   :  { %12828 = vst [vmem:[#allocation45_spill] sm:$0xff] %v8675_v25 }
 0x1b6   :  { %12829 = vst [vmem:[#allocation46_spill] sm:$0xff] %v8677_v16  ;;  %v8780_v16 = vpop.f32.mrf.mxu3 }
 0x1b7   :  { %1513 = vmatmul.f32.vlgmr.msra.gmra.mxu0 %v7627_v50  ;;  %5906 = vmatmul.msk.f32.vlgmr.msra.gmra.mxu1 %vm566_vm3, %v7629_v51  ;;  %12839 = vst [vmem:[#allocation56_spill] sm:$0xff] %v8780_v16 }
 0x1b8   :  { %1589 = vmatmul.f32.vlgmr.msra.gmra.mxu2 %v7627_v50  ;;  %5914 = vmatmul.msk.f32.vlgmr.msra.gmra.mxu3 %vm566_vm3, %v7629_v51 }
 0x1bc   :  { %v8691_v15 = vpop.f32.mrf.mxu0  ;;  %v8693_v22 = vpop.f32.mrf.mxu1 }
 0x1bd   :  { %12830 = vst [vmem:[#allocation47_spill] sm:$0xff] %v8691_v15  ;;  %v8778_v15 = vpop.f32.mrf.mxu2 }
 0x1be   :  { %12831 = vst [vmem:[#allocation48_spill] sm:$0xff] %v8693_v22 }
 0x1bf   :  { %1516 = vmatmul.f32.gmra.mxu0 %v7691_v6  ;;  %5907 = vmatmul.msk.f32.gmra.mxu1 %vm566_vm3, %v7693_v7  ;;  %12838 = vst [vmem:[#allocation55_spill] sm:$0xff] %v8778_v15 }
 0x1c0   :  { %1592 = vmatmul.f32.gmra.mxu2 %v7691_v6  ;;  %5915 = vmatmul.msk.f32.gmra.mxu3 %vm566_vm3, %v7693_v7 }
 0x1c4   :  { %v8701_v23 = vpop.f32.mrf.mxu0  ;;  %v8703_v50 = vpop.f32.mrf.mxu1 }
 0x1c7   :  { %1519 = vmatmul.f32.gmra.mxu0 %v7749_v28  ;;  %5908 = vmatmul.msk.f32.gmra.mxu1 %vm566_vm3, %v7751_v29 }
 0x1c8   :  { %1595 = vmatmul.f32.gmra.mxu2 %v7749_v28  ;;  %5916 = vmatmul.msk.f32.gmra.mxu3 %vm566_vm3, %v7751_v29 }
 0x1cc   :  { %v8711_v51 = vpop.f32.mrf.mxu0  ;;  %v8713_v6 = vpop.f32.mrf.mxu1 }
 0x1cf   :  { %1522 = vmatmul.f32.gmra.mxu0 %v7807_v56  ;;  %5909 = vmatmul.msk.f32.gmra.mxu1 %vm566_vm3, %v7809_v57 }
 0x1d0   :  { %1598 = vmatmul.f32.gmra.mxu2 %v7807_v56  ;;  %5917 = vmatmul.msk.f32.gmra.mxu3 %vm566_vm3, %v7809_v57 }
 0x1d4   :  { %v8721_v7 = vpop.f32.mrf.mxu0  ;;  %v8723_v28 = vpop.f32.mrf.mxu1 }
 0x1d7   :  { %1525 = vmatmul.f32.gmra.mxu0 %v7823_v60  ;;  %5910 = vmatmul.msk.f32.gmra.mxu1 %vm566_vm3, %v7825_v61 }
 0x1d8   :  { %1601 = vmatmul.f32.gmra.mxu2 %v7823_v60  ;;  %5918 = vmatmul.msk.f32.gmra.mxu3 %vm566_vm3, %v7825_v61 }
 0x1dc   :  { %v8731_v29 = vpop.f32.mrf.mxu0  ;;  %v8733_v56 = vpop.f32.mrf.mxu1 }
 0x1df   :  { %1528 = vmatmul.f32.gmra.mxu0 %v7839_v0  ;;  %5911 = vmatmul.msk.f32.gmra.mxu1 %vm566_vm3, %v7841_v1 }
 0x1e0   :  { %1604 = vmatmul.f32.gmra.mxu2 %v7839_v0  ;;  %5919 = vmatmul.msk.f32.gmra.mxu3 %vm566_vm3, %v7841_v1  ;;  %v5921_v1 = vld [vmem:[%s12790_s23 + $0x70] sm:$0xff] }
 0x1e4   :  { %v8741_v57 = vpop.f32.mrf.mxu0  ;;  %v8743_v60 = vpop.f32.mrf.mxu1 }
 0x1e5   :  { %12832 = vst [vmem:[#allocation49_spill] sm:$0xff] %v8741_v57 }
 0x1e6   :  { %12833 = vst [vmem:[#allocation50_spill] sm:$0xff] %v8743_v60  ;;  %v6102_v60 = vld [vmem:[%s12791_s30 + $0xf70] sm:$0xff] }
 0x1e7   :  { %1531 = vmatmul.f32.gmra.mxu0 %v7899_v21  ;;  %5912 = vmatmul.msk.f32.gmra.mxu1 %vm566_vm3, %v7901_v35 }
 0x1e8   :  { %1607 = vmatmul.f32.gmra.mxu2 %v7899_v21  ;;  %5920 = vmatmul.msk.f32.gmra.mxu3 %vm566_vm3, %v7901_v35  ;;  %v5922_v21 = vld [vmem:[%s12790_s23 + $0x78] sm:$0xff] }
 0x1ec   :  { %v8751_v61 = vpop.f32.mrf.mxu0  ;;  %v8753_v0 = vpop.f32.mrf.mxu1 }
 0x1ed   :  { %12834 = vst [vmem:[#allocation51_spill] sm:$0xff] %v8753_v0  ;;  %v6098_v0 = vld [vmem:[%s12791_s30 + $0xf50] sm:$0xff] }
 0x1ef   :  { %5929 = vmatmul.msk.f32.vlgmr.msrb.gmra.mxu0 %vm84_vm1, %v5921_v1  ;;  %5937 = vmatmul.msk.f32.vlgmr.msrb.gmra.mxu1 %vm84_vm1, %v5921_v1  ;;  %v5923_v1 = vld [vmem:[%s12790_s23 + $0x80] sm:$0xff] }
 0x1f4   :  { %v8760_v24 = vpop.f32.mrf.mxu0  ;;  %v8762_v44 = vpop.f32.mrf.mxu1 }
 0x1f5   :  { %12835 = vst [vmem:[#allocation52_spill] sm:$0xff] %v8762_v44 }
 0x1f7   :  { %5930 = vmatmul.msk.f32.gmra.mxu0 %vm84_vm1, %v5922_v21  ;;  %5938 = vmatmul.msk.f32.gmra.mxu1 %vm84_vm1, %v5922_v21  ;;  %v5924_v21 = vld [vmem:[%s12790_s23 + $0x88] sm:$0xff] }
 0x1fc   :  { %v8769_v35 = vpop.f32.mrf.mxu0  ;;  %v8771_v22 = vpop.f32.mrf.mxu1 }
 0x1fd   :  { %12836 = vst [vmem:[#allocation53_spill] sm:$0xff] %v8769_v35  ;;  %v8793_v35 = vpop.f32.mrf.mxu3 }
 0x1fe   :  { %12837 = vst [vmem:[#allocation54_spill] sm:$0xff] %v8771_v22  ;;  %v8791_v22 = vpop.f32.mrf.mxu2 }
 0x1ff   :  { %5931 = vmatmul.msk.f32.gmra.mxu0 %vm84_vm1, %v5923_v1  ;;  %5939 = vmatmul.msk.f32.gmra.mxu1 %vm84_vm1, %v5923_v1  ;;  %12842 = vst [vmem:[#allocation59_spill] sm:$0xff] %v8791_v22 }
 0x200   :  { %12843 = vst [vmem:[#allocation60_spill] sm:$0xff] %v8793_v35 }
 0x204   :  { %v8782_v25 = vpop.f32.mrf.mxu0  ;;  %v8784_v32 = vpop.f32.mrf.mxu1 }
 0x205   :  { %12840 = vst [vmem:[#allocation57_spill] sm:$0xff] %v8782_v25 }
 0x206   :  { %12841 = vst [vmem:[#allocation58_spill] sm:$0xff] %v8784_v32  ;;  %v5925_v32 = vld [vmem:[%s12790_s23 + $0x90] sm:$0xff]  ;;  %v8811_v35 = vpop.f32.mrf.mxu2 }
 0x207   :  { %5932 = vmatmul.msk.f32.gmra.mxu0 %vm84_vm1, %v5924_v21  ;;  %5940 = vmatmul.msk.f32.gmra.mxu1 %vm84_vm1, %v5924_v21  ;;  %v5926_v21 = vld [vmem:[%s12790_s23 + $0x98] sm:$0xff]  ;;  %12848 = vst [vmem:[#allocation65_spill] sm:$0xff] %v8811_v35 }
 0x20c   :  { %v8795_v1 = vpop.f32.mrf.mxu0  ;;  %v8797_v15 = vpop.f32.mrf.mxu1 }
 0x20d   :  { %12844 = vst [vmem:[#allocation61_spill] sm:$0xff] %v8795_v1  ;;  %v8813_v1 = vpop.f32.mrf.mxu3 }
 0x20e   :  { %12845 = vst [vmem:[#allocation62_spill] sm:$0xff] %v8797_v15 }
 0x20f   :  { %5933 = vmatmul.msk.f32.gmra.mxu0 %vm84_vm1, %v5925_v32  ;;  %5941 = vmatmul.msk.f32.gmra.mxu1 %vm84_vm1, %v5925_v32  ;;  %12849 = vst [vmem:[#allocation66_spill] sm:$0xff] %v8813_v1  ;;  %v5927_v32 = vld [vmem:[%s12790_s23 + $0xa0] sm:$0xff] }
 0x214   :  { %v8804_v25 = vpop.f32.mrf.mxu0  ;;  %v8806_v16 = vpop.f32.mrf.mxu1 }
 0x215   :  { %12846 = vst [vmem:[#allocation63_spill] sm:$0xff] %v8804_v25  ;;  %v8826_v25 = vpop.f32.mrf.mxu3 }
 0x216   :  { %12847 = vst [vmem:[#allocation64_spill] sm:$0xff] %v8806_v16  ;;  %v8824_v16 = vpop.f32.mrf.mxu2 }
 0x217   :  { %5934 = vmatmul.msk.f32.gmra.mxu0 %vm84_vm1, %v5926_v21  ;;  %5942 = vmatmul.msk.f32.gmra.mxu1 %vm84_vm1, %v5926_v21  ;;  %12852 = vst [vmem:[#allocation69_spill] sm:$0xff] %v8824_v16  ;;  %v6091_v16 = vld [vmem:[%s12791_s30 + $0xf18] sm:$0xff] }
 0x218   :  { %12853 = vst [vmem:[#allocation70_spill] sm:$0xff] %v8826_v25  ;;  %v5989_v25 = vld [vmem:[%s12791_s30 + $0xca8] sm:$0xff] }
 0x219   :  { %1875 = vmatpush.msrb.mxu2 %v5989_v25  ;;  %v5984_v25 = vld [vmem:[%s12791_s30 + $0xc80] sm:$0xff] }
 0x21c   :  { %v8817_v15 = vpop.f32.mrf.mxu0  ;;  %v8819_v22 = vpop.f32.mrf.mxu1 }
 0x21d   :  { %12850 = vst [vmem:[#allocation67_spill] sm:$0xff] %v8817_v15  ;;  %v8836_v15 = vpop.f32.mrf.mxu3 }
 0x21e   :  { %12851 = vst [vmem:[#allocation68_spill] sm:$0xff] %v8819_v22  ;;  %v8834_v21 = vpop.f32.mrf.mxu2 }
 0x21f   :  { %5935 = vmatmul.msk.f32.gmra.mxu0 %vm84_vm1, %v5927_v32  ;;  %5943 = vmatmul.msk.f32.gmra.mxu1 %vm84_vm1, %v5927_v32  ;;  %12856 = vst [vmem:[#allocation73_spill] sm:$0xff] %v8834_v21  ;;  %v5990_v32 = vld [vmem:[%s12791_s30 + $0xcb0] sm:$0xff] }
 0x220   :  { %12857 = vst [vmem:[#allocation74_spill] sm:$0xff] %v8836_v15  ;;  %1951 = vmatpush.msra.mxu0 %v5990_v32 }
 0x224   :  { %v8830_v1 = vpop.f32.mrf.mxu0  ;;  %v8832_v35 = vpop.f32.mrf.mxu1 }
 0x225   :  { %12854 = vst [vmem:[#allocation71_spill] sm:$0xff] %v8830_v1  ;;  %v6031_v1 = vld [vmem:[%s12791_s30 + $0xdf8] sm:$0x1f]  ;;  %v8865_v15 = vpop.f32.mrf.mxu3 }
 0x226   :  { %12855 = vst [vmem:[#allocation72_spill] sm:$0xff] %v8832_v35  ;;  %v5986_v35 = vld [vmem:[%s12791_s30 + $0xc90] sm:$0xff]  ;;  %v8863_v32 = vpop.f32.mrf.mxu2  ;;  %6034 = vmatpush.msk.msrb.mxu3 %vm588_vm2, %v6031_v1  ;;  %v5981_v1 = vld [vmem:[%s12791_s30 + $0xc68] sm:$0xff] }
 0x227   :  { %1876 = vmatpush.msrb.mxu2 %v5986_v35  ;;  %12860 = vst [vmem:[#allocation77_spill] sm:$0xff] %v8863_v32  ;;  %v5980_v32 = vld [vmem:[%s12791_s30 + $0xc60] sm:$0xff] }
 0x228   :  { %12861 = vst [vmem:[#allocation78_spill] sm:$0xff] %v8865_v15  ;;  %v6016_v15 = vld [vmem:[%s12791_s30 + $0xd80] sm:$0xff] }
 0x22c   :  { %v8838_v22 = vpop.f32.mrf.mxu0  ;;  %v8840_v30 = vpop.f32.mrf.mxu1 }
 0x22d   :  { %12858 = vst [vmem:[#allocation75_spill] sm:$0xff] %v8838_v22  ;;  %v5987_v22 = vld [vmem:[%s12791_s30 + $0xc98] sm:$0xff]  ;;  %v8939_v4 = vpop.f32.mrf.mxu3 }
 0x22e   :  { %12859 = vst [vmem:[#allocation76_spill] sm:$0xff] %v8840_v30  ;;  %1952 = vmatpush.msra.mxu0 %v5987_v22  ;;  %v5983_v30 = vld [vmem:[%s12791_s30 + $0xc78] sm:$0xff]  ;;  %v6032_v22 = vld [vmem:[%s12791_s30 + $0xe00] sm:$0x1f] }
 0x22f   :  { %1877 = vmatpush.msrb.mxu2 %v5983_v30  ;;  %6042 = vmatpush.msk.msra.mxu1 %vm588_vm2, %v6032_v22  ;;  %v6028_v30 = vld [vmem:[%s12791_s30 + $0xde0] sm:$0xff]  ;;  %v5977_v22 = vld [vmem:[%s12791_s30 + $0xc48] sm:$0xff]  ;;  %12867 = vst [vmem:[#allocation84_spill] sm:$0xff] %v8939_v4 }
 0x230   :  { %1953 = vmatpush.msra.mxu0 %v5984_v25  ;;  %1916 = vmatpush.msrb.mxu3 %v6028_v30  ;;  %v6029_v25 = vld [vmem:[%s12791_s30 + $0xde8] sm:$0xff]  ;;  %v5974_v30 = vld [vmem:[%s12791_s30 + $0xc30] sm:$0xff]  ;;  %v6004_v4 = vld [vmem:[%s12791_s30 + $0xd20] sm:$0xff] }
 0x231   :  { %1878 = vmatpush.msrb.mxu2 %v5980_v32  ;;  %1992 = vmatpush.msra.mxu1 %v6029_v25  ;;  %v6026_v32 = vld [vmem:[%s12791_s30 + $0xdd0] sm:$0xff]  ;;  %v5975_v25 = vld [vmem:[%s12791_s30 + $0xc38] sm:$0xff] }
 0x232   :  { %1954 = vmatpush.msra.mxu0 %v5981_v1  ;;  %v6022_v1 = vld [vmem:[%s12791_s30 + $0xdb0] sm:$0xff] }
 0x233   :  { %1879 = vmatpush.msrb.mxu2 %v5977_v22  ;;  %1993 = vmatpush.msra.mxu1 %v6026_v32  ;;  %v5971_v22 = vld [vmem:[%s12791_s30 + $0xc18] sm:$0xff]  ;;  %v5972_v32 = vld [vmem:[%s12791_s30 + $0xc20] sm:$0xff] }
 0x234   :  { %v8871_v35 = vpop.f32.mrf.mxu0  ;;  %v8873_v21 = vpop.f32.mrf.mxu1 }
 0x235   :  { %12862 = vst [vmem:[#allocation79_spill] sm:$0xff] %v8871_v35  ;;  %v5978_v35 = vld [vmem:[%s12791_s30 + $0xc50] sm:$0xff]  ;;  %1880 = vmatpush.msrb.mxu2 %v5974_v30  ;;  %v6020_v30 = vld [vmem:[%s12791_s30 + $0xda0] sm:$0xff] }
 0x236   :  { %12863 = vst [vmem:[#allocation80_spill] sm:$0xff] %v8873_v21  ;;  %v6025_v21 = vld [vmem:[%s12791_s30 + $0xdc8] sm:$0xff]  ;;  %1955 = vmatpush.msra.mxu0 %v5978_v35  ;;  %v6019_v35 = vld [vmem:[%s12791_s30 + $0xd98] sm:$0xff] }
 0x237   :  { %1917 = vmatpush.msrb.mxu3 %v6025_v21  ;;  %v6023_v21 = vld [vmem:[%s12791_s30 + $0xdb8] sm:$0xff]  ;;  %1881 = vmatpush.msrb.mxu2 %v5971_v22  ;;  %v5969_v22 = vld [vmem:[%s12791_s30 + $0xc08] sm:$0xff] }
 0x238   :  { %1956 = vmatpush.msra.mxu0 %v5975_v25  ;;  %1994 = vmatpush.msra.mxu1 %v6023_v21  ;;  %v5968_v21 = vld [vmem:[%s12791_s30 + $0xc00] sm:$0xff] }
 0x239   :  { %1918 = vmatpush.msrb.mxu3 %v6022_v1  ;;  %1882 = vmatpush.msrb.mxu2 %v5968_v21  ;;  %v5962_v21 = vld [vmem:[%s12791_s30 + $0xbd0] sm:$0xff] }
 0x23a   :  { %1957 = vmatpush.msra.mxu0 %v5972_v32  ;;  %1995 = vmatpush.msra.mxu1 %v6020_v30  ;;  %v6017_v32 = vld [vmem:[%s12791_s30 + $0xd88] sm:$0xff] }
 0x23b   :  { %1919 = vmatpush.msrb.mxu3 %v6019_v35  ;;  %v8937_v35 = vpop.f32.mrf.mxu2  ;;  %v5965_v30 = vld [vmem:[%s12791_s30 + $0xbe8] sm:$0xff] }
 0x23c   :  { %v8924_v1 = vpop.f32.mrf.mxu0  ;;  %v8926_v25 = vpop.f32.mrf.mxu1  ;;  %12866 = vst [vmem:[#allocation83_spill] sm:$0xff] %v8937_v35  ;;  %1958 = vmatpush.msra.mxu0 %v5969_v22  ;;  %1996 = vmatpush.msra.mxu1 %v6017_v32  ;;  %v6010_v22 = vld [vmem:[%s12791_s30 + $0xd50] sm:$0xff]  ;;  %v5963_v32 = vld [vmem:[%s12791_s30 + $0xbd8] sm:$0xff] }
 0x23d   :  { %12864 = vst [vmem:[#allocation81_spill] sm:$0xff] %v8924_v1  ;;  %1920 = vmatpush.msrb.mxu3 %v6016_v15  ;;  %v5966_v1 = vld [vmem:[%s12791_s30 + $0xbf0] sm:$0xff]  ;;  %1883 = vmatpush.msrb.mxu2 %v5965_v30  ;;  %v5959_v30 = vld [vmem:[%s12791_s30 + $0xbb8] sm:$0xff] }
 0x23e   :  { %12865 = vst [vmem:[#allocation82_spill] sm:$0xff] %v8926_v25  ;;  %v6013_v25 = vld [vmem:[%s12791_s30 + $0xd68] sm:$0xff]  ;;  %v6014_v15 = vld [vmem:[%s12791_s30 + $0xd70] sm:$0xff]  ;;  %1959 = vmatpush.msra.mxu0 %v5966_v1  ;;  %v6007_v1 = vld [vmem:[%s12791_s30 + $0xd38] sm:$0xff] }
 0x23f   :  { %1921 = vmatpush.msrb.mxu3 %v6013_v25  ;;  %1997 = vmatpush.msra.mxu1 %v6014_v15  ;;  %v6011_v25 = vld [vmem:[%s12791_s30 + $0xd58] sm:$0xff]  ;;  %v5960_v15 = vld [vmem:[%s12791_s30 + $0xbc0] sm:$0xff] }
 0x240   :  { %1884 = vmatpush.msrb.mxu2 %v5962_v21  ;;  %1960 = vmatpush.msra.mxu0 %v5963_v32  ;;  %v6008_v21 = vld [vmem:[%s12791_s30 + $0xd40] sm:$0xff] }
 0x241   :  { %1922 = vmatpush.msrb.mxu3 %v6010_v22  ;;  %1998 = vmatpush.msra.mxu1 %v6011_v25  ;;  %v5956_v25 = vld [vmem:[%s12791_s30 + $0xba0] sm:$0xff] }
 0x242   :  { %1885 = vmatpush.msrb.mxu2 %v5959_v30  ;;  %1961 = vmatpush.msra.mxu0 %v5960_v15  ;;  %v5957_v30 = vld [vmem:[%s12791_s30 + $0xba8] sm:$0xff] }
 0x243   :  { %1923 = vmatpush.msrb.mxu3 %v6007_v1  ;;  %1999 = vmatpush.msra.mxu1 %v6008_v21  ;;  %v6005_v1 = vld [vmem:[%s12791_s30 + $0xd28] sm:$0xff] }
 0x244   :  { %v8980_v22 = vpop.f32.mrf.mxu0  ;;  %v8982_v32 = vpop.f32.mrf.mxu1  ;;  %1886 = vmatpush.msrb.mxu2 %v5956_v25  ;;  %1962 = vmatpush.msra.mxu0 %v5957_v30  ;;  %v5953_v15 = vld [vmem:[%s12791_s30 + $0xb88] sm:$0xff]  ;;  %v6002_v30 = vld [vmem:[%s12791_s30 + $0xd10] sm:$0xff] }
 0x245   :  { %12868 = vst [vmem:[#allocation85_spill] sm:$0xff] %v8980_v22  ;;  %1924 = vmatpush.msrb.mxu3 %v6004_v4  ;;  %2000 = vmatpush.msra.mxu1 %v6005_v1  ;;  %v6001_v21 = vld [vmem:[%s12791_s30 + $0xd08] sm:$0xff]  ;;  %v9005_v25 = vpop.f32.mrf.mxu2  ;;  %v9007_v4 = vpop.f32.mrf.mxu3  ;;  %v5950_v1 = vld [vmem:[%s12791_s30 + $0xb70] sm:$0xff] }
 0x246   :  { %12869 = vst [vmem:[#allocation86_spill] sm:$0xff] %v8982_v32  ;;  %v5954_v32 = vld [vmem:[%s12791_s30 + $0xb90] sm:$0xff]  ;;  %1887 = vmatpush.msrb.mxu2 %v5953_v15  ;;  %v5999_v15 = vld [vmem:[%s12791_s30 + $0xcf8] sm:$0xff] }
 0x247   :  { %12870 = vst [vmem:[#allocation87_spill] sm:$0xff] %v9005_v25  ;;  %1925 = vmatpush.msrb.mxu3 %v6001_v21  ;;  %v5998_v22 = vld [vmem:[%s12791_s30 + $0xcf0] sm:$0xff]  ;;  %1963 = vmatpush.msra.mxu0 %v5954_v32  ;;  %v5947_v21 = vld [vmem:[%s12791_s30 + $0xb58] sm:$0xff]  ;;  %v5992_v25 = vld [vmem:[%s12791_s30 + $0xcc0] sm:$0xff] }
 0x248   :  { %12871 = vst [vmem:[#allocation88_spill] sm:$0xff] %v9007_v4  ;;  %2001 = vmatpush.msra.mxu1 %v6002_v30  ;;  %v5951_v4 = vld [vmem:[%s12791_s30 + $0xb78] sm:$0xff]  ;;  %1888 = vmatpush.msrb.mxu2 %v5950_v1  ;;  %v5948_v30 = vld [vmem:[%s12791_s30 + $0xb60] sm:$0xff] }
 0x249   :  { %1926 = vmatpush.msrb.mxu3 %v5998_v22  ;;  %1964 = vmatpush.msra.mxu0 %v5951_v4  ;;  %v5995_v32 = vld [vmem:[%s12791_s30 + $0xcd8] sm:$0xff]  ;;  %v5996_v22 = vld [vmem:[%s12791_s30 + $0xce0] sm:$0xff] }
 0x24a   :  { %2002 = vmatpush.msra.mxu1 %v5999_v15  ;;  %1889 = vmatpush.msrb.mxu2 %v5947_v21  ;;  %v5944_v15 = vld [vmem:[%s12791_s30 + $0xb40] sm:$0xff]  ;;  %v5945_v21 = vld [vmem:[%s12791_s30 + $0xb48] sm:$0xff] }
 0x24b   :  { %1927 = vmatpush.msrb.mxu3 %v5995_v32  ;;  %1965 = vmatpush.msra.mxu0 %v5948_v30  ;;  %v5993_v32 = vld [vmem:[%s12791_s30 + $0xcc8] sm:$0xff] }
 0x24c   :  { %v9036_v4 = vpop.f32.mrf.mxu0  ;;  %v9038_v1 = vpop.f32.mrf.mxu1  ;;  %2003 = vmatpush.msra.mxu1 %v5996_v22  ;;  %1890 = vmatpush.msrb.mxu2 %v5944_v15 }
 0x24d   :  { %12872 = vst [vmem:[#allocation89_spill] sm:$0xff] %v9036_v4  ;;  %1928 = vmatpush.msrb.mxu3 %v5992_v25  ;;  %1966 = vmatpush.msra.mxu0 %v5945_v21  ;;  %v9052_v30 = vpop.f32.mrf.mxu2  ;;  %v9054_v22 = vpop.f32.mrf.mxu3 }
 0x24e   :  { %12873 = vst [vmem:[#allocation90_spill] sm:$0xff] %v9038_v1  ;;  %2004 = vmatpush.msra.mxu1 %v5993_v32 }
 0x24f   :  { %12874 = vst [vmem:[#allocation91_spill] sm:$0xff] %v9052_v30 }
 0x250   :  { %12875 = vst [vmem:[#allocation92_spill] sm:$0xff] %v9054_v22 }
 0x254   :  { %v9056_v1 = vpop.f32.mrf.mxu0  ;;  %v9058_v4 = vpop.f32.mrf.mxu1 }
 0x255   :  { %12876 = vst [vmem:[#allocation93_spill] sm:$0xff] %v9056_v1  ;;  %v9060_v35 = vpop.f32.mrf.mxu2  ;;  %v9062_v33 = vpop.f32.mrf.mxu3  ;;  %v6103_v1 = vld [vmem:[%s12791_s30 + $0xf78] sm:$0xff] }
 0x256   :  { %12877 = vst [vmem:[#allocation94_spill] sm:$0xff] %v9058_v4  ;;  %v5991_v4 = vld [vmem:[%s12791_s30 + $0xcb8] sm:$0xff]  ;;  %2203 = vmatpush.msrb.mxu0 %v6103_v1 }
 0x257   :  { %12878 = vst [vmem:[#allocation95_spill] sm:$0xff] %v9060_v35  ;;  %2027 = vmatpush.msra.mxu2 %v5991_v4  ;;  %v6145_v4 = vld [vmem:[%s12791_s30 + $0x10c8] sm:$0x1f]  ;;  %v6030_v35 = vld [vmem:[%s12791_s30 + $0xdf0] sm:$0xff] }
 0x258   :  { %12879 = vst [vmem:[#allocation96_spill] sm:$0xff] %v9062_v33  ;;  %v6097_v33 = vld [vmem:[%s12791_s30 + $0xf48] sm:$0xff]  ;;  %6148 = vmatpush.msk.msrb.mxu1 %vm588_vm2, %v6145_v4 }
 0x25c   :  { %v9064_v15 = vpop.f32.mrf.mxu0  ;;  %v9066_v25 = vpop.f32.mrf.mxu1 }
 0x25d   :  { %12880 = vst [vmem:[#allocation97_spill] sm:$0xff] %v9064_v15  ;;  %v9072_v32 = vpop.f32.mrf.mxu2  ;;  %v9074_v30 = vpop.f32.mrf.mxu3  ;;  %v5985_v15 = vld [vmem:[%s12791_s30 + $0xc88] sm:$0xff] }
 0x25e   :  { %12881 = vst [vmem:[#allocation98_spill] sm:$0xff] %v9066_v25  ;;  %v5988_v25 = vld [vmem:[%s12791_s30 + $0xca0] sm:$0xff] }
 0x25f   :  { %2028 = vmatpush.msra.mxu2 %v5988_v25  ;;  %v5979_v25 = vld [vmem:[%s12791_s30 + $0xc58] sm:$0xff] }
 0x261   :  { %2029 = vmatpush.msra.mxu2 %v5985_v15  ;;  %v6142_v15 = vld [vmem:[%s12791_s30 + $0x10b0] sm:$0xff] }
 0x262   :  { %2244 = vmatpush.msrb.mxu1 %v6142_v15 }
 0x264   :  { %v9068_v31 = vpop.f32.mrf.mxu0  ;;  %v9070_v21 = vpop.f32.mrf.mxu1  ;;  %2245 = vmatpush.msrb.mxu1 %v6139_v53  ;;  %v6085_v53 = vld [vmem:[%s12791_s30 + $0xee8] sm:$0xff] }
 0x265   :  { %12882 = vst [vmem:[#allocation99_spill] sm:$0xff] %v9068_v31  ;;  %v6033_v31 = vld [vmem:[%s12791_s30 + $0xe08] sm:$0x1f]  ;;  %v9130_v4 = vpop.f32.mrf.mxu2  ;;  %v9132_v10 = vpop.f32.mrf.mxu3 }
 0x266   :  { %12883 = vst [vmem:[#allocation100_spill] sm:$0xff] %v9070_v21  ;;  %v6100_v21 = vld [vmem:[%s12791_s30 + $0xf60] sm:$0xff]  ;;  %6050 = vmatpush.msk.msra.mxu3 %vm588_vm2, %v6033_v31  ;;  %v5982_v31 = vld [vmem:[%s12791_s30 + $0xc70] sm:$0xff] }
 0x267   :  { %2204 = vmatpush.msrb.mxu0 %v6100_v21  ;;  %v6027_v21 = vld [vmem:[%s12791_s30 + $0xdd8] sm:$0xff]  ;;  %2030 = vmatpush.msra.mxu2 %v5982_v31  ;;  %v6136_v31 = vld [vmem:[%s12791_s30 + $0x1080] sm:$0xff] }
 0x268   :  { %2068 = vmatpush.msra.mxu3 %v6030_v35  ;;  %v6088_v35 = vld [vmem:[%s12791_s30 + $0xf00] sm:$0xff]  ;;  %2246 = vmatpush.msrb.mxu1 %v6136_v31  ;;  %v6130_v31 = vld [vmem:[%s12791_s30 + $0x1050] sm:$0xff] }
 0x269   :  { %2205 = vmatpush.msrb.mxu0 %v6097_v33  ;;  %v6094_v33 = vld [vmem:[%s12791_s30 + $0xf30] sm:$0xff]  ;;  %2031 = vmatpush.msra.mxu2 %v5979_v25  ;;  %v5973_v25 = vld [vmem:[%s12791_s30 + $0xc28] sm:$0xff] }
 0x26a   :  { %2069 = vmatpush.msra.mxu3 %v6027_v21  ;;  %v6021_v21 = vld [vmem:[%s12791_s30 + $0xda8] sm:$0xff] }
 0x26b   :  { %2206 = vmatpush.msrb.mxu0 %v6094_v33  ;;  %2032 = vmatpush.msra.mxu2 %v5976_v2  ;;  %v6133_v2 = vld [vmem:[%s12791_s30 + $0x1068] sm:$0xff] }
 0x26c   :  { %v9102_v1 = vpop.f32.mrf.mxu0  ;;  %v9104_v22 = vpop.f32.mrf.mxu1  ;;  %2070 = vmatpush.msra.mxu3 %v6024_v5  ;;  %v5970_v5 = vld [vmem:[%s12791_s30 + $0xc10] sm:$0xff]  ;;  %2247 = vmatpush.msrb.mxu1 %v6133_v2 }
 0x26d   :  { %1891 = vmatmul.f32.vlgmr.msrb.gmra.mxu2 %v9102_v1  ;;  %6035 = vmatmul.msk.f32.vlgmr.msrb.gmra.mxu3 %vm566_vm3, %v9104_v22 }
 0x26e   :  { %1967 = vmatmul.f32.vlgmr.msra.gmra.mxu0 %v9102_v1  ;;  %6043 = vmatmul.msk.f32.vlgmr.msra.gmra.mxu1 %vm566_vm3, %v9104_v22 }
 0x26f   :  { %2207 = vmatpush.msrb.mxu0 %v6091_v16  ;;  %v6018_v16 = vld [vmem:[%s12791_s30 + $0xd90] sm:$0xff]  ;;  %2033 = vmatpush.msra.mxu2 %v5973_v25  ;;  %v9192_v25 = vpop.f32.mrf.mxu2 }
 0x270   :  { %2071 = vmatpush.msra.mxu3 %v6021_v21  ;;  %v9194_v21 = vpop.f32.mrf.mxu3  ;;  %2248 = vmatpush.msrb.mxu1 %v6130_v31  ;;  %v6073_v31 = vld [vmem:[%s12791_s30 + $0xe88] sm:$0xff] }
 0x271   :  { %2208 = vmatpush.msrb.mxu0 %v6088_v35  ;;  %v6082_v35 = vld [vmem:[%s12791_s30 + $0xed0] sm:$0xff]  ;;  %2034 = vmatpush.msra.mxu2 %v5970_v5  ;;  %v5964_v5 = vld [vmem:[%s12791_s30 + $0xbe0] sm:$0xff] }
 0x272   :  { %2072 = vmatpush.msra.mxu3 %v6018_v16  ;;  %v6012_v16 = vld [vmem:[%s12791_s30 + $0xd60] sm:$0xff] }
 0x273   :  { %2209 = vmatpush.msrb.mxu0 %v6085_v53  ;;  %v6127_v53 = vld [vmem:[%s12791_s30 + $0x1038] sm:$0xff]  ;;  %2035 = vmatpush.msra.mxu2 %v5967_v3  ;;  %v5961_v3 = vld [vmem:[%s12791_s30 + $0xbc8] sm:$0xff] }
 0x274   :  { %v9152_v33 = vpop.f32.mrf.mxu0  ;;  %v9154_v15 = vpop.f32.mrf.mxu1  ;;  %2073 = vmatpush.msra.mxu3 %v6015_v13  ;;  %2249 = vmatpush.msrb.mxu1 %v6127_v53  ;;  %v6076_v13 = vld [vmem:[%s12791_s30 + $0xea0] sm:$0xff]  ;;  %v6121_v53 = vld [vmem:[%s12791_s30 + $0x1008] sm:$0xff] }
 0x275   :  { %1894 = vmatmul.f32.gmra.mxu2 %v9152_v33  ;;  %6036 = vmatmul.msk.f32.gmra.mxu3 %vm566_vm3, %v9154_v15 }
 0x276   :  { %1970 = vmatmul.f32.gmra.mxu0 %v9152_v33  ;;  %6044 = vmatmul.msk.f32.gmra.mxu1 %vm566_vm3, %v9154_v15 }
 0x277   :  { %2210 = vmatpush.msrb.mxu0 %v6082_v35  ;;  %v6009_v35 = vld [vmem:[%s12791_s30 + $0xd48] sm:$0xff]  ;;  %2036 = vmatpush.msra.mxu2 %v5964_v5  ;;  %v6070_v5 = vld [vmem:[%s12791_s30 + $0xe70] sm:$0xff] }
 0x278   :  { %2074 = vmatpush.msra.mxu3 %v6012_v16  ;;  %v6118_v16 = vld [vmem:[%s12791_s30 + $0xff0] sm:$0xff] }
 0x279   :  { %2211 = vmatpush.msrb.mxu0 %v6079_v12  ;;  %v6124_v12 = vld [vmem:[%s12791_s30 + $0x1020] sm:$0xff]  ;;  %2037 = vmatpush.msra.mxu2 %v5961_v3 }
 0x27a   :  { %2250 = vmatpush.msrb.mxu1 %v6124_v12  ;;  %2075 = vmatpush.msra.mxu3 %v6009_v35  ;;  %v9250_v12 = vpop.f32.mrf.mxu3  ;;  %v5955_v35 = vld [vmem:[%s12791_s30 + $0xb98] sm:$0xff] }
 0x27b   :  { %2212 = vmatpush.msrb.mxu0 %v6076_v13  ;;  %v9248_v13 = vpop.f32.mrf.mxu2  ;;  %2038 = vmatpush.msra.mxu2 %v5958_v36  ;;  %v6115_v36 = vld [vmem:[%s12791_s30 + $0xfd8] sm:$0xff] }
 0x27c   :  { %v9202_v2 = vpop.f32.mrf.mxu0  ;;  %v9204_v59 = vpop.f32.mrf.mxu1  ;;  %2251 = vmatpush.msrb.mxu1 %v6121_v53  ;;  %2076 = vmatpush.msra.mxu3 %v6006_v27  ;;  %v6067_v27 = vld [vmem:[%s12791_s30 + $0xe58] sm:$0xff]  ;;  %v5952_v53 = vld [vmem:[%s12791_s30 + $0xb80] sm:$0xff] }
 0x27d   :  { %1897 = vmatmul.f32.gmra.mxu2 %v9202_v2  ;;  %6037 = vmatmul.msk.f32.gmra.mxu3 %vm566_vm3, %v9204_v59 }
 0x27e   :  { %1973 = vmatmul.f32.gmra.mxu0 %v9202_v2  ;;  %6045 = vmatmul.msk.f32.gmra.mxu1 %vm566_vm3, %v9204_v59 }
 0x27f   :  { %2213 = vmatpush.msrb.mxu0 %v6073_v31  ;;  %2252 = vmatpush.msrb.mxu1 %v6118_v16  ;;  %v6003_v31 = vld [vmem:[%s12791_s30 + $0xd18] sm:$0xff]  ;;  %v6064_v16 = vld [vmem:[%s12791_s30 + $0xe40] sm:$0xff] }
 0x280   :  { %2039 = vmatpush.msra.mxu2 %v5955_v35  ;;  %2077 = vmatpush.msra.mxu3 %v6003_v31  ;;  %v6061_v35 = vld [vmem:[%s12791_s30 + $0xe28] sm:$0xff] }
 0x281   :  { %2214 = vmatpush.msrb.mxu0 %v6070_v5  ;;  %v6000_v5 = vld [vmem:[%s12791_s30 + $0xd00] sm:$0xff]  ;;  %2253 = vmatpush.msrb.mxu1 %v6115_v36  ;;  %v6109_v31 = vld [vmem:[%s12791_s30 + $0xfa8] sm:$0xff] }
 0x282   :  { %2040 = vmatpush.msra.mxu2 %v5952_v53  ;;  %2078 = vmatpush.msra.mxu3 %v6000_v5  ;;  %v5946_v53 = vld [vmem:[%s12791_s30 + $0xb50] sm:$0xff] }
 0x283   :  { %2215 = vmatpush.msrb.mxu0 %v6067_v27  ;;  %2254 = vmatpush.msrb.mxu1 %v6112_v34  ;;  %v5994_v5 = vld [vmem:[%s12791_s30 + $0xcd0] sm:$0xff]  ;;  %v9317_v34 = vpop.f32.mrf.mxu2 }
 0x284   :  { %v9252_v26 = vpop.f32.mrf.mxu0  ;;  %v9254_v3 = vpop.f32.mrf.mxu1  ;;  %2041 = vmatpush.msra.mxu2 %v5949_v20  ;;  %2079 = vmatpush.msra.mxu3 %v5997_v43  ;;  %v6058_v43 = vld [vmem:[%s12791_s30 + $0xe10] sm:$0xff]  ;;  %12884 = vst [vmem:[#allocation101_spill] sm:$0xff] %v9317_v34 }
 0x285   :  { %1900 = vmatmul.f32.gmra.mxu2 %v9252_v26  ;;  %6038 = vmatmul.msk.f32.gmra.mxu3 %vm566_vm3, %v9254_v3  ;;  %v6106_v20 = vld [vmem:[%s12791_s30 + $0xf90] sm:$0xff] }
 0x286   :  { %1976 = vmatmul.f32.gmra.mxu0 %v9252_v26  ;;  %6046 = vmatmul.msk.f32.gmra.mxu1 %vm566_vm3, %v9254_v3  ;;  %v6062_v34 = vld [vmem:[%s12791_s30 + $0xe30] sm:$0xff] }
 0x287   :  { %2216 = vmatpush.msrb.mxu0 %v6064_v16  ;;  %2255 = vmatpush.msrb.mxu1 %v6109_v31  ;;  %v9319_v16 = vpop.f32.mrf.mxu3 }
 0x288   :  { %12885 = vst [vmem:[#allocation102_spill] sm:$0xff] %v9319_v16  ;;  %2042 = vmatpush.msra.mxu2 %v5946_v53  ;;  %2080 = vmatpush.msra.mxu3 %v5994_v5  ;;  %v6146_v16 = vld [vmem:[%s12791_s30 + $0x10d0] sm:$0x1f] }
 0x289   :  { %2217 = vmatpush.msrb.mxu0 %v6061_v35  ;;  %2256 = vmatpush.msrb.mxu1 %v6106_v20  ;;  %v6104_v20 = vld [vmem:[%s12791_s30 + $0xf80] sm:$0xff] }
 0x28a   :  { %2279 = vmatpush.msrb.mxu2 %v6104_v20  ;;  %6156 = vmatpush.msk.msrb.mxu3 %vm588_vm2, %v6146_v16  ;;  %v6143_v20 = vld [vmem:[%s12791_s30 + $0x10b8] sm:$0xff] }
 0x28b   :  { %2218 = vmatpush.msrb.mxu0 %v6058_v43  ;;  %v9334_v49 = vpop.f32.mrf.mxu2 }
 0x28c   :  { %v9298_v27 = vpop.f32.mrf.mxu0  ;;  %v9300_v36 = vpop.f32.mrf.mxu1  ;;  %2280 = vmatpush.msrb.mxu2 %v6101_v8  ;;  %2320 = vmatpush.msrb.mxu3 %v6143_v20  ;;  %v6095_v8 = vld [vmem:[%s12791_s30 + $0xf38] sm:$0xff]  ;;  %v6137_v20 = vld [vmem:[%s12791_s30 + $0x1088] sm:$0xff] }
 0x28d   :  { %1903 = vmatmul.f32.gmra.mxu2 %v9298_v27  ;;  %6039 = vmatmul.msk.f32.gmra.mxu3 %vm566_vm3, %v9300_v36 }
 0x28e   :  { %1979 = vmatmul.f32.gmra.mxu0 %v9298_v27  ;;  %6047 = vmatmul.msk.f32.gmra.mxu1 %vm566_vm3, %v9300_v36 }
 0x28f   :  { %v9336_v53 = vpop.f32.mrf.mxu3  ;;  %2355 = vmatpush.msra.mxu0 %v6105_v9  ;;  %v6147_v9 = vld [vmem:[%s12791_s30 + $0x10d8] sm:$0x1f]  ;;  %2281 = vmatpush.msrb.mxu2 %v6098_v0  ;;  %v6140_v0 = vld [vmem:[%s12791_s30 + $0x10a0] sm:$0xff] }
 0x290   :  { %12886 = vst [vmem:[#allocation103_spill] sm:$0xff] %v9336_v53  ;;  %v6144_v53 = vld [vmem:[%s12791_s30 + $0x10c0] sm:$0xff]  ;;  %6164 = vmatpush.msk.msra.mxu1 %vm588_vm2, %v6147_v9  ;;  %v6141_v9 = vld [vmem:[%s12791_s30 + $0x10a8] sm:$0xff]  ;;  %2321 = vmatpush.msrb.mxu3 %v6140_v0  ;;  %v6135_v0 = vld [vmem:[%s12791_s30 + $0x1078] sm:$0xff] }
 0x291   :  { %2356 = vmatpush.msra.mxu0 %v6102_v60  ;;  %v6096_v60 = vld [vmem:[%s12791_s30 + $0xf40] sm:$0xff]  ;;  %2282 = vmatpush.msrb.mxu2 %v6095_v8  ;;  %v6138_v8 = vld [vmem:[%s12791_s30 + $0x1090] sm:$0xff] }
 0x292   :  { %2396 = vmatpush.msra.mxu1 %v6144_v53  ;;  %v6093_v53 = vld [vmem:[%s12791_s30 + $0xf28] sm:$0xff]  ;;  %2322 = vmatpush.msrb.mxu3 %v6137_v20  ;;  %v6083_v20 = vld [vmem:[%s12791_s30 + $0xed8] sm:$0xff] }
 0x293   :  { %v9379_v44 = vpop.f32.mrf.mxu2  ;;  %2357 = vmatpush.msra.mxu0 %v6099_v17  ;;  %v6092_v17 = vld [vmem:[%s12791_s30 + $0xf20] sm:$0xff] }
 0x294   :  { %v9324_v35 = vpop.f32.mrf.mxu0  ;;  %v9326_v31 = vpop.f32.mrf.mxu1  ;;  %12887 = vst [vmem:[#allocation104_spill] sm:$0xff] %v9379_v44  ;;  %2397 = vmatpush.msra.mxu1 %v6141_v9  ;;  %v6090_v44 = vld [vmem:[%s12791_s30 + $0xf10] sm:$0xff]  ;;  %2283 = vmatpush.msrb.mxu2 %v6092_v17 }
 0x295   :  { %1906 = vmatmul.f32.gmra.mxu2 %v9324_v35  ;;  %6040 = vmatmul.msk.f32.gmra.mxu3 %vm566_vm3, %v9326_v31  ;;  %v6086_v17 = vld [vmem:[%s12791_s30 + $0xef0] sm:$0xff] }
 0x296   :  { %1982 = vmatmul.f32.gmra.mxu0 %v9324_v35  ;;  %6048 = vmatmul.msk.f32.gmra.mxu1 %vm566_vm3, %v9326_v31 }
 0x297   :  { %v9381_v16 = vpop.f32.mrf.mxu3  ;;  %2358 = vmatpush.msra.mxu0 %v6096_v60  ;;  %v6134_v60 = vld [vmem:[%s12791_s30 + $0x1070] sm:$0xff]  ;;  %2398 = vmatpush.msra.mxu1 %v6138_v8  ;;  %v6084_v8 = vld [vmem:[%s12791_s30 + $0xee0] sm:$0xff] }
 0x298   :  { %12888 = vst [vmem:[#allocation105_spill] sm:$0xff] %v9381_v16  ;;  %v6089_v16 = vld [vmem:[%s12791_s30 + $0xf08] sm:$0xff]  ;;  %2323 = vmatpush.msrb.mxu3 %v6134_v60  ;;  %v6128_v60 = vld [vmem:[%s12791_s30 + $0x1040] sm:$0xff] }
 0x299   :  { %2359 = vmatpush.msra.mxu0 %v6093_v53  ;;  %2284 = vmatpush.msrb.mxu2 %v6089_v16  ;;  %v6087_v53 = vld [vmem:[%s12791_s30 + $0xef8] sm:$0xff]  ;;  %v6132_v16 = vld [vmem:[%s12791_s30 + $0x1060] sm:$0xff] }
 0x29a   :  { %2399 = vmatpush.msra.mxu1 %v6135_v0  ;;  %v6129_v0 = vld [vmem:[%s12791_s30 + $0x1048] sm:$0xff] }
 0x29b   :  { %2360 = vmatpush.msra.mxu0 %v6090_v44  ;;  %v9426_v9 = vpop.f32.mrf.mxu2  ;;  %v6131_v44 = vld [vmem:[%s12791_s30 + $0x1058] sm:$0xff]  ;;  %2285 = vmatpush.msrb.mxu2 %v6086_v17  ;;  %v6125_v17 = vld [vmem:[%s12791_s30 + $0x1028] sm:$0xff] }
 0x29c   :  { %v9338_v5 = vpop.f32.mrf.mxu0  ;;  %v9340_v43 = vpop.f32.mrf.mxu1  ;;  %12889 = vst [vmem:[#allocation106_spill] sm:$0xff] %v9426_v9  ;;  %2324 = vmatpush.msrb.mxu3 %v6131_v44  ;;  %2400 = vmatpush.msra.mxu1 %v6132_v16  ;;  %v6081_v9 = vld [vmem:[%s12791_s30 + $0xec8] sm:$0xff]  ;;  %v6078_v16 = vld [vmem:[%s12791_s30 + $0xeb0] sm:$0xff] }
 0x29d   :  { %1909 = vmatmul.f32.gmra.mxu2 %v9338_v5  ;;  %6041 = vmatmul.msk.f32.gmra.mxu3 %vm566_vm3, %v9340_v43  ;;  %v6077_v44 = vld [vmem:[%s12791_s30 + $0xea8] sm:$0xff] }
 0x29e   :  { %1985 = vmatmul.f32.gmra.mxu0 %v9338_v5  ;;  %6049 = vmatmul.msk.f32.gmra.mxu1 %vm566_vm3, %v9340_v43 }
 0x29f   :  { %v9428_v57 = vpop.f32.mrf.mxu3  ;;  %2361 = vmatpush.msra.mxu0 %v6087_v53  ;;  %2286 = vmatpush.msrb.mxu2 %v6083_v20  ;;  %v6126_v53 = vld [vmem:[%s12791_s30 + $0x1030] sm:$0xff] }
 0x2a0   :  { %12890 = vst [vmem:[#allocation107_spill] sm:$0xff] %v9428_v57  ;;  %v6080_v57 = vld [vmem:[%s12791_s30 + $0xec0] sm:$0xff]  ;;  %2325 = vmatpush.msrb.mxu3 %v6128_v60  ;;  %2401 = vmatpush.msra.mxu1 %v6129_v0  ;;  %v6074_v60 = vld [vmem:[%s12791_s30 + $0xe90] sm:$0xff]  ;;  %v6075_v0 = vld [vmem:[%s12791_s30 + $0xe98] sm:$0xff] }
 0x2a1   :  { %2362 = vmatpush.msra.mxu0 %v6084_v8  ;;  %2287 = vmatpush.msrb.mxu2 %v6080_v57  ;;  %v6122_v57 = vld [vmem:[%s12791_s30 + $0x1010] sm:$0xff] }
 0x2a2   :  { %2326 = vmatpush.msrb.mxu3 %v6125_v17  ;;  %2402 = vmatpush.msra.mxu1 %v6126_v53  ;;  %v6119_v17 = vld [vmem:[%s12791_s30 + $0xff8] sm:$0xff]  ;;  %v6120_v53 = vld [vmem:[%s12791_s30 + $0x1000] sm:$0xff] }
 0x2a3   :  { %2363 = vmatpush.msra.mxu0 %v6081_v9  ;;  %v6123_v9 = vld [vmem:[%s12791_s30 + $0x1018] sm:$0xff]  ;;  %v9487_v20 = vpop.f32.mrf.mxu2  ;;  %2288 = vmatpush.msrb.mxu2 %v6077_v44  ;;  %v6116_v44 = vld [vmem:[%s12791_s30 + $0xfe0] sm:$0xff] }
 0x2a4   :  { %12891 = vst [vmem:[#allocation108_spill] sm:$0xff] %v9487_v20  ;;  %2327 = vmatpush.msrb.mxu3 %v6122_v57  ;;  %2403 = vmatpush.msra.mxu1 %v6123_v9  ;;  %v6072_v20 = vld [vmem:[%s12791_s30 + $0xe80] sm:$0xff]  ;;  %v6069_v9 = vld [vmem:[%s12791_s30 + $0xe68] sm:$0xff] }
 0x2a5   :  { %2043 = vmatmul.f32.vlgmr.msra.gmra.mxu2 %v9102_v1  ;;  %6051 = vmatmul.msk.f32.vlgmr.msra.gmra.mxu3 %vm566_vm3, %v9104_v22  ;;  %v6068_v57 = vld [vmem:[%s12791_s30 + $0xe60] sm:$0xff] }
 0x2a6   :  { %2219 = vmatmul.f32.vlgmr.msrb.gmra.mxu0 %v9102_v1  ;;  %6149 = vmatmul.msk.f32.vlgmr.msrb.gmra.mxu1 %vm566_vm3, %v9104_v22 }
 0x2a7   :  { %v9489_v8 = vpop.f32.mrf.mxu3  ;;  %2364 = vmatpush.msra.mxu0 %v6078_v16  ;;  %2289 = vmatpush.msrb.mxu2 %v6074_v60  ;;  %v6117_v16 = vld [vmem:[%s12791_s30 + $0xfe8] sm:$0xff] }
 0x2a8   :  { %12892 = vst [vmem:[#allocation109_spill] sm:$0xff] %v9489_v8  ;;  %v6071_v8 = vld [vmem:[%s12791_s30 + $0xe78] sm:$0xff]  ;;  %2328 = vmatpush.msrb.mxu3 %v6119_v17  ;;  %2404 = vmatpush.msra.mxu1 %v6120_v53  ;;  %v6065_v60 = vld [vmem:[%s12791_s30 + $0xe48] sm:$0xff]  ;;  %v6110_v17 = vld [vmem:[%s12791_s30 + $0xfb0] sm:$0xff] }
 0x2a9   :  { %2365 = vmatpush.msra.mxu0 %v6075_v0  ;;  %2290 = vmatpush.msrb.mxu2 %v6071_v8  ;;  %v6113_v8 = vld [vmem:[%s12791_s30 + $0xfc8] sm:$0xff]  ;;  %v6066_v0 = vld [vmem:[%s12791_s30 + $0xe50] sm:$0xff]  ;;  %v6111_v53 = vld [vmem:[%s12791_s30 + $0xfb8] sm:$0xff] }
 0x2aa   :  { %2329 = vmatpush.msrb.mxu3 %v6116_v44  ;;  %2405 = vmatpush.msra.mxu1 %v6117_v16 }
 0x2ab   :  { %2366 = vmatpush.msra.mxu0 %v6072_v20  ;;  %v6114_v20 = vld [vmem:[%s12791_s30 + $0xfd0] sm:$0xff]  ;;  %2291 = vmatpush.msrb.mxu2 %v6068_v57  ;;  %v9548_v44 = vpop.f32.mrf.mxu2  ;;  %v6063_v57 = vld [vmem:[%s12791_s30 + $0xe38] sm:$0xff] }
 0x2ac   :  { %2330 = vmatpush.msrb.mxu3 %v6113_v8  ;;  %2406 = vmatpush.msra.mxu1 %v6114_v20  ;;  %v6059_v8 = vld [vmem:[%s12791_s30 + $0xe18] sm:$0xff]  ;;  %v6060_v20 = vld [vmem:[%s12791_s30 + $0xe20] sm:$0xff] }
 0x2ad   :  { %2046 = vmatmul.f32.gmra.mxu2 %v9152_v33  ;;  %6052 = vmatmul.msk.f32.gmra.mxu3 %vm566_vm3, %v9154_v15 }
 0x2ae   :  { %2222 = vmatmul.f32.gmra.mxu0 %v9152_v33  ;;  %6150 = vmatmul.msk.f32.gmra.mxu1 %vm566_vm3, %v9154_v15 }
 0x2af   :  { %2367 = vmatpush.msra.mxu0 %v6069_v9  ;;  %v9550_v16 = vpop.f32.mrf.mxu3  ;;  %2292 = vmatpush.msrb.mxu2 %v6065_v60  ;;  %v6107_v9 = vld [vmem:[%s12791_s30 + $0xf98] sm:$0xff] }
 0x2b0   :  { %12893 = vst [vmem:[#allocation110_spill] sm:$0xff] %v9550_v16  ;;  %v6108_v16 = vld [vmem:[%s12791_s30 + $0xfa0] sm:$0xff]  ;;  %2331 = vmatpush.msrb.mxu3 %v6110_v17  ;;  %2407 = vmatpush.msra.mxu1 %v6111_v53 }
 0x2b1   :  { %2368 = vmatpush.msra.mxu0 %v6066_v0  ;;  %2293 = vmatpush.msrb.mxu2 %v6062_v34 }
 0x2b2   :  { %2332 = vmatpush.msrb.mxu3 %v6107_v9  ;;  %2408 = vmatpush.msra.mxu1 %v6108_v16 }
 0x2b3   :  { %2369 = vmatpush.msra.mxu0 %v6063_v57  ;;  %2294 = vmatpush.msrb.mxu2 %v6059_v8  ;;  %v9576_v34 = vpop.f32.mrf.mxu2 }
 0x2b5   :  { %2049 = vmatmul.f32.gmra.mxu2 %v9202_v2  ;;  %6053 = vmatmul.msk.f32.gmra.mxu3 %vm566_vm3, %v9204_v59 }
 0x2b6   :  { %2225 = vmatmul.f32.gmra.mxu0 %v9202_v2  ;;  %6151 = vmatmul.msk.f32.gmra.mxu1 %vm566_vm3, %v9204_v59 }
 0x2b7   :  { %2370 = vmatpush.msra.mxu0 %v6060_v20  ;;  %v9578_v60 = vpop.f32.mrf.mxu3 }
 0x2b8   :  { %12894 = vst [vmem:[#allocation111_spill] sm:$0xff] %v9578_v60 }
 0x2bb   :  { %v9586_v0 = vpop.f32.mrf.mxu2 }
 0x2bd   :  { %2052 = vmatmul.f32.gmra.mxu2 %v9252_v26  ;;  %6054 = vmatmul.msk.f32.gmra.mxu3 %vm566_vm3, %v9254_v3 }
 0x2be   :  { %2228 = vmatmul.f32.gmra.mxu0 %v9252_v26  ;;  %6152 = vmatmul.msk.f32.gmra.mxu1 %vm566_vm3, %v9254_v3 }
 0x2bf   :  { %v9588_v17 = vpop.f32.mrf.mxu3 }
 0x2c0   :  { %12895 = vst [vmem:[#allocation112_spill] sm:$0xff] %v9588_v17 }
 0x2c3   :  { %v9599_v53 = vpop.f32.mrf.mxu2 }
 0x2c4   :  { %12896 = vst [vmem:[#allocation113_spill] sm:$0xff] %v9599_v53 }
 0x2c5   :  { %2055 = vmatmul.f32.gmra.mxu2 %v9298_v27  ;;  %6055 = vmatmul.msk.f32.gmra.mxu3 %vm566_vm3, %v9300_v36 }
 0x2c6   :  { %2231 = vmatmul.f32.gmra.mxu0 %v9298_v27  ;;  %6153 = vmatmul.msk.f32.gmra.mxu1 %vm566_vm3, %v9300_v36 }
 0x2c7   :  { %v9601_v16 = vpop.f32.mrf.mxu3 }
 0x2c8   :  { %12897 = vst [vmem:[#allocation114_spill] sm:$0xff] %v9601_v16 }
 0x2cb   :  { %v9612_v57 = vpop.f32.mrf.mxu2 }
 0x2cc   :  { %12898 = vst [vmem:[#allocation115_spill] sm:$0xff] %v9612_v57  ;;  %v1439_v57 = vadd.f32 %v9072_v32, %v8269_v48 }
 0x2cd   :  { %2058 = vmatmul.f32.gmra.mxu2 %v9324_v35  ;;  %6056 = vmatmul.msk.f32.gmra.mxu3 %vm566_vm3, %v9326_v31 }
 0x2ce   :  { %2234 = vmatmul.f32.gmra.mxu0 %v9324_v35  ;;  %6154 = vmatmul.msk.f32.gmra.mxu1 %vm566_vm3, %v9326_v31  ;;  %v1477_v32 = vadd.f32 %v9074_v30, %v1439_v57 }
 0x2cf   :  { %v9614_v9 = vpop.f32.mrf.mxu3 }
 0x2d0   :  { %12899 = vst [vmem:[#allocation116_spill] sm:$0xff] %v9614_v9 }
 0x2d5   :  { %2061 = vmatmul.f32.gmra.mxu2 %v9338_v5  ;;  %6057 = vmatmul.msk.f32.gmra.mxu3 %vm566_vm3, %v9340_v43 }
 0x2d6   :  { %2237 = vmatmul.f32.gmra.mxu0 %v9338_v5  ;;  %6155 = vmatmul.msk.f32.gmra.mxu1 %vm566_vm3, %v9340_v43 }
 0x2dd   :  { %2295 = vmatmul.f32.vlgmr.msrb.gmra.mxu2 %v9102_v1  ;;  %6157 = vmatmul.msk.f32.vlgmr.msrb.gmra.mxu3 %vm566_vm3, %v9104_v22 }
 0x2de   :  { %2371 = vmatmul.f32.vlgmr.msra.gmra.mxu0 %v9102_v1  ;;  %6165 = vmatmul.msk.f32.vlgmr.msra.gmra.mxu1 %vm566_vm3, %v9104_v22 }
 0x2e5   :  { %2298 = vmatmul.f32.gmra.mxu2 %v9152_v33  ;;  %6158 = vmatmul.msk.f32.gmra.mxu3 %vm566_vm3, %v9154_v15 }
 0x2e6   :  { %2374 = vmatmul.f32.gmra.mxu0 %v9152_v33  ;;  %6166 = vmatmul.msk.f32.gmra.mxu1 %vm566_vm3, %v9154_v15 }
 0x2eb   :  { %v9616_v8 = vpop.f32.mrf.mxu0  ;;  %v9618_v1 = vpop.f32.mrf.mxu1 }
 0x2ec   :  { %12900 = vst [vmem:[#allocation117_spill] sm:$0xff] %v9616_v8  ;;  %v654_v8 = vadd.f32 %v7959_v47, %v7957_v46  ;;  %v9699_v46 = vld [vmem:[%s12914_s21] sm:$0x7]  ;;  %v657_v47 = vadd.f32 %v8007_v14, %v8005_v11  ;;  %v1442_v11 = vadd.f32 %v9130_v4, %v8317_v19 }
 0x2ed   :  { %12901 = vst [vmem:[#allocation118_spill] sm:$0xff] %v9618_v1  ;;  %2301 = vmatmul.f32.gmra.mxu2 %v9202_v2  ;;  %6159 = vmatmul.msk.f32.gmra.mxu3 %vm566_vm3, %v9204_v59 }
 0x2ee   :  { %2377 = vmatmul.f32.gmra.mxu0 %v9202_v2  ;;  %6167 = vmatmul.msk.f32.gmra.mxu1 %vm566_vm3, %v9204_v59  ;;  %v1205_v48 = vadd.f32 %v8711_v51, %v657_v47  ;;  %v660_v51 = vadd.f32 %v8055_v39, %v8053_v38  ;;  %v1445_v38 = vadd.f32 %v9192_v25, %v8341_v42 }
 0x2f0   :  { %v1892_v22 = vpop.f32.mrf.mxu2  ;;  %v1930_v33 = vpop.f32.mrf.mxu3  ;;  %v1243_v53 = vadd.f32 %v8713_v6, %v1205_v48  ;;  %v1480_v6 = vadd.f32 %v9132_v10, %v1442_v11  ;;  %v663_v10 = vadd.f32 %v8079_v52, %v8077_v45  ;;  %v1448_v52 = vadd.f32 %v9248_v13, %v8353_v58 }
 0x2f3   :  { %v9626_v15 = vpop.f32.mrf.mxu0  ;;  %v9628_v20 = vpop.f32.mrf.mxu1 }
 0x2f4   :  { %12902 = vst [vmem:[#allocation119_spill] sm:$0xff] %v9626_v15 }
 0x2f5   :  { %12903 = vst [vmem:[#allocation120_spill] sm:$0xff] %v9628_v20  ;;  %2304 = vmatmul.f32.gmra.mxu2 %v9252_v26  ;;  %6160 = vmatmul.msk.f32.gmra.mxu3 %vm566_vm3, %v9254_v3 }
 0x2f6   :  { %2380 = vmatmul.f32.gmra.mxu0 %v9252_v26  ;;  %6168 = vmatmul.msk.f32.gmra.mxu1 %vm566_vm3, %v9254_v3 }
 0x2f8   :  { %v1895_v2 = vpop.f32.mrf.mxu2  ;;  %v1933_v9 = vpop.f32.mrf.mxu3 }
 0x2fb   :  { %v9636_v16 = vpop.f32.mrf.mxu0  ;;  %v9638_v59 = vpop.f32.mrf.mxu1 }
 0x2fc   :  { %12904 = vst [vmem:[#allocation121_spill] sm:$0xff] %v9636_v16 }
 0x2fd   :  { %12905 = vst [vmem:[#allocation122_spill] sm:$0xff] %v9638_v59  ;;  %2307 = vmatmul.f32.gmra.mxu2 %v9298_v27  ;;  %6161 = vmatmul.msk.f32.gmra.mxu3 %vm566_vm3, %v9300_v36  ;;  %v1931_v59 = vadd.f32 %v1930_v33, %v1892_v22 }
 0x2fe   :  { %2383 = vmatmul.f32.gmra.mxu0 %v9298_v27  ;;  %6169 = vmatmul.msk.f32.gmra.mxu1 %vm566_vm3, %v9300_v36 }
 0x300   :  { %v1898_v26 = vpop.f32.mrf.mxu2  ;;  %v1936_v20 = vpop.f32.mrf.mxu3 }
 0x303   :  { %v9646_v15 = vpop.f32.mrf.mxu0  ;;  %v9648_v3 = vpop.f32.mrf.mxu1 }
 0x304   :  { %12906 = vst [vmem:[#allocation123_spill] sm:$0xff] %v9646_v15 }
 0x305   :  { %12907 = vst [vmem:[#allocation124_spill] sm:$0xff] %v9648_v3  ;;  %2310 = vmatmul.f32.gmra.mxu2 %v9324_v35  ;;  %6162 = vmatmul.msk.f32.gmra.mxu3 %vm566_vm3, %v9326_v31 }
 0x306   :  { %2386 = vmatmul.f32.gmra.mxu0 %v9324_v35  ;;  %6170 = vmatmul.msk.f32.gmra.mxu1 %vm566_vm3, %v9326_v31 }
 0x308   :  { %v9656_v27 = vpop.f32.mrf.mxu2  ;;  %v9658_v17 = vpop.f32.mrf.mxu3 }
 0x30b   :  { %v9660_v36 = vpop.f32.mrf.mxu0  ;;  %v9662_v1 = vpop.f32.mrf.mxu1 }
 0x30c   :  { %12908 = vst [vmem:[#allocation125_spill] sm:$0xff] %v9660_v36 }
 0x30d   :  { %12909 = vst [vmem:[#allocation126_spill] sm:$0xff] %v9662_v1  ;;  %2313 = vmatmul.f32.gmra.mxu2 %v9338_v5  ;;  %6163 = vmatmul.msk.f32.gmra.mxu3 %vm566_vm3, %v9340_v43 }
 0x30e   :  { %2389 = vmatmul.f32.gmra.mxu0 %v9338_v5  ;;  %6171 = vmatmul.msk.f32.gmra.mxu1 %vm566_vm3, %v9340_v43  ;;  %v1202_v43 = vadd.f32 %v8701_v23, %v654_v8  ;;  %v9704_v23 = vperm.slane %v9699_v46, 0 }
 0x310   :  { %v9670_v35 = vpop.f32.mrf.mxu2  ;;  %v9672_v31 = vpop.f32.mrf.mxu3  ;;  %v1240_v16 = vadd.f32 %v8703_v50, %v1202_v43  ;;  %v1934_v43 = vadd.f32 %v1933_v9, %v1895_v2  ;;  %v1208_v2 = vadd.f32 %v8721_v7, %v660_v51 }
 0x312   :  { %v2434_v30 = vadd.f32 %v1934_v43, %v1243_v53  ;;  %v1246_v48 = vadd.f32 %v8723_v28, %v1208_v2  ;;  %v1483_v28 = vadd.f32 %v9194_v21, %v1445_v38 }
 0x313   :  { %v9674_v3 = vpop.f32.mrf.mxu0  ;;  %v9676_v15 = vpop.f32.mrf.mxu1 }
 0x314   :  { %12910 = vst [vmem:[#allocation127_spill] sm:$0xff] %v9674_v3  ;;  %v2484_v4 = vadd.f32 %v9704_v23, %v2434_v30 }
 0x315   :  { %12911 = vst [vmem:[#allocation128_spill] sm:$0xff] %v9676_v15 }
 0x318   :  { %v9678_v36 = vpop.f32.mrf.mxu2  ;;  %v9680_v1 = vpop.f32.mrf.mxu3 }
 0x31b   :  { %v9684_v60 = vpop.f32.mrf.mxu0  ;;  %v9686_v5 = vpop.f32.mrf.mxu1 }
 0x31c   :  { %12912 = vst [vmem:[#allocation129_spill] sm:$0xff] %v9684_v60 }
 0x31d   :  { %12913 = vst [vmem:[#allocation130_spill] sm:$0xff] %v9686_v5  ;;  %v2431_v5 = vadd.f32 %v1931_v59, %v1240_v16 }
 0x31f   :  { %v2481_v33 = vadd.f32 %v9704_v23, %v2431_v5 }
 0x320   :  { %v9692_v15 = vpop.f32.mrf.mxu2  ;;  %v9694_v3 = vpop.f32.mrf.mxu3 }
 0x321   :  { %v2502_v57 = vmax.f32 %v2481_v33, 0.0 }
 0x323   :  { %v2220_v50 = vpop.f32.mrf.mxu0  ;;  %v2258_v8 = vpop.f32.mrf.mxu1 }
 0x324   :  { %v2259_v22 = vadd.f32 %v2258_v8, %v2220_v50 }
 0x326   :  { %v2452_v60 = vadd.f32 %v2259_v22, %v1477_v32  ;;  %v2505_v22 = vmax.f32 %v2484_v4, 0.0 }
 0x328   :  { %v2523_v14 = vadd.f32 %v9704_v23, %v2452_v60  ;;  %v9713_v16 = vpop.f32.mrf.mxu2  ;;  %v9715_v59 = vpop.f32.mrf.mxu3  ;;  %v1937_v60 = vadd.f32 %v1936_v20, %v1898_v26  ;;  %v1211_v26 = vadd.f32 %v8731_v29, %v663_v10 }
 0x32a   :  { %v2544_v47 = vmax.f32 %v2523_v14, 0.0  ;;  %v2437_v7 = vadd.f32 %v1937_v60, %v1246_v48  ;;  %v1940_v14 = vadd.f32 %v9658_v17, %v9656_v27  ;;  %v1249_v45 = vadd.f32 %v8733_v56, %v1211_v26 }
 0x32b   :  { %v2223_v5 = vpop.f32.mrf.mxu0  ;;  %v2261_v9 = vpop.f32.mrf.mxu1  ;;  %v1454_v26 = vadd.f32 %v9334_v49, %v8439_v37  ;;  %v12924_v49 = vld [vmem:[#allocation104_spill] sm:$0xff] }
 0x32c   :  { %v2262_v50 = vadd.f32 %v2261_v9, %v2223_v5  ;;  %v9721_v19 = vmax.f32 %v2502_v57, %v2544_v47  ;;  %v2487_v25 = vadd.f32 %v9704_v23, %v2437_v7  ;;  %v2440_v21 = vadd.f32 %v1940_v14, %v1249_v45  ;;  %v12922_v45 = vld [vmem:[#allocation103_spill] sm:$0xff] }
 0x32d   :  { %v672_v7 = vadd.f32 %v8177_v41, %v8175_v40  ;;  %v1949_v40 = vadd.f32 %v9694_v3, %v9692_v15  ;;  %v12926_v3 = vld [vmem:[#allocation102_spill] sm:$0xff] }
 0x32e   :  { %12915 = vst [vmem:[#allocation131_spill] sm:$0xff] %v9721_v19  ;;  %v2455_v8 = vadd.f32 %v2262_v50, %v1480_v6  ;;  %v2508_v47 = vmax.f32 %v2487_v25, 0.0  ;;  %v1486_v6 = vadd.f32 %v9250_v12, %v1448_v52  ;;  %v2490_v56 = vadd.f32 %v9704_v23, %v2440_v21  ;;  %v12919_v25 = vld [vmem:[#allocation101_spill] sm:$0xff]  ;;  %v12925_v21 = vld [vmem:[#allocation51_spill] sm:$0xff] }
 0x32f   :  { %v1451_v14 = vadd.f32 %v12919_v25, %v8377_v18  ;;  %v1492_v52 = vadd.f32 %v12922_v45, %v1454_v26 }
 0x330   :  { %v2526_v39 = vadd.f32 %v9704_v23, %v2455_v8  ;;  %v9728_v53 = vpop.f32.mrf.mxu2  ;;  %v9730_v32 = vpop.f32.mrf.mxu3  ;;  %v2511_v60 = vmax.f32 %v2490_v56, 0.0 }
 0x332   :  { %v2547_v33 = vmax.f32 %v2526_v39, 0.0 }
 0x333   :  { %v2226_v43 = vpop.f32.mrf.mxu0  ;;  %v2264_v20 = vpop.f32.mrf.mxu1 }
 0x334   :  { %v2265_v11 = vadd.f32 %v2264_v20, %v2226_v43  ;;  %v9736_v42 = vmax.f32 %v2505_v22, %v2547_v33  ;;  %v669_v22 = vadd.f32 %v8115_v63, %v8113_v62  ;;  %v1220_v33 = vadd.f32 %v8760_v24, %v672_v7  ;;  %v12920_v62 = vld [vmem:[#allocation49_spill] sm:$0xff]  ;;  %v12921_v24 = vld [vmem:[#allocation52_spill] sm:$0xff] }
 0x336   :  { %12916 = vst [vmem:[#allocation132_spill] sm:$0xff] %v9736_v42  ;;  %v2458_v51 = vadd.f32 %v2265_v11, %v1483_v28  ;;  %v666_v28 = vadd.f32 %v8091_v55, %v8089_v54  ;;  %v1217_v11 = vadd.f32 %v8751_v61, %v669_v22  ;;  %v1946_v54 = vadd.f32 %v9680_v1, %v9678_v36 }
 0x338   :  { %v2529_v30 = vadd.f32 %v9704_v23, %v2458_v51  ;;  %v9745_v57 = vpop.f32.mrf.mxu2  ;;  %v9747_v29 = vpop.f32.mrf.mxu3  ;;  %v1214_v63 = vadd.f32 %v12920_v62, %v666_v28  ;;  %v1258_v51 = vadd.f32 %v12921_v24, %v1220_v33  ;;  %v1255_v15 = vadd.f32 %v12925_v21, %v1217_v11 }
 0x33a   :  { %v2550_v5 = vmax.f32 %v2529_v30, 0.0  ;;  %v12923_v30 = vld [vmem:[#allocation30_spill] sm:$0xff]  ;;  %v2446_v36 = vadd.f32 %v1946_v54, %v1255_v15  ;;  %v12942_v15 = vld [vmem:[#allocation16_spill] sm:$0xff] }
 0x33b   :  { %v2229_v9 = vpop.f32.mrf.mxu0  ;;  %v2267_v2 = vpop.f32.mrf.mxu1  ;;  %v1457_v37 = vadd.f32 %v12924_v49, %v12923_v30 }
 0x33c   :  { %v2268_v17 = vadd.f32 %v2267_v2, %v2229_v9  ;;  %v9750_v27 = vmax.f32 %v2508_v47, %v2550_v5  ;;  %v1489_v47 = vadd.f32 %v12926_v3, %v1451_v14  ;;  %v1943_v5 = vadd.f32 %v9672_v31, %v9670_v35  ;;  %v12943_v3 = vld [vmem:[#allocation17_spill] sm:$0xff] }
 0x33d   :  { %v2449_v9 = vadd.f32 %v1949_v40, %v1258_v51  ;;  %v2496_v33 = vadd.f32 %v9704_v23, %v2446_v36  ;;  %v12950_v36 = vld [vmem:[#allocation24_spill] sm:$0xff] }
 0x33e   :  { %12917 = vst [vmem:[#allocation133_spill] sm:$0xff] %v9750_v27  ;;  %v2461_v50 = vadd.f32 %v2268_v17, %v1486_v6  ;;  %v12927_v6 = vld [vmem:[#allocation50_spill] sm:$0xff] }
 0x33f   :  { %v1252_v17 = vadd.f32 %v12927_v6, %v1214_v63  ;;  %v2517_v62 = vmax.f32 %v2496_v33, 0.0  ;;  %v12946_v6 = vld [vmem:[#allocation20_spill] sm:$0xff]  ;;  %v12955_v33 = vld [vmem:[#allocation29_spill] sm:$0xff] }
 0x340   :  { %v2532_v58 = vadd.f32 %v9704_v23, %v2461_v50  ;;  %v9754_v13 = vpop.f32.mrf.mxu2  ;;  %v9756_v4 = vpop.f32.mrf.mxu3 }
 0x342   :  { %v2553_v8 = vmax.f32 %v2532_v58, 0.0  ;;  %v12928_v58 = vld [vmem:[#allocation105_spill] sm:$0xff] }
 0x343   :  { %v2232_v48 = vpop.f32.mrf.mxu0  ;;  %v2270_v38 = vpop.f32.mrf.mxu1  ;;  %v1495_v1 = vadd.f32 %v12928_v58, %v1457_v37  ;;  %v12949_v58 = vld [vmem:[#allocation23_spill] sm:$0xff] }
 0x344   :  { %v9758_v39 = vmax.f32 %v2511_v60, %v2553_v8  ;;  %v2271_v55 = vadd.f32 %v2270_v38, %v2232_v48  ;;  %v2443_v48 = vadd.f32 %v1943_v5, %v1252_v17  ;;  %v2499_v38 = vadd.f32 %v9704_v23, %v2449_v9  ;;  %v12944_v5 = vld [vmem:[#allocation18_spill] sm:$0xff]  ;;  %v12945_v9 = vld [vmem:[#allocation19_spill] sm:$0xff]  ;;  %v12947_v17 = vld [vmem:[#allocation21_spill] sm:$0xff] }
 0x346   :  { %12918 = vst [vmem:[#allocation134_spill] sm:$0xff] %v9758_v39  ;;  %v2464_v60 = vadd.f32 %v2271_v55, %v1489_v47  ;;  %v2493_v26 = vadd.f32 %v9704_v23, %v2443_v48  ;;  %v2520_v28 = vmax.f32 %v2499_v38, 0.0  ;;  %v806_v47 = vadd.f32 %v12943_v3, %v12942_v15  ;;  %v12952_v48 = vld [vmem:[#allocation26_spill] sm:$0xff]  ;;  %v12953_v38 = vld [vmem:[#allocation27_spill] sm:$0xff] }
 0x347   :  { %v12962_v15 = vld [vmem:[#allocation34_spill] sm:$0xff]  ;;  %v12963_v3 = vld [vmem:[#allocation35_spill] sm:$0xff] }
 0x348   :  { %v9760_v10 = vpop.f32.mrf.mxu2  ;;  %v9762_v12 = vpop.f32.mrf.mxu3  ;;  %v2535_v35 = vadd.f32 %v9704_v23, %v2464_v60  ;;  %v2514_v51 = vmax.f32 %v2493_v26, 0.0  ;;  %v12951_v60 = vld [vmem:[#allocation25_spill] sm:$0xff]  ;;  %v12957_v26 = vld [vmem:[#allocation32_spill] sm:$0xff] }
 0x34a   :  { %v2556_v63 = vmax.f32 %v2535_v35, 0.0 }
 0x34b   :  { %v2235_v43 = vpop.f32.mrf.mxu0  ;;  %v2273_v20 = vpop.f32.mrf.mxu1 }
 0x34c   :  { %v2274_v41 = vadd.f32 %v2273_v20, %v2235_v43 }
 0x34e   :  { %v2467_v2 = vadd.f32 %v2274_v41, %v1492_v52  ;;  %v9819_v52 = vmax.f32 %v2514_v51, %v2556_v63 }
 0x350   :  { %v9785_v61 = vpop.f32.mrf.mxu2  ;;  %v9787_v18 = vpop.f32.mrf.mxu3  ;;  %v2538_v7 = vadd.f32 %v9704_v23, %v2467_v2  ;;  %12935 = vst [vmem:[#allocation51_spill] sm:$0xff] %v9819_v52  ;;  %v809_v2 = vadd.f32 %v12945_v9, %v12944_v5  ;;  %v1061_v5 = vadd.f32 %v12963_v3, %v12962_v15  ;;  %v12964_v9 = vld [vmem:[#allocation37_spill] sm:$0xff]  ;;  %v12977_v15 = vld [vmem:[#allocation83_spill] sm:$0xff] }
 0x352   :  { %v2559_v25 = vmax.f32 %v2538_v7, 0.0  ;;  %v821_v7 = vadd.f32 %v12953_v38, %v12952_v48  ;;  %v12969_v48 = vld [vmem:[#allocation73_spill] sm:$0xff] }
 0x353   :  { %v2238_v56 = vpop.f32.mrf.mxu0  ;;  %v2276_v50 = vpop.f32.mrf.mxu1 }
 0x354   :  { %v2277_v8 = vadd.f32 %v2276_v50, %v2238_v56  ;;  %v9812_v24 = vmax.f32 %v2517_v62, %v2559_v25  ;;  %v812_v56 = vadd.f32 %v12947_v17, %v12946_v6  ;;  %v12948_v50 = vld [vmem:[#allocation22_spill] sm:$0xff]  ;;  %v12959_v25 = vld [vmem:[#allocation69_spill] sm:$0xff] }
 0x355   :  { %v12965_v6 = vld [vmem:[#allocation38_spill] sm:$0xff] }
 0x356   :  { %v2470_v22 = vadd.f32 %v2277_v8, %v1495_v1  ;;  %12932 = vst [vmem:[#allocation103_spill] sm:$0xff] %v9812_v24  ;;  %v815_v1 = vadd.f32 %v12949_v58, %v12948_v50  ;;  %v818_v8 = vadd.f32 %v12951_v60, %v12950_v36  ;;  %v1064_v17 = vadd.f32 %v12965_v6, %v12964_v9  ;;  %v12966_v50 = vld [vmem:[#allocation40_spill] sm:$0xff]  ;;  %v12967_v58 = vld [vmem:[#allocation41_spill] sm:$0xff]  ;;  %v12968_v60 = vld [vmem:[#allocation10_spill] sm:$0xff] }
 0x357   :  { %v1067_v36 = vadd.f32 %v12967_v58, %v12966_v50  ;;  %v1281_v38 = vadd.f32 %v12969_v48, %v12968_v60  ;;  %v12979_v9 = vld [vmem:[#allocation46_spill] sm:$0xff]  ;;  %v12981_v50 = vld [vmem:[#allocation60_spill] sm:$0xff] }
 0x358   :  { %v2541_v31 = vadd.f32 %v9704_v23, %v2470_v22  ;;  %v9800_v43 = vpop.f32.mrf.mxu2  ;;  %v9802_v20 = vpop.f32.mrf.mxu3  ;;  %v12954_v22 = vld [vmem:[#allocation28_spill] sm:$0xff] }
 0x359   :  { %v824_v35 = vadd.f32 %v12955_v33, %v12954_v22  ;;  %v12970_v22 = vld [vmem:[#allocation43_spill] sm:$0xff]  ;;  %v12971_v33 = vld [vmem:[#allocation44_spill] sm:$0xff] }
 0x35a   :  { %v2562_v11 = vmax.f32 %v2541_v31, 0.0  ;;  %v12956_v31 = vld [vmem:[#allocation31_spill] sm:$0xff]  ;;  %v12983_v60 = vld [vmem:[#allocation48_spill] sm:$0xff] }
 0x35b   :  { %v9805_v14 = vpop.f32.mrf.mxu0  ;;  %v9807_v40 = vpop.f32.mrf.mxu1 }
 0x35c   :  { %12929 = vst [vmem:[#allocation101_spill] sm:$0xff] %v9805_v14  ;;  %v9809_v41 = vmax.f32 %v2520_v28, %v2562_v11  ;;  %v1058_v28 = vadd.f32 %v12957_v26, %v12956_v31  ;;  %v12958_v11 = vld [vmem:[#allocation9_spill] sm:$0xff]  ;;  %v1070_v31 = vadd.f32 %v12971_v33, %v12970_v22  ;;  %v12972_v26 = vld [vmem:[#allocation55_spill] sm:$0xff] }
 0x35d   :  { %12930 = vst [vmem:[#allocation49_spill] sm:$0xff] %v9807_v40  ;;  %v1278_v62 = vadd.f32 %v12959_v25, %v12958_v11  ;;  %v12973_v11 = vld [vmem:[#allocation56_spill] sm:$0xff]  ;;  %v12985_v22 = vld [vmem:[#allocation87_spill] sm:$0xff]  ;;  %v12996_v40 = vld [vmem:[#allocation61_spill] sm:$0xff] }
 0x35e   :  { %12931 = vst [vmem:[#allocation52_spill] sm:$0xff] %v9809_v41  ;;  %2612 = vmatpush.msra.mxu2 %v9809_v41  ;;  %v1146_v25 = vadd.f32 %v12973_v11, %v12972_v26  ;;  %v12982_v41 = vld [vmem:[#allocation47_spill] sm:$0xff]  ;;  %v1360_v14 = vadd.f32 %v12996_v40, %v812_v56  ;;  %v13006_v56 = vld [vmem:[#allocation96_spill] sm:$0xff] }
 0x35f   :  { %v1076_v48 = vadd.f32 %v12983_v60, %v12982_v41  ;;  %v12993_v41 = vld [vmem:[#allocation74_spill] sm:$0xff] }
 0x360   :  { %2613 = vmatpush.msra.mxu2 %v9812_v24  ;;  %v9815_v45 = vpop.f32.mrf.mxu2  ;;  %v9817_v23 = vpop.f32.mrf.mxu3  ;;  %v12980_v24 = vld [vmem:[#allocation59_spill] sm:$0xff]  ;;  %v9898_v60 = vadd.f32 %v12993_v41, %v1281_v38 }
 0x361   :  { %12933 = vst [vmem:[#allocation30_spill] sm:$0xff] %v9815_v45  ;;  %v1149_v58 = vadd.f32 %v12981_v50, %v12980_v24  ;;  %v12991_v24 = vld [vmem:[#allocation15_spill] sm:$0xff] }
 0x362   :  { %12934 = vst [vmem:[#allocation104_spill] sm:$0xff] %v9817_v23  ;;  %2614 = vmatpush.msra.mxu2 %v9819_v52  ;;  %v12978_v52 = vld [vmem:[#allocation45_spill] sm:$0xff]  ;;  %v12992_v50 = vld [vmem:[#allocation95_spill] sm:$0xff] }
 0x363   :  { %v9822_v30 = vpop.f32.mrf.mxu0  ;;  %v9824_v49 = vpop.f32.mrf.mxu1  ;;  %v1073_v6 = vadd.f32 %v12979_v9, %v12978_v52  ;;  %v12984_v23 = vld [vmem:[#allocation13_spill] sm:$0xff]  ;;  %v12989_v52 = vld [vmem:[#allocation14_spill] sm:$0xff]  ;;  %v12990_v9 = vld [vmem:[#allocation91_spill] sm:$0xff] }
 0x364   :  { %12936 = vst [vmem:[#allocation102_spill] sm:$0xff] %v9822_v30  ;;  %2615 = vmatpush.msra.mxu2 %v9758_v39  ;;  %v12976_v39 = vld [vmem:[#allocation12_spill] sm:$0xff]  ;;  %v1290_v33 = vadd.f32 %v12985_v22, %v12984_v23  ;;  %v12994_v23 = vld [vmem:[#allocation53_spill] sm:$0xff]  ;;  %v13002_v38 = vld [vmem:[#allocation71_spill] sm:$0xff] }
 0x365   :  { %12937 = vst [vmem:[#allocation50_spill] sm:$0xff] %v9824_v49  ;;  %v1287_v3 = vadd.f32 %v12977_v15, %v12976_v39  ;;  %v12988_v39 = vld [vmem:[#allocation70_spill] sm:$0xff]  ;;  %v1354_v22 = vadd.f32 %v12994_v23, %v806_v47  ;;  %v13003_v41 = vld [vmem:[#allocation75_spill] sm:$0xff] }
 0x366   :  { %2616 = vmatpush.msra.mxu2 %v9750_v27  ;;  %v9891_v15 = vadd.f32 %v12988_v39, %v1278_v62  ;;  %v12997_v49 = vld [vmem:[#allocation78_spill] sm:$0xff]  ;;  %v12999_v39 = vld [vmem:[#allocation63_spill] sm:$0xff]  ;;  %v1372_v47 = vadd.f32 %v13003_v41, %v824_v35  ;;  %v13016_v41 = vld [vmem:[#allocation64_spill] sm:$0xff] }
 0x367   :  { %v1363_v30 = vadd.f32 %v12999_v39, %v815_v1  ;;  %v13004_v23 = vld [vmem:[#allocation79_spill] sm:$0xff] }
 0x368   :  { %2617 = vmatpush.msra.mxu2 %v9736_v42  ;;  %v9829_v37 = vpop.f32.mrf.mxu2  ;;  %v9831_v54 = vpop.f32.mrf.mxu3  ;;  %v12975_v42 = vld [vmem:[#allocation77_spill] sm:$0xff] }
 0x369   :  { %12938 = vst [vmem:[#allocation105_spill] sm:$0xff] %v9829_v37  ;;  %v1296_v37 = vadd.f32 %v12992_v50, %v12991_v24  ;;  %v1369_v50 = vadd.f32 %v13002_v38, %v821_v7  ;;  %v13012_v7 = vld [vmem:[#allocation58_spill] sm:$0xff] }
 0x36a   :  { %12939 = vst [vmem:[#allocation135_spill] sm:$0xff] %v9831_v54  ;;  %2618 = vmatpush.msra.mxu2 %v9721_v19  ;;  %v12974_v19 = vld [vmem:[#allocation11_spill] sm:$0xff]  ;;  %v1293_v54 = vadd.f32 %v12990_v9, %v12989_v52 }
 0x36b   :  { %v9834_v55 = vpop.f32.mrf.mxu0  ;;  %v9836_v21 = vpop.f32.mrf.mxu1  ;;  %v1284_v27 = vadd.f32 %v12975_v42, %v12974_v19  ;;  %v12986_v19 = vld [vmem:[#allocation65_spill] sm:$0xff]  ;;  %v12987_v42 = vld [vmem:[#allocation66_spill] sm:$0xff]  ;;  %v13000_v52 = vld [vmem:[#allocation67_spill] sm:$0xff] }
 0x36c   :  { %12940 = vst [vmem:[#allocation136_spill] sm:$0xff] %v9834_v55  ;;  %v1152_v11 = vadd.f32 %v12987_v42, %v12986_v19  ;;  %v12998_v42 = vld [vmem:[#allocation84_spill] sm:$0xff]  ;;  %v1366_v9 = vadd.f32 %v13000_v52, %v818_v8  ;;  %v13009_v55 = vld [vmem:[#allocation81_spill] sm:$0xff] }
 0x36d   :  { %12941 = vst [vmem:[#allocation137_spill] sm:$0xff] %v9836_v21  ;;  %v1322_v19 = vadd.f32 %v12997_v49, %v1284_v27  ;;  %v9905_v62 = vadd.f32 %v12998_v42, %v1287_v3  ;;  %v13001_v21 = vld [vmem:[#allocation88_spill] sm:$0xff]  ;;  %v1334_v27 = vadd.f32 %v13006_v56, %v1296_v37  ;;  %v13007_v49 = vld [vmem:[#allocation33_spill] sm:$0xff]  ;;  %v13008_v3 = vld [vmem:[#allocation106_spill] sm:$0xff]  ;;  %v1518_v1 = vadd.f32 %v13009_v55, %v1061_v5 }
 0x36e   :  { %v9910_v24 = vadd.f32 %v13001_v21, %v1290_v33  ;;  %v1591_v42 = vadd.f32 %v13008_v3, %v13007_v49  ;;  %v13011_v21 = vld [vmem:[#allocation54_spill] sm:$0xff]  ;;  %v13015_v37 = vld [vmem:[#allocation108_spill] sm:$0xff]  ;;  %v13019_v49 = vld [vmem:[#allocation39_spill] sm:$0xff] }
 0x36f   :  { %v9925_v33 = vadd.f32 %v13011_v21, %v1354_v22  ;;  %v13017_v55 = vld [vmem:[#allocation68_spill] sm:$0xff]  ;;  %v1597_v22 = vadd.f32 %v9548_v44, %v13019_v49 }
 0x370   :  { %v9856_v63 = vpop.f32.mrf.mxu2  ;;  %v9858_v51 = vpop.f32.mrf.mxu3  ;;  %v9939_v5 = vadd.f32 %v13017_v55, %v1366_v9  ;;  %v13020_v3 = vld [vmem:[#allocation72_spill] sm:$0xff]  ;;  %v13027_v55 = vld [vmem:[#allocation82_spill] sm:$0xff] }
 0x371   :  { %12960 = vst [vmem:[#allocation16_spill] sm:$0xff] %v9856_v63  ;;  %v13021_v21 = vld [vmem:[#allocation76_spill] sm:$0xff] }
 0x372   :  { %12961 = vst [vmem:[#allocation17_spill] sm:$0xff] %v9858_v51  ;;  %v12995_v51 = vld [vmem:[#allocation57_spill] sm:$0xff] }
 0x373   :  { %v9884_v45 = vpop.f32.mrf.mxu0  ;;  %v9886_v26 = vpop.f32.mrf.mxu1  ;;  %v1357_v63 = vadd.f32 %v12995_v51, %v809_v2  ;;  %v1515_v2 = vadd.f32 %v13004_v23, %v1058_v28  ;;  %v13005_v51 = vld [vmem:[#allocation92_spill] sm:$0xff]  ;;  %v13013_v28 = vld [vmem:[#allocation62_spill] sm:$0xff]  ;;  %v9936_v23 = vadd.f32 %v13016_v41, %v1363_v30 }
 0x374   :  { %v1331_v40 = vadd.f32 %v13005_v51, %v1293_v54  ;;  %v9931_v52 = vadd.f32 %v13013_v28, %v1360_v14  ;;  %v13014_v54 = vld [vmem:[#allocation36_spill] sm:$0xff]  ;;  %v13018_v51 = vld [vmem:[#allocation85_spill] sm:$0xff] }
 0x375   :  { %v9928_v35 = vadd.f32 %v13012_v7, %v1357_v63  ;;  %v1594_v38 = vadd.f32 %v13015_v37, %v13014_v54  ;;  %v1521_v56 = vadd.f32 %v13018_v51, %v1064_v17  ;;  %v1407_v63 = vadd.f32 %v13020_v3, %v1369_v50  ;;  %v13022_v14 = vld [vmem:[#allocation80_spill] sm:$0xff]  ;;  %v13024_v54 = vld [vmem:[#allocation89_spill] sm:$0xff]  ;;  %v13029_v51 = vld [vmem:[#allocation42_spill] sm:$0xff] }
 0x376   :  { %v9946_v7 = vadd.f32 %v13021_v21, %v1372_v47  ;;  %v9949_v28 = vadd.f32 %v13022_v14, %v1515_v2  ;;  %v1524_v37 = vadd.f32 %v13024_v54, %v1067_v36  ;;  %v9956_v17 = vadd.f32 %v13027_v55, %v1518_v1  ;;  %v13030_v50 = vld [vmem:[#allocation93_spill] sm:$0xff]  ;;  %v13038_v55 = vld [vmem:[#allocation127_spill] sm:$0xff] }
 0x377   :  { %v1600_v44 = vadd.f32 %v9576_v34, %v13029_v51  ;;  %v1527_v49 = vadd.f32 %v13030_v50, %v1070_v31  ;;  %v13031_v47 = vld [vmem:[#allocation109_spill] sm:$0xff]  ;;  %v1603_v2 = vadd.f32 %v9586_v0, %v1146_v25  ;;  %v13041_v31 = vld [vmem:[#allocation130_spill] sm:$0xff]  ;;  %v13044_v0 = vld [vmem:[#allocation99_spill] sm:$0xff] }
 0x378   :  { %v9920_v39 = vpop.f32.mrf.mxu2  ;;  %v9922_v8 = vpop.f32.mrf.mxu3  ;;  %13023 = vst [vmem:[#allocation19_spill] sm:$0xff] %v9949_v28  ;;  %v9962_v3 = vadd.f32 %v13031_v47, %v1594_v38  ;;  %v13033_v21 = vld [vmem:[#allocation97_spill] sm:$0xff]  ;;  %v13035_v28 = vld [vmem:[#allocation86_spill] sm:$0xff]  ;;  %v1533_v25 = vadd.f32 %v13044_v0, %v1076_v48  ;;  %v13055_v0 = vld [vmem:[#allocation112_spill] sm:$0xff] }
 0x379   :  { %13010 = vst [vmem:[#allocation18_spill] sm:$0xff] %v9922_v8  ;;  %v13025_v8 = vld [vmem:[#allocation107_spill] sm:$0xff]  ;;  %v1530_v36 = vadd.f32 %v13033_v21, %v1073_v6  ;;  %v13034_v14 = vld [vmem:[#allocation113_spill] sm:$0xff]  ;;  %v13042_v38 = vld [vmem:[#allocation90_spill] sm:$0xff] }
 0x37a   :  { %v9953_v9 = vadd.f32 %v13025_v8, %v1591_v42  ;;  %13028 = vst [vmem:[#allocation21_spill] sm:$0xff] %v9956_v17  ;;  %v1606_v54 = vadd.f32 %v13034_v14, %v1149_v58  ;;  %v9968_v42 = vadd.f32 %v13035_v28, %v1521_v56  ;;  %v13037_v8 = vld [vmem:[#allocation110_spill] sm:$0xff]  ;;  %v13039_v17 = vld [vmem:[#allocation128_spill] sm:$0xff]  ;;  %v13040_v51 = vld [vmem:[#allocation129_spill] sm:$0xff]  ;;  %v9978_v47 = vadd.f32 %v13042_v38, %v1524_v37 }
 0x37b   :  { %v2384_v30 = vpop.f32.mrf.mxu0  ;;  %v2422_v41 = vpop.f32.mrf.mxu1  ;;  %13032 = vst [vmem:[#allocation22_spill] sm:$0xff] %v9962_v3  ;;  %v9971_v1 = vadd.f32 %v13037_v8, %v1597_v22  ;;  %v2022_v34 = vadd.f32 %v13039_v17, %v13038_v55  ;;  %v2025_v50 = vadd.f32 %v13041_v31, %v13040_v51  ;;  %v13045_v6 = vld [vmem:[#allocation115_spill] sm:$0xff]  ;;  %v13046_v58 = vld [vmem:[#allocation121_spill] sm:$0xff]  ;;  %v13047_v14 = vld [vmem:[#allocation122_spill] sm:$0xff] }
 0x37c   :  { %13026 = vst [vmem:[#allocation20_spill] sm:$0xff] %v9953_v9  ;;  %v1609_v21 = vadd.f32 %v13045_v6, %v1152_v11  ;;  %v2013_v56 = vadd.f32 %v13047_v14, %v13046_v58  ;;  %v13048_v28 = vld [vmem:[#allocation111_spill] sm:$0xff]  ;;  %v13049_v22 = vld [vmem:[#allocation94_spill] sm:$0xff]  ;;  %v13051_v17 = vld [vmem:[#allocation117_spill] sm:$0xff]  ;;  %v1641_v11 = vadd.f32 %v13055_v0, %v1603_v2 }
 0x37d   :  { %13036 = vst [vmem:[#allocation23_spill] sm:$0xff] %v9968_v42  ;;  %v9985_v42 = vadd.f32 %v13048_v28, %v1600_v44  ;;  %v9988_v8 = vadd.f32 %v13049_v22, %v1527_v49  ;;  %v13052_v55 = vld [vmem:[#allocation118_spill] sm:$0xff]  ;;  %v13053_v51 = vld [vmem:[#allocation123_spill] sm:$0xff]  ;;  %v13054_v31 = vld [vmem:[#allocation124_spill] sm:$0xff] }
 0x37e   :  { %13043 = vst [vmem:[#allocation24_spill] sm:$0xff] %v9978_v47  ;;  %v2007_v9 = vadd.f32 %v13052_v55, %v13051_v17  ;;  %v2016_v37 = vadd.f32 %v13054_v31, %v13053_v51  ;;  %v13056_v6 = vld [vmem:[#allocation98_spill] sm:$0xff]  ;;  %v13058_v14 = vld [vmem:[#allocation125_spill] sm:$0xff]  ;;  %v13060_v22 = vld [vmem:[#allocation119_spill] sm:$0xff]  ;;  %v2447_v17 = vadd.f32 %v2022_v34, %v1331_v40  ;;  %v2450_v55 = vadd.f32 %v2025_v50, %v1334_v27 }
 0x37f   :  { %13050 = vst [vmem:[#allocation25_spill] sm:$0xff] %v9988_v8  ;;  %v9998_v47 = vadd.f32 %v13056_v6, %v1530_v36  ;;  %v13057_v58 = vld [vmem:[#allocation114_spill] sm:$0xff]  ;;  %v13061_v3 = vld [vmem:[#allocation120_spill] sm:$0xff]  ;;  %v2098_v6 = vadd.f32 %v9787_v18, %v9785_v61  ;;  %v10022_v27 = vperm.slane %v9699_v46, 1  ;;  %v2086_v34 = vadd.f32 %v9730_v32, %v9728_v53 }
 0x380   :  { %v9994_v38 = vpop.f32.mrf.mxu2  ;;  %v2346_v48 = vpop.f32.mrf.mxu3  ;;  %v1644_v44 = vadd.f32 %v13057_v58, %v1606_v54  ;;  %v13059_v28 = vld [vmem:[#allocation126_spill] sm:$0xff]  ;;  %v2010_v8 = vadd.f32 %v13061_v3, %v13060_v22  ;;  %v10008_v51 = vld [vmem:[%s12759_s4] sm:$0xff]  ;;  %v2438_v54 = vadd.f32 %v2013_v56, %v1322_v19  ;;  %v10019_v40 = vadd.f32 %v2007_v9, %v9891_v15 }
 0x381   :  { %v2019_v49 = vadd.f32 %v13059_v28, %v13058_v14  ;;  %v13062_v2 = vld [vmem:[#allocation100_spill] sm:$0xff]  ;;  %6172 = vmatmul.msk.f32.vlgmr.msra.gmra.mxu2 %vm2590_vm4, %v10008_v51  ;;  %v2441_v3 = vadd.f32 %v2016_v37, %v9905_v62  ;;  %v2089_v61 = vadd.f32 %v9747_v29, %v9745_v57  ;;  %v2092_v18 = vadd.f32 %v9756_v4, %v9754_v13  ;;  %v13065_v37 = vld [vmem:[#allocation137_spill] sm:$0xff] }
 0x382   :  { %v10011_v31 = vadd.f32 %v13062_v2, %v1533_v25  ;;  %v13063_v36 = vld [vmem:[#allocation116_spill] sm:$0xff]  ;;  %v2101_v15 = vadd.f32 %v9802_v20, %v9800_v43  ;;  %v10035_v9 = vadd.f32 %v2010_v8, %v9898_v60  ;;  %v10038_v50 = vadd.f32 %v10022_v27, %v2447_v17  ;;  %v13067_v2 = vld [vmem:[#allocation50_spill] sm:$0xff] }
 0x383   :  { %v1647_v0 = vadd.f32 %v13063_v36, %v1609_v21  ;;  %v2387_v58 = vpop.f32.mrf.mxu0  ;;  %v2425_v14 = vpop.f32.mrf.mxu1  ;;  %v2444_v19 = vadd.f32 %v2019_v49, %v9910_v24  ;;  %v10041_v62 = vadd.f32 %v10022_v27, %v2450_v55  ;;  %v10044_v32 = vadd.f32 %v10022_v27, %v2438_v54  ;;  %v13066_v55 = vld [vmem:[#allocation102_spill] sm:$0xff] }
 0x384   :  { %v2426_v53 = vadd.f32 %v2425_v14, %v2387_v58  ;;  %v2083_v57 = vadd.f32 %v9715_v59, %v9713_v16  ;;  %v2095_v29 = vadd.f32 %v9762_v12, %v9760_v10  ;;  %v2448_v13 = vadd.f32 %v2098_v6, %v1407_v63  ;;  %v13068_v14 = vld [vmem:[#allocation18_spill] sm:$0xff] }
 0x385   :  { %v10051_v4 = vadd.f32 %v10022_v27, %v2441_v3  ;;  %v10054_v43 = vperm.slane %v9699_v46, 2  ;;  %v2436_v20 = vadd.f32 %v2086_v34, %v9928_v35  ;;  %v2423_v60 = vadd.f32 %v2422_v41, %v2384_v30  ;;  %v10070_v30 = vld [vmem:[%s12759_s4 + $0x8] sm:$0xff] }
 0x386   :  { %v10058_v21 = vadd.f32 %v10022_v27, %v2444_v19  ;;  %v2439_v16 = vadd.f32 %v2089_v61, %v9931_v52  ;;  %v2442_v59 = vadd.f32 %v2092_v18, %v9936_v23  ;;  %v2451_v10 = vadd.f32 %v2101_v15, %v9946_v7  ;;  %v13069_v61 = vld [vmem:[#allocation101_spill] sm:$0xff] }
 0x387   :  { %v2521_v12 = vmax.f32 %v10041_v62, 0.0  ;;  %v2420_v46 = vadd.f32 %v9886_v26, %v9884_v45  ;;  %v2469_v63 = vadd.f32 %v2426_v53, %v1644_v44  ;;  %v2518_v35 = vmax.f32 %v10038_v50, 0.0  ;;  %v13064_v26 = vld [vmem:[#allocation136_spill] sm:$0xff]  ;;  %v13070_v18 = vld [vmem:[#allocation49_spill] sm:$0xff] }
 0x388   :  { %v2311_v24 = vpop.f32.mrf.mxu2  ;;  %v2349_v25 = vpop.f32.mrf.mxu3  ;;  %v10073_v41 = vadd.f32 %v2083_v57, %v9925_v33  ;;  %v2445_v52 = vadd.f32 %v2095_v29, %v9939_v5  ;;  %v2498_v23 = vadd.f32 %v10054_v43, %v2448_v13  ;;  %v10080_v45 = vadd.f32 %v10054_v43, %v2436_v20  ;;  %v13071_v29 = vld [vmem:[#allocation16_spill] sm:$0xff]  ;;  %v13072_v13 = vld [vmem:[#allocation17_spill] sm:$0xff] }
 0x389   :  { %v2350_v7 = vadd.f32 %v2349_v25, %v2311_v24  ;;  %6173 = vmatmul.msk.f32.gmra.mxu2 %vm2590_vm4, %v10070_v30  ;;  %v2417_v44 = vadd.f32 %v13065_v37, %v13064_v26  ;;  %v2466_v28 = vadd.f32 %v2423_v60, %v1641_v11  ;;  %v10085_v33 = vadd.f32 %v10054_v43, %v2439_v16  ;;  %v13073_v60 = vld [vmem:[#allocation25_spill] sm:$0xff]  ;;  %v13078_v26 = vld [vmem:[#allocation20_spill] sm:$0xff] }
 0x38a   :  { %v10088_v5 = vadd.f32 %v10054_v43, %v2442_v59  ;;  %v2501_v22 = vadd.f32 %v10054_v43, %v2451_v10  ;;  %v2347_v17 = vadd.f32 %v2346_v48, %v9994_v38  ;;  %v2414_v36 = vadd.f32 %v13067_v2, %v13066_v55  ;;  %v13081_v2 = vld [vmem:[#allocation23_spill] sm:$0xff] }
 0x38b   :  { %v2390_v56 = vpop.f32.mrf.mxu0  ;;  %v2428_v8 = vpop.f32.mrf.mxu1  ;;  %v2463_v54 = vadd.f32 %v2420_v46, %v9985_v42  ;;  %v2540_v6 = vadd.f32 %v10054_v43, %v2469_v63  ;;  %v2495_v11 = vadd.f32 %v10054_v43, %v2445_v52  ;;  %v2344_v3 = vadd.f32 %v13068_v14, %v9920_v39  ;;  %v13075_v46 = vld [vmem:[#allocation105_spill] sm:$0xff]  ;;  %v13076_v63 = vld [vmem:[#allocation135_spill] sm:$0xff] }
 0x38c   :  { %v2429_v49 = vadd.f32 %v2428_v8, %v2390_v56  ;;  %v2468_v34 = vadd.f32 %v2350_v7, %v9998_v47  ;;  %v2519_v19 = vmax.f32 %v2498_v23, 0.0  ;;  %v2411_v15 = vadd.f32 %v13070_v18, %v13069_v61  ;;  %v13074_v47 = vld [vmem:[#allocation22_spill] sm:$0xff]  ;;  %v13077_v23 = vld [vmem:[#allocation24_spill] sm:$0xff] }
 0x38d   :  { %v2460_v38 = vadd.f32 %v2417_v44, %v9971_v1  ;;  %v2537_v48 = vadd.f32 %v10054_v43, %v2466_v28  ;;  %v2341_v20 = vadd.f32 %v13072_v13, %v13071_v29  ;;  %v2465_v39 = vadd.f32 %v2347_v17, %v13073_v60  ;;  %v10113_v1 = vld [vmem:[%s12759_s4 + $0x10] sm:$0xff]  ;;  %v13080_v17 = vld [vmem:[#allocation104_spill] sm:$0xff] }
 0x38e   :  { %v2472_v58 = vadd.f32 %v2429_v49, %v1647_v0  ;;  %v2522_v0 = vmax.f32 %v2501_v22, 0.0  ;;  %v2457_v25 = vadd.f32 %v2414_v36, %v13074_v47  ;;  %v2534_v16 = vadd.f32 %v10054_v43, %v2463_v54  ;;  %v13079_v22 = vld [vmem:[#allocation30_spill] sm:$0xff] }
 0x38f   :  { %v2561_v10 = vmax.f32 %v2540_v6, 0.0  ;;  %v2338_v52 = vadd.f32 %v13076_v63, %v13075_v46  ;;  %v2462_v7 = vadd.f32 %v2344_v3, %v13077_v23  ;;  %v2539_v56 = vadd.f32 %v10022_v27, %v2468_v34  ;;  %v13082_v34 = vld [vmem:[#allocation21_spill] sm:$0xff] }
 0x390   :  { %v2543_v42 = vadd.f32 %v10054_v43, %v2472_v58  ;;  %v2314_v53 = vpop.f32.mrf.mxu2  ;;  %v2352_v57 = vpop.f32.mrf.mxu3  ;;  %v2454_v37 = vadd.f32 %v2411_v15, %v13078_v26  ;;  %v2531_v44 = vadd.f32 %v10054_v43, %v2460_v38  ;;  %v2558_v49 = vmax.f32 %v2537_v48, 0.0  ;;  %v13084_v26 = vld [vmem:[#allocation52_spill] sm:$0xff] }
 0x391   :  { %v2353_v24 = vadd.f32 %v2352_v57, %v2314_v53  ;;  %6174 = vmatmul.msk.f32.gmra.mxu2 %vm2590_vm4, %v10113_v1  ;;  %v2335_v55 = vadd.f32 %v13080_v17, %v13079_v22  ;;  %v2459_v36 = vadd.f32 %v2341_v20, %v13081_v2  ;;  %v2536_v54 = vadd.f32 %v10022_v27, %v2465_v39  ;;  %v13088_v22 = vld [vmem:[#allocation133_spill] sm:$0xff]  ;;  %v13089_v17 = vld [vmem:[#allocation132_spill] sm:$0xff]  ;;  %v6187_v2 = vld [vmem:[%s12759_s4 + $0x38] sm:$0xf] }
 0x392   :  { %v2564_v59 = vmax.f32 %v2543_v42, 0.0  ;;  %v2582_v58 = vmax.f32 %v2519_v19, %v2561_v10  ;;  %v2516_v14 = vmax.f32 %v2495_v11, 0.0  ;;  %v2555_v3 = vmax.f32 %v2534_v16, 0.0 }
 0x393   :  { %v2471_v8 = vadd.f32 %v2353_v24, %v10011_v31  ;;  %v2528_v31 = vadd.f32 %v10054_v43, %v2457_v25  ;;  %v2456_v61 = vadd.f32 %v2338_v52, %v13082_v34  ;;  %v2533_v18 = vadd.f32 %v10022_v27, %v2462_v7 }
 0x394   :  { %v2585_v28 = vmax.f32 %v2522_v0, %v2564_v59  ;;  %v2560_v38 = vmax.f32 %v2539_v56, 0.0  ;;  %v2525_v48 = vadd.f32 %v10054_v43, %v2454_v37  ;;  %v2579_v42 = vmax.f32 %v2516_v14, %v2558_v49  ;;  %v13083_v0 = vld [vmem:[#allocation19_spill] sm:$0xff]  ;;  %v13087_v49 = vld [vmem:[#allocation134_spill] sm:$0xff] }
 0x395   :  { %v2542_v6 = vadd.f32 %v10022_v27, %v2471_v8  ;;  %v2513_v53 = vmax.f32 %v10088_v5, 0.0  ;;  %v2552_v57 = vmax.f32 %v2531_v44, 0.0  ;;  %v2453_v29 = vadd.f32 %v2335_v55, %v13083_v0  ;;  %v2589_v56 = vld [vmem:[%s12759_s4 + $0x18] sm:$0xf]  ;;  %v6185_v44 = vld [vmem:[%s12759_s4 + $0x28] sm:$0xff]  ;;  %v6186_v55 = vld [vmem:[%s12759_s4 + $0x30] sm:$0xff] }
 0x396   :  { %2670 = vmatpush.msrb.mxu2 %v2585_v28  ;;  %2774 = vmatpush.msrb.mxu1 %v2585_v28  ;;  %v2530_v19 = vadd.f32 %v10022_v27, %v2459_v36  ;;  %v2557_v13 = vmax.f32 %v2536_v54, 0.0  ;;  %v2483_v20 = vadd.f32 %v10054_v43, %v10073_v41  ;;  %v2510_v39 = vmax.f32 %v10085_v33, 0.0  ;;  %v13085_v37 = vld [vmem:[#allocation103_spill] sm:$0xff] }
 0x397   :  { %v2563_v15 = vmax.f32 %v2542_v6, 0.0  ;;  %v2576_v60 = vmax.f32 %v2513_v53, %v2555_v3  ;;  %v2549_v24 = vmax.f32 %v2528_v31, 0.0  ;;  %v2527_v5 = vadd.f32 %v10022_v27, %v2456_v61  ;;  %v13086_v28 = vld [vmem:[#allocation51_spill] sm:$0xff] }
 0x398   :  { %2671 = vmatpush.msrb.mxu2 %v2582_v58  ;;  %2775 = vmatpush.msrb.mxu1 %v2582_v58  ;;  %v2581_v47 = vmax.f32 %v2518_v35, %v2560_v38  ;;  %v2515_v62 = vmax.f32 %v10058_v21, 0.0  ;;  %v2485_v25 = vadd.f32 %v10022_v27, %v10035_v9  ;;  %v2573_v43 = vmax.f32 %v2510_v39, %v2552_v57 }
 0x399   :  { %v2584_v11 = vmax.f32 %v2521_v12, %v2563_v15  ;;  %v2554_v12 = vmax.f32 %v2533_v18, 0.0  ;;  %v2507_v41 = vmax.f32 %v10080_v45, 0.0  ;;  %v2546_v33 = vmax.f32 %v2525_v48, 0.0  ;;  %6175 = vmatmul.msk.f32.gmra.mxu2 %vm2590_vm4, %v2589_v56 }
 0x39a   :  { %2672 = vmatpush.msrb.mxu2 %v2579_v42  ;;  %2776 = vmatpush.msrb.mxu1 %v2579_v42  ;;  %v2524_v16 = vadd.f32 %v10022_v27, %v2453_v29  ;;  %v2578_v59 = vmax.f32 %v2515_v62, %v2557_v13  ;;  %v2512_v50 = vmax.f32 %v10051_v4, 0.0  ;;  %v2551_v35 = vmax.f32 %v2530_v19, 0.0 }
 0x39b   :  { %2641 = vmatpush.msra.mxu3 %v2584_v11  ;;  %2745 = vmatpush.msrb.mxu0 %v2584_v11  ;;  %v2570_v21 = vmax.f32 %v2507_v41, %v2549_v24  ;;  %v2504_v10 = vmax.f32 %v2483_v20, 0.0  ;;  %v2482_v9 = vadd.f32 %v10022_v27, %v10019_v40  ;;  %v2509_v45 = vmax.f32 %v10044_v32, 0.0  ;;  %v6184_v32 = vld [vmem:[%s12759_s4 + $0x20] sm:$0xff] }
 0x39c   :  { %2673 = vmatpush.msrb.mxu2 %v2576_v60  ;;  %2777 = vmatpush.msrb.mxu1 %v2576_v60  ;;  %v2575_v46 = vmax.f32 %v2512_v50, %v2554_v12  ;;  %v2548_v63 = vmax.f32 %v2527_v5, 0.0  ;;  %v2506_v23 = vmax.f32 %v2485_v25, 0.0  ;;  %v2545_v7 = vmax.f32 %v2524_v16, 0.0  ;;  %v2806_v5 = vld [vmem:[%s12762_s7] sm:$0xff]  ;;  %v2807_v12 = vld [vmem:[%s12762_s7 + $0x8] sm:$0xff] }
 0x39d   :  { %2642 = vmatpush.msra.mxu3 %v2581_v47  ;;  %2746 = vmatpush.msrb.mxu0 %v2581_v47  ;;  %v2567_v52 = vmax.f32 %v2504_v10, %v2546_v33  ;;  %v2572_v4 = vmax.f32 %v2509_v45, %v2551_v35  ;;  %v2503_v27 = vmax.f32 %v2482_v9, 0.0  ;;  %v10253_v33 = vld [vmem:[%s12762_s7 + $0x18] sm:$0xff]  ;;  %v10277_v10 = vld [vmem:[%s12762_s7 + $0x20] sm:$0xff]  ;;  %v6290_v9 = vld [vmem:[%s12762_s7 + $0x28] sm:$0xff] }
 0x39e   :  { %2674 = vmatpush.msrb.mxu2 %v2573_v43  ;;  %2778 = vmatpush.msrb.mxu1 %v2573_v43  ;;  %v2569_v40 = vmax.f32 %v2506_v23, %v2548_v63  ;;  %v2808_v43 = vld [vmem:[%s12762_s7 + $0x10] sm:$0xff]  ;;  %v6375_v45 = vld [vmem:[%s12760_s5 + $0x700] sm:$0xff] }
 0x39f   :  { %2643 = vmatpush.msra.mxu3 %v2578_v59  ;;  %2747 = vmatpush.msrb.mxu0 %v2578_v59  ;;  %v2566_v8 = vmax.f32 %v2503_v27, %v2545_v7  ;;  %v6373_v63 = vld [vmem:[%s12760_s5 + $0x6f0] sm:$0xff]  ;;  %v6363_v7 = vld [vmem:[%s12760_s5 + $0x6a0] sm:$0xff] }
 0x3a0   :  { %2675 = vmatpush.msrb.mxu2 %v2570_v21  ;;  %2779 = vmatpush.msrb.mxu1 %v2570_v21  ;;  %v6333_v23 = vld [vmem:[%s12760_s5 + $0x5b0] sm:$0xff]  ;;  %v6371_v27 = vld [vmem:[%s12760_s5 + $0x6e0] sm:$0xff] }
 0x3a1   :  { %2644 = vmatpush.msra.mxu3 %v2575_v46  ;;  %2748 = vmatpush.msrb.mxu0 %v2575_v46  ;;  %v6377_v46 = vld [vmem:[%s12760_s5 + $0x710] sm:$0xff] }
 0x3a2   :  { %2676 = vmatpush.msrb.mxu2 %v2567_v52  ;;  %2780 = vmatpush.msrb.mxu1 %v2567_v52  ;;  %v6365_v52 = vld [vmem:[%s12760_s5 + $0x6b0] sm:$0xff] }
 0x3a3   :  { %2645 = vmatpush.msra.mxu3 %v2572_v4  ;;  %2749 = vmatpush.msrb.mxu0 %v2572_v4  ;;  %v6334_v4 = vld [vmem:[%s12760_s5 + $0x5b8] sm:$0xff] }
 0x3a4   :  { %6196 = vmatmul.msk.f32.vlgmr.msrb.gmra.mxu1 %vm2590_vm4, %v6184_v32  ;;  %6180 = vmatmul.msk.f32.vlgmr.msrb.gmra.mxu2 %vm2590_vm4, %v10008_v51 }
 0x3a5   :  { %2646 = vmatpush.msra.mxu3 %v2569_v40  ;;  %2750 = vmatpush.msrb.mxu0 %v2569_v40  ;;  %v6331_v40 = vld [vmem:[%s12760_s5 + $0x5a0] sm:$0xff] }
 0x3a7   :  { %2647 = vmatpush.msra.mxu3 %v2566_v8  ;;  %2751 = vmatpush.msrb.mxu0 %v2566_v8  ;;  %v6330_v8 = vld [vmem:[%s12760_s5 + $0x598] sm:$0xff] }
 0x3a8   :  { %6176 = vmatmul.msk.f32.vlgmr.msra.gmra.mxu3 %vm2590_vm4, %v10008_v51  ;;  %6192 = vmatmul.msk.f32.vlgmr.msrb.gmra.mxu0 %vm2590_vm4, %v6184_v32  ;;  %v13090_v51 = vld [vmem:[#allocation131_spill] sm:$0xff] }
 0x3a9   :  { %2716 = vmatpush.msrb.mxu3 %v13084_v26  ;;  %v6369_v26 = vld [vmem:[%s12760_s5 + $0x6d0] sm:$0xff] }
 0x3ab   :  { %2717 = vmatpush.msrb.mxu3 %v13085_v37  ;;  %v6329_v37 = vld [vmem:[%s12760_s5 + $0x590] sm:$0xff] }
 0x3ac   :  { %6197 = vmatmul.msk.f32.gmra.mxu1 %vm2590_vm4, %v6185_v44  ;;  %6181 = vmatmul.msk.f32.gmra.mxu2 %vm2590_vm4, %v10070_v30 }
 0x3ad   :  { %2718 = vmatpush.msrb.mxu3 %v13086_v28  ;;  %v6328_v28 = vld [vmem:[%s12760_s5 + $0x588] sm:$0xff] }
 0x3af   :  { %2719 = vmatpush.msrb.mxu3 %v13087_v49  ;;  %v6367_v49 = vld [vmem:[%s12760_s5 + $0x6c0] sm:$0xff] }
 0x3b0   :  { %6177 = vmatmul.msk.f32.gmra.mxu3 %vm2590_vm4, %v10070_v30  ;;  %6193 = vmatmul.msk.f32.gmra.mxu0 %vm2590_vm4, %v6185_v44 }
 0x3b1   :  { %2720 = vmatpush.msrb.mxu3 %v13088_v22  ;;  %v6327_v22 = vld [vmem:[%s12760_s5 + $0x580] sm:$0xff] }
 0x3b3   :  { %2721 = vmatpush.msrb.mxu3 %v13089_v17  ;;  %v6357_v17 = vld [vmem:[%s12760_s5 + $0x670] sm:$0xff] }
 0x3b4   :  { %6198 = vmatmul.msk.f32.gmra.mxu1 %vm2590_vm4, %v6186_v55  ;;  %6182 = vmatmul.msk.f32.gmra.mxu2 %vm2590_vm4, %v10113_v1 }
 0x3b5   :  { %2722 = vmatpush.msrb.mxu3 %v13090_v51  ;;  %v6366_v51 = vld [vmem:[%s12760_s5 + $0x6b8] sm:$0xff] }
 0x3b8   :  { %6178 = vmatmul.msk.f32.gmra.mxu3 %vm2590_vm4, %v10113_v1  ;;  %6194 = vmatmul.msk.f32.gmra.mxu0 %vm2590_vm4, %v6186_v55 }
 0x3bc   :  { %6199 = vmatmul.msk.f32.gmra.mxu1 %vm2590_vm4, %v6187_v2  ;;  %6183 = vmatmul.msk.f32.gmra.mxu2 %vm2590_vm4, %v2589_v56 }
 0x3c0   :  { %6179 = vmatmul.msk.f32.gmra.mxu3 %vm2590_vm4, %v2589_v56  ;;  %6195 = vmatmul.msk.f32.gmra.mxu0 %vm2590_vm4, %v6187_v2  ;;  %v6332_v56 = vld [vmem:[%s12760_s5 + $0x5a8] sm:$0xff] }
 0x3c8   :  { %6188 = vmatmul.msk.f32.vlgmr.msrb.gmra.mxu3 %vm2590_vm4, %v6184_v32  ;;  %v6361_v32 = vld [vmem:[%s12760_s5 + $0x690] sm:$0xff] }
 0x3d0   :  { %6189 = vmatmul.msk.f32.gmra.mxu3 %vm2590_vm4, %v6185_v44  ;;  %v6359_v44 = vld [vmem:[%s12760_s5 + $0x680] sm:$0xff] }
 0x3d8   :  { %6190 = vmatmul.msk.f32.gmra.mxu3 %vm2590_vm4, %v6186_v55  ;;  %v6326_v55 = vld [vmem:[%s12760_s5 + $0x578] sm:$0xff] }
 0x3e0   :  { %6191 = vmatmul.msk.f32.gmra.mxu3 %vm2590_vm4, %v6187_v2  ;;  %v6364_v2 = vld [vmem:[%s12760_s5 + $0x6a8] sm:$0xff] }
 0x404   :  { %v10202_v30 = vpop.f32.mrf.mxu2 }
 0x40c   :  { %v2623_v36 = vpop.f32.mrf.mxu2 }
 0x414   :  { %v2626_v1 = vpop.f32.mrf.mxu2 }
 0x41c   :  { %v2629_v6 = vpop.f32.mrf.mxu2 }
 0x421   :  { %v2782_v31 = vpop.f32.mrf.mxu1 }
 0x425   :  { %v2753_v54 = vpop.f32.mrf.mxu0 }
 0x427   :  { %v2678_v3 = vpop.f32.mrf.mxu2 }
 0x428   :  { %v10227_v62 = vmax.f32 %v2678_v3, %v2782_v31  ;;  %v6323_v31 = vld [vmem:[%s12760_s5 + $0x560] sm:$0xff]  ;;  %v6322_v3 = vld [vmem:[%s12760_s5 + $0x558] sm:$0xff] }
 0x429   :  { %v2785_v34 = vpop.f32.mrf.mxu1 }
 0x42b   :  { %v2649_v58 = vpop.f32.mrf.mxu3 }
 0x42c   :  { %v10217_v39 = vmax.f32 %v2649_v58, %v2753_v54  ;;  %v6355_v54 = vld [vmem:[%s12760_s5 + $0x660] sm:$0xff]  ;;  %v6358_v58 = vld [vmem:[%s12760_s5 + $0x678] sm:$0xff] }
 0x42d   :  { %v2756_v14 = vpop.f32.mrf.mxu0 }
 0x42f   :  { %v2681_v15 = vpop.f32.mrf.mxu2 }
 0x430   :  { %v10220_v24 = vmax.f32 %v2681_v15, %v2785_v34  ;;  %v6321_v34 = vld [vmem:[%s12760_s5 + $0x550] sm:$0xff]  ;;  %v6320_v15 = vld [vmem:[%s12760_s5 + $0x548] sm:$0xff] }
 0x431   :  { %v2788_v48 = vpop.f32.mrf.mxu1 }
 0x433   :  { %v2652_v61 = vpop.f32.mrf.mxu3 }
 0x434   :  { %v10210_v13 = vmax.f32 %v2652_v61, %v2756_v14  ;;  %v6353_v14 = vld [vmem:[%s12760_s5 + $0x650] sm:$0xff]  ;;  %v6356_v61 = vld [vmem:[%s12760_s5 + $0x668] sm:$0xff] }
 0x435   :  { %v2759_v18 = vpop.f32.mrf.mxu0 }
 0x437   :  { %v2684_v42 = vpop.f32.mrf.mxu2 }
 0x438   :  { %v10213_v20 = vmax.f32 %v2684_v42, %v2788_v48  ;;  %v6354_v48 = vld [vmem:[%s12760_s5 + $0x658] sm:$0xff]  ;;  %v6349_v42 = vld [vmem:[%s12760_s5 + $0x630] sm:$0xff] }
 0x439   :  { %v2791_v29 = vpop.f32.mrf.mxu1 }
 0x43b   :  { %v2655_v38 = vpop.f32.mrf.mxu3 }
 0x43c   :  { %v10206_v19 = vmax.f32 %v2655_v38, %v2759_v18  ;;  %v6351_v18 = vld [vmem:[%s12760_s5 + $0x640] sm:$0xff] }
 0x43d   :  { %v2762_v53 = vpop.f32.mrf.mxu0  ;;  %v6319_v38 = vld [vmem:[%s12760_s5 + $0x540] sm:$0xff] }
 0x43f   :  { %v2687_v11 = vpop.f32.mrf.mxu2 }
 0x440   :  { %v10215_v60 = vmax.f32 %v2687_v11, %v2791_v29  ;;  %v6352_v29 = vld [vmem:[%s12760_s5 + $0x648] sm:$0xff]  ;;  %v6347_v11 = vld [vmem:[%s12760_s5 + $0x620] sm:$0xff] }
 0x442   :  { %6208 = vmatpush.msk.msra.mxu0 %vm106_vm0, %v10215_v60 }
 0x443   :  { %v2658_v57 = vpop.f32.mrf.mxu3 }
 0x444   :  { %v10204_v0 = vmax.f32 %v2658_v57, %v2762_v53  ;;  %2893 = vmatpush.msra.mxu0 %v10213_v20  ;;  %v6318_v53 = vld [vmem:[%s12760_s5 + $0x538] sm:$0xff]  ;;  %v6317_v57 = vld [vmem:[%s12760_s5 + $0x530] sm:$0xff] }
 0x446   :  { %6204 = vmatpush.msk.msra.mxu3 %vm106_vm0, %v10204_v0  ;;  %2894 = vmatpush.msra.mxu0 %v10220_v24 }
 0x448   :  { %2867 = vmatpush.msra.mxu3 %v10206_v19  ;;  %2895 = vmatpush.msra.mxu0 %v10227_v62 }
 0x449   :  { %6209 = vmatmul.msk.f32.vlgmr.msra.gmra.mxu0 %vm2809_vm5, %v2806_v5 }
 0x44a   :  { %2868 = vmatpush.msra.mxu3 %v10210_v13  ;;  %3237 = vmatpush.msrb.mxu0 %v6333_v23  ;;  %v6339_v23 = vld [vmem:[%s12760_s5 + $0x5e0] sm:$0xff] }
 0x44b   :  { %v2724_v47 = vpop.f32.mrf.mxu3 }
 0x44c   :  { %2869 = vmatpush.msra.mxu3 %v10217_v39  ;;  %v10270_v21 = vmax.f32 %v10202_v30, %v2724_v47  ;;  %3238 = vmatpush.msrb.mxu0 %v6331_v40  ;;  %v6362_v30 = vld [vmem:[%s12760_s5 + $0x698] sm:$0xff]  ;;  %v6315_v47 = vld [vmem:[%s12760_s5 + $0x520] sm:$0xff] }
 0x44d   :  { %6205 = vmatmul.msk.f32.vlgmr.msra.gmra.mxu3 %vm2809_vm5, %v2806_v5  ;;  %v6342_v40 = vld [vmem:[%s12760_s5 + $0x5f8] sm:$0xff] }
 0x44e   :  { %6299 = vmatpush.msk.msrb.mxu3 %vm106_vm0, %v10215_v60  ;;  %3239 = vmatpush.msrb.mxu0 %v6329_v37  ;;  %v6335_v37 = vld [vmem:[%s12760_s5 + $0x5c0] sm:$0xff] }
 0x450   :  { %3137 = vmatpush.msrb.mxu3 %v10213_v20  ;;  %3240 = vmatpush.msrb.mxu0 %v6327_v22  ;;  %v6415_v22 = vld [vmem:[%s12760_s5 + $0x810] sm:$0xff] }
 0x451   :  { %6210 = vmatmul.msk.f32.gmra.mxu0 %vm2809_vm5, %v2807_v12 }
 0x452   :  { %3138 = vmatpush.msrb.mxu3 %v10220_v24 }
 0x453   :  { %v2727_v25 = vpop.f32.mrf.mxu3 }
 0x454   :  { %3139 = vmatpush.msrb.mxu3 %v10227_v62  ;;  %v10265_v35 = vmax.f32 %v2623_v36, %v2727_v25  ;;  %v6325_v36 = vld [vmem:[%s12760_s5 + $0x570] sm:$0xff] }
 0x455   :  { %6206 = vmatmul.msk.f32.gmra.mxu3 %vm2809_vm5, %v2807_v12  ;;  %3241 = vmatpush.msrb.mxu0 %v6325_v36  ;;  %v6345_v25 = vld [vmem:[%s12760_s5 + $0x610] sm:$0xff] }
 0x456   :  { %3315 = vmatpush.msra.mxu3 %v6334_v4  ;;  %v6344_v4 = vld [vmem:[%s12760_s5 + $0x608] sm:$0xff]  ;;  %v6411_v36 = vld [vmem:[%s12760_s5 + $0x7f0] sm:$0xff] }
 0x457   :  { %3242 = vmatpush.msrb.mxu0 %v6323_v31  ;;  %v6409_v31 = vld [vmem:[%s12760_s5 + $0x7e0] sm:$0xff] }
 0x458   :  { %3316 = vmatpush.msra.mxu3 %v6332_v56  ;;  %v6307_v56 = vld [vmem:[%s12760_s5 + $0x4e0] sm:$0xff] }
 0x459   :  { %6211 = vmatmul.msk.f32.gmra.mxu0 %vm2809_vm5, %v2808_v43 }
 0x45a   :  { %3317 = vmatpush.msra.mxu3 %v6330_v8  ;;  %3243 = vmatpush.msrb.mxu0 %v6321_v34  ;;  %v6305_v8 = vld [vmem:[%s12760_s5 + $0x4d0] sm:$0xff] }
 0x45b   :  { %v2730_v41 = vpop.f32.mrf.mxu3  ;;  %v6439_v34 = vld [vmem:[%s12760_s5 + $0x8d0] sm:$0xff] }
 0x45c   :  { %v10259_v50 = vmax.f32 %v2626_v1, %v2730_v41  ;;  %3318 = vmatpush.msra.mxu3 %v6328_v28  ;;  %v6360_v1 = vld [vmem:[%s12760_s5 + $0x688] sm:$0xff]  ;;  %3244 = vmatpush.msrb.mxu0 %v6319_v38  ;;  %v6313_v41 = vld [vmem:[%s12760_s5 + $0x510] sm:$0xff]  ;;  %v6303_v28 = vld [vmem:[%s12760_s5 + $0x4c0] sm:$0xff] }
 0x45d   :  { %6207 = vmatmul.msk.f32.gmra.mxu3 %vm2809_vm5, %v2808_v43  ;;  %v6370_v38 = vld [vmem:[%s12760_s5 + $0x6d8] sm:$0xff] }
 0x45e   :  { %3319 = vmatpush.msra.mxu3 %v6326_v55  ;;  %3245 = vmatpush.msrb.mxu0 %v6317_v57  ;;  %v6336_v55 = vld [vmem:[%s12760_s5 + $0x5c8] sm:$0xff] }
 0x460   :  { %3246 = vmatpush.msrb.mxu0 %v6315_v47  ;;  %v6431_v47 = vld [vmem:[%s12760_s5 + $0x890] sm:$0xff] }
 0x462   :  { %3247 = vmatpush.msrb.mxu0 %v6313_v41  ;;  %v6427_v41 = vld [vmem:[%s12760_s5 + $0x870] sm:$0xff] }
 0x463   :  { %v2733_v16 = vpop.f32.mrf.mxu3 }
 0x464   :  { %v10255_v59 = vmax.f32 %v2629_v6, %v2733_v16  ;;  %v6324_v6 = vld [vmem:[%s12760_s5 + $0x568] sm:$0xff]  ;;  %v6343_v16 = vld [vmem:[%s12760_s5 + $0x600] sm:$0xff] }
 0x465   :  { %6300 = vmatmul.msk.f32.vlgmr.msrb.gmra.mxu3 %vm2809_vm5, %v10253_v33 }
 0x466   :  { %6200 = vmatpush.msk.msra.mxu2 %vm106_vm0, %v10255_v59  ;;  %6291 = vmatpush.msk.msra.mxu1 %vm106_vm0, %v10255_v59 }
 0x467   :  { %3320 = vmatpush.msra.mxu3 %v6324_v6 }
 0x468   :  { %2841 = vmatpush.msra.mxu2 %v10259_v50  ;;  %3085 = vmatpush.msra.mxu1 %v10259_v50 }
 0x469   :  { %3321 = vmatpush.msra.mxu3 %v6322_v3  ;;  %v6407_v3 = vld [vmem:[%s12760_s5 + $0x7d0] sm:$0xff] }
 0x46a   :  { %2842 = vmatpush.msra.mxu2 %v10265_v35  ;;  %3086 = vmatpush.msra.mxu1 %v10265_v35 }
 0x46b   :  { %3322 = vmatpush.msra.mxu3 %v6320_v15  ;;  %v6437_v15 = vld [vmem:[%s12760_s5 + $0x8c0] sm:$0xff] }
 0x46c   :  { %2843 = vmatpush.msra.mxu2 %v10270_v21  ;;  %3087 = vmatpush.msra.mxu1 %v10270_v21 }
 0x46d   :  { %6201 = vmatmul.msk.f32.vlgmr.msra.gmra.mxu2 %vm2809_vm5, %v2806_v5  ;;  %6292 = vmatmul.msk.f32.vlgmr.msra.gmra.mxu1 %vm2809_vm5, %v10253_v33  ;;  %v6316_v5 = vld [vmem:[%s12760_s5 + $0x528] sm:$0xff] }
 0x46e   :  { %6295 = vmatpush.msk.msrb.mxu2 %vm106_vm0, %v10204_v0  ;;  %6301 = vmatmul.msk.f32.gmra.mxu3 %vm2809_vm5, %v10277_v10 }
 0x46f   :  { %3263 = vmatpush.msrb.mxu1 %v6365_v52  ;;  %3323 = vmatpush.msra.mxu3 %v6318_v53  ;;  %v6309_v52 = vld [vmem:[%s12760_s5 + $0x4f0] sm:$0xff]  ;;  %v6368_v53 = vld [vmem:[%s12760_s5 + $0x6c8] sm:$0xff] }
 0x470   :  { %3111 = vmatpush.msrb.mxu2 %v10206_v19 }
 0x471   :  { %3264 = vmatpush.msrb.mxu1 %v6363_v7  ;;  %3324 = vmatpush.msra.mxu3 %v6316_v5  ;;  %v6308_v7 = vld [vmem:[%s12760_s5 + $0x4e8] sm:$0xff]  ;;  %v6399_v5 = vld [vmem:[%s12760_s5 + $0x790] sm:$0xff] }
 0x472   :  { %3112 = vmatpush.msrb.mxu2 %v10210_v13 }
 0x473   :  { %3265 = vmatpush.msrb.mxu1 %v6361_v32  ;;  %v6306_v32 = vld [vmem:[%s12760_s5 + $0x4d8] sm:$0xff] }
 0x474   :  { %3113 = vmatpush.msrb.mxu2 %v10217_v39 }
 0x475   :  { %6202 = vmatmul.msk.f32.gmra.mxu2 %vm2809_vm5, %v2807_v12  ;;  %6293 = vmatmul.msk.f32.gmra.mxu1 %vm2809_vm5, %v10277_v10  ;;  %v6350_v12 = vld [vmem:[%s12760_s5 + $0x638] sm:$0xff] }
 0x476   :  { %6302 = vmatmul.msk.f32.gmra.mxu3 %vm2809_vm5, %v6290_v9  ;;  %3299 = vmatpush.msra.mxu2 %v6377_v46  ;;  %v6346_v46 = vld [vmem:[%s12760_s5 + $0x618] sm:$0xff] }
 0x477   :  { %3266 = vmatpush.msrb.mxu1 %v6359_v44  ;;  %v6304_v44 = vld [vmem:[%s12760_s5 + $0x4c8] sm:$0xff] }
 0x478   :  { %3300 = vmatpush.msra.mxu2 %v6375_v45  ;;  %v6341_v45 = vld [vmem:[%s12760_s5 + $0x5f0] sm:$0xff] }
 0x479   :  { %3267 = vmatpush.msrb.mxu1 %v6357_v17  ;;  %v6447_v17 = vld [vmem:[%s12760_s5 + $0x910] sm:$0xff] }
 0x47a   :  { %3301 = vmatpush.msra.mxu2 %v6373_v63  ;;  %v6310_v63 = vld [vmem:[%s12760_s5 + $0x4f8] sm:$0xff] }
 0x47b   :  { %3268 = vmatpush.msrb.mxu1 %v6355_v54  ;;  %v6376_v54 = vld [vmem:[%s12760_s5 + $0x708] sm:$0xff] }
 0x47c   :  { %3302 = vmatpush.msra.mxu2 %v6371_v27  ;;  %v6337_v27 = vld [vmem:[%s12760_s5 + $0x5d0] sm:$0xff] }
 0x47d   :  { %6203 = vmatmul.msk.f32.gmra.mxu2 %vm2809_vm5, %v2808_v43  ;;  %6294 = vmatmul.msk.f32.gmra.mxu1 %vm2809_vm5, %v6290_v9  ;;  %v6314_v43 = vld [vmem:[%s12760_s5 + $0x518] sm:$0xff] }
 0x47e   :  { %3303 = vmatpush.msra.mxu2 %v6369_v26  ;;  %3269 = vmatpush.msrb.mxu1 %v6353_v14  ;;  %v6340_v26 = vld [vmem:[%s12760_s5 + $0x5e8] sm:$0xff]  ;;  %v6374_v14 = vld [vmem:[%s12760_s5 + $0x6f8] sm:$0xff] }
 0x47f   :  { %3325 = vmatpush.msra.mxu3 %v6314_v43  ;;  %v6395_v43 = vld [vmem:[%s12760_s5 + $0x770] sm:$0xff] }
 0x480   :  { %3304 = vmatpush.msra.mxu2 %v6367_v49  ;;  %3270 = vmatpush.msrb.mxu1 %v6351_v18  ;;  %v6338_v49 = vld [vmem:[%s12760_s5 + $0x5d8] sm:$0xff]  ;;  %v6405_v18 = vld [vmem:[%s12760_s5 + $0x7c0] sm:$0xff] }
 0x482   :  { %3271 = vmatpush.msrb.mxu1 %v6349_v42  ;;  %v6435_v42 = vld [vmem:[%s12760_s5 + $0x8b0] sm:$0xff] }
 0x484   :  { %3272 = vmatpush.msrb.mxu1 %v6347_v11  ;;  %v6433_v11 = vld [vmem:[%s12760_s5 + $0x8a0] sm:$0xff] }
 0x485   :  { %6296 = vmatmul.msk.f32.vlgmr.msrb.gmra.mxu2 %vm2809_vm5, %v10253_v33  ;;  %v6348_v33 = vld [vmem:[%s12760_s5 + $0x628] sm:$0xff] }
 0x486   :  { %3341 = vmatpush.msrb.mxu2 %v6366_v51  ;;  %3273 = vmatpush.msrb.mxu1 %v6345_v25  ;;  %v6413_v51 = vld [vmem:[%s12760_s5 + $0x800] sm:$0xff] }
 0x487   :  { %v6429_v25 = vld [vmem:[%s12760_s5 + $0x880] sm:$0xff] }
 0x488   :  { %3342 = vmatpush.msrb.mxu2 %v6364_v2  ;;  %3274 = vmatpush.msrb.mxu1 %v6343_v16  ;;  %v6445_v2 = vld [vmem:[%s12760_s5 + $0x900] sm:$0xff] }
 0x489   :  { %v6393_v16 = vld [vmem:[%s12760_s5 + $0x760] sm:$0xff] }
 0x48a   :  { %3343 = vmatpush.msrb.mxu2 %v6362_v30  ;;  %3275 = vmatpush.msrb.mxu1 %v6341_v45  ;;  %v6378_v30 = vld [vmem:[%s12760_s5 + $0x718] sm:$0xff]  ;;  %v6389_v45 = vld [vmem:[%s12760_s5 + $0x740] sm:$0xff] }
 0x48c   :  { %3344 = vmatpush.msrb.mxu2 %v6360_v1  ;;  %3276 = vmatpush.msrb.mxu1 %v6339_v23  ;;  %v6443_v1 = vld [vmem:[%s12760_s5 + $0x8f0] sm:$0xff]  ;;  %v6416_v23 = vld [vmem:[%s12760_s5 + $0x818] sm:$0xff] }
 0x48d   :  { %6297 = vmatmul.msk.f32.gmra.mxu2 %vm2809_vm5, %v10277_v10  ;;  %v6312_v10 = vld [vmem:[%s12760_s5 + $0x508] sm:$0xff] }
 0x48e   :  { %3345 = vmatpush.msrb.mxu2 %v6358_v58  ;;  %3326 = vmatpush.msra.mxu3 %v6312_v10  ;;  %v6441_v58 = vld [vmem:[%s12760_s5 + $0x8e0] sm:$0xff] }
 0x48f   :  { %3277 = vmatpush.msrb.mxu1 %v6337_v27  ;;  %v6425_v10 = vld [vmem:[%s12760_s5 + $0x860] sm:$0xff]  ;;  %v6459_v27 = vld [vmem:[%s12760_s5 + $0x970] sm:$0xff] }
 0x490   :  { %3346 = vmatpush.msrb.mxu2 %v6356_v61  ;;  %3327 = vmatpush.msra.mxu3 %v6310_v63  ;;  %v6372_v61 = vld [vmem:[%s12760_s5 + $0x6e8] sm:$0xff]  ;;  %v6421_v63 = vld [vmem:[%s12760_s5 + $0x840] sm:$0xff] }
 0x491   :  { %3278 = vmatpush.msrb.mxu1 %v6335_v37  ;;  %v6457_v37 = vld [vmem:[%s12760_s5 + $0x960] sm:$0xff] }
 0x492   :  { %3347 = vmatpush.msrb.mxu2 %v6354_v48  ;;  %3328 = vmatpush.msra.mxu3 %v6308_v7  ;;  %v6403_v48 = vld [vmem:[%s12760_s5 + $0x7b0] sm:$0xff] }
 0x493   :  { %3470 = vmatpush.msra.mxu1 %v6415_v22  ;;  %v6453_v22 = vld [vmem:[%s12760_s5 + $0x940] sm:$0xff] }
 0x494   :  { %3348 = vmatpush.msrb.mxu2 %v6352_v29  ;;  %3329 = vmatpush.msra.mxu3 %v6306_v32  ;;  %v6401_v29 = vld [vmem:[%s12760_s5 + $0x7a0] sm:$0xff] }
 0x495   :  { %6298 = vmatmul.msk.f32.gmra.mxu2 %vm2809_vm5, %v6290_v9  ;;  %v6311_v9 = vld [vmem:[%s12760_s5 + $0x500] sm:$0xff]  ;;  %3471 = vmatpush.msra.mxu1 %v6413_v51 }
 0x496   :  { %3349 = vmatpush.msrb.mxu2 %v6350_v12  ;;  %3248 = vmatpush.msrb.mxu0 %v6311_v9  ;;  %v6397_v12 = vld [vmem:[%s12760_s5 + $0x780] sm:$0xff]  ;;  %v6391_v9 = vld [vmem:[%s12760_s5 + $0x750] sm:$0xff] }
 0x497   :  { %3330 = vmatpush.msra.mxu3 %v6304_v44  ;;  %3472 = vmatpush.msra.mxu1 %v6411_v36  ;;  %v6410_v44 = vld [vmem:[%s12760_s5 + $0x7e8] sm:$0xff]  ;;  %v6404_v36 = vld [vmem:[%s12760_s5 + $0x7b8] sm:$0xff] }
 0x498   :  { %3350 = vmatpush.msrb.mxu2 %v6348_v33  ;;  %3249 = vmatpush.msrb.mxu0 %v6309_v52  ;;  %v6387_v52 = vld [vmem:[%s12760_s5 + $0x730] sm:$0xff] }
 0x499   :  { %3496 = vmatpush.msrb.mxu3 %v6447_v17  ;;  %3473 = vmatpush.msra.mxu1 %v6409_v31  ;;  %v6400_v31 = vld [vmem:[%s12760_s5 + $0x798] sm:$0xff] }
 0x49a   :  { %3351 = vmatpush.msrb.mxu2 %v6346_v46  ;;  %3250 = vmatpush.msrb.mxu0 %v6307_v56  ;;  %v6423_v46 = vld [vmem:[%s12760_s5 + $0x850] sm:$0xff]  ;;  %v6385_v56 = vld [vmem:[%s12760_s5 + $0x720] sm:$0xff] }
 0x49b   :  { %3497 = vmatpush.msrb.mxu3 %v6445_v2  ;;  %3474 = vmatpush.msra.mxu1 %v6407_v3  ;;  %v6398_v3 = vld [vmem:[%s12760_s5 + $0x788] sm:$0xff] }
 0x49c   :  { %3352 = vmatpush.msrb.mxu2 %v6344_v4  ;;  %3251 = vmatpush.msrb.mxu0 %v6305_v8  ;;  %v6419_v4 = vld [vmem:[%s12760_s5 + $0x830] sm:$0xff]  ;;  %v6417_v8 = vld [vmem:[%s12760_s5 + $0x820] sm:$0xff] }
 0x49d   :  { %3498 = vmatpush.msrb.mxu3 %v6443_v1  ;;  %3475 = vmatpush.msra.mxu1 %v6405_v18  ;;  %v6449_v1 = vld [vmem:[%s12760_s5 + $0x920] sm:$0xff] }
 0x49e   :  { %3353 = vmatpush.msrb.mxu2 %v6342_v40  ;;  %3252 = vmatpush.msrb.mxu0 %v6303_v28  ;;  %v6414_v40 = vld [vmem:[%s12760_s5 + $0x808] sm:$0xff]  ;;  %v6455_v28 = vld [vmem:[%s12760_s5 + $0x950] sm:$0xff] }
 0x49f   :  { %3499 = vmatpush.msrb.mxu3 %v6441_v58  ;;  %3476 = vmatpush.msra.mxu1 %v6403_v48  ;;  %v6460_v58 = vld [vmem:[%s12760_s5 + $0x978] sm:$0xff]  ;;  %v6394_v48 = vld [vmem:[%s12760_s5 + $0x768] sm:$0xff] }
 0x4a0   :  { %3354 = vmatpush.msrb.mxu2 %v6340_v26  ;;  %3377 = vmatpush.msra.mxu0 %v6378_v30  ;;  %v6412_v26 = vld [vmem:[%s12760_s5 + $0x7f8] sm:$0xff]  ;;  %v6451_v30 = vld [vmem:[%s12760_s5 + $0x930] sm:$0xff] }
 0x4a1   :  { %3500 = vmatpush.msrb.mxu3 %v6439_v34  ;;  %3477 = vmatpush.msra.mxu1 %v6401_v29 }
 0x4a2   :  { %3355 = vmatpush.msrb.mxu2 %v6338_v49  ;;  %3378 = vmatpush.msra.mxu0 %v6376_v54  ;;  %v6408_v49 = vld [vmem:[%s12760_s5 + $0x7d8] sm:$0xff]  ;;  %v6402_v54 = vld [vmem:[%s12760_s5 + $0x7a8] sm:$0xff] }
 0x4a3   :  { %3501 = vmatpush.msrb.mxu3 %v6437_v15  ;;  %3478 = vmatpush.msra.mxu1 %v6399_v5  ;;  %v6396_v15 = vld [vmem:[%s12760_s5 + $0x778] sm:$0xff]  ;;  %v2936_v5 = vld [vmem:[%s12760_s5 + $0xf0] sm:$0xff] }
 0x4a4   :  { %3356 = vmatpush.msrb.mxu2 %v6336_v55  ;;  %3379 = vmatpush.msra.mxu0 %v6374_v14  ;;  %v6406_v55 = vld [vmem:[%s12760_s5 + $0x7c8] sm:$0xff] }
 0x4a5   :  { %3502 = vmatpush.msrb.mxu3 %v6435_v42  ;;  %3479 = vmatpush.msra.mxu1 %v6397_v12  ;;  %v6454_v42 = vld [vmem:[%s12760_s5 + $0x948] sm:$0xff] }
 0x4a6   :  { %3380 = vmatpush.msra.mxu0 %v6372_v61  ;;  %v6458_v61 = vld [vmem:[%s12760_s5 + $0x968] sm:$0xff] }
 0x4a7   :  { %3503 = vmatpush.msrb.mxu3 %v6433_v11  ;;  %3480 = vmatpush.msra.mxu1 %v6395_v43  ;;  %v6452_v11 = vld [vmem:[%s12760_s5 + $0x938] sm:$0xff]  ;;  %v6450_v12 = vld [vmem:[%s12760_s5 + $0x928] sm:$0xff] }
 0x4a8   :  { %3381 = vmatpush.msra.mxu0 %v6370_v38  ;;  %v6456_v38 = vld [vmem:[%s12760_s5 + $0x958] sm:$0xff] }
 0x4a9   :  { %3504 = vmatpush.msrb.mxu3 %v6431_v47  ;;  %3481 = vmatpush.msra.mxu1 %v6393_v16  ;;  %v6390_v47 = vld [vmem:[%s12760_s5 + $0x748] sm:$0xff]  ;;  %v6388_v43 = vld [vmem:[%s12760_s5 + $0x738] sm:$0xff] }
 0x4aa   :  { %3382 = vmatpush.msra.mxu0 %v6368_v53  ;;  %v6392_v53 = vld [vmem:[%s12760_s5 + $0x758] sm:$0xff]  ;;  %v6386_v16 = vld [vmem:[%s12760_s5 + $0x728] sm:$0xff] }
 0x4ab   :  { %3505 = vmatpush.msrb.mxu3 %v6429_v25  ;;  %3482 = vmatpush.msra.mxu1 %v6391_v9  ;;  %v2934_v25 = vld [vmem:[%s12760_s5 + $0xe0] sm:$0xff] }
 0x4ad   :  { %3506 = vmatpush.msrb.mxu3 %v6427_v41  ;;  %3483 = vmatpush.msra.mxu1 %v6389_v45  ;;  %v2932_v41 = vld [vmem:[%s12760_s5 + $0xd0] sm:$0xff] }
 0x4ae   :  { %v2968_v45 = vld [vmem:[%s12760_s5 + $0x1f0] sm:$0xff] }
 0x4af   :  { %3507 = vmatpush.msrb.mxu3 %v6425_v10  ;;  %3484 = vmatpush.msra.mxu1 %v6387_v52  ;;  %v6448_v10 = vld [vmem:[%s12760_s5 + $0x918] sm:$0xff]  ;;  %v2928_v52 = vld [vmem:[%s12760_s5 + $0xb0] sm:$0xff] }
 0x4b1   :  { %3508 = vmatpush.msrb.mxu3 %v6423_v46  ;;  %3485 = vmatpush.msra.mxu1 %v6385_v56  ;;  %v2930_v46 = vld [vmem:[%s12760_s5 + $0xc0] sm:$0xff] }
 0x4b2   :  { %v2926_v56 = vld [vmem:[%s12760_s5 + $0xa0] sm:$0xff] }
 0x4b3   :  { %3509 = vmatpush.msrb.mxu3 %v6421_v63  ;;  %v6446_v63 = vld [vmem:[%s12760_s5 + $0x908] sm:$0xff] }
 0x4b5   :  { %3510 = vmatpush.msrb.mxu3 %v6419_v4  ;;  %v2966_v4 = vld [vmem:[%s12760_s5 + $0x1e0] sm:$0xff] }
 0x4b7   :  { %3511 = vmatpush.msrb.mxu3 %v6417_v8  ;;  %v2924_v8 = vld [vmem:[%s12760_s5 + $0x90] sm:$0xff] }
 0x4d0   :  { %v10539_v6 = vpop.f32.mrf.mxu3 }
 0x4d8   :  { %v10577_v57 = vpop.f32.mrf.mxu3 }
 0x4e0   :  { %v10603_v33 = vpop.f32.mrf.mxu3 }
 0x4e8   :  { %v10632_v7 = vpop.f32.mrf.mxu3 }
 0x4e9   :  { %6379 = vmatmul.msk.f32.vlgmr.msra.gmra.mxu2 %vm3227_vm6, %v10632_v7 }
 0x4ea   :  { %v10645_v32 = vpop.f32.mrf.mxu1  ;;  %3548 = vmatpush.msra.mxu2 %v6416_v23  ;;  %v6444_v23 = vld [vmem:[%s12760_s5 + $0x8f8] sm:$0xff] }
 0x4eb   :  { %3253 = vmatmul.f32.vlgmr.msrb.gmra.mxu0 %v10645_v32  ;;  %3331 = vmatmul.f32.vlgmr.msra.gmra.mxu3 %v10645_v32 }
 0x4ec   :  { %3549 = vmatpush.msra.mxu2 %v6414_v40  ;;  %3532 = vmatpush.msrb.mxu0 %v6459_v27  ;;  %v2964_v40 = vld [vmem:[%s12760_s5 + $0x1d0] sm:$0xff]  ;;  %v6442_v27 = vld [vmem:[%s12760_s5 + $0x8e8] sm:$0xff] }
 0x4ed   :  { %3610 = vmatpush.msra.mxu3 %v6460_v58  ;;  %v6434_v58 = vld [vmem:[%s12760_s5 + $0x8a8] sm:$0xff] }
 0x4ee   :  { %3550 = vmatpush.msra.mxu2 %v6412_v26  ;;  %3533 = vmatpush.msrb.mxu0 %v6457_v37  ;;  %v6440_v37 = vld [vmem:[%s12760_s5 + $0x8d8] sm:$0xff] }
 0x4ef   :  { %3611 = vmatpush.msra.mxu3 %v6458_v61  ;;  %v2956_v61 = vld [vmem:[%s12760_s5 + $0x190] sm:$0xff] }
 0x4f0   :  { %v10670_v17 = vpop.f32.mrf.mxu2  ;;  %3551 = vmatpush.msra.mxu2 %v6410_v44  ;;  %3534 = vmatpush.msrb.mxu0 %v6455_v28  ;;  %v2922_v44 = vld [vmem:[%s12760_s5 + $0x80] sm:$0xff] }
 0x4f1   :  { %v10675_v51 = vpop.f32.mrf.mxu3  ;;  %3612 = vmatpush.msra.mxu3 %v6456_v38  ;;  %v2962_v28 = vld [vmem:[%s12760_s5 + $0x1c0] sm:$0xff]  ;;  %v6432_v38 = vld [vmem:[%s12760_s5 + $0x898] sm:$0xff] }
 0x4f2   :  { %v10677_v2 = vpop.f32.mrf.mxu1  ;;  %3552 = vmatpush.msra.mxu2 %v6408_v49  ;;  %3535 = vmatpush.msrb.mxu0 %v6453_v22  ;;  %v6438_v49 = vld [vmem:[%s12760_s5 + $0x8c8] sm:$0xff]  ;;  %v2920_v22 = vld [vmem:[%s12760_s5 + $0x70] sm:$0xff] }
 0x4f3   :  { %3256 = vmatmul.f32.gmra.mxu0 %v10677_v2  ;;  %6380 = vmatmul.msk.f32.gmra.mxu2 %vm3227_vm6, %v10675_v51 }
 0x4f4   :  { %3553 = vmatpush.msra.mxu2 %v6406_v55  ;;  %3334 = vmatmul.f32.gmra.mxu3 %v10677_v2  ;;  %v2960_v55 = vld [vmem:[%s12760_s5 + $0x1b0] sm:$0xff] }
 0x4f5   :  { %3536 = vmatpush.msrb.mxu0 %v6451_v30  ;;  %3613 = vmatpush.msra.mxu3 %v6454_v42  ;;  %v2980_v30 = vld [vmem:[%s12760_s5 + $0x250] sm:$0xff]  ;;  %v2954_v42 = vld [vmem:[%s12760_s5 + $0x180] sm:$0xff] }
 0x4f6   :  { %3554 = vmatpush.msra.mxu2 %v6404_v36  ;;  %v6436_v36 = vld [vmem:[%s12760_s5 + $0x8b8] sm:$0xff] }
 0x4f7   :  { %3537 = vmatpush.msrb.mxu0 %v6449_v1  ;;  %3614 = vmatpush.msra.mxu3 %v6452_v11  ;;  %v2918_v1 = vld [vmem:[%s12760_s5 + $0x60] sm:$0xff]  ;;  %v2912_v11 = vld [vmem:[%s12760_s5 + $0x30] sm:$0xff] }
 0x4f8   :  { %v10701_v14 = vpop.f32.mrf.mxu2  ;;  %3555 = vmatpush.msra.mxu2 %v6402_v54  ;;  %v2958_v54 = vld [vmem:[%s12760_s5 + $0x1a0] sm:$0xff] }
 0x4f9   :  { %v10706_v34 = vpop.f32.mrf.mxu3  ;;  %3615 = vmatpush.msra.mxu3 %v6450_v12  ;;  %v6428_v12 = vld [vmem:[%s12760_s5 + $0x878] sm:$0xff] }
 0x4fa   :  { %v10711_v18 = vpop.f32.mrf.mxu1  ;;  %3556 = vmatpush.msra.mxu2 %v6400_v31  ;;  %v2978_v31 = vld [vmem:[%s12760_s5 + $0x240] sm:$0xff] }
 0x4fb   :  { %3259 = vmatmul.f32.gmra.mxu0 %v10711_v18  ;;  %6381 = vmatmul.msk.f32.gmra.mxu2 %vm3227_vm6, %v10706_v34 }
 0x4fc   :  { %3557 = vmatpush.msra.mxu2 %v6398_v3  ;;  %3337 = vmatmul.f32.gmra.mxu3 %v10711_v18  ;;  %v2916_v3 = vld [vmem:[%s12760_s5 + $0x50] sm:$0xff] }
 0x4fe   :  { %3558 = vmatpush.msra.mxu2 %v6396_v15 }
 0x500   :  { %v10732_v29 = vpop.f32.mrf.mxu2  ;;  %3559 = vmatpush.msra.mxu2 %v6394_v48  ;;  %v2914_v48 = vld [vmem:[%s12760_s5 + $0x40] sm:$0xff] }
 0x502   :  { %3560 = vmatpush.msra.mxu2 %v6392_v53  ;;  %v6430_v53 = vld [vmem:[%s12760_s5 + $0x888] sm:$0xff] }
 0x503   :  { %6382 = vmatmul.msk.f32.vlgmr.msra.gmra.mxu0 %vm3227_vm6, %v10632_v7 }
 0x504   :  { %3635 = vmatpush.msra.mxu0 %v2936_v5  ;;  %3561 = vmatpush.msra.mxu2 %v6390_v47  ;;  %v2952_v5 = vld [vmem:[%s12760_s5 + $0x170] sm:$0xff] }
 0x505   :  { %v2976_v47 = vld [vmem:[%s12760_s5 + $0x230] sm:$0xff] }
 0x506   :  { %3636 = vmatpush.msra.mxu0 %v2934_v25  ;;  %3562 = vmatpush.msra.mxu2 %v6388_v43  ;;  %v2910_v25 = vld [vmem:[%s12760_s5 + $0x20] sm:$0xff] }
 0x507   :  { %v2950_v43 = vld [vmem:[%s12760_s5 + $0x160] sm:$0xff] }
 0x508   :  { %3637 = vmatpush.msra.mxu0 %v2932_v41  ;;  %v10763_v9 = vpop.f32.mrf.mxu2  ;;  %3563 = vmatpush.msra.mxu2 %v6386_v16  ;;  %v2974_v41 = vld [vmem:[%s12760_s5 + $0x220] sm:$0xff]  ;;  %v6426_v16 = vld [vmem:[%s12760_s5 + $0x868] sm:$0xff] }
 0x509   :  { %3279 = vmatmul.f32.vlgmr.msrb.gmra.mxu1 %v10763_v9  ;;  %3357 = vmatmul.f32.vlgmr.msrb.gmra.mxu2 %v10763_v9 }
 0x50a   :  { %3512 = vmatmul.f32.vlgmr.msrb.gmra.mxu3 %v10763_v9  ;;  %3574 = vmatpush.msrb.mxu1 %v6448_v10  ;;  %v2908_v10 = vld [vmem:[%s12760_s5 + $0x10] sm:$0xff] }
 0x50b   :  { %3638 = vmatpush.msra.mxu0 %v2930_v46  ;;  %3661 = vmatpush.msrb.mxu2 %v2968_v45  ;;  %v2948_v46 = vld [vmem:[%s12760_s5 + $0x150] sm:$0xff]  ;;  %v6424_v45 = vld [vmem:[%s12760_s5 + $0x858] sm:$0xff] }
 0x50c   :  { %6383 = vmatmul.msk.f32.gmra.mxu0 %vm3227_vm6, %v10675_v51  ;;  %3575 = vmatpush.msrb.mxu1 %v6446_v63  ;;  %v2906_v63 = vld [vmem:[%s12760_s5] sm:$0xff] }
 0x50d   :  { %3639 = vmatpush.msra.mxu0 %v2928_v52  ;;  %3662 = vmatpush.msrb.mxu2 %v2966_v4  ;;  %v2946_v52 = vld [vmem:[%s12760_s5 + $0x140] sm:$0xff]  ;;  %v2969_v4 = vld [vmem:[%s12760_s5 + $0x1f8] sm:$0xff] }
 0x50e   :  { %3576 = vmatpush.msrb.mxu1 %v6444_v23  ;;  %3697 = vmatpush.msrb.mxu3 %v2980_v30  ;;  %v6422_v23 = vld [vmem:[%s12760_s5 + $0x848] sm:$0xff] }
 0x50f   :  { %3640 = vmatpush.msra.mxu0 %v2926_v56  ;;  %3663 = vmatpush.msrb.mxu2 %v2964_v40  ;;  %v2944_v56 = vld [vmem:[%s12760_s5 + $0x130] sm:$0xff]  ;;  %v2967_v40 = vld [vmem:[%s12760_s5 + $0x1e8] sm:$0xff] }
 0x510   :  { %3577 = vmatpush.msrb.mxu1 %v6442_v27  ;;  %v10800_v26 = vpop.f32.mrf.mxu2  ;;  %3698 = vmatpush.msrb.mxu3 %v2978_v31  ;;  %v2972_v27 = vld [vmem:[%s12760_s5 + $0x210] sm:$0xff]  ;;  %v2935_v30 = vld [vmem:[%s12760_s5 + $0xe8] sm:$0xff] }
 0x511   :  { %3641 = vmatpush.msra.mxu0 %v2924_v8  ;;  %3282 = vmatmul.f32.gmra.mxu1 %v10800_v26  ;;  %v2965_v8 = vld [vmem:[%s12760_s5 + $0x1d8] sm:$0xff]  ;;  %v2959_v31 = vld [vmem:[%s12760_s5 + $0x1a8] sm:$0xff] }
 0x512   :  { %3360 = vmatmul.f32.gmra.mxu2 %v10800_v26  ;;  %3515 = vmatmul.f32.gmra.mxu3 %v10800_v26 }
 0x513   :  { %3578 = vmatpush.msrb.mxu1 %v6440_v37  ;;  %3642 = vmatpush.msra.mxu0 %v2922_v44  ;;  %v6418_v37 = vld [vmem:[%s12760_s5 + $0x828] sm:$0xff]  ;;  %v2970_v44 = vld [vmem:[%s12760_s5 + $0x200] sm:$0xff] }
 0x514   :  { %3664 = vmatpush.msrb.mxu2 %v2962_v28  ;;  %6384 = vmatmul.msk.f32.gmra.mxu0 %vm3227_vm6, %v10706_v34  ;;  %v2940_v28 = vld [vmem:[%s12760_s5 + $0x110] sm:$0xff] }
 0x515   :  { %3579 = vmatpush.msrb.mxu1 %v6438_v49  ;;  %3643 = vmatpush.msra.mxu0 %v2920_v22  ;;  %v2937_v49 = vld [vmem:[%s12760_s5 + $0xf8] sm:$0xff]  ;;  %v2963_v22 = vld [vmem:[%s12760_s5 + $0x1c8] sm:$0xff] }
 0x516   :  { %3665 = vmatpush.msrb.mxu2 %v2960_v55  ;;  %3699 = vmatpush.msrb.mxu3 %v2976_v47  ;;  %v2938_v55 = vld [vmem:[%s12760_s5 + $0x100] sm:$0xff]  ;;  %v2977_v47 = vld [vmem:[%s12760_s5 + $0x238] sm:$0xff] }
 0x517   :  { %3580 = vmatpush.msrb.mxu1 %v6436_v36  ;;  %3644 = vmatpush.msra.mxu0 %v2918_v1  ;;  %v2961_v36 = vld [vmem:[%s12760_s5 + $0x1b8] sm:$0xff]  ;;  %v6242_v1 = vld [vmem:[%s12760_s5 + $0x350] sm:$0xff] }
 0x518   :  { %3666 = vmatpush.msrb.mxu2 %v2958_v54  ;;  %v10849_v15 = vpop.f32.mrf.mxu2  ;;  %3700 = vmatpush.msrb.mxu3 %v2974_v41  ;;  %v2933_v54 = vld [vmem:[%s12760_s5 + $0xd8] sm:$0xff]  ;;  %v2923_v41 = vld [vmem:[%s12760_s5 + $0x88] sm:$0xff] }
 0x519   :  { %3581 = vmatpush.msrb.mxu1 %v6434_v58  ;;  %3645 = vmatpush.msra.mxu0 %v2916_v3  ;;  %v6240_v58 = vld [vmem:[%s12760_s5 + $0x340] sm:$0xff]  ;;  %v2957_v3 = vld [vmem:[%s12760_s5 + $0x198] sm:$0xff] }
 0x51a   :  { %3667 = vmatpush.msrb.mxu2 %v2956_v61  ;;  %3285 = vmatmul.f32.gmra.mxu1 %v10849_v15  ;;  %v6238_v61 = vld [vmem:[%s12760_s5 + $0x330] sm:$0xff] }
 0x51b   :  { %3363 = vmatmul.f32.gmra.mxu2 %v10849_v15  ;;  %3518 = vmatmul.f32.gmra.mxu3 %v10849_v15 }
 0x51c   :  { %3582 = vmatpush.msrb.mxu1 %v6432_v38  ;;  %3646 = vmatpush.msra.mxu0 %v2914_v48  ;;  %v2929_v38 = vld [vmem:[%s12760_s5 + $0xb8] sm:$0xff]  ;;  %v2979_v48 = vld [vmem:[%s12760_s5 + $0x248] sm:$0xff] }
 0x51d   :  { %3668 = vmatpush.msrb.mxu2 %v2954_v42  ;;  %6461 = vmatmul.msk.f32.vlgmr.msrb.gmra.mxu0 %vm3227_vm6, %v10632_v7  ;;  %v2955_v42 = vld [vmem:[%s12760_s5 + $0x188] sm:$0xff] }
 0x51e   :  { %3583 = vmatpush.msrb.mxu1 %v6430_v53  ;;  %3647 = vmatpush.msra.mxu0 %v2912_v11  ;;  %v6236_v53 = vld [vmem:[%s12760_s5 + $0x320] sm:$0xff]  ;;  %v2927_v11 = vld [vmem:[%s12760_s5 + $0xa8] sm:$0xff] }
 0x51f   :  { %3669 = vmatpush.msrb.mxu2 %v2952_v5  ;;  %3701 = vmatpush.msrb.mxu3 %v2972_v27  ;;  %v2953_v5 = vld [vmem:[%s12760_s5 + $0x178] sm:$0xff]  ;;  %v6224_v27 = vld [vmem:[%s12760_s5 + $0x2c0] sm:$0xff] }
 0x520   :  { %3584 = vmatpush.msrb.mxu1 %v6428_v12  ;;  %3648 = vmatpush.msra.mxu0 %v2910_v25  ;;  %v6234_v12 = vld [vmem:[%s12760_s5 + $0x310] sm:$0xff]  ;;  %v2925_v25 = vld [vmem:[%s12760_s5 + $0x98] sm:$0xff] }
 0x521   :  { %3670 = vmatpush.msrb.mxu2 %v2950_v43  ;;  %3702 = vmatpush.msrb.mxu3 %v2970_v44  ;;  %v2951_v43 = vld [vmem:[%s12760_s5 + $0x168] sm:$0xff]  ;;  %v6222_v44 = vld [vmem:[%s12760_s5 + $0x2b0] sm:$0xff] }
 0x522   :  { %3585 = vmatpush.msrb.mxu1 %v6426_v16  ;;  %3649 = vmatpush.msra.mxu0 %v2908_v10  ;;  %v2949_v16 = vld [vmem:[%s12760_s5 + $0x158] sm:$0xff]  ;;  %v6230_v10 = vld [vmem:[%s12760_s5 + $0x2f0] sm:$0xff] }
 0x523   :  { %3671 = vmatpush.msrb.mxu2 %v2948_v46  ;;  %3486 = vmatmul.f32.vlgmr.msra.gmra.mxu1 %v10645_v32  ;;  %v11041_v46 = vpop.f32.mrf.mxu0 }
 0x524   :  { %3564 = vmatmul.f32.vlgmr.msra.gmra.mxu2 %v10645_v32  ;;  %3586 = vmatpush.msrb.mxu1 %v6424_v45  ;;  %v6420_v32 = vld [vmem:[%s12760_s5 + $0x838] sm:$0xff] }
 0x525   :  { %6464 = vmatmul.msk.f32.vlgmr.msra.gmra.mxu3 %vm3227_vm6, %v10632_v7  ;;  %3650 = vmatpush.msra.mxu0 %v2906_v63  ;;  %v2942_v7 = vld [vmem:[%s12760_s5 + $0x120] sm:$0xff]  ;;  %v2921_v45 = vld [vmem:[%s12760_s5 + $0x78] sm:$0xff]  ;;  %v2947_v63 = vld [vmem:[%s12760_s5 + $0x148] sm:$0xff] }
 0x526   :  { %3672 = vmatpush.msrb.mxu2 %v2946_v52  ;;  %6462 = vmatmul.msk.f32.gmra.mxu0 %vm3227_vm6, %v10675_v51  ;;  %v6228_v52 = vld [vmem:[%s12760_s5 + $0x2e0] sm:$0xff] }
 0x527   :  { %3739 = vmatpush.msrb.mxu0 %v2969_v4  ;;  %3587 = vmatpush.msrb.mxu1 %v6422_v23  ;;  %v2919_v4 = vld [vmem:[%s12760_s5 + $0x68] sm:$0xff]  ;;  %v2945_v23 = vld [vmem:[%s12760_s5 + $0x138] sm:$0xff] }
 0x528   :  { %3673 = vmatpush.msrb.mxu2 %v2944_v56  ;;  %v2973_v56 = vld [vmem:[%s12760_s5 + $0x218] sm:$0xff] }
 0x529   :  { %3740 = vmatpush.msrb.mxu0 %v2967_v40  ;;  %3588 = vmatpush.msrb.mxu1 %v6420_v32  ;;  %v2917_v40 = vld [vmem:[%s12760_s5 + $0x58] sm:$0xff]  ;;  %v2943_v32 = vld [vmem:[%s12760_s5 + $0x128] sm:$0xff] }
 0x52a   :  { %3674 = vmatpush.msrb.mxu2 %v2942_v7  ;;  %v2971_v7 = vld [vmem:[%s12760_s5 + $0x208] sm:$0xff] }
 0x52b   :  { %3741 = vmatpush.msrb.mxu0 %v2965_v8  ;;  %3589 = vmatpush.msrb.mxu1 %v6418_v37  ;;  %v2915_v8 = vld [vmem:[%s12760_s5 + $0x48] sm:$0xff]  ;;  %v2941_v37 = vld [vmem:[%s12760_s5 + $0x118] sm:$0xff] }
 0x52c   :  { %3675 = vmatpush.msrb.mxu2 %v2940_v28  ;;  %3489 = vmatmul.f32.gmra.mxu1 %v10677_v2  ;;  %v11090_v28 = vpop.f32.mrf.mxu0 }
 0x52d   :  { %3713 = vmatpush.msra.mxu1 %v2937_v49  ;;  %3742 = vmatpush.msrb.mxu0 %v2963_v22  ;;  %v2913_v49 = vld [vmem:[%s12760_s5 + $0x38] sm:$0xff]  ;;  %v2939_v22 = vld [vmem:[%s12760_s5 + $0x108] sm:$0xff] }
 0x52e   :  { %3567 = vmatmul.f32.gmra.mxu2 %v10677_v2  ;;  %6465 = vmatmul.msk.f32.gmra.mxu3 %vm3227_vm6, %v10675_v51  ;;  %v2931_v51 = vld [vmem:[%s12760_s5 + $0xc8] sm:$0xff]  ;;  %v2981_v2 = vld [vmem:[%s12760_s5 + $0x258] sm:$0xff] }
 0x52f   :  { %3676 = vmatpush.msrb.mxu2 %v2938_v55  ;;  %3714 = vmatpush.msra.mxu1 %v2935_v30  ;;  %v6220_v55 = vld [vmem:[%s12760_s5 + $0x2a0] sm:$0xff]  ;;  %v6243_v30 = vld [vmem:[%s12760_s5 + $0x358] sm:$0xff] }
 0x530   :  { %3743 = vmatpush.msrb.mxu0 %v2961_v36  ;;  %3775 = vmatpush.msra.mxu3 %v2981_v2  ;;  %v2911_v36 = vld [vmem:[%s12760_s5 + $0x28] sm:$0xff] }
 0x531   :  { %3791 = vmatpush.msra.mxu2 %v6242_v1  ;;  %6463 = vmatmul.msk.f32.gmra.mxu0 %vm3227_vm6, %v10706_v34  ;;  %v6241_v1 = vld [vmem:[%s12760_s5 + $0x348] sm:$0xff] }
 0x532   :  { %3715 = vmatpush.msra.mxu1 %v2933_v54  ;;  %3744 = vmatpush.msrb.mxu0 %v2959_v31  ;;  %v2909_v54 = vld [vmem:[%s12760_s5 + $0x18] sm:$0xff]  ;;  %v6286_v31 = vld [vmem:[%s12760_s5 + $0x4b0] sm:$0xff]  ;;  %v2907_v2 = vld [vmem:[%s12760_s5 + $0x8] sm:$0xff] }
 0x533   :  { %3792 = vmatpush.msra.mxu2 %v6240_v58  ;;  %3776 = vmatpush.msra.mxu3 %v2979_v48  ;;  %v6216_v58 = vld [vmem:[%s12760_s5 + $0x280] sm:$0xff]  ;;  %v6237_v48 = vld [vmem:[%s12760_s5 + $0x328] sm:$0xff] }
 0x534   :  { %3716 = vmatpush.msra.mxu1 %v2931_v51  ;;  %3745 = vmatpush.msrb.mxu0 %v2957_v3  ;;  %v6239_v51 = vld [vmem:[%s12760_s5 + $0x338] sm:$0xff]  ;;  %v6284_v3 = vld [vmem:[%s12760_s5 + $0x4a0] sm:$0xff] }
 0x535   :  { %3793 = vmatpush.msra.mxu2 %v6238_v61  ;;  %3492 = vmatmul.f32.gmra.mxu1 %v10711_v18  ;;  %v6214_v61 = vld [vmem:[%s12760_s5 + $0x270] sm:$0xff] }
 0x536   :  { %3717 = vmatpush.msra.mxu1 %v2929_v38  ;;  %3746 = vmatpush.msrb.mxu0 %v2955_v42  ;;  %v6274_v38 = vld [vmem:[%s12760_s5 + $0x450] sm:$0xff]  ;;  %v11145_v42 = vpop.f32.mrf.mxu0 }
 0x537   :  { %3570 = vmatmul.f32.gmra.mxu2 %v10711_v18  ;;  %6466 = vmatmul.msk.f32.gmra.mxu3 %vm3227_vm6, %v10706_v34  ;;  %v6232_v18 = vld [vmem:[%s12760_s5 + $0x300] sm:$0xff]  ;;  %v2975_v34 = vld [vmem:[%s12760_s5 + $0x228] sm:$0xff] }
 0x538   :  { %3794 = vmatpush.msra.mxu2 %v6236_v53  ;;  %3718 = vmatpush.msra.mxu1 %v2927_v11  ;;  %v6212_v53 = vld [vmem:[%s12760_s5 + $0x260] sm:$0xff] }
 0x539   :  { %3747 = vmatpush.msrb.mxu0 %v2953_v5  ;;  %3777 = vmatpush.msra.mxu3 %v2977_v47  ;;  %v6272_v11 = vld [vmem:[%s12760_s5 + $0x440] sm:$0xff]  ;;  %v6235_v5 = vld [vmem:[%s12760_s5 + $0x318] sm:$0xff]  ;;  %v6282_v47 = vld [vmem:[%s12760_s5 + $0x490] sm:$0xff] }
 0x53a   :  { %3651 = vmatmul.f32.vlgmr.msra.gmra.mxu0 %v10670_v17  ;;  %3795 = vmatpush.msra.mxu2 %v6234_v12  ;;  %v6275_v12 = vld [vmem:[%s12760_s5 + $0x458] sm:$0xff] }
 0x53b   :  { %3719 = vmatpush.msra.mxu1 %v2925_v25  ;;  %3748 = vmatpush.msrb.mxu0 %v2951_v43  ;;  %v6233_v25 = vld [vmem:[%s12760_s5 + $0x308] sm:$0xff]  ;;  %v6280_v43 = vld [vmem:[%s12760_s5 + $0x480] sm:$0xff] }
 0x53c   :  { %3796 = vmatpush.msra.mxu2 %v6232_v18  ;;  %3778 = vmatpush.msra.mxu3 %v2975_v34  ;;  %v6273_v18 = vld [vmem:[%s12760_s5 + $0x448] sm:$0xff]  ;;  %v6268_v34 = vld [vmem:[%s12760_s5 + $0x420] sm:$0xff] }
 0x53d   :  { %3720 = vmatpush.msra.mxu1 %v2923_v41  ;;  %3749 = vmatpush.msrb.mxu0 %v2949_v16  ;;  %v6231_v41 = vld [vmem:[%s12760_s5 + $0x2f8] sm:$0xff]  ;;  %v6278_v16 = vld [vmem:[%s12760_s5 + $0x470] sm:$0xff] }
 0x53e   :  { %3797 = vmatpush.msra.mxu2 %v6230_v10  ;;  %3590 = vmatmul.f32.vlgmr.msrb.gmra.mxu1 %v10763_v9  ;;  %v6226_v9 = vld [vmem:[%s12760_s5 + $0x2d0] sm:$0xff]  ;;  %v6271_v10 = vld [vmem:[%s12760_s5 + $0x438] sm:$0xff] }
 0x53f   :  { %3721 = vmatpush.msra.mxu1 %v2921_v45  ;;  %3750 = vmatpush.msrb.mxu0 %v2947_v63  ;;  %v6266_v45 = vld [vmem:[%s12760_s5 + $0x410] sm:$0xff]  ;;  %v6229_v63 = vld [vmem:[%s12760_s5 + $0x2e8] sm:$0xff] }
 0x540   :  { %3677 = vmatmul.f32.vlgmr.msrb.gmra.mxu2 %v10539_v6  ;;  %6467 = vmatmul.msk.f32.vlgmr.msrb.gmra.mxu3 %vm3227_vm6, %v11041_v46 }
 0x541   :  { %3798 = vmatpush.msra.mxu2 %v6228_v52  ;;  %3722 = vmatpush.msra.mxu1 %v2919_v4  ;;  %v6276_v52 = vld [vmem:[%s12760_s5 + $0x460] sm:$0xff]  ;;  %v6269_v4 = vld [vmem:[%s12760_s5 + $0x428] sm:$0xff] }
 0x542   :  { %3751 = vmatpush.msrb.mxu0 %v2945_v23  ;;  %3779 = vmatpush.msra.mxu3 %v2973_v56  ;;  %v6264_v23 = vld [vmem:[%s12760_s5 + $0x400] sm:$0xff]  ;;  %v6227_v56 = vld [vmem:[%s12760_s5 + $0x2d8] sm:$0xff] }
 0x543   :  { %3654 = vmatmul.f32.gmra.mxu0 %v10701_v14  ;;  %3799 = vmatpush.msra.mxu2 %v6226_v9  ;;  %v6267_v9 = vld [vmem:[%s12760_s5 + $0x418] sm:$0xff] }
 0x544   :  { %3723 = vmatpush.msra.mxu1 %v2917_v40  ;;  %3752 = vmatpush.msrb.mxu0 %v2943_v32  ;;  %v6262_v40 = vld [vmem:[%s12760_s5 + $0x3f0] sm:$0xff]  ;;  %v6225_v32 = vld [vmem:[%s12760_s5 + $0x2c8] sm:$0xff] }
 0x545   :  { %3800 = vmatpush.msra.mxu2 %v6224_v27  ;;  %3780 = vmatpush.msra.mxu3 %v2971_v7  ;;  %v6265_v27 = vld [vmem:[%s12760_s5 + $0x408] sm:$0xff]  ;;  %v6260_v7 = vld [vmem:[%s12760_s5 + $0x3e0] sm:$0xff] }
 0x546   :  { %3724 = vmatpush.msra.mxu1 %v2915_v8  ;;  %3753 = vmatpush.msrb.mxu0 %v2941_v37  ;;  %v6223_v8 = vld [vmem:[%s12760_s5 + $0x2b8] sm:$0xff]  ;;  %v6258_v37 = vld [vmem:[%s12760_s5 + $0x3d0] sm:$0xff] }
 0x547   :  { %3801 = vmatpush.msra.mxu2 %v6222_v44  ;;  %3593 = vmatmul.f32.gmra.mxu1 %v10800_v26  ;;  %v6218_v26 = vld [vmem:[%s12760_s5 + $0x290] sm:$0xff]  ;;  %v6221_v44 = vld [vmem:[%s12760_s5 + $0x2a8] sm:$0xff] }
 0x548   :  { %3725 = vmatpush.msra.mxu1 %v2913_v49  ;;  %3754 = vmatpush.msrb.mxu0 %v2939_v22  ;;  %v6261_v49 = vld [vmem:[%s12760_s5 + $0x3e8] sm:$0xff]  ;;  %v6219_v22 = vld [vmem:[%s12760_s5 + $0x298] sm:$0xff] }
 0x549   :  { %3680 = vmatmul.f32.gmra.mxu2 %v10577_v57  ;;  %6468 = vmatmul.msk.f32.gmra.mxu3 %vm3227_vm6, %v11090_v28 }
 0x54a   :  { %3802 = vmatpush.msra.mxu2 %v6220_v55  ;;  %3869 = vmatpush.msra.mxu0 %v6243_v30  ;;  %v6259_v55 = vld [vmem:[%s12760_s5 + $0x3d8] sm:$0xff]  ;;  %v6257_v30 = vld [vmem:[%s12760_s5 + $0x3c8] sm:$0xff] }
 0x54b   :  { %3726 = vmatpush.msra.mxu1 %v2911_v36  ;;  %3657 = vmatmul.f32.gmra.mxu0 %v10732_v29  ;;  %v6252_v36 = vld [vmem:[%s12760_s5 + $0x3a0] sm:$0xff] }
 0x54c   :  { %3803 = vmatpush.msra.mxu2 %v6218_v26  ;;  %3870 = vmatpush.msra.mxu0 %v6241_v1  ;;  %v6215_v1 = vld [vmem:[%s12760_s5 + $0x278] sm:$0xff] }
 0x54d   :  { %3727 = vmatpush.msra.mxu1 %v2909_v54  ;;  %3853 = vmatpush.msrb.mxu3 %v6286_v31  ;;  %v6255_v54 = vld [vmem:[%s12760_s5 + $0x3b8] sm:$0xff]  ;;  %v6250_v31 = vld [vmem:[%s12760_s5 + $0x390] sm:$0xff] }
 0x54e   :  { %3804 = vmatpush.msra.mxu2 %v6216_v58  ;;  %3871 = vmatpush.msra.mxu0 %v6239_v51  ;;  %v6213_v58 = vld [vmem:[%s12760_s5 + $0x268] sm:$0xff] }
 0x54f   :  { %3728 = vmatpush.msra.mxu1 %v2907_v2  ;;  %3854 = vmatpush.msrb.mxu3 %v6284_v3  ;;  %v6253_v51 = vld [vmem:[%s12760_s5 + $0x3a8] sm:$0xff]  ;;  %v6248_v2 = vld [vmem:[%s12760_s5 + $0x380] sm:$0xff]  ;;  %v6251_v3 = vld [vmem:[%s12760_s5 + $0x398] sm:$0xff] }
 0x550   :  { %3805 = vmatpush.msra.mxu2 %v6214_v61  ;;  %3872 = vmatpush.msra.mxu0 %v6237_v48  ;;  %v6246_v48 = vld [vmem:[%s12760_s5 + $0x370] sm:$0xff] }
 0x551   :  { %3817 = vmatpush.msrb.mxu1 %v6274_v38  ;;  %3683 = vmatmul.f32.gmra.mxu2 %v10603_v33 }
 0x552   :  { %3596 = vmatmul.f32.gmra.mxu1 %v10849_v15  ;;  %6469 = vmatmul.msk.f32.gmra.mxu3 %vm3227_vm6, %v11145_v42  ;;  %v6270_v15 = vld [vmem:[%s12760_s5 + $0x430] sm:$0xff] }
 0x553   :  { %3806 = vmatpush.msra.mxu2 %v6212_v53  ;;  %3818 = vmatpush.msrb.mxu1 %v6272_v11  ;;  %v6244_v11 = vld [vmem:[%s12760_s5 + $0x360] sm:$0xff] }
 0x554   :  { %3873 = vmatpush.msra.mxu0 %v6235_v5  ;;  %3855 = vmatpush.msrb.mxu3 %v6282_v47  ;;  %v6247_v5 = vld [vmem:[%s12760_s5 + $0x378] sm:$0xff] }
 0x555   :  { %3895 = vmatpush.msrb.mxu2 %v6275_v12  ;;  %3755 = vmatmul.f32.vlgmr.msrb.gmra.mxu0 %v10539_v6  ;;  %v6287_v47 = vld [vmem:[%s12760_s5 + $0x4b8] sm:$0xff] }
 0x556   :  { %3819 = vmatpush.msrb.mxu1 %v6270_v15  ;;  %3874 = vmatpush.msra.mxu0 %v6233_v25  ;;  %v6283_v12 = vld [vmem:[%s12760_s5 + $0x498] sm:$0xff] }
 0x557   :  { %3856 = vmatpush.msrb.mxu3 %v6280_v43  ;;  %3896 = vmatpush.msrb.mxu2 %v6273_v18  ;;  %v6279_v43 = vld [vmem:[%s12760_s5 + $0x478] sm:$0xff]  ;;  %v6277_v18 = vld [vmem:[%s12760_s5 + $0x468] sm:$0xff] }
 0x558   :  { %3820 = vmatpush.msrb.mxu1 %v6268_v34  ;;  %3875 = vmatpush.msra.mxu0 %v6231_v41 }
 0x559   :  { %3857 = vmatpush.msrb.mxu3 %v6278_v16  ;;  %3897 = vmatpush.msrb.mxu2 %v6271_v10 }
 0x55a   :  { %3821 = vmatpush.msrb.mxu1 %v6266_v45  ;;  %3876 = vmatpush.msra.mxu0 %v6229_v63 }
 0x55b   :  { %3858 = vmatpush.msrb.mxu3 %v6276_v52  ;;  %3898 = vmatpush.msrb.mxu2 %v6269_v4 }
 0x55c   :  { %3729 = vmatmul.f32.vlgmr.msra.gmra.mxu1 %v10670_v17  ;;  %6470 = vmatmul.msk.f32.vlgmr.msra.gmra.mxu3 %vm3227_vm6, %v11041_v46 }
 0x55d   :  { %3807 = vmatmul.f32.vlgmr.msra.gmra.mxu2 %v10670_v17  ;;  %3822 = vmatpush.msrb.mxu1 %v6264_v23 }
 0x55e   :  { %3877 = vmatpush.msra.mxu0 %v6227_v56  ;;  %6482 = vmatpush.msk.msra.mxu3 %vm106_vm0, %v10255_v59  ;;  %v6263_v59 = vld [vmem:[%s12760_s5 + $0x3f8] sm:$0xff] }
 0x55f   :  { %3899 = vmatpush.msrb.mxu2 %v6267_v9  ;;  %3758 = vmatmul.f32.gmra.mxu0 %v10577_v57 }
 0x560   :  { %3823 = vmatpush.msrb.mxu1 %v6262_v40  ;;  %3878 = vmatpush.msra.mxu0 %v6225_v32 }
 0x561   :  { %3973 = vmatpush.msra.mxu3 %v10259_v50  ;;  %3900 = vmatpush.msrb.mxu2 %v6265_v27  ;;  %v6256_v50 = vld [vmem:[%s12760_s5 + $0x3c0] sm:$0xff] }
 0x562   :  { %3824 = vmatpush.msrb.mxu1 %v6260_v7  ;;  %3879 = vmatpush.msra.mxu0 %v6223_v8 }
 0x563   :  { %3974 = vmatpush.msra.mxu3 %v10265_v35  ;;  %3901 = vmatpush.msrb.mxu2 %v6263_v59  ;;  %v6254_v35 = vld [vmem:[%s12760_s5 + $0x3b0] sm:$0xff] }
 0x564   :  { %3825 = vmatpush.msrb.mxu1 %v6258_v37  ;;  %3880 = vmatpush.msra.mxu0 %v6221_v44 }
 0x565   :  { %3975 = vmatpush.msra.mxu3 %v10270_v21  ;;  %3902 = vmatpush.msrb.mxu2 %v6261_v49  ;;  %v6217_v21 = vld [vmem:[%s12760_s5 + $0x288] sm:$0xff] }
 0x566   :  { %3732 = vmatmul.f32.gmra.mxu1 %v10701_v14  ;;  %6471 = vmatmul.msk.f32.gmra.mxu3 %vm3227_vm6, %v11090_v28 }
 0x567   :  { %3810 = vmatmul.f32.gmra.mxu2 %v10701_v14  ;;  %3826 = vmatpush.msrb.mxu1 %v6256_v50 }
 0x568   :  { %3881 = vmatpush.msra.mxu0 %v6219_v22  ;;  %3903 = vmatpush.msrb.mxu2 %v6259_v55  ;;  %v11274_v26 = vpop.f32.mrf.mxu0 }
 0x569   :  { %3761 = vmatmul.f32.gmra.mxu0 %v10603_v33  ;;  %3827 = vmatpush.msrb.mxu1 %v6254_v35  ;;  %v6524_v35 = vld [vmem:[%s12760_s5 + $0xa70] sm:$0xff] }
 0x56a   :  { %3882 = vmatpush.msra.mxu0 %v6217_v21  ;;  %3904 = vmatpush.msrb.mxu2 %v6257_v30  ;;  %v6522_v21 = vld [vmem:[%s12760_s5 + $0xa60] sm:$0xff] }
 0x56b   :  { %3828 = vmatpush.msrb.mxu1 %v6252_v36  ;;  %v6520_v36 = vld [vmem:[%s12760_s5 + $0xa50] sm:$0xff] }
 0x56c   :  { %3883 = vmatpush.msra.mxu0 %v6215_v1  ;;  %3905 = vmatpush.msrb.mxu2 %v6255_v54  ;;  %v11298_v61 = vpop.f32.mrf.mxu2 }
 0x56d   :  { %3829 = vmatpush.msrb.mxu1 %v6250_v31  ;;  %v6518_v31 = vld [vmem:[%s12760_s5 + $0xa40] sm:$0xff] }
 0x56e   :  { %3884 = vmatpush.msra.mxu0 %v6213_v58  ;;  %3906 = vmatpush.msrb.mxu2 %v6253_v51  ;;  %v11303_v38 = vpop.f32.mrf.mxu3  ;;  %v6525_v58 = vld [vmem:[%s12760_s5 + $0xa78] sm:$0xff] }
 0x56f   :  { %3735 = vmatmul.f32.gmra.mxu1 %v10732_v29  ;;  %6472 = vmatmul.msk.f32.gmra.mxu3 %vm3227_vm6, %v11145_v42 }
 0x570   :  { %6486 = vmatpush.msk.msrb.mxu0 %vm106_vm0, %v10204_v0  ;;  %3813 = vmatmul.f32.gmra.mxu2 %v10732_v29  ;;  %v11311_v53 = vpop.f32.mrf.mxu0  ;;  %v6249_v0 = vld [vmem:[%s12760_s5 + $0x388] sm:$0xff] }
 0x571   :  { %3830 = vmatpush.msrb.mxu1 %v6248_v2  ;;  %3907 = vmatpush.msrb.mxu2 %v6251_v3  ;;  %v6516_v2 = vld [vmem:[%s12760_s5 + $0xa30] sm:$0xff] }
 0x572   :  { %3999 = vmatpush.msrb.mxu0 %v10206_v19  ;;  %v6245_v19 = vld [vmem:[%s12760_s5 + $0x368] sm:$0xff]  ;;  %v6556_v3 = vld [vmem:[%s12760_s5 + $0xb70] sm:$0xff] }
 0x573   :  { %3831 = vmatpush.msrb.mxu1 %v6246_v48  ;;  %3885 = vmatmul.f32.vlgmr.msra.gmra.mxu0 %v10670_v17  ;;  %v6285_v17 = vld [vmem:[%s12760_s5 + $0x4a8] sm:$0xff] }
 0x574   :  { %3908 = vmatpush.msrb.mxu2 %v6249_v0  ;;  %4000 = vmatpush.msrb.mxu0 %v10210_v13  ;;  %v6523_v48 = vld [vmem:[%s12760_s5 + $0xa68] sm:$0xff]  ;;  %v6514_v0 = vld [vmem:[%s12760_s5 + $0xa20] sm:$0xff] }
 0x575   :  { %3832 = vmatpush.msrb.mxu1 %v6244_v11  ;;  %v6554_v11 = vld [vmem:[%s12760_s5 + $0xb60] sm:$0xff] }
 0x576   :  { %3909 = vmatpush.msrb.mxu2 %v6247_v5  ;;  %4001 = vmatpush.msrb.mxu0 %v10217_v39  ;;  %v11341_v15 = vpop.f32.mrf.mxu2  ;;  %v6281_v39 = vld [vmem:[%s12760_s5 + $0x488] sm:$0xff] }
 0x577   :  { %3931 = vmatpush.msra.mxu1 %v6287_v47  ;;  %6473 = vmatmul.msk.f32.vlgmr.msrb.gmra.mxu3 %vm3227_vm6, %v11041_v46  ;;  %v11349_v25 = vpop.f32.mrf.mxu3  ;;  %v6521_v47 = vld [vmem:[%s12760_s5 + $0xa58] sm:$0xff] }
 0x578   :  { %3833 = vmatmul.f32.vlgmr.msrb.gmra.mxu1 %v10539_v6  ;;  %3910 = vmatpush.msrb.mxu2 %v6245_v19  ;;  %v11339_v13 = vpop.f32.mrf.mxu0  ;;  %v6512_v19 = vld [vmem:[%s12760_s5 + $0xa10] sm:$0xff] }
 0x579   :  { %3932 = vmatpush.msra.mxu1 %v6285_v17  ;;  %3911 = vmatmul.f32.vlgmr.msrb.gmra.mxu2 %v10539_v6  ;;  %v6552_v17 = vld [vmem:[%s12760_s5 + $0xb50] sm:$0xff] }
 0x57a   :  { %4124 = vmatpush.msra.mxu2 %v6524_v35  ;;  %4150 = vmatpush.msrb.mxu3 %v6556_v3  ;;  %v6548_v35 = vld [vmem:[%s12760_s5 + $0xb30] sm:$0xff] }
 0x57b   :  { %3933 = vmatpush.msra.mxu1 %v6283_v12  ;;  %3888 = vmatmul.f32.gmra.mxu0 %v10701_v14  ;;  %v6519_v12 = vld [vmem:[%s12760_s5 + $0xa48] sm:$0xff] }
 0x57c   :  { %4125 = vmatpush.msra.mxu2 %v6522_v21  ;;  %4151 = vmatpush.msrb.mxu3 %v6554_v11  ;;  %v6511_v11 = vld [vmem:[%s12760_s5 + $0xa08] sm:$0xff] }
 0x57d   :  { %3934 = vmatpush.msra.mxu1 %v6281_v39 }
 0x57e   :  { %v11366_v14 = vpop.f32.mrf.mxu2  ;;  %4126 = vmatpush.msra.mxu2 %v6520_v36  ;;  %4152 = vmatpush.msrb.mxu3 %v6552_v17  ;;  %v6515_v36 = vld [vmem:[%s12760_s5 + $0xa28] sm:$0xff]  ;;  %v6509_v17 = vld [vmem:[%s12760_s5 + $0x9f8] sm:$0xff] }
 0x57f   :  { %3935 = vmatpush.msra.mxu1 %v6279_v43  ;;  %6474 = vmatmul.msk.f32.gmra.mxu3 %vm3227_vm6, %v11090_v28  ;;  %v11369_v34 = vpop.f32.mrf.mxu3  ;;  %v6510_v43 = vld [vmem:[%s12760_s5 + $0xa00] sm:$0xff] }
 0x580   :  { %3836 = vmatmul.f32.gmra.mxu1 %v10577_v57  ;;  %v11359_v6 = vpop.f32.mrf.mxu0  ;;  %4127 = vmatpush.msra.mxu2 %v6518_v31  ;;  %v6506_v31 = vld [vmem:[%s12760_s5 + $0x9e0] sm:$0xff] }
 0x581   :  { %3936 = vmatpush.msra.mxu1 %v6277_v18  ;;  %3914 = vmatmul.f32.gmra.mxu2 %v10577_v57  ;;  %v6550_v18 = vld [vmem:[%s12760_s5 + $0xb40] sm:$0xff] }
 0x582   :  { %4128 = vmatpush.msra.mxu2 %v6516_v2  ;;  %4153 = vmatpush.msrb.mxu3 %v6550_v18  ;;  %v6513_v2 = vld [vmem:[%s12760_s5 + $0xa18] sm:$0xff]  ;;  %v6500_v18 = vld [vmem:[%s12760_s5 + $0x9b0] sm:$0xff] }
 0x583   :  { %6490 = vmatpush.msk.msrb.mxu1 %vm106_vm0, %v10215_v60  ;;  %3891 = vmatmul.f32.gmra.mxu0 %v10732_v29  ;;  %v6479_v60 = vld [vmem:[%s12762_s7 + $0x30] sm:$0xff] }
 0x584   :  { %4129 = vmatpush.msra.mxu2 %v6514_v0  ;;  %4154 = vmatpush.msrb.mxu3 %v6548_v35  ;;  %v6544_v0 = vld [vmem:[%s12760_s5 + $0xb10] sm:$0xff]  ;;  %v6498_v35 = vld [vmem:[%s12760_s5 + $0x9a0] sm:$0xff] }
 0x585   :  { %4025 = vmatpush.msrb.mxu1 %v10213_v20 }
 0x586   :  { %v11373_v41 = vpop.f32.mrf.mxu1  ;;  %4130 = vmatpush.msra.mxu2 %v6512_v19  ;;  %v6542_v19 = vld [vmem:[%s12760_s5 + $0xb00] sm:$0xff] }
 0x587   :  { %4026 = vmatpush.msrb.mxu1 %v10220_v24  ;;  %6475 = vmatmul.msk.f32.gmra.mxu3 %vm3227_vm6, %v11145_v42 }
 0x588   :  { %3839 = vmatmul.f32.gmra.mxu1 %v10603_v33  ;;  %4131 = vmatpush.msra.mxu2 %v6510_v43 }
 0x589   :  { %4027 = vmatpush.msrb.mxu1 %v10227_v62  ;;  %3917 = vmatmul.f32.gmra.mxu2 %v10603_v33  ;;  %v11383_v57 = vpop.f32.mrf.mxu0  ;;  %v6480_v62 = vld [vmem:[%s12762_s7 + $0x38] sm:$0xff] }
 0x58b   :  { %6487 = vmatmul.msk.f32.vlgmr.msrb.gmra.mxu0 %vm2809_vm5, %v6479_v60 }
 0x58c   :  { %v11386_v20 = vpop.f32.mrf.mxu2 }
 0x58d   :  { %v11388_v24 = vpop.f32.mrf.mxu3 }
 0x58e   :  { %v11390_v29 = vpop.f32.mrf.mxu1 }
 0x58f   :  { %6483 = vmatmul.msk.f32.vlgmr.msra.gmra.mxu3 %vm2809_vm5, %v6479_v60 }
 0x590   :  { %6476 = vmatmul.msk.f32.vlgmr.msra.gmra.mxu1 %vm3227_vm6, %v11041_v46  ;;  %v6481_v46 = vld [vmem:[%s12762_s7 + $0x40] sm:$0xff] }
 0x591   :  { %v11398_v33 = vpop.f32.mrf.mxu0  ;;  %4202 = vmatpush.msra.mxu1 %v6525_v58  ;;  %v6546_v58 = vld [vmem:[%s12760_s5 + $0xb20] sm:$0xff] }
 0x592   :  { %4155 = vmatpush.msrb.mxu3 %v6546_v58 }
 0x593   :  { %6488 = vmatmul.msk.f32.gmra.mxu0 %vm2809_vm5, %v6480_v62  ;;  %4203 = vmatpush.msra.mxu1 %v6523_v48  ;;  %v6504_v48 = vld [vmem:[%s12760_s5 + $0x9d0] sm:$0xff] }
 0x594   :  { %4156 = vmatpush.msrb.mxu3 %v6544_v0  ;;  %v6503_v0 = vld [vmem:[%s12760_s5 + $0x9c8] sm:$0xff] }
 0x595   :  { %v11401_v16 = vpop.f32.mrf.mxu2  ;;  %v11403_v10 = vpop.f32.mrf.mxu3  ;;  %4204 = vmatpush.msra.mxu1 %v6521_v47  ;;  %v6502_v47 = vld [vmem:[%s12760_s5 + $0x9c0] sm:$0xff] }
 0x596   :  { %4157 = vmatpush.msrb.mxu3 %v6542_v19  ;;  %v6534_v19 = vld [vmem:[%s12760_s5 + $0xac0] sm:$0xff] }
 0x597   :  { %v11407_v45 = vpop.f32.mrf.mxu1  ;;  %6484 = vmatmul.msk.f32.gmra.mxu3 %vm2809_vm5, %v6480_v62  ;;  %4205 = vmatpush.msra.mxu1 %v6519_v12 }
 0x598   :  { %6477 = vmatmul.msk.f32.gmra.mxu1 %vm3227_vm6, %v11090_v28 }
 0x59a   :  { %v11413_v63 = vpop.f32.mrf.mxu0 }
 0x59b   :  { %6489 = vmatmul.msk.f32.gmra.mxu0 %vm2809_vm5, %v6481_v46 }
 0x59e   :  { %v11416_v52 = vpop.f32.mrf.mxu2  ;;  %v11418_v4 = vpop.f32.mrf.mxu3 }
 0x59f   :  { %6485 = vmatmul.msk.f32.gmra.mxu3 %vm2809_vm5, %v6481_v46 }
 0x5a0   :  { %6478 = vmatmul.msk.f32.gmra.mxu1 %vm3227_vm6, %v11145_v42  ;;  %v11422_v28 = vpop.f32.mrf.mxu1 }
 0x5a3   :  { %v11425_v23 = vpop.f32.mrf.mxu0 }
 0x5a7   :  { %v11428_v56 = vpop.f32.mrf.mxu2 }
 0x5a8   :  { %6491 = vmatmul.msk.f32.vlgmr.msrb.gmra.mxu1 %vm2809_vm5, %v6479_v60  ;;  %v11430_v9 = vpop.f32.mrf.mxu3  ;;  %v6517_v60 = vld [vmem:[%s12760_s5 + $0xa38] sm:$0xff] }
 0x5a9   :  { %v11432_v40 = vpop.f32.mrf.mxu1  ;;  %4206 = vmatpush.msra.mxu1 %v6517_v60  ;;  %v6540_v60 = vld [vmem:[%s12760_s5 + $0xaf0] sm:$0xff] }
 0x5aa   :  { %4158 = vmatpush.msrb.mxu3 %v6540_v60  ;;  %v6532_v60 = vld [vmem:[%s12760_s5 + $0xab0] sm:$0xff] }
 0x5ab   :  { %4207 = vmatpush.msra.mxu1 %v6515_v36  ;;  %v6538_v36 = vld [vmem:[%s12760_s5 + $0xae0] sm:$0xff] }
 0x5ac   :  { %4159 = vmatpush.msrb.mxu3 %v6538_v36  ;;  %v6530_v36 = vld [vmem:[%s12760_s5 + $0xaa0] sm:$0xff] }
 0x5ad   :  { %4208 = vmatpush.msra.mxu1 %v6513_v2  ;;  %v6496_v2 = vld [vmem:[%s12760_s5 + $0x990] sm:$0xff] }
 0x5ae   :  { %v11434_v32 = vpop.f32.mrf.mxu0 }
 0x5af   :  { %4209 = vmatpush.msra.mxu1 %v6511_v11 }
 0x5b0   :  { %6492 = vmatmul.msk.f32.gmra.mxu1 %vm2809_vm5, %v6480_v62 }
 0x5b1   :  { %v11437_v27 = vpop.f32.mrf.mxu2  ;;  %v11439_v42 = vpop.f32.mrf.mxu3  ;;  %4210 = vmatpush.msra.mxu1 %v6509_v17  ;;  %v6501_v17 = vld [vmem:[%s12760_s5 + $0x9b8] sm:$0xff] }
 0x5b2   :  { %v11441_v7 = vpop.f32.mrf.mxu1 }
 0x5b7   :  { %v11444_v8 = vpop.f32.mrf.mxu0 }
 0x5b8   :  { %6493 = vmatmul.msk.f32.gmra.mxu1 %vm2809_vm5, %v6481_v46  ;;  %v6508_v46 = vld [vmem:[%s12760_s5 + $0x9f0] sm:$0xff] }
 0x5b9   :  { %4132 = vmatpush.msra.mxu2 %v6508_v46  ;;  %v6507_v46 = vld [vmem:[%s12760_s5 + $0x9e8] sm:$0xff] }
 0x5ba   :  { %v11446_v59 = vpop.f32.mrf.mxu2  ;;  %v11448_v37 = vpop.f32.mrf.mxu3  ;;  %4211 = vmatpush.msra.mxu1 %v6507_v46  ;;  %v6499_v46 = vld [vmem:[%s12760_s5 + $0x9a8] sm:$0xff] }
 0x5bb   :  { %v11450_v44 = vpop.f32.mrf.mxu1  ;;  %4133 = vmatpush.msra.mxu2 %v6506_v31  ;;  %v6505_v31 = vld [vmem:[%s12760_s5 + $0x9d8] sm:$0xff] }
 0x5bc   :  { %4212 = vmatpush.msra.mxu1 %v6505_v31 }
 0x5bd   :  { %4134 = vmatpush.msra.mxu2 %v6504_v48  ;;  %v6536_v48 = vld [vmem:[%s12760_s5 + $0xad0] sm:$0xff] }
 0x5be   :  { %4160 = vmatpush.msrb.mxu3 %v6536_v48  ;;  %4213 = vmatpush.msra.mxu1 %v6503_v0  ;;  %v6553_v48 = vld [vmem:[%s12760_s5 + $0xb58] sm:$0xff] }
 0x5bf   :  { %4135 = vmatpush.msra.mxu2 %v6502_v47  ;;  %v6494_v47 = vld [vmem:[%s12760_s5 + $0x980] sm:$0xff] }
 0x5c0   :  { %v11452_v49 = vpop.f32.mrf.mxu0  ;;  %4161 = vmatpush.msrb.mxu3 %v6534_v19  ;;  %4214 = vmatpush.msra.mxu1 %v6501_v17  ;;  %v6528_v19 = vld [vmem:[%s12760_s5 + $0xa90] sm:$0xff]  ;;  %v6495_v17 = vld [vmem:[%s12760_s5 + $0x988] sm:$0xff] }
 0x5c1   :  { %4136 = vmatpush.msra.mxu2 %v6500_v18  ;;  %v6557_v18 = vld [vmem:[%s12760_s5 + $0xb78] sm:$0xff] }
 0x5c2   :  { %4162 = vmatpush.msrb.mxu3 %v6532_v60  ;;  %4215 = vmatpush.msra.mxu1 %v6499_v46  ;;  %v6526_v60 = vld [vmem:[%s12760_s5 + $0xa80] sm:$0xff]  ;;  %v6568_v46 = vld [vmem:[%s12760_s5 + $0xbd0] sm:$0xff] }
 0x5c3   :  { %v11454_v50 = vpop.f32.mrf.mxu2  ;;  %v11456_v22 = vpop.f32.mrf.mxu3  ;;  %4137 = vmatpush.msra.mxu2 %v6498_v35  ;;  %v6555_v35 = vld [vmem:[%s12760_s5 + $0xb68] sm:$0xff]  ;;  %4186 = vmatpush.msra.mxu0 %v6568_v46  ;;  %v6545_v46 = vld [vmem:[%s12760_s5 + $0xb18] sm:$0xff] }
 0x5c4   :  { %v11458_v55 = vpop.f32.mrf.mxu1  ;;  %4163 = vmatpush.msrb.mxu3 %v6530_v36  ;;  %v6549_v36 = vld [vmem:[%s12760_s5 + $0xb38] sm:$0xff] }
 0x5c5   :  { %4138 = vmatpush.msra.mxu2 %v6496_v2  ;;  %v6497_v2 = vld [vmem:[%s12760_s5 + $0x998] sm:$0xff] }
 0x5c6   :  { %4216 = vmatpush.msra.mxu1 %v6497_v2  ;;  %4164 = vmatpush.msrb.mxu3 %v6528_v19  ;;  %v6566_v2 = vld [vmem:[%s12760_s5 + $0xbc0] sm:$0xff] }
 0x5c7   :  { %4139 = vmatpush.msra.mxu2 %v6494_v47  ;;  %4187 = vmatpush.msra.mxu0 %v6566_v2  ;;  %v6562_v2 = vld [vmem:[%s12760_s5 + $0xba0] sm:$0xff] }
 0x5c8   :  { %v11466_v30 = vpop.f32.mrf.mxu0  ;;  %4217 = vmatpush.msra.mxu1 %v6495_v17  ;;  %4165 = vmatpush.msrb.mxu3 %v6526_v60  ;;  %v6547_v17 = vld [vmem:[%s12760_s5 + $0xb28] sm:$0xff]  ;;  %v6634_v60 = vld [vmem:[%s12760_s5 + $0xdb0] sm:$0xff] }
 0x5c9   :  { %4228 = vmatpush.msrb.mxu2 %v6557_v18  ;;  %v6551_v18 = vld [vmem:[%s12760_s5 + $0xb48] sm:$0xff] }
 0x5cb   :  { %4229 = vmatpush.msrb.mxu2 %v6555_v35  ;;  %v6638_v35 = vld [vmem:[%s12760_s5 + $0xdd0] sm:$0xff] }
 0x5cc   :  { %v11471_v1 = vpop.f32.mrf.mxu2  ;;  %v11473_v54 = vpop.f32.mrf.mxu3  ;;  %4383 = vmatpush.msrb.mxu1 %v6638_v35 }
 0x5cd   :  { %4230 = vmatpush.msrb.mxu2 %v6553_v48  ;;  %v6636_v48 = vld [vmem:[%s12760_s5 + $0xdc0] sm:$0xff] }
 0x5ce   :  { %4384 = vmatpush.msrb.mxu1 %v6636_v48  ;;  %v3592_v48 = vadd.f32 %v11450_v44, %v11428_v56  ;;  %v6541_v56 = vld [vmem:[%s12760_s5 + $0xaf8] sm:$0xff]  ;;  %v6558_v44 = vld [vmem:[%s12760_s5 + $0xb80] sm:$0xff] }
 0x5cf   :  { %v11481_v51 = vpop.f32.mrf.mxu1  ;;  %4231 = vmatpush.msrb.mxu2 %v6551_v18  ;;  %v6564_v18 = vld [vmem:[%s12760_s5 + $0xbb0] sm:$0xff] }
 0x5d0   :  { %4188 = vmatpush.msra.mxu0 %v6564_v18  ;;  %4385 = vmatpush.msrb.mxu1 %v6634_v60  ;;  %v3517_v18 = vadd.f32 %v11403_v10, %v11432_v40  ;;  %v6560_v60 = vld [vmem:[%s12760_s5 + $0xb90] sm:$0xff]  ;;  %v6628_v10 = vld [vmem:[%s12760_s5 + $0xd80] sm:$0xff]  ;;  %v6539_v40 = vld [vmem:[%s12760_s5 + $0xae8] sm:$0xff] }
 0x5d1   :  { %4232 = vmatpush.msrb.mxu2 %v6549_v36 }
 0x5d2   :  { %v11498_v5 = vpop.f32.mrf.mxu0  ;;  %4189 = vmatpush.msra.mxu0 %v6562_v2  ;;  %v6606_v2 = vld [vmem:[%s12760_s5 + $0xcd0] sm:$0xff] }
 0x5d3   :  { %4233 = vmatpush.msrb.mxu2 %v6547_v17  ;;  %v6543_v17 = vld [vmem:[%s12760_s5 + $0xb08] sm:$0xff] }
 0x5d4   :  { %v11523_v62 = vpop.f32.mrf.mxu2  ;;  %4190 = vmatpush.msra.mxu0 %v6560_v60  ;;  %v6626_v60 = vld [vmem:[%s12760_s5 + $0xd70] sm:$0xff] }
 0x5d5   :  { %v11512_v39 = vpop.f32.mrf.mxu3  ;;  %4234 = vmatpush.msrb.mxu2 %v6545_v46  ;;  %v6630_v46 = vld [vmem:[%s12760_s5 + $0xd90] sm:$0xff] }
 0x5d6   :  { %4191 = vmatpush.msra.mxu0 %v6558_v44 }
 0x5d7   :  { %4235 = vmatpush.msrb.mxu2 %v6543_v17  ;;  %v3618_v17 = vadd.f32 %v11430_v9, %v3592_v48 }
 0x5d8   :  { %4357 = vmatpush.msrb.mxu0 %v6606_v2  ;;  %v6620_v2 = vld [vmem:[%s12760_s5 + $0xd40] sm:$0xff] }
 0x5d9   :  { %v11531_v21 = vpop.f32.mrf.mxu1  ;;  %4236 = vmatpush.msrb.mxu2 %v6541_v56 }
 0x5db   :  { %4237 = vmatpush.msrb.mxu2 %v6539_v40 }
 0x5dc   :  { %v11545_v3 = vpop.f32.mrf.mxu0 }
 0x5dd   :  { %13091 = vst [vmem:[#allocation26_spill] sm:$0xff] %v11545_v3  ;;  %v6632_v3 = vld [vmem:[%s12760_s5 + $0xda0] sm:$0xff] }
 0x5de   :  { %4386 = vmatpush.msrb.mxu1 %v6632_v3 }
 0x5df   :  { %v11565_v12 = vpop.f32.mrf.mxu3 }
 0x5e0   :  { %v11567_v43 = vpop.f32.mrf.mxu2  ;;  %4387 = vmatpush.msrb.mxu1 %v6630_v46  ;;  %v6604_v46 = vld [vmem:[%s12760_s5 + $0xcc0] sm:$0xff] }
 0x5e1   :  { %4358 = vmatpush.msrb.mxu0 %v6604_v46  ;;  %v6598_v46 = vld [vmem:[%s12760_s5 + $0xc90] sm:$0xff] }
 0x5e2   :  { %4388 = vmatpush.msrb.mxu1 %v6628_v10 }
 0x5e3   :  { %v11587_v58 = vpop.f32.mrf.mxu1 }
 0x5e4   :  { %13092 = vst [vmem:[#allocation27_spill] sm:$0xff] %v11587_v58  ;;  %4389 = vmatpush.msrb.mxu1 %v6626_v60  ;;  %v6569_v58 = vld [vmem:[%s12760_s5 + $0xbd8] sm:$0xff]  ;;  %v6531_v60 = vld [vmem:[%s12760_s5 + $0xaa8] sm:$0xff] }
 0x5e5   :  { %4264 = vmatpush.msra.mxu3 %v6569_v58  ;;  %v6533_v58 = vld [vmem:[%s12760_s5 + $0xab8] sm:$0xff] }
 0x5e6   :  { %v11598_v11 = vpop.f32.mrf.mxu0 }
 0x5e7   :  { %13093 = vst [vmem:[#allocation28_spill] sm:$0xff] %v11598_v11  ;;  %v3543_v11 = vadd.f32 %v11425_v23, %v3517_v18  ;;  %v6624_v23 = vld [vmem:[%s12760_s5 + $0xd60] sm:$0xff]  ;;  %v3595_v18 = vadd.f32 %v11458_v55, %v11437_v27  ;;  %v6567_v27 = vld [vmem:[%s12760_s5 + $0xbc8] sm:$0xff]  ;;  %v6622_v55 = vld [vmem:[%s12760_s5 + $0xd50] sm:$0xff] }
 0x5e8   :  { %4390 = vmatpush.msrb.mxu1 %v6624_v23  ;;  %4265 = vmatpush.msra.mxu3 %v6567_v27  ;;  %v6529_v23 = vld [vmem:[%s12760_s5 + $0xa98] sm:$0xff] }
 0x5e9   :  { %v11624_v31 = vpop.f32.mrf.mxu3 }
 0x5ea   :  { %13094 = vst [vmem:[#allocation29_spill] sm:$0xff] %v11624_v31  ;;  %v11632_v0 = vpop.f32.mrf.mxu2  ;;  %4391 = vmatpush.msrb.mxu1 %v6622_v55 }
 0x5eb   :  { %v3812_v9 = vadd.f32 %v11632_v0, %v3543_v11  ;;  %v6535_v11 = vld [vmem:[%s12760_s5 + $0xac8] sm:$0xff]  ;;  %v6602_v0 = vld [vmem:[%s12760_s5 + $0xcb0] sm:$0xff] }
 0x5ec   :  { %v11634_v47 = vpop.f32.mrf.mxu1  ;;  %4359 = vmatpush.msrb.mxu0 %v6602_v0  ;;  %4392 = vmatpush.msrb.mxu1 %v6620_v2  ;;  %v6614_v2 = vld [vmem:[%s12760_s5 + $0xd10] sm:$0xff] }
 0x5f0   :  { %v3886_v19 = vpop.f32.mrf.mxu0 }
 0x5f1   :  { %v3887_v56 = vadd.f32 %v3886_v19, %v3618_v17 }
 0x5f2   :  { %v11675_v35 = vpop.f32.mrf.mxu3 }
 0x5f3   :  { %13095 = vst [vmem:[#allocation31_spill] sm:$0xff] %v11675_v35  ;;  %v11677_v36 = vpop.f32.mrf.mxu2  ;;  %v6537_v35 = vld [vmem:[%s12760_s5 + $0xad8] sm:$0xff] }
 0x5f4   :  { %4238 = vmatpush.msrb.mxu2 %v6537_v35  ;;  %v3520_v35 = vadd.f32 %v11418_v4, %v11441_v7  ;;  %v6600_v4 = vld [vmem:[%s12760_s5 + $0xca0] sm:$0xff]  ;;  %v6565_v7 = vld [vmem:[%s12760_s5 + $0xbb8] sm:$0xff] }
 0x5f5   :  { %v11679_v31 = vpop.f32.mrf.mxu1  ;;  %4360 = vmatpush.msrb.mxu0 %v6600_v4  ;;  %4266 = vmatpush.msra.mxu3 %v6565_v7  ;;  %v6559_v4 = vld [vmem:[%s12760_s5 + $0xb88] sm:$0xff] }
 0x5f6   :  { %4239 = vmatpush.msrb.mxu2 %v6535_v11  ;;  %v6596_v11 = vld [vmem:[%s12760_s5 + $0xc80] sm:$0xff] }
 0x5f7   :  { %4361 = vmatpush.msrb.mxu0 %v6598_v46  ;;  %v6612_v46 = vld [vmem:[%s12760_s5 + $0xd00] sm:$0xff] }
 0x5f8   :  { %v3889_v3 = vpop.f32.mrf.mxu0  ;;  %4240 = vmatpush.msrb.mxu2 %v6533_v58 }
 0x5f9   :  { %4362 = vmatpush.msrb.mxu0 %v6596_v11 }
 0x5fa   :  { %v11727_v48 = vpop.f32.mrf.mxu3  ;;  %4241 = vmatpush.msrb.mxu2 %v6531_v60  ;;  %v6592_v60 = vld [vmem:[%s12760_s5 + $0xc60] sm:$0xff] }
 0x5fc   :  { %v3912_v44 = vpop.f32.mrf.mxu2  ;;  %4242 = vmatpush.msrb.mxu2 %v6529_v23  ;;  %v6588_v23 = vld [vmem:[%s12760_s5 + $0xc40] sm:$0xff] }
 0x5fd   :  { %v11737_v19 = vadd.f32 %v3912_v44, %v3887_v56  ;;  %v3837_v10 = vpop.f32.mrf.mxu1  ;;  %v6563_v56 = vld [vmem:[%s12760_s5 + $0xba8] sm:$0xff]  ;;  %v6618_v44 = vld [vmem:[%s12760_s5 + $0xd30] sm:$0xff] }
 0x5fe   :  { %v11747_v40 = vadd.f32 %v3837_v10, %v3812_v9  ;;  %v3621_v9 = vadd.f32 %v11439_v42, %v3595_v18  ;;  %v3546_v10 = vadd.f32 %v11434_v32, %v3520_v35  ;;  %4267 = vmatpush.msra.mxu3 %v6563_v56  ;;  %4393 = vmatpush.msrb.mxu1 %v6618_v44  ;;  %v6561_v32 = vld [vmem:[%s12760_s5 + $0xb98] sm:$0xff]  ;;  %v6616_v35 = vld [vmem:[%s12760_s5 + $0xd20] sm:$0xff]  ;;  %v6610_v44 = vld [vmem:[%s12760_s5 + $0xcf0] sm:$0xff] }
 0x600   :  { %v11767_v17 = vpop.f32.mrf.mxu0  ;;  %v3890_v0 = vadd.f32 %v3889_v3, %v3621_v9  ;;  %v3815_v42 = vadd.f32 %v11677_v36, %v3546_v10  ;;  %4268 = vmatpush.msra.mxu3 %v6561_v32  ;;  %v6527_v36 = vld [vmem:[%s12760_s5 + $0xa88] sm:$0xff]  ;;  %v6594_v3 = vld [vmem:[%s12760_s5 + $0xc70] sm:$0xff]  ;;  %4394 = vmatpush.msrb.mxu1 %v6616_v35  ;;  %v6608_v10 = vld [vmem:[%s12760_s5 + $0xce0] sm:$0xff] }
 0x601   :  { %4243 = vmatpush.msrb.mxu2 %v6527_v36  ;;  %4363 = vmatpush.msrb.mxu0 %v6594_v3  ;;  %v6590_v9 = vld [vmem:[%s12760_s5 + $0xc50] sm:$0xff]  ;;  %v6584_v35 = vld [vmem:[%s12760_s5 + $0xc20] sm:$0xff] }
 0x602   :  { %v11790_v18 = vpop.f32.mrf.mxu3  ;;  %4269 = vmatpush.msra.mxu3 %v6559_v4  ;;  %4395 = vmatpush.msrb.mxu1 %v6614_v2  ;;  %v6582_v3 = vld [vmem:[%s12760_s5 + $0xc10] sm:$0xff]  ;;  %v6580_v4 = vld [vmem:[%s12760_s5 + $0xc00] sm:$0xff] }
 0x603   :  { %4364 = vmatpush.msrb.mxu0 %v6592_v60 }
 0x604   :  { %v3915_v27 = vpop.f32.mrf.mxu2  ;;  %4396 = vmatpush.msrb.mxu1 %v6612_v46  ;;  %v6605_v46 = vld [vmem:[%s12760_s5 + $0xcc8] sm:$0xff] }
 0x605   :  { %v3916_v55 = vadd.f32 %v3915_v27, %v3890_v0  ;;  %v3840_v58 = vpop.f32.mrf.mxu1  ;;  %4365 = vmatpush.msrb.mxu0 %v6590_v9  ;;  %v6586_v27 = vld [vmem:[%s12760_s5 + $0xc30] sm:$0xff] }
 0x606   :  { %v3841_v7 = vadd.f32 %v3840_v58, %v3815_v42  ;;  %4397 = vmatpush.msrb.mxu1 %v6610_v44  ;;  %v6650_v58 = vld [vmem:[%s12760_s5 + $0xe30] sm:$0xff]  ;;  %v6648_v44 = vld [vmem:[%s12760_s5 + $0xe20] sm:$0xff] }
 0x607   :  { %4366 = vmatpush.msrb.mxu0 %v6588_v23  ;;  %v6578_v9 = vld [vmem:[%s12760_s5 + $0xbf0] sm:$0xff]  ;;  %v6576_v23 = vld [vmem:[%s12760_s5 + $0xbe0] sm:$0xff] }
 0x608   :  { %v11816_v56 = vpop.f32.mrf.mxu0  ;;  %4398 = vmatpush.msrb.mxu1 %v6608_v10 }
 0x609   :  { %4166 = vmatmul.f32.vlgmr.msrb.gmra.mxu3 %v11816_v56  ;;  %4367 = vmatpush.msrb.mxu0 %v6586_v27  ;;  %v6601_v27 = vld [vmem:[%s12760_s5 + $0xca8] sm:$0xff] }
 0x60a   :  { %v3866_v11 = vpop.f32.mrf.mxu3  ;;  %4419 = vmatpush.msrb.mxu3 %v6650_v58  ;;  %v6644_v58 = vld [vmem:[%s12760_s5 + $0xe00] sm:$0xff] }
 0x60b   :  { %v11831_v0 = vadd.f32 %v3866_v11, %v3841_v7  ;;  %4368 = vmatpush.msrb.mxu0 %v6584_v35  ;;  %v3598_v7 = vadd.f32 %v11481_v51, %v11446_v59  ;;  %v6603_v51 = vld [vmem:[%s12760_s5 + $0xcb8] sm:$0xff] }
 0x60c   :  { %4420 = vmatpush.msrb.mxu3 %v6648_v44  ;;  %v6593_v44 = vld [vmem:[%s12760_s5 + $0xc68] sm:$0xff] }
 0x60d   :  { %v3938_v42 = vpop.f32.mrf.mxu1  ;;  %4369 = vmatpush.msrb.mxu0 %v6582_v3  ;;  %v3624_v10 = vadd.f32 %v11448_v37, %v3598_v7  ;;  %v6599_v37 = vld [vmem:[%s12760_s5 + $0xc98] sm:$0xff]  ;;  %v6642_v7 = vld [vmem:[%s12760_s5 + $0xdf0] sm:$0xff] }
 0x60e   :  { %v11837_v32 = vadd.f32 %v3938_v42, %v11737_v19  ;;  %v6607_v19 = vld [vmem:[%s12760_s5 + $0xcd8] sm:$0xff]  ;;  %v3918_v42 = vpop.f32.mrf.mxu2 }
 0x60f   :  { %4370 = vmatpush.msrb.mxu0 %v6580_v4  ;;  %v3893_v35 = vadd.f32 %v11767_v17, %v3624_v10  ;;  %v6597_v4 = vld [vmem:[%s12760_s5 + $0xc88] sm:$0xff]  ;;  %v6639_v10 = vld [vmem:[%s12760_s5 + $0xdd8] sm:$0xff] }
 0x610   :  { %v11845_v36 = vpop.f32.mrf.mxu0 }
 0x611   :  { %4169 = vmatmul.f32.gmra.mxu3 %v11845_v36  ;;  %4371 = vmatpush.msrb.mxu0 %v6578_v9  ;;  %v3919_v3 = vadd.f32 %v3918_v42, %v3893_v35  ;;  %v6640_v9 = vld [vmem:[%s12760_s5 + $0xde0] sm:$0xff]  ;;  %v6589_v42 = vld [vmem:[%s12760_s5 + $0xc48] sm:$0xff]  ;;  %v6651_v35 = vld [vmem:[%s12760_s5 + $0xe38] sm:$0xff] }
 0x612   :  { %v11859_v2 = vpop.f32.mrf.mxu3 }
 0x613   :  { %4140 = vmatmul.f32.vlgmr.msra.gmra.mxu2 %v11859_v2  ;;  %4218 = vmatmul.f32.vlgmr.msra.gmra.mxu1 %v11859_v2 }
 0x614   :  { %4435 = vmatpush.msra.mxu2 %v6607_v19  ;;  %4372 = vmatpush.msrb.mxu0 %v6576_v23  ;;  %v6591_v23 = vld [vmem:[%s12760_s5 + $0xc58] sm:$0xff] }
 0x615   :  { %v3941_v60 = vpop.f32.mrf.mxu1 }
 0x616   :  { %v11872_v59 = vadd.f32 %v3941_v60, %v3916_v55  ;;  %4436 = vmatpush.msra.mxu2 %v6605_v46  ;;  %v6646_v55 = vld [vmem:[%s12760_s5 + $0xe10] sm:$0xff]  ;;  %v6595_v46 = vld [vmem:[%s12760_s5 + $0xc78] sm:$0xff] }
 0x617   :  { %4421 = vmatpush.msrb.mxu3 %v6646_v55 }
 0x618   :  { %13096 = vst [vmem:[#allocation32_spill] sm:$0xff] %v11872_v59  ;;  %v11881_v11 = vpop.f32.mrf.mxu0  ;;  %4437 = vmatpush.msra.mxu2 %v6603_v51 }
 0x619   :  { %4172 = vmatmul.f32.gmra.mxu3 %v11881_v11 }
 0x61a   :  { %v11897_v19 = vpop.f32.mrf.mxu3  ;;  %4438 = vmatpush.msra.mxu2 %v6601_v27  ;;  %4422 = vmatpush.msrb.mxu3 %v6644_v58  ;;  %v6637_v27 = vld [vmem:[%s12760_s5 + $0xdc8] sm:$0xff]  ;;  %v6635_v58 = vld [vmem:[%s12760_s5 + $0xdb8] sm:$0xff] }
 0x61b   :  { %4143 = vmatmul.f32.gmra.mxu2 %v11897_v19  ;;  %4221 = vmatmul.f32.gmra.mxu1 %v11897_v19 }
 0x61c   :  { %4439 = vmatpush.msra.mxu2 %v6599_v37  ;;  %4423 = vmatpush.msrb.mxu3 %v6642_v7  ;;  %v6587_v37 = vld [vmem:[%s12760_s5 + $0xc38] sm:$0xff]  ;;  %v6649_v7 = vld [vmem:[%s12760_s5 + $0xe28] sm:$0xff] }
 0x61d   :  { %v3944_v17 = vpop.f32.mrf.mxu1 }
 0x61e   :  { %v11907_v60 = vadd.f32 %v3944_v17, %v3919_v3  ;;  %4440 = vmatpush.msra.mxu2 %v6597_v4  ;;  %4424 = vmatpush.msrb.mxu3 %v6640_v9  ;;  %v6585_v3 = vld [vmem:[%s12760_s5 + $0xc28] sm:$0xff]  ;;  %v6631_v9 = vld [vmem:[%s12760_s5 + $0xd98] sm:$0xff] }
 0x61f   :  { %v6633_v17 = vld [vmem:[%s12760_s5 + $0xda8] sm:$0xff] }
 0x620   :  { %13097 = vst [vmem:[#allocation9_spill] sm:$0xff] %v11907_v60  ;;  %4441 = vmatpush.msra.mxu2 %v6595_v46  ;;  %v6583_v46 = vld [vmem:[%s12760_s5 + $0xc18] sm:$0xff]  ;;  %v3284_v60 = vadd.f32 %v11390_v29, %v11311_v53 }
 0x622   :  { %v11918_v51 = vpop.f32.mrf.mxu3  ;;  %4442 = vmatpush.msra.mxu2 %v6593_v44  ;;  %v6647_v44 = vld [vmem:[%s12760_s5 + $0xe18] sm:$0xff] }
 0x623   :  { %4146 = vmatmul.f32.gmra.mxu2 %v11918_v51  ;;  %4224 = vmatmul.f32.gmra.mxu1 %v11918_v51 }
 0x624   :  { %4443 = vmatpush.msra.mxu2 %v6591_v23  ;;  %v6581_v23 = vld [vmem:[%s12760_s5 + $0xc08] sm:$0xff] }
 0x625   :  { %v11928_v55 = vpop.f32.mrf.mxu1 }
 0x626   :  { %6570 = vmatmul.msk.f32.vlgmr.msra.gmra.mxu0 %vm3227_vm6, %v11928_v55  ;;  %6573 = vmatmul.msk.f32.vlgmr.msra.gmra.mxu3 %vm3227_vm6, %v11928_v55 }
 0x627   :  { %4461 = vmatpush.msra.mxu0 %v6639_v10  ;;  %4497 = vmatpush.msra.mxu3 %v6651_v35  ;;  %v6629_v10 = vld [vmem:[%s12760_s5 + $0xd88] sm:$0xff]  ;;  %v6627_v35 = vld [vmem:[%s12760_s5 + $0xd78] sm:$0xff] }
 0x628   :  { %4444 = vmatpush.msra.mxu2 %v6589_v42  ;;  %v6645_v42 = vld [vmem:[%s12760_s5 + $0xe08] sm:$0xff] }
 0x629   :  { %4462 = vmatpush.msra.mxu0 %v6637_v27  ;;  %4498 = vmatpush.msra.mxu3 %v6649_v7  ;;  %v6579_v27 = vld [vmem:[%s12760_s5 + $0xbf8] sm:$0xff]  ;;  %v6641_v7 = vld [vmem:[%s12760_s5 + $0xde8] sm:$0xff] }
 0x62a   :  { %4445 = vmatpush.msra.mxu2 %v6587_v37 }
 0x62b   :  { %4463 = vmatpush.msra.mxu0 %v6635_v58  ;;  %4244 = vmatmul.f32.vlgmr.msrb.gmra.mxu2 %v11816_v56  ;;  %v6643_v58 = vld [vmem:[%s12760_s5 + $0xdf8] sm:$0xff] }
 0x62c   :  { %4399 = vmatmul.f32.vlgmr.msrb.gmra.mxu1 %v11816_v56  ;;  %4446 = vmatpush.msra.mxu2 %v6585_v3  ;;  %v6577_v3 = vld [vmem:[%s12760_s5 + $0xbe8] sm:$0xff] }
 0x62d   :  { %v11957_v4 = vpop.f32.mrf.mxu1  ;;  %4464 = vmatpush.msra.mxu0 %v6633_v17  ;;  %4499 = vmatpush.msra.mxu3 %v6647_v44  ;;  %v6625_v17 = vld [vmem:[%s12760_s5 + $0xd68] sm:$0xff]  ;;  %v6619_v44 = vld [vmem:[%s12760_s5 + $0xd38] sm:$0xff] }
 0x62e   :  { %6571 = vmatmul.msk.f32.gmra.mxu0 %vm3227_vm6, %v11957_v4  ;;  %6574 = vmatmul.msk.f32.gmra.mxu3 %vm3227_vm6, %v11957_v4 }
 0x62f   :  { %4447 = vmatpush.msra.mxu2 %v6583_v46  ;;  %4465 = vmatpush.msra.mxu0 %v6631_v9  ;;  %v6623_v46 = vld [vmem:[%s12760_s5 + $0xd58] sm:$0xff]  ;;  %v6621_v9 = vld [vmem:[%s12760_s5 + $0xd48] sm:$0xff] }
 0x630   :  { %4500 = vmatpush.msra.mxu3 %v6645_v42  ;;  %v6613_v42 = vld [vmem:[%s12760_s5 + $0xd08] sm:$0xff] }
 0x631   :  { %4448 = vmatpush.msra.mxu2 %v6581_v23  ;;  %4466 = vmatpush.msra.mxu0 %v6629_v10  ;;  %v6617_v23 = vld [vmem:[%s12760_s5 + $0xd28] sm:$0xff]  ;;  %v6615_v10 = vld [vmem:[%s12760_s5 + $0xd18] sm:$0xff] }
 0x632   :  { %4501 = vmatpush.msra.mxu3 %v6643_v58 }
 0x633   :  { %4247 = vmatmul.f32.gmra.mxu2 %v11845_v36  ;;  %4467 = vmatpush.msra.mxu0 %v6627_v35  ;;  %v6609_v35 = vld [vmem:[%s12760_s5 + $0xce8] sm:$0xff] }
 0x634   :  { %4402 = vmatmul.f32.gmra.mxu1 %v11845_v36  ;;  %4449 = vmatpush.msra.mxu2 %v6579_v27  ;;  %v6611_v27 = vld [vmem:[%s12760_s5 + $0xcf8] sm:$0xff] }
 0x635   :  { %v4035_v37 = vpop.f32.mrf.mxu1  ;;  %4468 = vmatpush.msra.mxu0 %v6625_v17  ;;  %4502 = vmatpush.msra.mxu3 %v6641_v7 }
 0x636   :  { %6572 = vmatmul.msk.f32.gmra.mxu0 %vm3227_vm6, %v4035_v37  ;;  %6575 = vmatmul.msk.f32.gmra.mxu3 %vm3227_vm6, %v4035_v37 }
 0x637   :  { %4450 = vmatpush.msra.mxu2 %v6577_v3  ;;  %4469 = vmatpush.msra.mxu0 %v6623_v46 }
 0x639   :  { %4470 = vmatpush.msra.mxu0 %v6621_v9 }
 0x63b   :  { %4250 = vmatmul.f32.gmra.mxu2 %v11881_v11  ;;  %4471 = vmatpush.msra.mxu0 %v6619_v44 }
 0x63c   :  { %4405 = vmatmul.f32.gmra.mxu1 %v11881_v11 }
 0x63d   :  { %4472 = vmatpush.msra.mxu0 %v6617_v23 }
 0x63e   :  { %4373 = vmatmul.f32.vlgmr.msrb.gmra.mxu0 %v11859_v2  ;;  %6652 = vmatmul.msk.f32.vlgmr.msrb.gmra.mxu3 %vm3227_vm6, %v11928_v55 }
 0x63f   :  { %4473 = vmatpush.msra.mxu0 %v6615_v10 }
 0x641   :  { %4474 = vmatpush.msra.mxu0 %v6613_v42 }
 0x643   :  { %4451 = vmatmul.f32.vlgmr.msra.gmra.mxu2 %v11859_v2  ;;  %4475 = vmatpush.msra.mxu0 %v6611_v27  ;;  %v3514_v27 = vadd.f32 %v11388_v24, %v11422_v28  ;;  %v4525_v24 = vld [vmem:[%s12761_s6] sm:$0x3]  ;;  %s6936_s6 = smov [#allocation4]  }
 0x644   :  { %s5485_s20 = sshll.u32 %s6936_s6, 4  ;;  %s5486_s20 = int_to_ptr.vmem [resolvable:$true] %s5485_s20 }
 0x645   :  { %4476 = vmatpush.msra.mxu0 %v6609_v35 }
 0x646   :  { %4376 = vmatmul.f32.gmra.mxu0 %v11897_v19  ;;  %6653 = vmatmul.msk.f32.gmra.mxu3 %vm3227_vm6, %v11957_v4 }
 0x64b   :  { %4454 = vmatmul.f32.gmra.mxu2 %v11897_v19 }
 0x64e   :  { %4379 = vmatmul.f32.gmra.mxu0 %v11918_v51  ;;  %6654 = vmatmul.msk.f32.gmra.mxu3 %vm3227_vm6, %v4035_v37 }
 0x653   :  { %4457 = vmatmul.f32.gmra.mxu2 %v11918_v51 }
 0x656   :  { %4477 = vmatmul.f32.vlgmr.msra.gmra.mxu0 %v11816_v56  ;;  %6655 = vmatmul.msk.f32.vlgmr.msra.gmra.mxu3 %vm3227_vm6, %v11928_v55 }
 0x65e   :  { %4480 = vmatmul.f32.gmra.mxu0 %v11845_v36  ;;  %6656 = vmatmul.msk.f32.gmra.mxu3 %vm3227_vm6, %v11957_v4 }
 0x666   :  { %4483 = vmatmul.f32.gmra.mxu0 %v11881_v11  ;;  %6657 = vmatmul.msk.f32.gmra.mxu3 %vm3227_vm6, %v4035_v37  ;;  %v3281_v11 = vadd.f32 %v11373_v41, %v11274_v26  ;;  %v3540_v41 = vadd.f32 %v11413_v63, %v3514_v27 }
 0x668   :  { %v3307_v42 = vadd.f32 %v11298_v61, %v3281_v11  ;;  %v3310_v61 = vadd.f32 %v11341_v15, %v3284_v60  ;;  %v3809_v53 = vadd.f32 %v11567_v43, %v3540_v41  ;;  %v3287_v15 = vadd.f32 %v11407_v45, %v11339_v13 }
 0x66a   :  { %v3653_v35 = vadd.f32 %v11444_v8, %v3307_v42  ;;  %v3656_v29 = vadd.f32 %v11452_v49, %v3310_v61 }
 0x68c   :  { %v4167_v2 = vpop.f32.mrf.mxu3 }
 0x690   :  { %v4219_v3 = vpop.f32.mrf.mxu1 }
 0x694   :  { %v4170_v19 = vpop.f32.mrf.mxu3 }
 0x696   :  { %v4141_v58 = vpop.f32.mrf.mxu2 }
 0x698   :  { %v12051_v56 = vpop.f32.mrf.mxu1 }
 0x69c   :  { %v4173_v17 = vpop.f32.mrf.mxu3 }
 0x69e   :  { %v4144_v51 = vpop.f32.mrf.mxu2 }
 0x6a0   :  { %v12053_v44 = vpop.f32.mrf.mxu1 }
 0x6a3   :  { %v4193_v7 = vpop.f32.mrf.mxu0 }
 0x6a6   :  { %v4147_v46 = vpop.f32.mrf.mxu2 }
 0x6a7   :  { %v4174_v41 = vadd.f32 %v4173_v17, %v4147_v46 }
 0x6a9   :  { %v4271_v55 = vpop.f32.mrf.mxu3 }
 0x6ab   :  { %v4196_v9 = vpop.f32.mrf.mxu0 }
 0x6ae   :  { %v4245_v36 = vpop.f32.mrf.mxu2 }
 0x6af   :  { %v4246_v4 = vadd.f32 %v4245_v36, %v4219_v3  ;;  %v3679_v3 = vadd.f32 %v11454_v50, %v3653_v35  ;;  %v4168_v36 = vadd.f32 %v4167_v2, %v4141_v58  ;;  %v3835_v50 = vadd.f32 %v11679_v31, %v3809_v53 }
 0x6b0   :  { %v4527_v58 = vperm.slane %v4525_v24, 0  ;;  %v3313_v35 = vadd.f32 %v11366_v14, %v3287_v15  ;;  %v3864_v14 = vadd.f32 %v11790_v18, %v11747_v40 }
 0x6b1   :  { %v12055_v23 = vpop.f32.mrf.mxu3  ;;  %v12059_v37 = vadd.f32 %v4271_v55, %v4246_v4  ;;  %v4194_v55 = vadd.f32 %v4193_v7, %v4168_v36  ;;  %v3705_v28 = vadd.f32 %v11456_v22, %v3679_v3  ;;  %v3682_v7 = vadd.f32 %v11471_v1, %v3656_v29 }
 0x6b2   :  { %13098 = vst [vmem:[#allocation69_spill] sm:$0xff] %v12055_v23  ;;  %v4400_v23 = vpop.f32.mrf.mxu1  ;;  %v3861_v4 = vadd.f32 %v11727_v48, %v3835_v50  ;;  %v4171_v22 = vadd.f32 %v4170_v19, %v4144_v51  ;;  %v3659_v36 = vadd.f32 %v11466_v30, %v3313_v35  ;;  %v3359_v48 = vadd.f32 %v11386_v20, %v11303_v38 }
 0x6b3   :  { %v4199_v10 = vpop.f32.mrf.mxu0  ;;  %v4513_v2 = vadd.f32 %v4194_v55, %v3705_v28  ;;  %v3708_v3 = vadd.f32 %v11473_v54, %v3682_v7  ;;  %v3365_v35 = vadd.f32 %v11416_v52, %v11369_v34  ;;  %v4561_v34 = vld [vmem:[%s12763_s8] sm:$0xff] }
 0x6b4   :  { %v4197_v49 = vadd.f32 %v4196_v9, %v4171_v22  ;;  %v3685_v19 = vadd.f32 %v11523_v62, %v3659_v36  ;;  %v4200_v30 = vadd.f32 %v4199_v10, %v4174_v41  ;;  %v3385_v29 = vadd.f32 %v11359_v6, %v3359_v48 }
 0x6b5   :  { %v4531_v42 = vadd.f32 %v4527_v58, %v4513_v2 }
 0x6b6   :  { %v12078_v8 = vpop.f32.mrf.mxu2  ;;  %v4515_v45 = vadd.f32 %v4197_v49, %v3708_v3  ;;  %v3711_v50 = vadd.f32 %v11512_v39, %v3685_v19  ;;  %v3731_v38 = vadd.f32 %v11531_v21, %v3385_v29  ;;  %v13100_v19 = vld [vmem:[#allocation28_spill] sm:$0xff] }
 0x6b7   :  { %v4537_v13 = vmax.f32 %v4531_v42, 0.0 }
 0x6b8   :  { %v4533_v28 = vadd.f32 %v4527_v58, %v4515_v45  ;;  %v3757_v10 = vadd.f32 %v11498_v5, %v3731_v38  ;;  %v3362_v5 = vadd.f32 %v11401_v16, %v11349_v25  ;;  %v6662_v25 = vld [vmem:[%s12763_s8 + $0x10] sm:$0xff] }
 0x6b9   :  { %v12067_v59 = vpop.f32.mrf.mxu3  ;;  %v13099_v45 = vld [vmem:[#allocation27_spill] sm:$0xff] }
 0x6ba   :  { %v4403_v31 = vpop.f32.mrf.mxu1  ;;  %v4539_v62 = vmax.f32 %v4533_v28, 0.0  ;;  %v3783_v39 = vadd.f32 %v11565_v12, %v3757_v10  ;;  %v3388_v16 = vadd.f32 %v11383_v57, %v3362_v5  ;;  %v6696_v5 = vld [vmem:[%s12766_s11 + $0x8] sm:$0xff] }
 0x6bb   :  { %v4374_v26 = vpop.f32.mrf.mxu0 }
 0x6bc   :  { %v4401_v63 = vadd.f32 %v4400_v23, %v4374_v26  ;;  %v4514_v21 = vadd.f32 %v12059_v37, %v3783_v39  ;;  %v3391_v37 = vadd.f32 %v11398_v33, %v3365_v35  ;;  %v4675_v35 = vld [vmem:[%s12766_s11] sm:$0xff] }
 0x6be   :  { %v4251_v51 = vpop.f32.mrf.mxu2  ;;  %v3737_v52 = vadd.f32 %v11634_v47, %v3391_v37  ;;  %v6711_v37 = vld [vmem:[%s12764_s9 + $0x1d0] sm:$0xff] }
 0x6c0   :  { %v3763_v47 = vadd.f32 %v13100_v19, %v3737_v52  ;;  %v6740_v52 = vld [vmem:[%s12764_s9 + $0x2b0] sm:$0xff]  ;;  %v6705_v19 = vld [vmem:[%s12764_s9 + $0x1a0] sm:$0xff] }
 0x6c1   :  { %v4426_v60 = vpop.f32.mrf.mxu3 }
 0x6c2   :  { %v4427_v11 = vadd.f32 %v4426_v60, %v4401_v63  ;;  %v4406_v20 = vpop.f32.mrf.mxu1  ;;  %v4517_v63 = vadd.f32 %v4200_v30, %v3711_v50  ;;  %v4562_v30 = vld [vmem:[%s12763_s8 + $0x8] sm:$0xf]  ;;  %v13105_v50 = vld [vmem:[#allocation32_spill] sm:$0xff] }
 0x6c3   :  { %v4377_v43 = vpop.f32.mrf.mxu0 }
 0x6c4   :  { %v4519_v27 = vadd.f32 %v4427_v11, %v3861_v4  ;;  %v4404_v1 = vadd.f32 %v4403_v31, %v4377_v43  ;;  %v4535_v4 = vadd.f32 %v4527_v58, %v4517_v63  ;;  %v4528_v11 = vperm.slane %v4525_v24, 1 }
 0x6c6   :  { %v4543_v23 = vadd.f32 %v4527_v58, %v4519_v27  ;;  %v4452_v46 = vpop.f32.mrf.mxu2  ;;  %v4541_v43 = vmax.f32 %v4535_v4, 0.0  ;;  %v4532_v12 = vadd.f32 %v4528_v11, %v4514_v21 }
 0x6c8   :  { %v4549_v26 = vmax.f32 %v4543_v23, 0.0  ;;  %v4538_v33 = vmax.f32 %v4532_v12, 0.0  ;;  %v6712_v12 = vld [vmem:[%s12764_s9 + $0x1d8] sm:$0xff] }
 0x6c9   :  { %v4429_v9 = vpop.f32.mrf.mxu3 }
 0x6ca   :  { %v4430_v55 = vadd.f32 %v4429_v9, %v4404_v1  ;;  %v4555_v54 = vmax.f32 %v4537_v13, %v4549_v26  ;;  %v3734_v26 = vadd.f32 %v13099_v45, %v3388_v16  ;;  %v4249_v1 = vadd.f32 %v12078_v8, %v12051_v56  ;;  %v6663_v56 = vld [vmem:[%s12763_s8 + $0x18] sm:$0xf]  ;;  %v6709_v16 = vld [vmem:[%s12764_s9 + $0x1c0] sm:$0xff]  ;;  %s5498_s8 = sshll.u32 %s12774_s19, 4  ;;  %s5476_s19 = sshll.u32 %s12772_s17, 4  ;;  %s5499_s8 = int_to_ptr.hbm [resolvable:$true] %s5498_s8  ;;  %s5477_s19 = int_to_ptr.hbm [resolvable:$true] %s5476_s19 }
 0x6cb   :  { %v4380_v61 = vpop.f32.mrf.mxu0  ;;  %v6738_v45 = vld [vmem:[%s12764_s9 + $0x2a0] sm:$0xff] }
 0x6cc   :  { %v4521_v53 = vadd.f32 %v4430_v55, %v3864_v14  ;;  %v4407_v60 = vadd.f32 %v4406_v20, %v4380_v61  ;;  %v13101_v14 = vld [vmem:[#allocation26_spill] sm:$0xff]  ;;  %v13102_v55 = vld [vmem:[#allocation31_spill] sm:$0xff]  ;;  %v13103_v61 = vld [vmem:[#allocation69_spill] sm:$0xff] }
 0x6cd   :  { %v3760_v41 = vadd.f32 %v13101_v14, %v3734_v26  ;;  %v4275_v28 = vadd.f32 %v13103_v61, %v4249_v1  ;;  %v6706_v1 = vld [vmem:[%s12764_s9 + $0x1a8] sm:$0xff]  ;;  %v6748_v14 = vld [vmem:[%s12764_s9 + $0x2f0] sm:$0xff]  ;;  %v6746_v61 = vld [vmem:[%s12764_s9 + $0x2e0] sm:$0xff] }
 0x6ce   :  { %v4545_v2 = vadd.f32 %v4527_v58, %v4521_v53  ;;  %v4455_v24 = vpop.f32.mrf.mxu2  ;;  %v13104_v53 = vld [vmem:[#allocation29_spill] sm:$0xff] }
 0x6cf   :  { %v3786_v29 = vadd.f32 %v13104_v53, %v3760_v41  ;;  %v6723_v41 = vld [vmem:[%s12764_s9 + $0x230] sm:$0xff]  ;;  %v6743_v53 = vld [vmem:[%s12764_s9 + $0x2c8] sm:$0xff] }
 0x6d0   :  { %v4551_v15 = vmax.f32 %v4545_v2, 0.0 }
 0x6d1   :  { %v4432_v40 = vpop.f32.mrf.mxu3 }
 0x6d2   :  { %v4433_v18 = vadd.f32 %v4432_v40, %v4407_v60  ;;  %v4557_v17 = vmax.f32 %v4539_v62, %v4551_v15  ;;  %v4516_v62 = vadd.f32 %v4275_v28, %v3786_v29  ;;  %v13106_v40 = vld [vmem:[#allocation9_spill] sm:$0xff] }
 0x6d3   :  { %v4478_v7 = vpop.f32.mrf.mxu0  ;;  %v6721_v28 = vld [vmem:[%s12764_s9 + $0x220] sm:$0xff] }
 0x6d4   :  { %v4523_v6 = vadd.f32 %v4433_v18, %v11831_v0  ;;  %v4479_v49 = vadd.f32 %v4478_v7, %v4452_v46  ;;  %v4534_v46 = vadd.f32 %v4528_v11, %v4516_v62  ;;  %v6742_v29 = vld [vmem:[%s12764_s9 + $0x2c0] sm:$0xff]  ;;  %v4744_v62 = vld [vmem:[%s12764_s9 + $0x90] sm:$0xff] }
 0x6d6   :  { %v4547_v22 = vadd.f32 %v4527_v58, %v4523_v6  ;;  %v4458_v8 = vpop.f32.mrf.mxu2  ;;  %v4540_v39 = vmax.f32 %v4534_v46, 0.0  ;;  %v6719_v46 = vld [vmem:[%s12764_s9 + $0x210] sm:$0xff] }
 0x6d8   :  { %v4553_v42 = vmax.f32 %v4547_v22, 0.0 }
 0x6d9   :  { %v4504_v27 = vpop.f32.mrf.mxu3 }
 0x6da   :  { %v4559_v31 = vmax.f32 %v4541_v43, %v4553_v42  ;;  %v4505_v3 = vadd.f32 %v4504_v27, %v4479_v49 }
 0x6db   :  { %v4481_v23 = vpop.f32.mrf.mxu0 }
 0x6dc   :  { %v4520_v0 = vadd.f32 %v4505_v3, %v11837_v32  ;;  %4583 = vmatpush.msra.mxu1 %v4559_v31  ;;  %4638 = vmatpush.msrb.mxu0 %v4559_v31  ;;  %v4252_v32 = vadd.f32 %v4251_v51, %v12053_v44  ;;  %v4482_v48 = vadd.f32 %v4481_v23, %v4455_v24  ;;  %v6716_v31 = vld [vmem:[%s12764_s9 + $0x1f8] sm:$0xff]  ;;  %v6715_v3 = vld [vmem:[%s12764_s9 + $0x1f0] sm:$0xff]  ;;  %v6714_v23 = vld [vmem:[%s12764_s9 + $0x1e8] sm:$0xff] }
 0x6de   :  { %v4544_v58 = vadd.f32 %v4528_v11, %v4520_v0  ;;  %4584 = vmatpush.msra.mxu1 %v4557_v17  ;;  %4639 = vmatpush.msrb.mxu0 %v4557_v17  ;;  %v4278_v44 = vadd.f32 %v12067_v59, %v4252_v32  ;;  %v6713_v0 = vld [vmem:[%s12764_s9 + $0x1e0] sm:$0xff]  ;;  %v6708_v32 = vld [vmem:[%s12764_s9 + $0x1b8] sm:$0xff] }
 0x6e0   :  { %v4550_v36 = vmax.f32 %v4544_v58, 0.0  ;;  %4585 = vmatpush.msra.mxu1 %v4555_v54  ;;  %4640 = vmatpush.msrb.mxu0 %v4555_v54  ;;  %v3789_v54 = vadd.f32 %v13102_v55, %v3763_v47  ;;  %v6736_v47 = vld [vmem:[%s12764_s9 + $0x290] sm:$0xff]  ;;  %v6747_v55 = vld [vmem:[%s12764_s9 + $0x2e8] sm:$0xff] }
 0x6e1   :  { %v4507_v13 = vpop.f32.mrf.mxu3  ;;  %6658 = vmatmul.msk.f32.vlgmr.msra.gmra.mxu1 %vm4563_vm7, %v4561_v34  ;;  %6664 = vmatmul.msk.f32.vlgmr.msrb.gmra.mxu0 %vm4563_vm7, %v6662_v25 }
 0x6e2   :  { %v4556_v57 = vmax.f32 %v4538_v33, %v4550_v36  ;;  %v4508_v51 = vadd.f32 %v4507_v13, %v4482_v48  ;;  %v4518_v59 = vadd.f32 %v4278_v44, %v3789_v54  ;;  %v6739_v36 = vld [vmem:[%s12764_s9 + $0x2a8] sm:$0xff]  ;;  %v6707_v13 = vld [vmem:[%s12764_s9 + $0x1b0] sm:$0xff]  ;;  %v6737_v48 = vld [vmem:[%s12764_s9 + $0x298] sm:$0xff] }
 0x6e3   :  { %v4484_v9 = vpop.f32.mrf.mxu0  ;;  %v6722_v54 = vld [vmem:[%s12764_s9 + $0x228] sm:$0xff] }
 0x6e4   :  { %v4522_v2 = vadd.f32 %v4508_v51, %v13105_v50  ;;  %v4485_v38 = vadd.f32 %v4484_v9, %v4458_v8  ;;  %v4536_v15 = vadd.f32 %v4528_v11, %v4518_v59  ;;  %v6749_v51 = vld [vmem:[%s12764_s9 + $0x2f8] sm:$0xff]  ;;  %v6744_v8 = vld [vmem:[%s12764_s9 + $0x2d0] sm:$0xff] }
 0x6e5   :  { %v6724_v9 = vld [vmem:[%s12764_s9 + $0x238] sm:$0xff]  ;;  %v4748_v50 = vld [vmem:[%s12764_s9 + $0xb0] sm:$0xff] }
 0x6e6   :  { %v4546_v60 = vadd.f32 %v4528_v11, %v4522_v2  ;;  %v4542_v7 = vmax.f32 %v4536_v15, 0.0  ;;  %v4749_v59 = vld [vmem:[%s12764_s9 + $0xb8] sm:$0xff]  ;;  %v4747_v2 = vld [vmem:[%s12764_s9 + $0xa8] sm:$0xff] }
 0x6e7   :  { %v6704_v15 = vld [vmem:[%s12764_s9 + $0x198] sm:$0xff] }
 0x6e8   :  { %v4552_v10 = vmax.f32 %v4546_v60, 0.0  ;;  %v6703_v60 = vld [vmem:[%s12764_s9 + $0x190] sm:$0xff] }
 0x6e9   :  { %v4510_v20 = vpop.f32.mrf.mxu3  ;;  %6659 = vmatmul.msk.f32.gmra.mxu1 %vm4563_vm7, %v4562_v30  ;;  %6665 = vmatmul.msk.f32.gmra.mxu0 %vm4563_vm7, %v6663_v56 }
 0x6ea   :  { %v4511_v63 = vadd.f32 %v4510_v20, %v4485_v38  ;;  %v4558_v22 = vmax.f32 %v4540_v39, %v4552_v10  ;;  %v4746_v38 = vld [vmem:[%s12764_s9 + $0xa0] sm:$0xff]  ;;  %v4745_v20 = vld [vmem:[%s12764_s9 + $0x98] sm:$0xff]  ;;  %v6686_v10 = vld [vmem:[%s12764_s9 + $0x130] sm:$0xff] }
 0x6eb   :  { %v6685_v39 = vld [vmem:[%s12764_s9 + $0x128] sm:$0xff] }
 0x6ec   :  { %v4524_v18 = vadd.f32 %v4511_v63, %v13106_v40  ;;  %v4743_v63 = vld [vmem:[%s12764_s9 + $0x88] sm:$0xff] }
 0x6ed   :  { %v6702_v40 = vld [vmem:[%s12764_s9 + $0x188] sm:$0xff] }
 0x6ee   :  { %v4548_v17 = vadd.f32 %v4528_v11, %v4524_v18  ;;  %v6701_v18 = vld [vmem:[%s12764_s9 + $0x180] sm:$0xff] }
 0x6f0   :  { %v4554_v4 = vmax.f32 %v4548_v17, 0.0  ;;  %v6687_v17 = vld [vmem:[%s12764_s9 + $0x138] sm:$0xff] }
 0x6f2   :  { %v4560_v6 = vmax.f32 %v4542_v7, %v4554_v4  ;;  %v6735_v7 = vld [vmem:[%s12764_s9 + $0x288] sm:$0xff] }
 0x6f3   :  { %v6718_v4 = vld [vmem:[%s12764_s9 + $0x208] sm:$0xff] }
 0x6f4   :  { %4606 = vmatpush.msrb.mxu2 %v4560_v6  ;;  %4661 = vmatpush.msrb.mxu1 %v4560_v6  ;;  %v6734_v6 = vld [vmem:[%s12764_s9 + $0x280] sm:$0xff] }
 0x6f6   :  { %4607 = vmatpush.msrb.mxu2 %v4558_v22  ;;  %4662 = vmatpush.msrb.mxu1 %v4558_v22  ;;  %v6717_v22 = vld [vmem:[%s12764_s9 + $0x200] sm:$0xff] }
 0x6f8   :  { %4608 = vmatpush.msrb.mxu2 %v4556_v57  ;;  %4663 = vmatpush.msrb.mxu1 %v4556_v57 }
 0x6f9   :  { %6660 = vmatmul.msk.f32.vlgmr.msrb.gmra.mxu2 %vm4563_vm7, %v4561_v34  ;;  %6666 = vmatmul.msk.f32.vlgmr.msrb.gmra.mxu1 %vm4563_vm7, %v6662_v25  ;;  %v6710_v34 = vld [vmem:[%s12764_s9 + $0x1c8] sm:$0xff]  ;;  %v6741_v25 = vld [vmem:[%s12764_s9 + $0x2b8] sm:$0xff] }
 0x6fa   :  { %4849 = vmatpush.msra.mxu1 %v6716_v31  ;;  %v6683_v31 = vld [vmem:[%s12764_s9 + $0x118] sm:$0xff] }
 0x6fc   :  { %4850 = vmatpush.msra.mxu1 %v6715_v3  ;;  %v6731_v3 = vld [vmem:[%s12764_s9 + $0x268] sm:$0xff] }
 0x6fe   :  { %4851 = vmatpush.msra.mxu1 %v6714_v23  ;;  %v6682_v23 = vld [vmem:[%s12764_s9 + $0x110] sm:$0xff] }
 0x700   :  { %4852 = vmatpush.msra.mxu1 %v6713_v0  ;;  %v6730_v0 = vld [vmem:[%s12764_s9 + $0x260] sm:$0xff] }
 0x701   :  { %6661 = vmatmul.msk.f32.gmra.mxu2 %vm4563_vm7, %v4562_v30  ;;  %6667 = vmatmul.msk.f32.gmra.mxu1 %vm4563_vm7, %v6663_v56  ;;  %v6745_v30 = vld [vmem:[%s12764_s9 + $0x2d8] sm:$0xff] }
 0x702   :  { %4853 = vmatpush.msra.mxu1 %v6712_v12  ;;  %v6720_v56 = vld [vmem:[%s12764_s9 + $0x218] sm:$0xff]  ;;  %v4738_v12 = vld [vmem:[%s12764_s9 + $0x60] sm:$0xff] }
 0x704   :  { %4854 = vmatpush.msra.mxu1 %v6711_v37  ;;  %v6729_v37 = vld [vmem:[%s12764_s9 + $0x258] sm:$0xff] }
 0x706   :  { %4855 = vmatpush.msra.mxu1 %v6710_v34  ;;  %v6680_v34 = vld [vmem:[%s12764_s9 + $0x100] sm:$0xff] }
 0x708   :  { %4856 = vmatpush.msra.mxu1 %v6709_v16  ;;  %v4736_v16 = vld [vmem:[%s12764_s9 + $0x50] sm:$0xff] }
 0x70a   :  { %4857 = vmatpush.msra.mxu1 %v6708_v32  ;;  %v6727_v32 = vld [vmem:[%s12764_s9 + $0x248] sm:$0xff] }
 0x70c   :  { %4858 = vmatpush.msra.mxu1 %v6707_v13  ;;  %v6726_v13 = vld [vmem:[%s12764_s9 + $0x240] sm:$0xff] }
 0x70e   :  { %4859 = vmatpush.msra.mxu1 %v6706_v1  ;;  %v6677_v1 = vld [vmem:[%s12764_s9 + $0xe8] sm:$0xff] }
 0x710   :  { %4860 = vmatpush.msra.mxu1 %v6705_v19  ;;  %v6694_v19 = vld [vmem:[%s12764_s9 + $0x170] sm:$0xff] }
 0x712   :  { %4861 = vmatpush.msra.mxu1 %v6704_v15  ;;  %v6773_v15 = vld [vmem:[%s12764_s9 + $0x378] sm:$0xff] }
 0x714   :  { %4862 = vmatpush.msra.mxu1 %v6703_v60 }
 0x716   :  { %4863 = vmatpush.msra.mxu1 %v6702_v40  ;;  %v6772_v40 = vld [vmem:[%s12764_s9 + $0x370] sm:$0xff] }
 0x718   :  { %4864 = vmatpush.msra.mxu1 %v6701_v18  ;;  %v6771_v18 = vld [vmem:[%s12764_s9 + $0x368] sm:$0xff] }
 0x71a   :  { %4997 = vmatpush.msrb.mxu1 %v6687_v17 }
 0x71c   :  { %4998 = vmatpush.msrb.mxu1 %v6686_v10  ;;  %v6769_v10 = vld [vmem:[%s12764_s9 + $0x358] sm:$0xff] }
 0x71e   :  { %4999 = vmatpush.msrb.mxu1 %v6685_v39  ;;  %v6793_v39 = vld [vmem:[%s12764_s9 + $0x410] sm:$0xff] }
 0x75e   :  { %v4587_v11 = vpop.f32.mrf.mxu1  ;;  %v4642_v21 = vpop.f32.mrf.mxu0 }
 0x75f   :  { %v12140_v49 = vmax.f32 %v4587_v11, %v4642_v21  ;;  %v6733_v11 = vld [vmem:[%s12764_s9 + $0x278] sm:$0xff] }
 0x760   :  { %v4741_v21 = vld [vmem:[%s12764_s9 + $0x78] sm:$0xff] }
 0x766   :  { %v4590_v43 = vpop.f32.mrf.mxu1  ;;  %v4645_v42 = vpop.f32.mrf.mxu0 }
 0x767   :  { %v12142_v27 = vmax.f32 %v4590_v43, %v4645_v42  ;;  %v6684_v43 = vld [vmem:[%s12764_s9 + $0x120] sm:$0xff]  ;;  %v6732_v42 = vld [vmem:[%s12764_s9 + $0x270] sm:$0xff] }
 0x768   :  { %5000 = vmatpush.msrb.mxu1 %v6684_v43  ;;  %v6791_v43 = vld [vmem:[%s12764_s9 + $0x400] sm:$0xff] }
 0x769   :  { %6668 = vmatpush.msk.msrb.mxu3 %vm106_vm0, %v12142_v27 }
 0x76a   :  { %5001 = vmatpush.msrb.mxu1 %v6683_v31  ;;  %v6764_v31 = vld [vmem:[%s12764_s9 + $0x330] sm:$0xff] }
 0x76b   :  { %4701 = vmatpush.msrb.mxu3 %v12140_v49 }
 0x76c   :  { %6669 = vmatmul.msk.f32.vlgmr.msrb.gmra.mxu3 %vm4676_vm8, %v4675_v35  ;;  %5002 = vmatpush.msrb.mxu1 %v6682_v23  ;;  %v6788_v23 = vld [vmem:[%s12764_s9 + $0x3e8] sm:$0xff] }
 0x76d   :  { %6697 = vmatpush.msk.msra.mxu3 %vm106_vm0, %v12142_v27 }
 0x76f   :  { %4795 = vmatpush.msra.mxu3 %v12140_v49 }
 0x771   :  { %4914 = vmatpush.msrb.mxu3 %v6741_v25  ;;  %v6728_v25 = vld [vmem:[%s12764_s9 + $0x250] sm:$0xff] }
 0x773   :  { %4915 = vmatpush.msrb.mxu3 %v6740_v52  ;;  %v6679_v52 = vld [vmem:[%s12764_s9 + $0xf8] sm:$0xff] }
 0x774   :  { %6698 = vmatmul.msk.f32.vlgmr.msra.gmra.mxu3 %vm4676_vm8, %v6696_v5 }
 0x775   :  { %4916 = vmatpush.msrb.mxu3 %v6739_v36  ;;  %v4735_v36 = vld [vmem:[%s12764_s9 + $0x48] sm:$0xff] }
 0x776   :  { %v4665_v24 = vpop.f32.mrf.mxu1 }
 0x777   :  { %4917 = vmatpush.msrb.mxu3 %v6738_v45  ;;  %v4734_v45 = vld [vmem:[%s12764_s9 + $0x40] sm:$0xff] }
 0x779   :  { %4918 = vmatpush.msrb.mxu3 %v6737_v48  ;;  %v4733_v48 = vld [vmem:[%s12764_s9 + $0x38] sm:$0xff] }
 0x77b   :  { %4919 = vmatpush.msrb.mxu3 %v6736_v47  ;;  %v6676_v47 = vld [vmem:[%s12764_s9 + $0xe0] sm:$0xff] }
 0x77c   :  { %v4610_v58 = vpop.f32.mrf.mxu2 }
 0x77d   :  { %v12214_v44 = vmax.f32 %v4610_v58, %v4665_v24  ;;  %4920 = vmatpush.msrb.mxu3 %v6735_v7  ;;  %v6681_v24 = vld [vmem:[%s12764_s9 + $0x108] sm:$0xff]  ;;  %v4737_v58 = vld [vmem:[%s12764_s9 + $0x58] sm:$0xff]  ;;  %v6795_v7 = vld [vmem:[%s12764_s9 + $0x420] sm:$0xff] }
 0x77e   :  { %v4668_v33 = vpop.f32.mrf.mxu1  ;;  %5003 = vmatpush.msrb.mxu1 %v6681_v24  ;;  %v6780_v24 = vld [vmem:[%s12764_s9 + $0x3b0] sm:$0xff] }
 0x77f   :  { %4921 = vmatpush.msrb.mxu3 %v6734_v6  ;;  %v6768_v6 = vld [vmem:[%s12764_s9 + $0x350] sm:$0xff] }
 0x780   :  { %5004 = vmatpush.msrb.mxu1 %v6680_v34  ;;  %v6804_v34 = vld [vmem:[%s12764_s9 + $0x468] sm:$0xff] }
 0x781   :  { %4922 = vmatpush.msrb.mxu3 %v6733_v11  ;;  %v6792_v11 = vld [vmem:[%s12764_s9 + $0x408] sm:$0xff] }
 0x782   :  { %5005 = vmatpush.msrb.mxu1 %v6679_v52  ;;  %v6761_v52 = vld [vmem:[%s12764_s9 + $0x318] sm:$0xff] }
 0x783   :  { %4923 = vmatpush.msrb.mxu3 %v6732_v42  ;;  %v6765_v42 = vld [vmem:[%s12764_s9 + $0x338] sm:$0xff] }
 0x784   :  { %v4613_v26 = vpop.f32.mrf.mxu2 }
 0x785   :  { %v12206_v57 = vmax.f32 %v4613_v26, %v4668_v33  ;;  %4924 = vmatpush.msrb.mxu3 %v6731_v3  ;;  %v6678_v33 = vld [vmem:[%s12764_s9 + $0xf0] sm:$0xff]  ;;  %v6695_v26 = vld [vmem:[%s12764_s9 + $0x178] sm:$0xff] }
 0x786   :  { %5006 = vmatpush.msrb.mxu1 %v6678_v33  ;;  %v6789_v3 = vld [vmem:[%s12764_s9 + $0x3f0] sm:$0xff] }
 0x787   :  { %6699 = vmatpush.msk.msra.mxu0 %vm106_vm0, %v12206_v57  ;;  %6670 = vmatpush.msk.msra.mxu2 %vm106_vm0, %v12206_v57  ;;  %v6785_v33 = vld [vmem:[%s12764_s9 + $0x3d0] sm:$0xff] }
 0x788   :  { %4925 = vmatpush.msrb.mxu3 %v6730_v0  ;;  %5007 = vmatpush.msrb.mxu1 %v6677_v1  ;;  %v6781_v0 = vld [vmem:[%s12764_s9 + $0x3b8] sm:$0xff]  ;;  %v6803_v1 = vld [vmem:[%s12764_s9 + $0x460] sm:$0xff] }
 0x789   :  { %4815 = vmatpush.msra.mxu0 %v12214_v44  ;;  %4721 = vmatpush.msra.mxu2 %v12214_v44 }
 0x78a   :  { %6700 = vmatmul.msk.f32.vlgmr.msra.gmra.mxu0 %vm4676_vm8, %v6696_v5  ;;  %6671 = vmatmul.msk.f32.vlgmr.msra.gmra.mxu2 %vm4676_vm8, %v4675_v35  ;;  %v4740_v35 = vld [vmem:[%s12764_s9 + $0x70] sm:$0xff]  ;;  %v4739_v5 = vld [vmem:[%s12764_s9 + $0x68] sm:$0xff] }
 0x78b   :  { %4942 = vmatpush.msrb.mxu0 %v6749_v51  ;;  %4877 = vmatpush.msrb.mxu2 %v6724_v9  ;;  %v4732_v51 = vld [vmem:[%s12764_s9 + $0x30] sm:$0xff]  ;;  %v6693_v9 = vld [vmem:[%s12764_s9 + $0x168] sm:$0xff] }
 0x78c   :  { %4926 = vmatpush.msrb.mxu3 %v6729_v37  ;;  %5008 = vmatpush.msrb.mxu1 %v6676_v47  ;;  %v6805_v37 = vld [vmem:[%s12764_s9 + $0x470] sm:$0xff] }
 0x78d   :  { %4943 = vmatpush.msrb.mxu0 %v6748_v14  ;;  %4878 = vmatpush.msrb.mxu2 %v6723_v41  ;;  %v6675_v14 = vld [vmem:[%s12764_s9 + $0xd8] sm:$0xff]  ;;  %v4731_v41 = vld [vmem:[%s12764_s9 + $0x28] sm:$0xff]  ;;  %v6776_v47 = vld [vmem:[%s12764_s9 + $0x390] sm:$0xff] }
 0x78e   :  { %4927 = vmatpush.msrb.mxu3 %v6728_v25  ;;  %5009 = vmatpush.msrb.mxu1 %v6675_v14  ;;  %v6762_v25 = vld [vmem:[%s12764_s9 + $0x320] sm:$0xff] }
 0x78f   :  { %4944 = vmatpush.msrb.mxu0 %v6747_v55  ;;  %4879 = vmatpush.msrb.mxu2 %v6722_v54  ;;  %v6692_v55 = vld [vmem:[%s12764_s9 + $0x160] sm:$0xff]  ;;  %v6674_v54 = vld [vmem:[%s12764_s9 + $0xd0] sm:$0xff] }
 0x790   :  { %4928 = vmatpush.msrb.mxu3 %v6727_v32  ;;  %5010 = vmatpush.msrb.mxu1 %v6674_v54  ;;  %v6786_v32 = vld [vmem:[%s12764_s9 + $0x3d8] sm:$0xff]  ;;  %v6783_v14 = vld [vmem:[%s12764_s9 + $0x3c0] sm:$0xff] }
 0x791   :  { %4945 = vmatpush.msrb.mxu0 %v6746_v61  ;;  %4880 = vmatpush.msrb.mxu2 %v6721_v28  ;;  %v4742_v61 = vld [vmem:[%s12764_s9 + $0x80] sm:$0xff] }
 0x792   :  { %4929 = vmatpush.msrb.mxu3 %v6726_v13  ;;  %v4730_v28 = vld [vmem:[%s12764_s9 + $0x20] sm:$0xff]  ;;  %v6759_v13 = vld [vmem:[%s12764_s9 + $0x308] sm:$0xff] }
 0x793   :  { %4946 = vmatpush.msrb.mxu0 %v6745_v30  ;;  %4881 = vmatpush.msrb.mxu2 %v6720_v56  ;;  %v6691_v30 = vld [vmem:[%s12764_s9 + $0x158] sm:$0xff]  ;;  %v6673_v56 = vld [vmem:[%s12764_s9 + $0xc8] sm:$0xff]  ;;  %v6774_v54 = vld [vmem:[%s12764_s9 + $0x380] sm:$0xff] }
 0x794   :  { %5025 = vmatpush.msra.mxu3 %v6695_v26  ;;  %5011 = vmatpush.msrb.mxu1 %v6673_v56  ;;  %v6778_v26 = vld [vmem:[%s12764_s9 + $0x3a0] sm:$0xff] }
 0x795   :  { %4947 = vmatpush.msrb.mxu0 %v6744_v8  ;;  %4882 = vmatpush.msrb.mxu2 %v6719_v46  ;;  %v4729_v8 = vld [vmem:[%s12764_s9 + $0x18] sm:$0xff]  ;;  %v6797_v46 = vld [vmem:[%s12764_s9 + $0x430] sm:$0xff] }
 0x796   :  { %5026 = vmatpush.msra.mxu3 %v6694_v19  ;;  %v6802_v19 = vld [vmem:[%s12764_s9 + $0x458] sm:$0xff] }
 0x797   :  { %4948 = vmatpush.msrb.mxu0 %v6743_v53  ;;  %4883 = vmatpush.msrb.mxu2 %v6718_v4  ;;  %v6690_v53 = vld [vmem:[%s12764_s9 + $0x150] sm:$0xff]  ;;  %v6794_v4 = vld [vmem:[%s12764_s9 + $0x418] sm:$0xff] }
 0x798   :  { %5027 = vmatpush.msra.mxu3 %v6693_v9  ;;  %v6758_v9 = vld [vmem:[%s12764_s9 + $0x300] sm:$0xff] }
 0x799   :  { %4949 = vmatpush.msrb.mxu0 %v6742_v29  ;;  %4884 = vmatpush.msrb.mxu2 %v6717_v22  ;;  %v6672_v29 = vld [vmem:[%s12764_s9 + $0xc0] sm:$0xff]  ;;  %v6767_v22 = vld [vmem:[%s12764_s9 + $0x348] sm:$0xff] }
 0x79a   :  { %5028 = vmatpush.msra.mxu3 %v6692_v55  ;;  %5012 = vmatpush.msrb.mxu1 %v6672_v29  ;;  %v6800_v55 = vld [vmem:[%s12764_s9 + $0x448] sm:$0xff] }
 0x79b   :  { %4985 = vmatpush.msra.mxu0 %v4749_v59  ;;  %4957 = vmatpush.msra.mxu2 %v4741_v21  ;;  %v4728_v59 = vld [vmem:[%s12764_s9 + $0x10] sm:$0xff]  ;;  %v6766_v21 = vld [vmem:[%s12764_s9 + $0x340] sm:$0xff] }
 0x79c   :  { %5029 = vmatpush.msra.mxu3 %v6691_v30 }
 0x79d   :  { %4986 = vmatpush.msra.mxu0 %v4748_v50  ;;  %4958 = vmatpush.msra.mxu2 %v4740_v35  ;;  %v6689_v50 = vld [vmem:[%s12764_s9 + $0x148] sm:$0xff]  ;;  %v6790_v35 = vld [vmem:[%s12764_s9 + $0x3f8] sm:$0xff] }
 0x79e   :  { %5030 = vmatpush.msra.mxu3 %v6690_v53 }
 0x79f   :  { %4987 = vmatpush.msra.mxu0 %v4747_v2  ;;  %4959 = vmatpush.msra.mxu2 %v4739_v5  ;;  %v4727_v2 = vld [vmem:[%s12764_s9 + $0x8] sm:$0xff] }
 0x7a0   :  { %5031 = vmatpush.msra.mxu3 %v6689_v50  ;;  %v6763_v5 = vld [vmem:[%s12764_s9 + $0x328] sm:$0xff] }
 0x7a1   :  { %4988 = vmatpush.msra.mxu0 %v4746_v38  ;;  %4960 = vmatpush.msra.mxu2 %v4738_v12  ;;  %v6688_v38 = vld [vmem:[%s12764_s9 + $0x140] sm:$0xff]  ;;  %v6806_v12 = vld [vmem:[%s12764_s9 + $0x478] sm:$0xff] }
 0x7a2   :  { %5032 = vmatpush.msra.mxu3 %v6688_v38  ;;  %v6831_v38 = vld [vmem:[%s12769_s14 + $0x70] sm:$0xff] }
 0x7a3   :  { %4989 = vmatpush.msra.mxu0 %v4745_v20  ;;  %4961 = vmatpush.msra.mxu2 %v4737_v58  ;;  %v6779_v58 = vld [vmem:[%s12764_s9 + $0x3a8] sm:$0xff] }
 0x7a5   :  { %4990 = vmatpush.msra.mxu0 %v4744_v62  ;;  %4962 = vmatpush.msra.mxu2 %v4736_v16  ;;  %v4726_v62 = vld [vmem:[%s12764_s9] sm:$0xff] }
 0x7a6   :  { %v6787_v16 = vld [vmem:[%s12764_s9 + $0x3e0] sm:$0xff] }
 0x7a7   :  { %4991 = vmatpush.msra.mxu0 %v4743_v63  ;;  %4963 = vmatpush.msra.mxu2 %v4735_v36  ;;  %v6760_v36 = vld [vmem:[%s12764_s9 + $0x310] sm:$0xff] }
 0x7a9   :  { %4964 = vmatpush.msra.mxu2 %v4734_v45  ;;  %4992 = vmatpush.msra.mxu0 %v4742_v61  ;;  %v6784_v45 = vld [vmem:[%s12764_s9 + $0x3c8] sm:$0xff]  ;;  %v6799_v61 = vld [vmem:[%s12764_s9 + $0x440] sm:$0xff] }
 0x7ab   :  { %4965 = vmatpush.msra.mxu2 %v4733_v48  ;;  %v6777_v48 = vld [vmem:[%s12764_s9 + $0x398] sm:$0xff] }
 0x7ad   :  { %4966 = vmatpush.msra.mxu2 %v4732_v51  ;;  %v6801_v51 = vld [vmem:[%s12764_s9 + $0x450] sm:$0xff] }
 0x7af   :  { %4967 = vmatpush.msra.mxu2 %v4731_v41  ;;  %v6775_v41 = vld [vmem:[%s12764_s9 + $0x388] sm:$0xff] }
 0x7b1   :  { %4968 = vmatpush.msra.mxu2 %v4730_v28 }
 0x7b3   :  { %4969 = vmatpush.msra.mxu2 %v4729_v8 }
 0x7b5   :  { %4970 = vmatpush.msra.mxu2 %v4728_v59 }
 0x7b7   :  { %4971 = vmatpush.msra.mxu2 %v4727_v2  ;;  %v6832_v2 = vld [vmem:[%s12769_s14 + $0x78] sm:$0xff] }
 0x7b9   :  { %4972 = vmatpush.msra.mxu2 %v4726_v62 }
 0x7ef   :  { %v4703_v20 = vpop.f32.mrf.mxu3 }
 0x7f7   :  { %v4797_v63 = vpop.f32.mrf.mxu3 }
 0x7f8   :  { %4930 = vmatmul.f32.vlgmr.msrb.gmra.mxu3 %v4797_v63  ;;  %4865 = vmatmul.f32.vlgmr.msra.gmra.mxu1 %v4797_v63 }
 0x7f9   :  { %5138 = vmatpush.msrb.mxu3 %v6781_v0  ;;  %5203 = vmatpush.msra.mxu1 %v6806_v12  ;;  %v5335_v0 = vld [vmem:[%s12768_s13 + $0x38] sm:$0xff]  ;;  %v5334_v12 = vld [vmem:[%s12768_s13 + $0x30] sm:$0xff] }
 0x7fb   :  { %5139 = vmatpush.msrb.mxu3 %v6780_v24  ;;  %5204 = vmatpush.msra.mxu1 %v6805_v37  ;;  %v6822_v24 = vld [vmem:[%s12768_s13 + $0x68] sm:$0xff] }
 0x7fc   :  { %v5333_v37 = vld [vmem:[%s12768_s13 + $0x28] sm:$0xff] }
 0x7fd   :  { %5140 = vmatpush.msrb.mxu3 %v6779_v58  ;;  %5205 = vmatpush.msra.mxu1 %v6804_v34  ;;  %v6821_v58 = vld [vmem:[%s12768_s13 + $0x60] sm:$0xff] }
 0x7fe   :  { %v5332_v34 = vld [vmem:[%s12768_s13 + $0x20] sm:$0xff] }
 0x7ff   :  { %5141 = vmatpush.msrb.mxu3 %v6778_v26  ;;  %5206 = vmatpush.msra.mxu1 %v6803_v1  ;;  %v6818_v26 = vld [vmem:[%s12768_s13 + $0x48] sm:$0xff]  ;;  %v6829_v1 = vld [vmem:[%s12769_s14 + $0x60] sm:$0xff] }
 0x800   :  { %5013 = vmatmul.f32.vlgmr.msrb.gmra.mxu1 %v4703_v20 }
 0x801   :  { %5142 = vmatpush.msrb.mxu3 %v6777_v48  ;;  %5207 = vmatpush.msra.mxu1 %v6802_v19  ;;  %v6828_v48 = vld [vmem:[%s12769_s14 + $0x58] sm:$0xff]  ;;  %v5340_v19 = vld [vmem:[%s12769_s14 + $0x20] sm:$0xff] }
 0x803   :  { %5143 = vmatpush.msrb.mxu3 %v6776_v47  ;;  %5208 = vmatpush.msra.mxu1 %v6801_v51  ;;  %v6817_v47 = vld [vmem:[%s12768_s13 + $0x40] sm:$0xff]  ;;  %v5329_v51 = vld [vmem:[%s12768_s13 + $0x8] sm:$0xff] }
 0x805   :  { %5144 = vmatpush.msrb.mxu3 %v6775_v41  ;;  %5209 = vmatpush.msra.mxu1 %v6800_v55  ;;  %v5339_v41 = vld [vmem:[%s12769_s14 + $0x18] sm:$0xff]  ;;  %v5338_v55 = vld [vmem:[%s12769_s14 + $0x10] sm:$0xff] }
 0x807   :  { %v4817_v60 = vpop.f32.mrf.mxu0  ;;  %5145 = vmatpush.msrb.mxu3 %v6774_v54  ;;  %5210 = vmatpush.msra.mxu1 %v6799_v61  ;;  %v6826_v54 = vld [vmem:[%s12769_s14 + $0x48] sm:$0xff] }
 0x808   :  { %6750 = vmatmul.msk.f32.vlgmr.msrb.gmra.mxu0 %vm4845_vm9, %v4817_v60  ;;  %6725 = vmatmul.msk.f32.vlgmr.msrb.gmra.mxu2 %vm4845_vm9, %v4817_v60  ;;  %v5337_v61 = vld [vmem:[%s12769_s14 + $0x8] sm:$0xff] }
 0x809   :  { %6754 = vmatpush.msk.msrb.mxu0 %vm106_vm0, %v12142_v27  ;;  %5110 = vmatpush.msrb.mxu2 %v6773_v15  ;;  %v6753_v27 = vld [vmem:[%s12766_s11 + $0x10] sm:$0xff] }
 0x80b   :  { %5057 = vmatpush.msrb.mxu0 %v12140_v49  ;;  %5111 = vmatpush.msrb.mxu2 %v6772_v40  ;;  %v6798_v49 = vld [vmem:[%s12764_s9 + $0x438] sm:$0xff] }
 0x80d   :  { %v4723_v17 = vpop.f32.mrf.mxu2  ;;  %5112 = vmatpush.msrb.mxu2 %v6771_v18 }
 0x80e   :  { %6752 = vmatmul.msk.f32.vlgmr.msra.gmra.mxu3 %vm4845_vm9, %v4723_v17 }
 0x810   :  { %6751 = vmatmul.msk.f32.vlgmr.msra.gmra.mxu0 %vm4845_vm9, %v4723_v17  ;;  %4973 = vmatmul.f32.vlgmr.msra.gmra.mxu2 %v4703_v20 }
 0x811   :  { %6756 = vmatpush.msk.msra.mxu0 %vm106_vm0, %v12206_v57  ;;  %v6796_v57 = vld [vmem:[%s12764_s9 + $0x428] sm:$0xff] }
 0x813   :  { %5077 = vmatpush.msra.mxu0 %v12214_v44  ;;  %v6770_v44 = vld [vmem:[%s12764_s9 + $0x360] sm:$0xff] }
 0x814   :  { %5113 = vmatpush.msrb.mxu2 %v6770_v44 }
 0x816   :  { %5114 = vmatpush.msrb.mxu2 %v6769_v10 }
 0x818   :  { %6755 = vmatmul.msk.f32.vlgmr.msrb.gmra.mxu0 %vm4676_vm8, %v6753_v27  ;;  %5115 = vmatpush.msrb.mxu2 %v6768_v6 }
 0x819   :  { %5175 = vmatpush.msrb.mxu0 %v6798_v49 }
 0x81a   :  { %5116 = vmatpush.msrb.mxu2 %v6767_v22 }
 0x81b   :  { %5176 = vmatpush.msrb.mxu0 %v6797_v46 }
 0x81c   :  { %5117 = vmatpush.msrb.mxu2 %v6766_v21 }
 0x81d   :  { %5177 = vmatpush.msrb.mxu0 %v6796_v57  ;;  %v6839_v57 = vld [vmem:[%s12765_s10] ss:$0 sm:$0xff]  ;;  %s5496_s10 = sshll.u32 %s6937_s2, 4  ;;  %s5497_s10 = int_to_ptr.vmem [resolvable:$true] %s5496_s10 }
 0x81e   :  { %5118 = vmatpush.msrb.mxu2 %v6765_v42  ;;  %v5226_v42 = vld [vmem:[%s12767_s12] sm:$0x3] }
 0x81f   :  { %5178 = vmatpush.msrb.mxu0 %v6795_v7 }
 0x820   :  { %6757 = vmatmul.msk.f32.vlgmr.msra.gmra.mxu0 %vm4676_vm8, %v6753_v27  ;;  %5119 = vmatpush.msrb.mxu2 %v6764_v31  ;;  %v6824_v31 = vld [vmem:[%s12768_s13 + $0x78] sm:$0xff] }
 0x821   :  { %5179 = vmatpush.msrb.mxu0 %v6794_v4 }
 0x822   :  { %5120 = vmatpush.msrb.mxu2 %v6763_v5  ;;  %v6811_v5 = vld [vmem:[%s12767_s12 + $0x4] sm:$0x3] }
 0x823   :  { %5180 = vmatpush.msrb.mxu0 %v6793_v39 }
 0x824   :  { %5121 = vmatpush.msrb.mxu2 %v6762_v25  ;;  %v5343_v25 = vld [vmem:[%s12769_s14 + $0x38] sm:$0xff] }
 0x825   :  { %5181 = vmatpush.msrb.mxu0 %v6792_v11 }
 0x826   :  { %5122 = vmatpush.msrb.mxu2 %v6761_v52  ;;  %v5331_v52 = vld [vmem:[%s12768_s13 + $0x18] sm:$0xff] }
 0x827   :  { %5182 = vmatpush.msrb.mxu0 %v6791_v43 }
 0x828   :  { %5123 = vmatpush.msrb.mxu2 %v6760_v36  ;;  %v6819_v36 = vld [vmem:[%s12768_s13 + $0x50] sm:$0xff] }
 0x829   :  { %5183 = vmatpush.msrb.mxu0 %v6790_v35  ;;  %v6809_v35 = vld [vmem:[%s12767_s12 + $0x2] sm:$0x3] }
 0x82a   :  { %5124 = vmatpush.msrb.mxu2 %v6759_v13  ;;  %v6830_v13 = vld [vmem:[%s12769_s14 + $0x68] sm:$0xff] }
 0x82b   :  { %5184 = vmatpush.msrb.mxu0 %v6789_v3  ;;  %v6823_v3 = vld [vmem:[%s12768_s13 + $0x70] sm:$0xff] }
 0x82c   :  { %5125 = vmatpush.msrb.mxu2 %v6758_v9  ;;  %v5328_v9 = vld [vmem:[%s12768_s13] sm:$0xff] }
 0x82d   :  { %5185 = vmatpush.msrb.mxu0 %v6788_v23  ;;  %v6813_v23 = vld [vmem:[%s12767_s12 + $0x6] sm:$0x3] }
 0x82e   :  { %5355 = vmatpush.msra.mxu2 %v5343_v25 }
 0x82f   :  { %5186 = vmatpush.msrb.mxu0 %v6787_v16  ;;  %v6820_v16 = vld [vmem:[%s12768_s13 + $0x58] sm:$0xff] }
 0x831   :  { %5187 = vmatpush.msrb.mxu0 %v6786_v32  ;;  %v5342_v32 = vld [vmem:[%s12769_s14 + $0x30] sm:$0xff] }
 0x832   :  { %5356 = vmatpush.msra.mxu2 %v5342_v32 }
 0x833   :  { %5188 = vmatpush.msrb.mxu0 %v6785_v33  ;;  %v5330_v33 = vld [vmem:[%s12768_s13 + $0x10] sm:$0xff] }
 0x835   :  { %5189 = vmatpush.msrb.mxu0 %v6784_v45  ;;  %v5341_v45 = vld [vmem:[%s12769_s14 + $0x28] sm:$0xff] }
 0x836   :  { %5357 = vmatpush.msra.mxu2 %v5341_v45 }
 0x837   :  { %5190 = vmatpush.msrb.mxu0 %v6783_v14  ;;  %v6827_v14 = vld [vmem:[%s12769_s14 + $0x50] sm:$0xff] }
 0x838   :  { %5358 = vmatpush.msra.mxu2 %v5340_v19 }
 0x839   :  { %5421 = vmatpush.msra.mxu0 %v6832_v2  ;;  %v6840_v2 = vld [vmem:[%s12770_s15 + $0x1] ss:$0 sm:$0xff] }
 0x83a   :  { %5359 = vmatpush.msra.mxu2 %v5339_v41 }
 0x83b   :  { %5422 = vmatpush.msra.mxu0 %v6831_v38 }
 0x83c   :  { %5360 = vmatpush.msra.mxu2 %v5338_v55 }
 0x83d   :  { %5423 = vmatpush.msra.mxu0 %v6830_v13 }
 0x83e   :  { %5361 = vmatpush.msra.mxu2 %v5337_v61 }
 0x83f   :  { %5424 = vmatpush.msra.mxu0 %v6829_v1 }
 0x841   :  { %5425 = vmatpush.msra.mxu0 %v6828_v48 }
 0x843   :  { %5426 = vmatpush.msra.mxu0 %v6827_v14 }
 0x845   :  { %5427 = vmatpush.msra.mxu0 %v6826_v54 }
 0x875   :  { %v4866_v53 = vpop.f32.mrf.mxu1 }
 0x87b   :  { %v4931_v59 = vpop.f32.mrf.mxu3 }
 0x87d   :  { %v5014_v50 = vpop.f32.mrf.mxu1 }
 0x885   :  { %v4951_v28 = vpop.f32.mrf.mxu0 }
 0x886   :  { %v4952_v20 = vadd.f32 %v4951_v28, %v4931_v59  ;;  %v6825_v28 = vld [vmem:[%s12769_s14 + $0x40] sm:$0xff] }
 0x887   :  { %5428 = vmatpush.msra.mxu0 %v6825_v28 }
 0x888   :  { %v5015_v18 = vadd.f32 %v5014_v50, %v4952_v20 }
 0x88b   :  { %v4886_v29 = vpop.f32.mrf.mxu2 }
 0x88c   :  { %v4887_v40 = vadd.f32 %v4886_v29, %v4866_v53 }
 0x88d   :  { %v4994_v30 = vpop.f32.mrf.mxu0 }
 0x891   :  { %v5034_v62 = vpop.f32.mrf.mxu3 }
 0x892   :  { %v5035_v27 = vadd.f32 %v5034_v62, %v5015_v18 }
 0x893   :  { %v4974_v63 = vpop.f32.mrf.mxu2 }
 0x894   :  { %v4975_v49 = vadd.f32 %v4974_v63, %v4887_v40 }
 0x895   :  { %v5059_v56 = vpop.f32.mrf.mxu0 }
 0x896   :  { %5126 = vmatmul.f32.vlgmr.msrb.gmra.mxu2 %v5059_v56  ;;  %5191 = vmatmul.f32.vlgmr.msrb.gmra.mxu0 %v5059_v56  ;;  %v4995_v10 = vadd.f32 %v4994_v30, %v4975_v49  ;;  %v5336_v30 = vld [vmem:[%s12769_s14] sm:$0xff] }
 0x897   :  { %5362 = vmatpush.msra.mxu2 %v5336_v30 }
 0x89d   :  { %v5079_v8 = vpop.f32.mrf.mxu0 }
 0x89e   :  { %6782 = vmatmul.msk.f32.vlgmr.msrb.gmra.mxu3 %vm4845_vm9, %v5079_v8  ;;  %6807 = vmatmul.msk.f32.vlgmr.msra.gmra.mxu1 %vm4845_vm9, %v5079_v8 }
 0x913   :  { %v5192_v15 = vpop.f32.mrf.mxu0 }
 0x919   :  { %v5127_v44 = vpop.f32.mrf.mxu2 }
 0x91b   :  { %v5212_v60 = vpop.f32.mrf.mxu1 }
 0x91c   :  { %v5213_v17 = vadd.f32 %v5212_v60, %v5192_v15  ;;  %v6841_v60 = vld [vmem:[%s12770_s15] ss:$0 sm:$0xff] }
 0x91e   :  { %v5216_v46 = vadd.f32 %v5213_v17, %v5035_v27 }
 0x920   :  { %v5223_v6 = vadd.f32 %v6839_v57, %v5216_v46  ;;  %v5462_v46 = vld [vmem:[%s12771_s16] sm:$0x3] }
 0x921   :  { %v5147_v7 = vpop.f32.mrf.mxu3 }
 0x922   :  { %v5148_v4 = vadd.f32 %v5147_v7, %v5127_v44  ;;  %v5224_v11 = vmax.f32 %v5223_v6, 0.0 }
 0x924   :  { %v5215_v39 = vadd.f32 %v5148_v4, %v4995_v10 }
 0x926   :  { %v5221_v22 = vadd.f32 %v6839_v57, %v5215_v39 }
 0x928   :  { %v5222_v21 = vmax.f32 %v5221_v22, 0.0 }
 0x92a   :  { %v5225_v43 = vmax.f32 %v5222_v21, %v5224_v11 }
 0x92c   :  { %5246 = vmatpush.msra.mxu3 %v5225_v43  ;;  %5271 = vmatpush.msrb.mxu1 %v5225_v43 }
 0x92d   :  { %6808 = vmatmul.msk.f32.vlgmr.msra.gmra.mxu3 %vm5227_vm10, %v5226_v42  ;;  %6810 = vmatmul.msk.f32.vlgmr.msrb.gmra.mxu1 %vm5227_vm10, %v6809_v35 }
 0x92e   :  { %5297 = vmatpush.msrb.mxu3 %v5225_v43  ;;  %5322 = vmatpush.msra.mxu1 %v5225_v43 }
 0x930   :  { %5441 = vmatpush.msrb.mxu1 %v6824_v31  ;;  %5378 = vmatpush.msra.mxu3 %v5335_v0 }
 0x932   :  { %5442 = vmatpush.msrb.mxu1 %v6823_v3  ;;  %5379 = vmatpush.msra.mxu3 %v5334_v12 }
 0x934   :  { %5443 = vmatpush.msrb.mxu1 %v6822_v24  ;;  %5380 = vmatpush.msra.mxu3 %v5333_v37 }
 0x935   :  { %6812 = vmatmul.msk.f32.vlgmr.msrb.gmra.mxu3 %vm5227_vm10, %v6811_v5  ;;  %6814 = vmatmul.msk.f32.vlgmr.msra.gmra.mxu1 %vm5227_vm10, %v6813_v23 }
 0x936   :  { %5444 = vmatpush.msrb.mxu1 %v6821_v58  ;;  %5381 = vmatpush.msra.mxu3 %v5332_v34 }
 0x938   :  { %5445 = vmatpush.msrb.mxu1 %v6820_v16  ;;  %5382 = vmatpush.msra.mxu3 %v5331_v52 }
 0x93a   :  { %5446 = vmatpush.msrb.mxu1 %v6819_v36  ;;  %5383 = vmatpush.msra.mxu3 %v5330_v33 }
 0x93c   :  { %5447 = vmatpush.msrb.mxu1 %v6818_v26  ;;  %5384 = vmatpush.msra.mxu3 %v5329_v51 }
 0x93e   :  { %5448 = vmatpush.msrb.mxu1 %v6817_v47  ;;  %5385 = vmatpush.msra.mxu3 %v5328_v9 }
 0x9aa   :  { %v5273_v56 = vpop.f32.mrf.mxu1 }
 0x9b0   :  { %v5248_v8 = vpop.f32.mrf.mxu3 }
 0x9b1   :  { %v5276_v53 = vmax.f32 %v5248_v8, %v5273_v56 }
 0x9b2   :  { %v5324_v29 = vpop.f32.mrf.mxu1 }
 0x9b3   :  { %6834 = vmatmul.msk.f32.vlgmr.msrb.gmra.mxu1 %vm4845_vm9, %v5276_v53  ;;  %6816 = vmatmul.msk.f32.vlgmr.msra.gmra.mxu3 %vm4845_vm9, %v5276_v53 }
 0x9b8   :  { %v5299_v59 = vpop.f32.mrf.mxu3 }
 0x9b9   :  { %v5327_v50 = vmax.f32 %v5299_v59, %v5324_v29 }
 0x9bb   :  { %6833 = vmatmul.msk.f32.vlgmr.msra.gmra.mxu0 %vm4845_vm9, %v5327_v50  ;;  %6815 = vmatmul.msk.f32.vlgmr.msra.gmra.mxu2 %vm4845_vm9, %v5327_v50 }
 0xa30   :  { %v5450_v20 = vpop.f32.mrf.mxu1 }
 0xa36   :  { %v5387_v18 = vpop.f32.mrf.mxu3 }
 0xa38   :  { %v5430_v38 = vpop.f32.mrf.mxu0 }
 0xa39   :  { %v5451_v62 = vadd.f32 %v5450_v20, %v5430_v38 }
 0xa3b   :  { %v5458_v63 = vadd.f32 %v6840_v2, %v5451_v62 }
 0xa3d   :  { %v5459_v15 = vmul.f32 0.5, %v5458_v63  ;;  %5468 = vst.msk [vmem:[#allocation6] sm:$0x3] %vm5465_vm11, %v5458_v63 }
 0xa3e   :  { %v5364_v40 = vpop.f32.mrf.mxu2 }
 0xa3f   :  { %v5460_v17 = vmul.f32 1.442695, %v5459_v15  ;;  %v5388_v27 = vadd.f32 %v5387_v18, %v5364_v40 }
 0xa41   :  { %6842 = vpow2.f32 %v5460_v17  ;;  %v5394_v49 = vadd.f32 %v6841_v60, %v5388_v27 }
 0xa43   :  { %5467 = vst.msk [vmem:[#allocation4] sm:$0x3] %vm5465_vm11, %v5394_v49 }
 0xa44   :  { %5490 = dma.vmem_to_hbm [thread:$0]  %s5486_s20, 32, %s5488_s22, [#allocation5]  }
 0xa45   :  { %5501 = dma.vmem_to_hbm [thread:$0]  %s5497_s10, 32, %s5499_s8, [#allocation5]  }
 0xa47   :  { %v6843_v57 = vpop.eup %6842 }
 0xa48   :  { %v5463_v44 = vmul.f32 %v6843_v57, %v5462_v46 }
 0xa4a   :  { %v5464_v7 = vadd.f32 %v5463_v44, %v5394_v49 }
 0xa4c   :  { %5466 = vst.msk [vmem:[#allocation2] sm:$0x3] %vm5465_vm11, %v5464_v7 }
 0xa4d   :  { %5479 = dma.vmem_to_hbm [thread:$0]  %s5475_s26, 32, %s5477_s19, [#allocation3]  }
 0xa4e   :  { %6932 = dma.done.wait [#allocation3], 32  }
 0xa4f   :  { %6933 = vsyncadd [#allocation3], 4294967264 }
 0xa50   :  { %6934 = dma.done.wait [#allocation5], 64  }
 0xa51   :  { %6935 = vsyncadd [#allocation5], 4294967232 }
 0xa52   :  { %5514 = vsyncpa [#allocation3], 1 }
 0xa53   :  { %5515 = vsyncpa [#allocation5], 1 }

</bundles_post_ra>
